<compile_context>
chip_gen: v5e
topology: v5e:2x2
jax: 0.10.0
libtpu: 0.0.40
codegen_flags: <defaults>
</compile_context>

<pallas_src>
import functools

import jax
import jax.numpy as jnp
from jax import lax
from jax.experimental import pallas as pl
from jax.experimental.pallas import tpu as pltpu

_ISSUE_UNROLL = 8  # rows of gather descriptors issued per loop iteration


def _log_sigmoid(x):
    # numerically stable: log(sigmoid(x)) = min(x, 0) - log1p(exp(-|x|))
    return jnp.minimum(x, 0.0) - jnp.log1p(jnp.exp(-jnp.abs(x)))


def _ceil_to(x, m):
    return ((x + m - 1) // m) * m


def _sgns_kernel(
    # scalar-prefetch refs (SMEM)
    c_ids_ref, t_ids_ref, n_ids_ref,
    # inputs (raw HBM refs, memory_space=pl.ANY)
    emb_v_hbm, emb_u_hbm,
    # output
    out_ref,
    # scratch
    gbuf, sems,
    *, batch, block_b, num_neg, emb_pad, rows_per_slot,
):
    tile = pl.program_id(0)
    num_tiles = pl.num_programs(0)
    slot = tile % 2

    def issue_tile(tile_idx, slot_idx):
        """Start all row-gather DMAs for one batch tile into buffer slot.

        Layout within a slot (rows of gbuf):
          [0, TB)                       centers     (from emb_v)
          [TB, 2*TB)                    targets     (from emb_u)
          [(2+k)*TB, (3+k)*TB)          negatives k (from emb_u), k = 0..K-1
        Every copy signals the single per-slot semaphore.
        """
        ids_base = tile_idx * block_b
        row0 = slot_idx * rows_per_slot
        sem = sems.at[slot_idx]

        def row_block(rb, carry):
            r0 = rb * _ISSUE_UNROLL
            for dr in range(_ISSUE_UNROLL):          # static unroll: co-issue
                r = r0 + dr
                idx = ids_base + r
                pltpu.make_async_copy(
                    emb_v_hbm.at[c_ids_ref[idx]],
                    gbuf.at[row0 + r], sem).start()
                pltpu.make_async_copy(
                    emb_u_hbm.at[t_ids_ref[idx]],
                    gbuf.at[row0 + block_b + r], sem).start()
                for k in range(num_neg):              # static unroll
                    pltpu.make_async_copy(
                        emb_u_hbm.at[n_ids_ref[idx * num_neg + k]],
                        gbuf.at[row0 + (2 + k) * block_b + r], sem).start()
            return carry

        lax.fori_loop(0, block_b // _ISSUE_UNROLL, row_block, 0)

    def wait_tile(slot_idx):
        """One aggregate wait covering every row copy issued into this slot.

        Byte count of the slab descriptor == sum of the (K+2)*TB issued row
        copies on the same semaphore, so this is an exact match.
        """
        start = pl.multiple_of(slot_idx * rows_per_slot, 8)
        slab = gbuf.at[pl.ds(start, rows_per_slot)]
        pltpu.make_async_copy(slab, slab, sems.at[slot_idx]).wait()

    # First grid step: zero the resident accumulator and prime the pipeline.
    @pl.when(tile == 0)
    def _():
        out_ref[...] = jnp.zeros_like(out_ref)
        issue_tile(0, 0)

    # Issue the NEXT tile's gathers first (other slot was consumed last step);
    # the descriptor pushes overlap the in-flight DMAs of the current tile.
    @pl.when(tile + 1 < num_tiles)
    def _():
        issue_tile(tile + 1, 1 - slot)

    # Single aggregate wait for the current tile's slot.
    wait_tile(slot)

    # ---- compute: row-wise dots + one lane-dense log-sigmoid pass ----------
    base = pl.multiple_of(slot * rows_per_slot, 8)
    c = gbuf[pl.ds(base, block_b), :].astype(jnp.float32)              # (TB, E)
    t = gbuf[pl.ds(base + block_b, block_b), :].astype(jnp.float32)    # (TB, E)

    def row_dot(x):
        # (TB, E) row-wise dot with centers -> (1, TB); TB is the lane dim.
        return jnp.sum((x * c).reshape(1, block_b, emb_pad), axis=-1)

    score_rows = [row_dot(t)]                                          # positive
    for k in range(num_neg):                                           # static
        n_start = pl.multiple_of(base + (2 + k) * block_b, 8)
        nk = gbuf[pl.ds(n_start, block_b), :].astype(jnp.float32)
        # Sign folded into the score: logsigmoid(-<n, c>). No (TB, E) negate.
        score_rows.append(-row_dot(nk))

    scores = jnp.concatenate(score_rows, axis=0)                       # (K+1, TB)
    lsig = _log_sigmoid(scores)                                        # one EUP pass

    # Mask rows of a ragged last tile (index arrays were padded with zeros;
    # padded rows gather row 0 of the tables — wasted bandwidth but correct).
    row_idx = tile * block_b + lax.broadcasted_iota(jnp.int32, (1, block_b), 1)
    lsig = jnp.where(row_idx < batch, lsig, 0.0)

    out_ref[...] += jnp.sum(lsig, keepdims=True)                       # (1, 1)

    @pl.when(tile == num_tiles - 1)
    def _():
        out_ref[...] = -out_ref[...] / jnp.float32(batch)


def _choose_block_b(requested, batch, num_neg, emb_pad, itemsize,
                    budget_bytes=16 << 20):
    """Largest batch tile whose double-buffered gather scratch fits the budget
    (16 MiB keeps comfortable headroom even on v7x's 64 MiB VMEM)."""
    per_elem = 2 * (num_neg + 2) * emb_pad * itemsize    # both slots, one row
    max_bb = max(8, budget_bytes // per_elem)
    bb = min(int(requested), int(max_bb), _ceil_to(batch, 8))
    bb = max(_ISSUE_UNROLL, (bb // _ISSUE_UNROLL) * _ISSUE_UNROLL)
    return bb


def skipgram_neg_sampling_loss(emb_v, emb_u, center_words, target_words,
                               negative_words, *, block_b=512):
    """Forward pass of SkipgramNegSampling.

    emb_v, emb_u   : (vocab, E) embedding tables. f32 or bf16 (bf16 halves the
                     random-gather HBM bytes; the kernel upcasts per tile).
    center_words   : (B, 1) int32
    target_words   : (B, 1) int32
    negative_words : (B, K) int32
    returns scalar f32:  -mean_b[ logsig(<t_b,c_b>) + sum_k logsig(-<n_bk,c_b>) ]
    """
    _, emb_size = emb_v.shape
    batch = center_words.shape[0]
    num_neg = negative_words.shape[1]

    dtype = jnp.result_type(emb_v.dtype, emb_u.dtype)
    emb_v = emb_v.astype(dtype)
    emb_u = emb_u.astype(dtype)

    # Pad the embedding dim to a 128-lane multiple so every row gather is a
    # lane-dense >= 512 B DMA and compute vregs are unmasked.  Zero columns
    # contribute nothing to the dots, so numerics are unchanged.
    # TODO(synk): in a real model, pad the tables once at creation instead of
    #             per call.
    emb_pad = _ceil_to(emb_size, 128)
    if emb_pad != emb_size:
        pad = ((0, 0), (0, emb_pad - emb_size))
        emb_v = jnp.pad(emb_v, pad)
        emb_u = jnp.pad(emb_u, pad)

    itemsize = jnp.dtype(dtype).itemsize
    block_b = _choose_block_b(block_b, batch, num_neg, emb_pad, itemsize)
    rows_per_slot = (num_neg + 2) * block_b
    num_tiles = (batch + block_b - 1) // block_b
    padded = num_tiles * block_b

    def pad_ids(ids, length):
        ids = ids.reshape(-1).astype(jnp.int32)
        return jnp.pad(ids, (0, length - ids.shape[0]))

    c_ids = pad_ids(center_words, padded)
    t_ids = pad_ids(target_words, padded)
    n_ids = pad_ids(negative_words, padded * num_neg)   # flat (padded*K,) SMEM

    scratch_bytes = 2 * rows_per_slot * emb_pad * itemsize
    vmem_limit = int(min(max(scratch_bytes + (8 << 20), 32 << 20), 48 << 20))

    kernel = functools.partial(
        _sgns_kernel, batch=batch, block_b=block_b, num_neg=num_neg,
        emb_pad=emb_pad, rows_per_slot=rows_per_slot)

    loss = pl.pallas_call(
        kernel,
        out_shape=jax.ShapeDtypeStruct((1, 1), jnp.float32),
        grid_spec=pltpu.PrefetchScalarGridSpec(
            num_scalar_prefetch=3,
            grid=(num_tiles,),
            in_specs=[
                pl.BlockSpec(memory_space=pl.ANY),   # emb_v stays in HBM
                pl.BlockSpec(memory_space=pl.ANY),   # emb_u stays in HBM
            ],
            out_specs=pl.BlockSpec((1, 1), lambda i, *_: (0, 0)),
            scratch_shapes=[
                # One slab holds centers/targets/negatives for both slots:
                # layout per slot = [TB centers | TB targets | K*TB negatives].
                pltpu.VMEM((2 * rows_per_slot, emb_pad), dtype),
                pltpu.SemaphoreType.DMA((2,)),       # one semaphore per slot
            ],
        ),
        compiler_params=pltpu.CompilerParams(
            # Output accumulates across the batch-tile axis -> "arbitrary".
            dimension_semantics=("arbitrary",),
            vmem_limit_bytes=vmem_limit,
        ),
    )(c_ids, t_ids, n_ids, emb_v, emb_u)
    return loss[0, 0]


def _reference_loss(emb_v, emb_u, center_words, target_words, negative_words):
    """Pure-JAX reference mirroring the PyTorch forward."""
    c = jnp.take(emb_v, center_words[:, 0], axis=0)[:, None, :]    # (B,1,E)
    t = jnp.take(emb_u, target_words[:, 0], axis=0)[:, None, :]    # (B,1,E)
    n = -jnp.take(emb_u, negative_words, axis=0)                   # (B,K,E)
    pos = jnp.einsum('bie,bje->bij', t, c)[:, :, 0]                # (B,1)
    neg = jnp.einsum('bke,bje->bkj', n, c)                         # (B,K,1)
    lsig = jax.nn.log_sigmoid
    loss = lsig(pos) + jnp.sum(lsig(neg), axis=1)                  # (B,1)
    return -jnp.mean(loss)


if __name__ == "__main__":
    vocab_size = 64
    emb_size = 32       # pads to 128 lanes inside the wrapper
    batch = 20          # not a multiple of block_b -> exercises ragged masking
    num_neg = 5

    key = jax.random.PRNGKey(0)
    k_v, k_u, k_c, k_t, k_n = jax.random.split(key, 5)

    # nn.Embedding default init ~ N(0, 1)
    emb_v = jax.random.normal(k_v, (vocab_size, emb_size), dtype=jnp.float32)
    emb_u = jax.random.normal(k_u, (vocab_size, emb_size), dtype=jnp.float32)

    center_words = jax.random.randint(k_c, (batch, 1), 0, vocab_size, jnp.int32)
    target_words = jax.random.randint(k_t, (batch, 1), 0, vocab_size, jnp.int32)
    negative_words = jax.random.randint(k_n, (batch, num_neg), 0, vocab_size,
                                        jnp.int32)

    ref = _reference_loss(emb_v, emb_u, center_words, target_words,
                          negative_words)

    # Small tile -> 3 grid steps: exercises the issue-ahead double-buffered
    # gather pipeline and the ragged last tile.
    loss_small = skipgram_neg_sampling_loss(
        emb_v, emb_u, center_words, target_words, negative_words, block_b=8)
    loss_small = jax.block_until_ready(loss_small)
    assert jnp.allclose(loss_small, ref, rtol=1e-5, atol=1e-5), (loss_small, ref)

    # Default tile -> single grid step: exercises the prime/finalize edge case.
    loss_big = skipgram_neg_sampling_loss(
        emb_v, emb_u, center_words, target_words, negative_words)
    loss_big = jax.block_until_ready(loss_big)
    assert jnp.allclose(loss_big, ref, rtol=1e-5, atol=1e-5), (loss_big, ref)

    print("KERNEL_OK")
</pallas_src>

<mosaic_0001>
module attributes {stable_mosaic.version = 11 : i64} {
  func.func @_sgns_kernel(%arg0: i32, %arg1: memref<24xi32, #tpu.memory_space<smem>>, %arg2: memref<24xi32, #tpu.memory_space<smem>>, %arg3: memref<120xi32, #tpu.memory_space<smem>>, %arg4: memref<64x128xf32, #tpu.memory_space<any>>, %arg5: memref<64x128xf32, #tpu.memory_space<any>>, %arg6: memref<1x1xf32, #tpu.memory_space<vmem>>, %arg7: memref<112x128xf32, #tpu.memory_space<vmem>>, %arg8: memref<2x!tpu.dma_semaphore, #tpu.memory_space<semaphore_mem>>) attributes {dimension_semantics = [#tpu.dimension_semantics<arbitrary>], iteration_bounds = array<i64: 3>, scalar_prefetch = 3 : i64, scratch_operands = 2 : i64, tpu.core_type = #tpu.core_type<tc>, window_params = [{}, {}, {pipeline_mode = #tpu.pipeline_mode<synchronous>, transform_indices = @transform_2, window_bounds = array<i64: 1, 1>}]} {
    %c2_i32 = arith.constant 2 : i32
    %c0_i32 = arith.constant 0 : i32
    %0 = arith.cmpi eq, %c2_i32, %c0_i32 : i32
    %c1_i32 = arith.constant 1 : i32
    %1 = arith.select %0, %c1_i32, %c2_i32 : i32
    %2 = arith.remsi %arg0, %1 : i32
    %c0_i32_0 = arith.constant 0 : i32
    %3 = arith.cmpi ne, %2, %c0_i32_0 : i32
    %c0_i32_1 = arith.constant 0 : i32
    %4 = arith.cmpi slt, %2, %c0_i32_1 : i32
    %c0_i32_2 = arith.constant 0 : i32
    %5 = arith.cmpi slt, %1, %c0_i32_2 : i32
    %6 = arith.xori %4, %5 : i1
    %7 = arith.andi %6, %3 : i1
    %8 = arith.addi %2, %1 : i32
    %9 = arith.select %7, %8, %2 : i32
    %c0_i32_3 = arith.constant 0 : i32
    %10 = arith.cmpi eq, %arg0, %c0_i32_3 : i32
    %11 = arith.extui %10 : i1 to i32
    %c0_i32_4 = arith.constant 0 : i32
    %12 = arith.cmpi ne, %11, %c0_i32_4 : i32
    scf.if %12 {
      %cst_37 = arith.constant 0.000000e+00 : f32
      %108 = vector.broadcast %cst_37 : f32 to vector<1x1xf32>
      %c0_38 = arith.constant 0 : index
      %c0_39 = arith.constant 0 : index
      %109 = vector.load %arg6[%c0_38, %c0_39] : memref<1x1xf32, #tpu.memory_space<vmem>>, vector<1x1xf32>
      tpu.vector_store %arg6[%c0_38, %c0_39], %108 {strides = array<i32>} : memref<1x1xf32, #tpu.memory_space<vmem>>, vector<1x1xf32>,
      %c0_i32_40 = arith.constant 0 : i32
      %c0_i32_41 = arith.constant 0 : i32
      %c8_i32_42 = arith.constant 8 : i32
      %110 = arith.muli %c0_i32_41, %c8_i32_42 : i32
      %c0_i32_43 = arith.constant 0 : i32
      %111 = arith.addi %110, %c0_i32_43 : i32
      %c0_i32_44 = arith.constant 0 : i32
      %112 = arith.addi %c0_i32_44, %111 : i32
      %113 = arith.index_cast %112 : i32 to index
      %114 = memref.load %arg1[%113] : memref<24xi32, #tpu.memory_space<smem>>
      %c0_i32_45 = arith.constant 0 : i32
      %115 = arith.addi %c0_i32_45, %111 : i32
      %c0_i32_46 = arith.constant 0 : i32
      %116 = tpu.memref_slice %arg4[%114, %c0_i32_46] : memref<64x128xf32, #tpu.memory_space<any>> -> memref<1x128xf32, #tpu.memory_space<any>>
      %117 = tpu.memref_squeeze %116 : memref<1x128xf32, #tpu.memory_space<any>> -> memref<128xf32, #tpu.memory_space<any>>
      %c0_i32_47 = arith.constant 0 : i32
      %118 = tpu.memref_slice %arg7[%115, %c0_i32_47] : memref<112x128xf32, #tpu.memory_space<vmem>> -> memref<1x128xf32, #tpu.memory_space<vmem>>
      %119 = tpu.memref_squeeze %118 : memref<1x128xf32, #tpu.memory_space<vmem>> -> memref<128xf32, #tpu.memory_space<vmem>>
      %120 = tpu.memref_slice %arg8[%c0_i32_40] : memref<2x!tpu.dma_semaphore, #tpu.memory_space<semaphore_mem>> -> memref<1x!tpu.dma_semaphore, #tpu.memory_space<semaphore_mem>>
      %121 = tpu.memref_squeeze %120 : memref<1x!tpu.dma_semaphore, #tpu.memory_space<semaphore_mem>> -> memref<!tpu.dma_semaphore, #tpu.memory_space<semaphore_mem>>
      tpu.enqueue_dma source(%117 : memref<128xf32, #tpu.memory_space<any>>) target(%119 : memref<128xf32, #tpu.memory_space<vmem>>) target_semaphore(%121 : memref<!tpu.dma_semaphore, #tpu.memory_space<semaphore_mem>>)
      %122 = arith.index_cast %112 : i32 to index
      %123 = memref.load %arg2[%122] : memref<24xi32, #tpu.memory_space<smem>>
      %c8_i32_48 = arith.constant 8 : i32
      %124 = arith.addi %c8_i32_48, %111 : i32
      %c0_i32_49 = arith.constant 0 : i32
      %125 = tpu.memref_slice %arg5[%123, %c0_i32_49] : memref<64x128xf32, #tpu.memory_space<any>> -> memref<1x128xf32, #tpu.memory_space<any>>
      %126 = tpu.memref_squeeze %125 : memref<1x128xf32, #tpu.memory_space<any>> -> memref<128xf32, #tpu.memory_space<any>>
      %c0_i32_50 = arith.constant 0 : i32
      %127 = tpu.memref_slice %arg7[%124, %c0_i32_50] : memref<112x128xf32, #tpu.memory_space<vmem>> -> memref<1x128xf32, #tpu.memory_space<vmem>>
      %128 = tpu.memref_squeeze %127 : memref<1x128xf32, #tpu.memory_space<vmem>> -> memref<128xf32, #tpu.memory_space<vmem>>
      %129 = tpu.memref_slice %arg8[%c0_i32_40] : memref<2x!tpu.dma_semaphore, #tpu.memory_space<semaphore_mem>> -> memref<1x!tpu.dma_semaphore, #tpu.memory_space<semaphore_mem>>
      %130 = tpu.memref_squeeze %129 : memref<1x!tpu.dma_semaphore, #tpu.memory_space<semaphore_mem>> -> memref<!tpu.dma_semaphore, #tpu.memory_space<semaphore_mem>>
      tpu.enqueue_dma source(%126 : memref<128xf32, #tpu.memory_space<any>>) target(%128 : memref<128xf32, #tpu.memory_space<vmem>>) target_semaphore(%130 : memref<!tpu.dma_semaphore, #tpu.memory_space<semaphore_mem>>)
      %c5_i32 = arith.constant 5 : i32
      %131 = arith.muli %112, %c5_i32 : i32
      %c0_i32_51 = arith.constant 0 : i32
      %132 = arith.addi %131, %c0_i32_51 : i32
      %133 = arith.index_cast %132 : i32 to index
      %134 = memref.load %arg3[%133] : memref<120xi32, #tpu.memory_space<smem>>
      %c16_i32_52 = arith.constant 16 : i32
      %135 = arith.addi %c16_i32_52, %111 : i32
      %c0_i32_53 = arith.constant 0 : i32
      %136 = tpu.memref_slice %arg5[%134, %c0_i32_53] : memref<64x128xf32, #tpu.memory_space<any>> -> memref<1x128xf32, #tpu.memory_space<any>>
      %137 = tpu.memref_squeeze %136 : memref<1x128xf32, #tpu.memory_space<any>> -> memref<128xf32, #tpu.memory_space<any>>
      %c0_i32_54 = arith.constant 0 : i32
      %138 = tpu.memref_slice %arg7[%135, %c0_i32_54] : memref<112x128xf32, #tpu.memory_space<vmem>> -> memref<1x128xf32, #tpu.memory_space<vmem>>
      %139 = tpu.memref_squeeze %138 : memref<1x128xf32, #tpu.memory_space<vmem>> -> memref<128xf32, #tpu.memory_space<vmem>>
      %140 = tpu.memref_slice %arg8[%c0_i32_40] : memref<2x!tpu.dma_semaphore, #tpu.memory_space<semaphore_mem>> -> memref<1x!tpu.dma_semaphore, #tpu.memory_space<semaphore_mem>>
      %141 = tpu.memref_squeeze %140 : memref<1x!tpu.dma_semaphore, #tpu.memory_space<semaphore_mem>> -> memref<!tpu.dma_semaphore, #tpu.memory_space<semaphore_mem>>
      tpu.enqueue_dma source(%137 : memref<128xf32, #tpu.memory_space<any>>) target(%139 : memref<128xf32, #tpu.memory_space<vmem>>) target_semaphore(%141 : memref<!tpu.dma_semaphore, #tpu.memory_space<semaphore_mem>>)
      %c5_i32_55 = arith.constant 5 : i32
      %142 = arith.muli %112, %c5_i32_55 : i32
      %c1_i32_56 = arith.constant 1 : i32
      %143 = arith.addi %142, %c1_i32_56 : i32
      %144 = arith.index_cast %143 : i32 to index
      %145 = memref.load %arg3[%144] : memref<120xi32, #tpu.memory_space<smem>>
      %c24_i32_57 = arith.constant 24 : i32
      %146 = arith.addi %c24_i32_57, %111 : i32
      %c0_i32_58 = arith.constant 0 : i32
      %147 = tpu.memref_slice %arg5[%145, %c0_i32_58] : memref<64x128xf32, #tpu.memory_space<any>> -> memref<1x128xf32, #tpu.memory_space<any>>
      %148 = tpu.memref_squeeze %147 : memref<1x128xf32, #tpu.memory_space<any>> -> memref<128xf32, #tpu.memory_space<any>>
      %c0_i32_59 = arith.constant 0 : i32
      %149 = tpu.memref_slice %arg7[%146, %c0_i32_59] : memref<112x128xf32, #tpu.memory_space<vmem>> -> memref<1x128xf32, #tpu.memory_space<vmem>>
      %150 = tpu.memref_squeeze %149 : memref<1x128xf32, #tpu.memory_space<vmem>> -> memref<128xf32, #tpu.memory_space<vmem>>
      %151 = tpu.memref_slice %arg8[%c0_i32_40] : memref<2x!tpu.dma_semaphore, #tpu.memory_space<semaphore_mem>> -> memref<1x!tpu.dma_semaphore, #tpu.memory_space<semaphore_mem>>
      %152 = tpu.memref_squeeze %151 : memref<1x!tpu.dma_semaphore, #tpu.memory_space<semaphore_mem>> -> memref<!tpu.dma_semaphore, #tpu.memory_space<semaphore_mem>>
      tpu.enqueue_dma source(%148 : memref<128xf32, #tpu.memory_space<any>>) target(%150 : memref<128xf32, #tpu.memory_space<vmem>>) target_semaphore(%152 : memref<!tpu.dma_semaphore, #tpu.memory_space<semaphore_mem>>)
      %c5_i32_60 = arith.constant 5 : i32
      %153 = arith.muli %112, %c5_i32_60 : i32
      %c2_i32_61 = arith.constant 2 : i32
      %154 = arith.addi %153, %c2_i32_61 : i32
      %155 = arith.index_cast %154 : i32 to index
      %156 = memref.load %arg3[%155] : memref<120xi32, #tpu.memory_space<smem>>
      %c32_i32_62 = arith.constant 32 : i32
      %157 = arith.addi %c32_i32_62, %111 : i32
      %c0_i32_63 = arith.constant 0 : i32
      %158 = tpu.memref_slice %arg5[%156, %c0_i32_63] : memref<64x128xf32, #tpu.memory_space<any>> -> memref<1x128xf32, #tpu.memory_space<any>>
      %159 = tpu.memref_squeeze %158 : memref<1x128xf32, #tpu.memory_space<any>> -> memref<128xf32, #tpu.memory_space<any>>
      %c0_i32_64 = arith.constant 0 : i32
      %160 = tpu.memref_slice %arg7[%157, %c0_i32_64] : memref<112x128xf32, #tpu.memory_space<vmem>> -> memref<1x128xf32, #tpu.memory_space<vmem>>
      %161 = tpu.memref_squeeze %160 : memref<1x128xf32, #tpu.memory_space<vmem>> -> memref<128xf32, #tpu.memory_space<vmem>>
      %162 = tpu.memref_slice %arg8[%c0_i32_40] : memref<2x!tpu.dma_semaphore, #tpu.memory_space<semaphore_mem>> -> memref<1x!tpu.dma_semaphore, #tpu.memory_space<semaphore_mem>>
      %163 = tpu.memref_squeeze %162 : memref<1x!tpu.dma_semaphore, #tpu.memory_space<semaphore_mem>> -> memref<!tpu.dma_semaphore, #tpu.memory_space<semaphore_mem>>
      tpu.enqueue_dma source(%159 : memref<128xf32, #tpu.memory_space<any>>) target(%161 : memref<128xf32, #tpu.memory_space<vmem>>) target_semaphore(%163 : memref<!tpu.dma_semaphore, #tpu.memory_space<semaphore_mem>>)
      %c5_i32_65 = arith.constant 5 : i32
      %164 = arith.muli %112, %c5_i32_65 : i32
      %c3_i32_66 = arith.constant 3 : i32
      %165 = arith.addi %164, %c3_i32_66 : i32
      %166 = arith.index_cast %165 : i32 to index
      %167 = memref.load %arg3[%166] : memref<120xi32, #tpu.memory_space<smem>>
      %c40_i32_67 = arith.constant 40 : i32
      %168 = arith.addi %c40_i32_67, %111 : i32
      %c0_i32_68 = arith.constant 0 : i32
      %169 = tpu.memref_slice %arg5[%167, %c0_i32_68] : memref<64x128xf32, #tpu.memory_space<any>> -> memref<1x128xf32, #tpu.memory_space<any>>
      %170 = tpu.memref_squeeze %169 : memref<1x128xf32, #tpu.memory_space<any>> -> memref<128xf32, #tpu.memory_space<any>>
      %c0_i32_69 = arith.constant 0 : i32
      %171 = tpu.memref_slice %arg7[%168, %c0_i32_69] : memref<112x128xf32, #tpu.memory_space<vmem>> -> memref<1x128xf32, #tpu.memory_space<vmem>>
      %172 = tpu.memref_squeeze %171 : memref<1x128xf32, #tpu.memory_space<vmem>> -> memref<128xf32, #tpu.memory_space<vmem>>
      %173 = tpu.memref_slice %arg8[%c0_i32_40] : memref<2x!tpu.dma_semaphore, #tpu.memory_space<semaphore_mem>> -> memref<1x!tpu.dma_semaphore, #tpu.memory_space<semaphore_mem>>
      %174 = tpu.memref_squeeze %173 : memref<1x!tpu.dma_semaphore, #tpu.memory_space<semaphore_mem>> -> memref<!tpu.dma_semaphore, #tpu.memory_space<semaphore_mem>>
      tpu.enqueue_dma source(%170 : memref<128xf32, #tpu.memory_space<any>>) target(%172 : memref<128xf32, #tpu.memory_space<vmem>>) target_semaphore(%174 : memref<!tpu.dma_semaphore, #tpu.memory_space<semaphore_mem>>)
      %c5_i32_70 = arith.constant 5 : i32
      %175 = arith.muli %112, %c5_i32_70 : i32
      %c4_i32 = arith.constant 4 : i32
      %176 = arith.addi %175, %c4_i32 : i32
      %177 = arith.index_cast %176 : i32 to index
      %178 = memref.load %arg3[%177] : memref<120xi32, #tpu.memory_space<smem>>
      %c48_i32_71 = arith.constant 48 : i32
      %179 = arith.addi %c48_i32_71, %111 : i32
      %c0_i32_72 = arith.constant 0 : i32
      %180 = tpu.memref_slice %arg5[%178, %c0_i32_72] : memref<64x128xf32, #tpu.memory_space<any>> -> memref<1x128xf32, #tpu.memory_space<any>>
      %181 = tpu.memref_squeeze %180 : memref<1x128xf32, #tpu.memory_space<any>> -> memref<128xf32, #tpu.memory_space<any>>
      %c0_i32_73 = arith.constant 0 : i32
      %182 = tpu.memref_slice %arg7[%179, %c0_i32_73] : memref<112x128xf32, #tpu.memory_space<vmem>> -> memref<1x128xf32, #tpu.memory_space<vmem>>
      %183 = tpu.memref_squeeze %182 : memref<1x128xf32, #tpu.memory_space<vmem>> -> memref<128xf32, #tpu.memory_space<vmem>>
      %184 = tpu.memref_slice %arg8[%c0_i32_40] : memref<2x!tpu.dma_semaphore, #tpu.memory_space<semaphore_mem>> -> memref<1x!tpu.dma_semaphore, #tpu.memory_space<semaphore_mem>>
      %185 = tpu.memref_squeeze %184 : memref<1x!tpu.dma_semaphore, #tpu.memory_space<semaphore_mem>> -> memref<!tpu.dma_semaphore, #tpu.memory_space<semaphore_mem>>
      tpu.enqueue_dma source(%181 : memref<128xf32, #tpu.memory_space<any>>) target(%183 : memref<128xf32, #tpu.memory_space<vmem>>) target_semaphore(%185 : memref<!tpu.dma_semaphore, #tpu.memory_space<semaphore_mem>>)
      %c1_i32_74 = arith.constant 1 : i32
      %186 = arith.addi %110, %c1_i32_74 : i32
      %c0_i32_75 = arith.constant 0 : i32
      %187 = arith.addi %c0_i32_75, %186 : i32
      %188 = arith.index_cast %187 : i32 to index
      %189 = memref.load %arg1[%188] : memref<24xi32, #tpu.memory_space<smem>>
      %c0_i32_76 = arith.constant 0 : i32
      %190 = arith.addi %c0_i32_76, %186 : i32
      %c0_i32_77 = arith.constant 0 : i32
      %191 = tpu.memref_slice %arg4[%189, %c0_i32_77] : memref<64x128xf32, #tpu.memory_space<any>> -> memref<1x128xf32, #tpu.memory_space<any>>
      %192 = tpu.memref_squeeze %191 : memref<1x128xf32, #tpu.memory_space<any>> -> memref<128xf32, #tpu.memory_space<any>>
      %c0_i32_78 = arith.constant 0 : i32
      %193 = tpu.memref_slice %arg7[%190, %c0_i32_78] : memref<112x128xf32, #tpu.memory_space<vmem>> -> memref<1x128xf32, #tpu.memory_space<vmem>>
      %194 = tpu.memref_squeeze %193 : memref<1x128xf32, #tpu.memory_space<vmem>> -> memref<128xf32, #tpu.memory_space<vmem>>
      %195 = tpu.memref_slice %arg8[%c0_i32_40] : memref<2x!tpu.dma_semaphore, #tpu.memory_space<semaphore_mem>> -> memref<1x!tpu.dma_semaphore, #tpu.memory_space<semaphore_mem>>
      %196 = tpu.memref_squeeze %195 : memref<1x!tpu.dma_semaphore, #tpu.memory_space<semaphore_mem>> -> memref<!tpu.dma_semaphore, #tpu.memory_space<semaphore_mem>>
      tpu.enqueue_dma source(%192 : memref<128xf32, #tpu.memory_space<any>>) target(%194 : memref<128xf32, #tpu.memory_space<vmem>>) target_semaphore(%196 : memref<!tpu.dma_semaphore, #tpu.memory_space<semaphore_mem>>)
      %197 = arith.index_cast %187 : i32 to index
      %198 = memref.load %arg2[%197] : memref<24xi32, #tpu.memory_space<smem>>
      %c8_i32_79 = arith.constant 8 : i32
      %199 = arith.addi %c8_i32_79, %186 : i32
      %c0_i32_80 = arith.constant 0 : i32
      %200 = tpu.memref_slice %arg5[%198, %c0_i32_80] : memref<64x128xf32, #tpu.memory_space<any>> -> memref<1x128xf32, #tpu.memory_space<any>>
      %201 = tpu.memref_squeeze %200 : memref<1x128xf32, #tpu.memory_space<any>> -> memref<128xf32, #tpu.memory_space<any>>
      %c0_i32_81 = arith.constant 0 : i32
      %202 = tpu.memref_slice %arg7[%199, %c0_i32_81] : memref<112x128xf32, #tpu.memory_space<vmem>> -> memref<1x128xf32, #tpu.memory_space<vmem>>
      %203 = tpu.memref_squeeze %202 : memref<1x128xf32, #tpu.memory_space<vmem>> -> memref<128xf32, #tpu.memory_space<vmem>>
      %204 = tpu.memref_slice %arg8[%c0_i32_40] : memref<2x!tpu.dma_semaphore, #tpu.memory_space<semaphore_mem>> -> memref<1x!tpu.dma_semaphore, #tpu.memory_space<semaphore_mem>>
      %205 = tpu.memref_squeeze %204 : memref<1x!tpu.dma_semaphore, #tpu.memory_space<semaphore_mem>> -> memref<!tpu.dma_semaphore, #tpu.memory_space<semaphore_mem>>
      tpu.enqueue_dma source(%201 : memref<128xf32, #tpu.memory_space<any>>) target(%203 : memref<128xf32, #tpu.memory_space<vmem>>) target_semaphore(%205 : memref<!tpu.dma_semaphore, #tpu.memory_space<semaphore_mem>>)
      %c5_i32_82 = arith.constant 5 : i32
      %206 = arith.muli %187, %c5_i32_82 : i32
      %c0_i32_83 = arith.constant 0 : i32
      %207 = arith.addi %206, %c0_i32_83 : i32
      %208 = arith.index_cast %207 : i32 to index
      %209 = memref.load %arg3[%208] : memref<120xi32, #tpu.memory_space<smem>>
      %c16_i32_84 = arith.constant 16 : i32
      %210 = arith.addi %c16_i32_84, %186 : i32
      %c0_i32_85 = arith.constant 0 : i32
      %211 = tpu.memref_slice %arg5[%209, %c0_i32_85] : memref<64x128xf32, #tpu.memory_space<any>> -> memref<1x128xf32, #tpu.memory_space<any>>
      %212 = tpu.memref_squeeze %211 : memref<1x128xf32, #tpu.memory_space<any>> -> memref<128xf32, #tpu.memory_space<any>>
      %c0_i32_86 = arith.constant 0 : i32
      %213 = tpu.memref_slice %arg7[%210, %c0_i32_86] : memref<112x128xf32, #tpu.memory_space<vmem>> -> memref<1x128xf32, #tpu.memory_space<vmem>>
      %214 = tpu.memref_squeeze %213 : memref<1x128xf32, #tpu.memory_space<vmem>> -> memref<128xf32, #tpu.memory_space<vmem>>
      %215 = tpu.memref_slice %arg8[%c0_i32_40] : memref<2x!tpu.dma_semaphore, #tpu.memory_space<semaphore_mem>> -> memref<1x!tpu.dma_semaphore, #tpu.memory_space<semaphore_mem>>
      %216 = tpu.memref_squeeze %215 : memref<1x!tpu.dma_semaphore, #tpu.memory_space<semaphore_mem>> -> memref<!tpu.dma_semaphore, #tpu.memory_space<semaphore_mem>>
      tpu.enqueue_dma source(%212 : memref<128xf32, #tpu.memory_space<any>>) target(%214 : memref<128xf32, #tpu.memory_space<vmem>>) target_semaphore(%216 : memref<!tpu.dma_semaphore, #tpu.memory_space<semaphore_mem>>)
      %c5_i32_87 = arith.constant 5 : i32
      %217 = arith.muli %187, %c5_i32_87 : i32
      %c1_i32_88 = arith.constant 1 : i32
      %218 = arith.addi %217, %c1_i32_88 : i32
      %219 = arith.index_cast %218 : i32 to index
      %220 = memref.load %arg3[%219] : memref<120xi32, #tpu.memory_space<smem>>
      %c24_i32_89 = arith.constant 24 : i32
      %221 = arith.addi %c24_i32_89, %186 : i32
      %c0_i32_90 = arith.constant 0 : i32
      %222 = tpu.memref_slice %arg5[%220, %c0_i32_90] : memref<64x128xf32, #tpu.memory_space<any>> -> memref<1x128xf32, #tpu.memory_space<any>>
      %223 = tpu.memref_squeeze %222 : memref<1x128xf32, #tpu.memory_space<any>> -> memref<128xf32, #tpu.memory_space<any>>
      %c0_i32_91 = arith.constant 0 : i32
      %224 = tpu.memref_slice %arg7[%221, %c0_i32_91] : memref<112x128xf32, #tpu.memory_space<vmem>> -> memref<1x128xf32, #tpu.memory_space<vmem>>
      %225 = tpu.memref_squeeze %224 : memref<1x128xf32, #tpu.memory_space<vmem>> -> memref<128xf32, #tpu.memory_space<vmem>>
      %226 = tpu.memref_slice %arg8[%c0_i32_40] : memref<2x!tpu.dma_semaphore, #tpu.memory_space<semaphore_mem>> -> memref<1x!tpu.dma_semaphore, #tpu.memory_space<semaphore_mem>>
      %227 = tpu.memref_squeeze %226 : memref<1x!tpu.dma_semaphore, #tpu.memory_space<semaphore_mem>> -> memref<!tpu.dma_semaphore, #tpu.memory_space<semaphore_mem>>
      tpu.enqueue_dma source(%223 : memref<128xf32, #tpu.memory_space<any>>) target(%225 : memref<128xf32, #tpu.memory_space<vmem>>) target_semaphore(%227 : memref<!tpu.dma_semaphore, #tpu.memory_space<semaphore_mem>>)
      %c5_i32_92 = arith.constant 5 : i32
      %228 = arith.muli %187, %c5_i32_92 : i32
      %c2_i32_93 = arith.constant 2 : i32
      %229 = arith.addi %228, %c2_i32_93 : i32
      %230 = arith.index_cast %229 : i32 to index
      %231 = memref.load %arg3[%230] : memref<120xi32, #tpu.memory_space<smem>>
      %c32_i32_94 = arith.constant 32 : i32
      %232 = arith.addi %c32_i32_94, %186 : i32
      %c0_i32_95 = arith.constant 0 : i32
      %233 = tpu.memref_slice %arg5[%231, %c0_i32_95] : memref<64x128xf32, #tpu.memory_space<any>> -> memref<1x128xf32, #tpu.memory_space<any>>
      %234 = tpu.memref_squeeze %233 : memref<1x128xf32, #tpu.memory_space<any>> -> memref<128xf32, #tpu.memory_space<any>>
      %c0_i32_96 = arith.constant 0 : i32
      %235 = tpu.memref_slice %arg7[%232, %c0_i32_96] : memref<112x128xf32, #tpu.memory_space<vmem>> -> memref<1x128xf32, #tpu.memory_space<vmem>>
      %236 = tpu.memref_squeeze %235 : memref<1x128xf32, #tpu.memory_space<vmem>> -> memref<128xf32, #tpu.memory_space<vmem>>
      %237 = tpu.memref_slice %arg8[%c0_i32_40] : memref<2x!tpu.dma_semaphore, #tpu.memory_space<semaphore_mem>> -> memref<1x!tpu.dma_semaphore, #tpu.memory_space<semaphore_mem>>
      %238 = tpu.memref_squeeze %237 : memref<1x!tpu.dma_semaphore, #tpu.memory_space<semaphore_mem>> -> memref<!tpu.dma_semaphore, #tpu.memory_space<semaphore_mem>>
      tpu.enqueue_dma source(%234 : memref<128xf32, #tpu.memory_space<any>>) target(%236 : memref<128xf32, #tpu.memory_space<vmem>>) target_semaphore(%238 : memref<!tpu.dma_semaphore, #tpu.memory_space<semaphore_mem>>)
      %c5_i32_97 = arith.constant 5 : i32
      %239 = arith.muli %187, %c5_i32_97 : i32
      %c3_i32_98 = arith.constant 3 : i32
      %240 = arith.addi %239, %c3_i32_98 : i32
      %241 = arith.index_cast %240 : i32 to index
      %242 = memref.load %arg3[%241] : memref<120xi32, #tpu.memory_space<smem>>
      %c40_i32_99 = arith.constant 40 : i32
      %243 = arith.addi %c40_i32_99, %186 : i32
      %c0_i32_100 = arith.constant 0 : i32
      %244 = tpu.memref_slice %arg5[%242, %c0_i32_100] : memref<64x128xf32, #tpu.memory_space<any>> -> memref<1x128xf32, #tpu.memory_space<any>>
      %245 = tpu.memref_squeeze %244 : memref<1x128xf32, #tpu.memory_space<any>> -> memref<128xf32, #tpu.memory_space<any>>
      %c0_i32_101 = arith.constant 0 : i32
      %246 = tpu.memref_slice %arg7[%243, %c0_i32_101] : memref<112x128xf32, #tpu.memory_space<vmem>> -> memref<1x128xf32, #tpu.memory_space<vmem>>
      %247 = tpu.memref_squeeze %246 : memref<1x128xf32, #tpu.memory_space<vmem>> -> memref<128xf32, #tpu.memory_space<vmem>>
      %248 = tpu.memref_slice %arg8[%c0_i32_40] : memref<2x!tpu.dma_semaphore, #tpu.memory_space<semaphore_mem>> -> memref<1x!tpu.dma_semaphore, #tpu.memory_space<semaphore_mem>>
      %249 = tpu.memref_squeeze %248 : memref<1x!tpu.dma_semaphore, #tpu.memory_space<semaphore_mem>> -> memref<!tpu.dma_semaphore, #tpu.memory_space<semaphore_mem>>
      tpu.enqueue_dma source(%245 : memref<128xf32, #tpu.memory_space<any>>) target(%247 : memref<128xf32, #tpu.memory_space<vmem>>) target_semaphore(%249 : memref<!tpu.dma_semaphore, #tpu.memory_space<semaphore_mem>>)
      %c5_i32_102 = arith.constant 5 : i32
      %250 = arith.muli %187, %c5_i32_102 : i32
      %c4_i32_103 = arith.constant 4 : i32
      %251 = arith.addi %250, %c4_i32_103 : i32
      %252 = arith.index_cast %251 : i32 to index
      %253 = memref.load %arg3[%252] : memref<120xi32, #tpu.memory_space<smem>>
      %c48_i32_104 = arith.constant 48 : i32
      %254 = arith.addi %c48_i32_104, %186 : i32
      %c0_i32_105 = arith.constant 0 : i32
      %255 = tpu.memref_slice %arg5[%253, %c0_i32_105] : memref<64x128xf32, #tpu.memory_space<any>> -> memref<1x128xf32, #tpu.memory_space<any>>
      %256 = tpu.memref_squeeze %255 : memref<1x128xf32, #tpu.memory_space<any>> -> memref<128xf32, #tpu.memory_space<any>>
      %c0_i32_106 = arith.constant 0 : i32
      %257 = tpu.memref_slice %arg7[%254, %c0_i32_106] : memref<112x128xf32, #tpu.memory_space<vmem>> -> memref<1x128xf32, #tpu.memory_space<vmem>>
      %258 = tpu.memref_squeeze %257 : memref<1x128xf32, #tpu.memory_space<vmem>> -> memref<128xf32, #tpu.memory_space<vmem>>
      %259 = tpu.memref_slice %arg8[%c0_i32_40] : memref<2x!tpu.dma_semaphore, #tpu.memory_space<semaphore_mem>> -> memref<1x!tpu.dma_semaphore, #tpu.memory_space<semaphore_mem>>
      %260 = tpu.memref_squeeze %259 : memref<1x!tpu.dma_semaphore, #tpu.memory_space<semaphore_mem>> -> memref<!tpu.dma_semaphore, #tpu.memory_space<semaphore_mem>>
      tpu.enqueue_dma source(%256 : memref<128xf32, #tpu.memory_space<any>>) target(%258 : memref<128xf32, #tpu.memory_space<vmem>>) target_semaphore(%260 : memref<!tpu.dma_semaphore, #tpu.memory_space<semaphore_mem>>)
      %c2_i32_107 = arith.constant 2 : i32
      %261 = arith.addi %110, %c2_i32_107 : i32
      %c0_i32_108 = arith.constant 0 : i32
      %262 = arith.addi %c0_i32_108, %261 : i32
      %263 = arith.index_cast %262 : i32 to index
      %264 = memref.load %arg1[%263] : memref<24xi32, #tpu.memory_space<smem>>
      %c0_i32_109 = arith.constant 0 : i32
      %265 = arith.addi %c0_i32_109, %261 : i32
      %c0_i32_110 = arith.constant 0 : i32
      %266 = tpu.memref_slice %arg4[%264, %c0_i32_110] : memref<64x128xf32, #tpu.memory_space<any>> -> memref<1x128xf32, #tpu.memory_space<any>>
      %267 = tpu.memref_squeeze %266 : memref<1x128xf32, #tpu.memory_space<any>> -> memref<128xf32, #tpu.memory_space<any>>
      %c0_i32_111 = arith.constant 0 : i32
      %268 = tpu.memref_slice %arg7[%265, %c0_i32_111] : memref<112x128xf32, #tpu.memory_space<vmem>> -> memref<1x128xf32, #tpu.memory_space<vmem>>
      %269 = tpu.memref_squeeze %268 : memref<1x128xf32, #tpu.memory_space<vmem>> -> memref<128xf32, #tpu.memory_space<vmem>>
      %270 = tpu.memref_slice %arg8[%c0_i32_40] : memref<2x!tpu.dma_semaphore, #tpu.memory_space<semaphore_mem>> -> memref<1x!tpu.dma_semaphore, #tpu.memory_space<semaphore_mem>>
      %271 = tpu.memref_squeeze %270 : memref<1x!tpu.dma_semaphore, #tpu.memory_space<semaphore_mem>> -> memref<!tpu.dma_semaphore, #tpu.memory_space<semaphore_mem>>
      tpu.enqueue_dma source(%267 : memref<128xf32, #tpu.memory_space<any>>) target(%269 : memref<128xf32, #tpu.memory_space<vmem>>) target_semaphore(%271 : memref<!tpu.dma_semaphore, #tpu.memory_space<semaphore_mem>>)
      %272 = arith.index_cast %262 : i32 to index
      %273 = memref.load %arg2[%272] : memref<24xi32, #tpu.memory_space<smem>>
      %c8_i32_112 = arith.constant 8 : i32
      %274 = arith.addi %c8_i32_112, %261 : i32
      %c0_i32_113 = arith.constant 0 : i32
      %275 = tpu.memref_slice %arg5[%273, %c0_i32_113] : memref<64x128xf32, #tpu.memory_space<any>> -> memref<1x128xf32, #tpu.memory_space<any>>
      %276 = tpu.memref_squeeze %275 : memref<1x128xf32, #tpu.memory_space<any>> -> memref<128xf32, #tpu.memory_space<any>>
      %c0_i32_114 = arith.constant 0 : i32
      %277 = tpu.memref_slice %arg7[%274, %c0_i32_114] : memref<112x128xf32, #tpu.memory_space<vmem>> -> memref<1x128xf32, #tpu.memory_space<vmem>>
      %278 = tpu.memref_squeeze %277 : memref<1x128xf32, #tpu.memory_space<vmem>> -> memref<128xf32, #tpu.memory_space<vmem>>
      %279 = tpu.memref_slice %arg8[%c0_i32_40] : memref<2x!tpu.dma_semaphore, #tpu.memory_space<semaphore_mem>> -> memref<1x!tpu.dma_semaphore, #tpu.memory_space<semaphore_mem>>
      %280 = tpu.memref_squeeze %279 : memref<1x!tpu.dma_semaphore, #tpu.memory_space<semaphore_mem>> -> memref<!tpu.dma_semaphore, #tpu.memory_space<semaphore_mem>>
      tpu.enqueue_dma source(%276 : memref<128xf32, #tpu.memory_space<any>>) target(%278 : memref<128xf32, #tpu.memory_space<vmem>>) target_semaphore(%280 : memref<!tpu.dma_semaphore, #tpu.memory_space<semaphore_mem>>)
      %c5_i32_115 = arith.constant 5 : i32
      %281 = arith.muli %262, %c5_i32_115 : i32
      %c0_i32_116 = arith.constant 0 : i32
      %282 = arith.addi %281, %c0_i32_116 : i32
      %283 = arith.index_cast %282 : i32 to index
      %284 = memref.load %arg3[%283] : memref<120xi32, #tpu.memory_space<smem>>
      %c16_i32_117 = arith.constant 16 : i32
      %285 = arith.addi %c16_i32_117, %261 : i32
      %c0_i32_118 = arith.constant 0 : i32
      %286 = tpu.memref_slice %arg5[%284, %c0_i32_118] : memref<64x128xf32, #tpu.memory_space<any>> -> memref<1x128xf32, #tpu.memory_space<any>>
      %287 = tpu.memref_squeeze %286 : memref<1x128xf32, #tpu.memory_space<any>> -> memref<128xf32, #tpu.memory_space<any>>
      %c0_i32_119 = arith.constant 0 : i32
      %288 = tpu.memref_slice %arg7[%285, %c0_i32_119] : memref<112x128xf32, #tpu.memory_space<vmem>> -> memref<1x128xf32, #tpu.memory_space<vmem>>
      %289 = tpu.memref_squeeze %288 : memref<1x128xf32, #tpu.memory_space<vmem>> -> memref<128xf32, #tpu.memory_space<vmem>>
      %290 = tpu.memref_slice %arg8[%c0_i32_40] : memref<2x!tpu.dma_semaphore, #tpu.memory_space<semaphore_mem>> -> memref<1x!tpu.dma_semaphore, #tpu.memory_space<semaphore_mem>>
      %291 = tpu.memref_squeeze %290 : memref<1x!tpu.dma_semaphore, #tpu.memory_space<semaphore_mem>> -> memref<!tpu.dma_semaphore, #tpu.memory_space<semaphore_mem>>
      tpu.enqueue_dma source(%287 : memref<128xf32, #tpu.memory_space<any>>) target(%289 : memref<128xf32, #tpu.memory_space<vmem>>) target_semaphore(%291 : memref<!tpu.dma_semaphore, #tpu.memory_space<semaphore_mem>>)
      %c5_i32_120 = arith.constant 5 : i32
      %292 = arith.muli %262, %c5_i32_120 : i32
      %c1_i32_121 = arith.constant 1 : i32
      %293 = arith.addi %292, %c1_i32_121 : i32
      %294 = arith.index_cast %293 : i32 to index
      %295 = memref.load %arg3[%294] : memref<120xi32, #tpu.memory_space<smem>>
      %c24_i32_122 = arith.constant 24 : i32
      %296 = arith.addi %c24_i32_122, %261 : i32
      %c0_i32_123 = arith.constant 0 : i32
      %297 = tpu.memref_slice %arg5[%295, %c0_i32_123] : memref<64x128xf32, #tpu.memory_space<any>> -> memref<1x128xf32, #tpu.memory_space<any>>
      %298 = tpu.memref_squeeze %297 : memref<1x128xf32, #tpu.memory_space<any>> -> memref<128xf32, #tpu.memory_space<any>>
      %c0_i32_124 = arith.constant 0 : i32
      %299 = tpu.memref_slice %arg7[%296, %c0_i32_124] : memref<112x128xf32, #tpu.memory_space<vmem>> -> memref<1x128xf32, #tpu.memory_space<vmem>>
      %300 = tpu.memref_squeeze %299 : memref<1x128xf32, #tpu.memory_space<vmem>> -> memref<128xf32, #tpu.memory_space<vmem>>
      %301 = tpu.memref_slice %arg8[%c0_i32_40] : memref<2x!tpu.dma_semaphore, #tpu.memory_space<semaphore_mem>> -> memref<1x!tpu.dma_semaphore, #tpu.memory_space<semaphore_mem>>
      %302 = tpu.memref_squeeze %301 : memref<1x!tpu.dma_semaphore, #tpu.memory_space<semaphore_mem>> -> memref<!tpu.dma_semaphore, #tpu.memory_space<semaphore_mem>>
      tpu.enqueue_dma source(%298 : memref<128xf32, #tpu.memory_space<any>>) target(%300 : memref<128xf32, #tpu.memory_space<vmem>>) target_semaphore(%302 : memref<!tpu.dma_semaphore, #tpu.memory_space<semaphore_mem>>)
      %c5_i32_125 = arith.constant 5 : i32
      %303 = arith.muli %262, %c5_i32_125 : i32
      %c2_i32_126 = arith.constant 2 : i32
      %304 = arith.addi %303, %c2_i32_126 : i32
      %305 = arith.index_cast %304 : i32 to index
      %306 = memref.load %arg3[%305] : memref<120xi32, #tpu.memory_space<smem>>
      %c32_i32_127 = arith.constant 32 : i32
      %307 = arith.addi %c32_i32_127, %261 : i32
      %c0_i32_128 = arith.constant 0 : i32
      %308 = tpu.memref_slice %arg5[%306, %c0_i32_128] : memref<64x128xf32, #tpu.memory_space<any>> -> memref<1x128xf32, #tpu.memory_space<any>>
      %309 = tpu.memref_squeeze %308 : memref<1x128xf32, #tpu.memory_space<any>> -> memref<128xf32, #tpu.memory_space<any>>
      %c0_i32_129 = arith.constant 0 : i32
      %310 = tpu.memref_slice %arg7[%307, %c0_i32_129] : memref<112x128xf32, #tpu.memory_space<vmem>> -> memref<1x128xf32, #tpu.memory_space<vmem>>
      %311 = tpu.memref_squeeze %310 : memref<1x128xf32, #tpu.memory_space<vmem>> -> memref<128xf32, #tpu.memory_space<vmem>>
      %312 = tpu.memref_slice %arg8[%c0_i32_40] : memref<2x!tpu.dma_semaphore, #tpu.memory_space<semaphore_mem>> -> memref<1x!tpu.dma_semaphore, #tpu.memory_space<semaphore_mem>>
      %313 = tpu.memref_squeeze %312 : memref<1x!tpu.dma_semaphore, #tpu.memory_space<semaphore_mem>> -> memref<!tpu.dma_semaphore, #tpu.memory_space<semaphore_mem>>
      tpu.enqueue_dma source(%309 : memref<128xf32, #tpu.memory_space<any>>) target(%311 : memref<128xf32, #tpu.memory_space<vmem>>) target_semaphore(%313 : memref<!tpu.dma_semaphore, #tpu.memory_space<semaphore_mem>>)
      %c5_i32_130 = arith.constant 5 : i32
      %314 = arith.muli %262, %c5_i32_130 : i32
      %c3_i32_131 = arith.constant 3 : i32
      %315 = arith.addi %314, %c3_i32_131 : i32
      %316 = arith.index_cast %315 : i32 to index
      %317 = memref.load %arg3[%316] : memref<120xi32, #tpu.memory_space<smem>>
      %c40_i32_132 = arith.constant 40 : i32
      %318 = arith.addi %c40_i32_132, %261 : i32
      %c0_i32_133 = arith.constant 0 : i32
      %319 = tpu.memref_slice %arg5[%317, %c0_i32_133] : memref<64x128xf32, #tpu.memory_space<any>> -> memref<1x128xf32, #tpu.memory_space<any>>
      %320 = tpu.memref_squeeze %319 : memref<1x128xf32, #tpu.memory_space<any>> -> memref<128xf32, #tpu.memory_space<any>>
      %c0_i32_134 = arith.constant 0 : i32
      %321 = tpu.memref_slice %arg7[%318, %c0_i32_134] : memref<112x128xf32, #tpu.memory_space<vmem>> -> memref<1x128xf32, #tpu.memory_space<vmem>>
      %322 = tpu.memref_squeeze %321 : memref<1x128xf32, #tpu.memory_space<vmem>> -> memref<128xf32, #tpu.memory_space<vmem>>
      %323 = tpu.memref_slice %arg8[%c0_i32_40] : memref<2x!tpu.dma_semaphore, #tpu.memory_space<semaphore_mem>> -> memref<1x!tpu.dma_semaphore, #tpu.memory_space<semaphore_mem>>
      %324 = tpu.memref_squeeze %323 : memref<1x!tpu.dma_semaphore, #tpu.memory_space<semaphore_mem>> -> memref<!tpu.dma_semaphore, #tpu.memory_space<semaphore_mem>>
      tpu.enqueue_dma source(%320 : memref<128xf32, #tpu.memory_space<any>>) target(%322 : memref<128xf32, #tpu.memory_space<vmem>>) target_semaphore(%324 : memref<!tpu.dma_semaphore, #tpu.memory_space<semaphore_mem>>)
      %c5_i32_135 = arith.constant 5 : i32
      %325 = arith.muli %262, %c5_i32_135 : i32
      %c4_i32_136 = arith.constant 4 : i32
      %326 = arith.addi %325, %c4_i32_136 : i32
      %327 = arith.index_cast %326 : i32 to index
      %328 = memref.load %arg3[%327] : memref<120xi32, #tpu.memory_space<smem>>
      %c48_i32_137 = arith.constant 48 : i32
      %329 = arith.addi %c48_i32_137, %261 : i32
      %c0_i32_138 = arith.constant 0 : i32
      %330 = tpu.memref_slice %arg5[%328, %c0_i32_138] : memref<64x128xf32, #tpu.memory_space<any>> -> memref<1x128xf32, #tpu.memory_space<any>>
      %331 = tpu.memref_squeeze %330 : memref<1x128xf32, #tpu.memory_space<any>> -> memref<128xf32, #tpu.memory_space<any>>
      %c0_i32_139 = arith.constant 0 : i32
      %332 = tpu.memref_slice %arg7[%329, %c0_i32_139] : memref<112x128xf32, #tpu.memory_space<vmem>> -> memref<1x128xf32, #tpu.memory_space<vmem>>
      %333 = tpu.memref_squeeze %332 : memref<1x128xf32, #tpu.memory_space<vmem>> -> memref<128xf32, #tpu.memory_space<vmem>>
      %334 = tpu.memref_slice %arg8[%c0_i32_40] : memref<2x!tpu.dma_semaphore, #tpu.memory_space<semaphore_mem>> -> memref<1x!tpu.dma_semaphore, #tpu.memory_space<semaphore_mem>>
      %335 = tpu.memref_squeeze %334 : memref<1x!tpu.dma_semaphore, #tpu.memory_space<semaphore_mem>> -> memref<!tpu.dma_semaphore, #tpu.memory_space<semaphore_mem>>
      tpu.enqueue_dma source(%331 : memref<128xf32, #tpu.memory_space<any>>) target(%333 : memref<128xf32, #tpu.memory_space<vmem>>) target_semaphore(%335 : memref<!tpu.dma_semaphore, #tpu.memory_space<semaphore_mem>>)
      %c3_i32_140 = arith.constant 3 : i32
      %336 = arith.addi %110, %c3_i32_140 : i32
      %c0_i32_141 = arith.constant 0 : i32
      %337 = arith.addi %c0_i32_141, %336 : i32
      %338 = arith.index_cast %337 : i32 to index
      %339 = memref.load %arg1[%338] : memref<24xi32, #tpu.memory_space<smem>>
      %c0_i32_142 = arith.constant 0 : i32
      %340 = arith.addi %c0_i32_142, %336 : i32
      %c0_i32_143 = arith.constant 0 : i32
      %341 = tpu.memref_slice %arg4[%339, %c0_i32_143] : memref<64x128xf32, #tpu.memory_space<any>> -> memref<1x128xf32, #tpu.memory_space<any>>
      %342 = tpu.memref_squeeze %341 : memref<1x128xf32, #tpu.memory_space<any>> -> memref<128xf32, #tpu.memory_space<any>>
      %c0_i32_144 = arith.constant 0 : i32
      %343 = tpu.memref_slice %arg7[%340, %c0_i32_144] : memref<112x128xf32, #tpu.memory_space<vmem>> -> memref<1x128xf32, #tpu.memory_space<vmem>>
      %344 = tpu.memref_squeeze %343 : memref<1x128xf32, #tpu.memory_space<vmem>> -> memref<128xf32, #tpu.memory_space<vmem>>
      %345 = tpu.memref_slice %arg8[%c0_i32_40] : memref<2x!tpu.dma_semaphore, #tpu.memory_space<semaphore_mem>> -> memref<1x!tpu.dma_semaphore, #tpu.memory_space<semaphore_mem>>
      %346 = tpu.memref_squeeze %345 : memref<1x!tpu.dma_semaphore, #tpu.memory_space<semaphore_mem>> -> memref<!tpu.dma_semaphore, #tpu.memory_space<semaphore_mem>>
      tpu.enqueue_dma source(%342 : memref<128xf32, #tpu.memory_space<any>>) target(%344 : memref<128xf32, #tpu.memory_space<vmem>>) target_semaphore(%346 : memref<!tpu.dma_semaphore, #tpu.memory_space<semaphore_mem>>)
      %347 = arith.index_cast %337 : i32 to index
      %348 = memref.load %arg2[%347] : memref<24xi32, #tpu.memory_space<smem>>
      %c8_i32_145 = arith.constant 8 : i32
      %349 = arith.addi %c8_i32_145, %336 : i32
      %c0_i32_146 = arith.constant 0 : i32
      %350 = tpu.memref_slice %arg5[%348, %c0_i32_146] : memref<64x128xf32, #tpu.memory_space<any>> -> memref<1x128xf32, #tpu.memory_space<any>>
      %351 = tpu.memref_squeeze %350 : memref<1x128xf32, #tpu.memory_space<any>> -> memref<128xf32, #tpu.memory_space<any>>
      %c0_i32_147 = arith.constant 0 : i32
      %352 = tpu.memref_slice %arg7[%349, %c0_i32_147] : memref<112x128xf32, #tpu.memory_space<vmem>> -> memref<1x128xf32, #tpu.memory_space<vmem>>
      %353 = tpu.memref_squeeze %352 : memref<1x128xf32, #tpu.memory_space<vmem>> -> memref<128xf32, #tpu.memory_space<vmem>>
      %354 = tpu.memref_slice %arg8[%c0_i32_40] : memref<2x!tpu.dma_semaphore, #tpu.memory_space<semaphore_mem>> -> memref<1x!tpu.dma_semaphore, #tpu.memory_space<semaphore_mem>>
      %355 = tpu.memref_squeeze %354 : memref<1x!tpu.dma_semaphore, #tpu.memory_space<semaphore_mem>> -> memref<!tpu.dma_semaphore, #tpu.memory_space<semaphore_mem>>
      tpu.enqueue_dma source(%351 : memref<128xf32, #tpu.memory_space<any>>) target(%353 : memref<128xf32, #tpu.memory_space<vmem>>) target_semaphore(%355 : memref<!tpu.dma_semaphore, #tpu.memory_space<semaphore_mem>>)
      %c5_i32_148 = arith.constant 5 : i32
      %356 = arith.muli %337, %c5_i32_148 : i32
      %c0_i32_149 = arith.constant 0 : i32
      %357 = arith.addi %356, %c0_i32_149 : i32
      %358 = arith.index_cast %357 : i32 to index
      %359 = memref.load %arg3[%358] : memref<120xi32, #tpu.memory_space<smem>>
      %c16_i32_150 = arith.constant 16 : i32
      %360 = arith.addi %c16_i32_150, %336 : i32
      %c0_i32_151 = arith.constant 0 : i32
      %361 = tpu.memref_slice %arg5[%359, %c0_i32_151] : memref<64x128xf32, #tpu.memory_space<any>> -> memref<1x128xf32, #tpu.memory_space<any>>
      %362 = tpu.memref_squeeze %361 : memref<1x128xf32, #tpu.memory_space<any>> -> memref<128xf32, #tpu.memory_space<any>>
      %c0_i32_152 = arith.constant 0 : i32
      %363 = tpu.memref_slice %arg7[%360, %c0_i32_152] : memref<112x128xf32, #tpu.memory_space<vmem>> -> memref<1x128xf32, #tpu.memory_space<vmem>>
      %364 = tpu.memref_squeeze %363 : memref<1x128xf32, #tpu.memory_space<vmem>> -> memref<128xf32, #tpu.memory_space<vmem>>
      %365 = tpu.memref_slice %arg8[%c0_i32_40] : memref<2x!tpu.dma_semaphore, #tpu.memory_space<semaphore_mem>> -> memref<1x!tpu.dma_semaphore, #tpu.memory_space<semaphore_mem>>
      %366 = tpu.memref_squeeze %365 : memref<1x!tpu.dma_semaphore, #tpu.memory_space<semaphore_mem>> -> memref<!tpu.dma_semaphore, #tpu.memory_space<semaphore_mem>>
      tpu.enqueue_dma source(%362 : memref<128xf32, #tpu.memory_space<any>>) target(%364 : memref<128xf32, #tpu.memory_space<vmem>>) target_semaphore(%366 : memref<!tpu.dma_semaphore, #tpu.memory_space<semaphore_mem>>)
      %c5_i32_153 = arith.constant 5 : i32
      %367 = arith.muli %337, %c5_i32_153 : i32
      %c1_i32_154 = arith.constant 1 : i32
      %368 = arith.addi %367, %c1_i32_154 : i32
      %369 = arith.index_cast %368 : i32 to index
      %370 = memref.load %arg3[%369] : memref<120xi32, #tpu.memory_space<smem>>
      %c24_i32_155 = arith.constant 24 : i32
      %371 = arith.addi %c24_i32_155, %336 : i32
      %c0_i32_156 = arith.constant 0 : i32
      %372 = tpu.memref_slice %arg5[%370, %c0_i32_156] : memref<64x128xf32, #tpu.memory_space<any>> -> memref<1x128xf32, #tpu.memory_space<any>>
      %373 = tpu.memref_squeeze %372 : memref<1x128xf32, #tpu.memory_space<any>> -> memref<128xf32, #tpu.memory_space<any>>
      %c0_i32_157 = arith.constant 0 : i32
      %374 = tpu.memref_slice %arg7[%371, %c0_i32_157] : memref<112x128xf32, #tpu.memory_space<vmem>> -> memref<1x128xf32, #tpu.memory_space<vmem>>
      %375 = tpu.memref_squeeze %374 : memref<1x128xf32, #tpu.memory_space<vmem>> -> memref<128xf32, #tpu.memory_space<vmem>>
      %376 = tpu.memref_slice %arg8[%c0_i32_40] : memref<2x!tpu.dma_semaphore, #tpu.memory_space<semaphore_mem>> -> memref<1x!tpu.dma_semaphore, #tpu.memory_space<semaphore_mem>>
      %377 = tpu.memref_squeeze %376 : memref<1x!tpu.dma_semaphore, #tpu.memory_space<semaphore_mem>> -> memref<!tpu.dma_semaphore, #tpu.memory_space<semaphore_mem>>
      tpu.enqueue_dma source(%373 : memref<128xf32, #tpu.memory_space<any>>) target(%375 : memref<128xf32, #tpu.memory_space<vmem>>) target_semaphore(%377 : memref<!tpu.dma_semaphore, #tpu.memory_space<semaphore_mem>>)
      %c5_i32_158 = arith.constant 5 : i32
      %378 = arith.muli %337, %c5_i32_158 : i32
      %c2_i32_159 = arith.constant 2 : i32
      %379 = arith.addi %378, %c2_i32_159 : i32
      %380 = arith.index_cast %379 : i32 to index
      %381 = memref.load %arg3[%380] : memref<120xi32, #tpu.memory_space<smem>>
      %c32_i32_160 = arith.constant 32 : i32
      %382 = arith.addi %c32_i32_160, %336 : i32
      %c0_i32_161 = arith.constant 0 : i32
      %383 = tpu.memref_slice %arg5[%381, %c0_i32_161] : memref<64x128xf32, #tpu.memory_space<any>> -> memref<1x128xf32, #tpu.memory_space<any>>
      %384 = tpu.memref_squeeze %383 : memref<1x128xf32, #tpu.memory_space<any>> -> memref<128xf32, #tpu.memory_space<any>>
      %c0_i32_162 = arith.constant 0 : i32
      %385 = tpu.memref_slice %arg7[%382, %c0_i32_162] : memref<112x128xf32, #tpu.memory_space<vmem>> -> memref<1x128xf32, #tpu.memory_space<vmem>>
      %386 = tpu.memref_squeeze %385 : memref<1x128xf32, #tpu.memory_space<vmem>> -> memref<128xf32, #tpu.memory_space<vmem>>
      %387 = tpu.memref_slice %arg8[%c0_i32_40] : memref<2x!tpu.dma_semaphore, #tpu.memory_space<semaphore_mem>> -> memref<1x!tpu.dma_semaphore, #tpu.memory_space<semaphore_mem>>
      %388 = tpu.memref_squeeze %387 : memref<1x!tpu.dma_semaphore, #tpu.memory_space<semaphore_mem>> -> memref<!tpu.dma_semaphore, #tpu.memory_space<semaphore_mem>>
      tpu.enqueue_dma source(%384 : memref<128xf32, #tpu.memory_space<any>>) target(%386 : memref<128xf32, #tpu.memory_space<vmem>>) target_semaphore(%388 : memref<!tpu.dma_semaphore, #tpu.memory_space<semaphore_mem>>)
      %c5_i32_163 = arith.constant 5 : i32
      %389 = arith.muli %337, %c5_i32_163 : i32
      %c3_i32_164 = arith.constant 3 : i32
      %390 = arith.addi %389, %c3_i32_164 : i32
      %391 = arith.index_cast %390 : i32 to index
      %392 = memref.load %arg3[%391] : memref<120xi32, #tpu.memory_space<smem>>
      %c40_i32_165 = arith.constant 40 : i32
      %393 = arith.addi %c40_i32_165, %336 : i32
      %c0_i32_166 = arith.constant 0 : i32
      %394 = tpu.memref_slice %arg5[%392, %c0_i32_166] : memref<64x128xf32, #tpu.memory_space<any>> -> memref<1x128xf32, #tpu.memory_space<any>>
      %395 = tpu.memref_squeeze %394 : memref<1x128xf32, #tpu.memory_space<any>> -> memref<128xf32, #tpu.memory_space<any>>
      %c0_i32_167 = arith.constant 0 : i32
      %396 = tpu.memref_slice %arg7[%393, %c0_i32_167] : memref<112x128xf32, #tpu.memory_space<vmem>> -> memref<1x128xf32, #tpu.memory_space<vmem>>
      %397 = tpu.memref_squeeze %396 : memref<1x128xf32, #tpu.memory_space<vmem>> -> memref<128xf32, #tpu.memory_space<vmem>>
      %398 = tpu.memref_slice %arg8[%c0_i32_40] : memref<2x!tpu.dma_semaphore, #tpu.memory_space<semaphore_mem>> -> memref<1x!tpu.dma_semaphore, #tpu.memory_space<semaphore_mem>>
      %399 = tpu.memref_squeeze %398 : memref<1x!tpu.dma_semaphore, #tpu.memory_space<semaphore_mem>> -> memref<!tpu.dma_semaphore, #tpu.memory_space<semaphore_mem>>
      tpu.enqueue_dma source(%395 : memref<128xf32, #tpu.memory_space<any>>) target(%397 : memref<128xf32, #tpu.memory_space<vmem>>) target_semaphore(%399 : memref<!tpu.dma_semaphore, #tpu.memory_space<semaphore_mem>>)
      %c5_i32_168 = arith.constant 5 : i32
      %400 = arith.muli %337, %c5_i32_168 : i32
      %c4_i32_169 = arith.constant 4 : i32
      %401 = arith.addi %400, %c4_i32_169 : i32
      %402 = arith.index_cast %401 : i32 to index
      %403 = memref.load %arg3[%402] : memref<120xi32, #tpu.memory_space<smem>>
      %c48_i32_170 = arith.constant 48 : i32
      %404 = arith.addi %c48_i32_170, %336 : i32
      %c0_i32_171 = arith.constant 0 : i32
      %405 = tpu.memref_slice %arg5[%403, %c0_i32_171] : memref<64x128xf32, #tpu.memory_space<any>> -> memref<1x128xf32, #tpu.memory_space<any>>
      %406 = tpu.memref_squeeze %405 : memref<1x128xf32, #tpu.memory_space<any>> -> memref<128xf32, #tpu.memory_space<any>>
      %c0_i32_172 = arith.constant 0 : i32
      %407 = tpu.memref_slice %arg7[%404, %c0_i32_172] : memref<112x128xf32, #tpu.memory_space<vmem>> -> memref<1x128xf32, #tpu.memory_space<vmem>>
      %408 = tpu.memref_squeeze %407 : memref<1x128xf32, #tpu.memory_space<vmem>> -> memref<128xf32, #tpu.memory_space<vmem>>
      %409 = tpu.memref_slice %arg8[%c0_i32_40] : memref<2x!tpu.dma_semaphore, #tpu.memory_space<semaphore_mem>> -> memref<1x!tpu.dma_semaphore, #tpu.memory_space<semaphore_mem>>
      %410 = tpu.memref_squeeze %409 : memref<1x!tpu.dma_semaphore, #tpu.memory_space<semaphore_mem>> -> memref<!tpu.dma_semaphore, #tpu.memory_space<semaphore_mem>>
      tpu.enqueue_dma source(%406 : memref<128xf32, #tpu.memory_space<any>>) target(%408 : memref<128xf32, #tpu.memory_space<vmem>>) target_semaphore(%410 : memref<!tpu.dma_semaphore, #tpu.memory_space<semaphore_mem>>)
      %c4_i32_173 = arith.constant 4 : i32
      %411 = arith.addi %110, %c4_i32_173 : i32
      %c0_i32_174 = arith.constant 0 : i32
      %412 = arith.addi %c0_i32_174, %411 : i32
      %413 = arith.index_cast %412 : i32 to index
      %414 = memref.load %arg1[%413] : memref<24xi32, #tpu.memory_space<smem>>
      %c0_i32_175 = arith.constant 0 : i32
      %415 = arith.addi %c0_i32_175, %411 : i32
      %c0_i32_176 = arith.constant 0 : i32
      %416 = tpu.memref_slice %arg4[%414, %c0_i32_176] : memref<64x128xf32, #tpu.memory_space<any>> -> memref<1x128xf32, #tpu.memory_space<any>>
      %417 = tpu.memref_squeeze %416 : memref<1x128xf32, #tpu.memory_space<any>> -> memref<128xf32, #tpu.memory_space<any>>
      %c0_i32_177 = arith.constant 0 : i32
      %418 = tpu.memref_slice %arg7[%415, %c0_i32_177] : memref<112x128xf32, #tpu.memory_space<vmem>> -> memref<1x128xf32, #tpu.memory_space<vmem>>
      %419 = tpu.memref_squeeze %418 : memref<1x128xf32, #tpu.memory_space<vmem>> -> memref<128xf32, #tpu.memory_space<vmem>>
      %420 = tpu.memref_slice %arg8[%c0_i32_40] : memref<2x!tpu.dma_semaphore, #tpu.memory_space<semaphore_mem>> -> memref<1x!tpu.dma_semaphore, #tpu.memory_space<semaphore_mem>>
      %421 = tpu.memref_squeeze %420 : memref<1x!tpu.dma_semaphore, #tpu.memory_space<semaphore_mem>> -> memref<!tpu.dma_semaphore, #tpu.memory_space<semaphore_mem>>
      tpu.enqueue_dma source(%417 : memref<128xf32, #tpu.memory_space<any>>) target(%419 : memref<128xf32, #tpu.memory_space<vmem>>) target_semaphore(%421 : memref<!tpu.dma_semaphore, #tpu.memory_space<semaphore_mem>>)
      %422 = arith.index_cast %412 : i32 to index
      %423 = memref.load %arg2[%422] : memref<24xi32, #tpu.memory_space<smem>>
      %c8_i32_178 = arith.constant 8 : i32
      %424 = arith.addi %c8_i32_178, %411 : i32
      %c0_i32_179 = arith.constant 0 : i32
      %425 = tpu.memref_slice %arg5[%423, %c0_i32_179] : memref<64x128xf32, #tpu.memory_space<any>> -> memref<1x128xf32, #tpu.memory_space<any>>
      %426 = tpu.memref_squeeze %425 : memref<1x128xf32, #tpu.memory_space<any>> -> memref<128xf32, #tpu.memory_space<any>>
      %c0_i32_180 = arith.constant 0 : i32
      %427 = tpu.memref_slice %arg7[%424, %c0_i32_180] : memref<112x128xf32, #tpu.memory_space<vmem>> -> memref<1x128xf32, #tpu.memory_space<vmem>>
      %428 = tpu.memref_squeeze %427 : memref<1x128xf32, #tpu.memory_space<vmem>> -> memref<128xf32, #tpu.memory_space<vmem>>
      %429 = tpu.memref_slice %arg8[%c0_i32_40] : memref<2x!tpu.dma_semaphore, #tpu.memory_space<semaphore_mem>> -> memref<1x!tpu.dma_semaphore, #tpu.memory_space<semaphore_mem>>
      %430 = tpu.memref_squeeze %429 : memref<1x!tpu.dma_semaphore, #tpu.memory_space<semaphore_mem>> -> memref<!tpu.dma_semaphore, #tpu.memory_space<semaphore_mem>>
      tpu.enqueue_dma source(%426 : memref<128xf32, #tpu.memory_space<any>>) target(%428 : memref<128xf32, #tpu.memory_space<vmem>>) target_semaphore(%430 : memref<!tpu.dma_semaphore, #tpu.memory_space<semaphore_mem>>)
      %c5_i32_181 = arith.constant 5 : i32
      %431 = arith.muli %412, %c5_i32_181 : i32
      %c0_i32_182 = arith.constant 0 : i32
      %432 = arith.addi %431, %c0_i32_182 : i32
      %433 = arith.index_cast %432 : i32 to index
      %434 = memref.load %arg3[%433] : memref<120xi32, #tpu.memory_space<smem>>
      %c16_i32_183 = arith.constant 16 : i32
      %435 = arith.addi %c16_i32_183, %411 : i32
      %c0_i32_184 = arith.constant 0 : i32
      %436 = tpu.memref_slice %arg5[%434, %c0_i32_184] : memref<64x128xf32, #tpu.memory_space<any>> -> memref<1x128xf32, #tpu.memory_space<any>>
      %437 = tpu.memref_squeeze %436 : memref<1x128xf32, #tpu.memory_space<any>> -> memref<128xf32, #tpu.memory_space<any>>
      %c0_i32_185 = arith.constant 0 : i32
      %438 = tpu.memref_slice %arg7[%435, %c0_i32_185] : memref<112x128xf32, #tpu.memory_space<vmem>> -> memref<1x128xf32, #tpu.memory_space<vmem>>
      %439 = tpu.memref_squeeze %438 : memref<1x128xf32, #tpu.memory_space<vmem>> -> memref<128xf32, #tpu.memory_space<vmem>>
      %440 = tpu.memref_slice %arg8[%c0_i32_40] : memref<2x!tpu.dma_semaphore, #tpu.memory_space<semaphore_mem>> -> memref<1x!tpu.dma_semaphore, #tpu.memory_space<semaphore_mem>>
      %441 = tpu.memref_squeeze %440 : memref<1x!tpu.dma_semaphore, #tpu.memory_space<semaphore_mem>> -> memref<!tpu.dma_semaphore, #tpu.memory_space<semaphore_mem>>
      tpu.enqueue_dma source(%437 : memref<128xf32, #tpu.memory_space<any>>) target(%439 : memref<128xf32, #tpu.memory_space<vmem>>) target_semaphore(%441 : memref<!tpu.dma_semaphore, #tpu.memory_space<semaphore_mem>>)
      %c5_i32_186 = arith.constant 5 : i32
      %442 = arith.muli %412, %c5_i32_186 : i32
      %c1_i32_187 = arith.constant 1 : i32
      %443 = arith.addi %442, %c1_i32_187 : i32
      %444 = arith.index_cast %443 : i32 to index
      %445 = memref.load %arg3[%444] : memref<120xi32, #tpu.memory_space<smem>>
      %c24_i32_188 = arith.constant 24 : i32
      %446 = arith.addi %c24_i32_188, %411 : i32
      %c0_i32_189 = arith.constant 0 : i32
      %447 = tpu.memref_slice %arg5[%445, %c0_i32_189] : memref<64x128xf32, #tpu.memory_space<any>> -> memref<1x128xf32, #tpu.memory_space<any>>
      %448 = tpu.memref_squeeze %447 : memref<1x128xf32, #tpu.memory_space<any>> -> memref<128xf32, #tpu.memory_space<any>>
      %c0_i32_190 = arith.constant 0 : i32
      %449 = tpu.memref_slice %arg7[%446, %c0_i32_190] : memref<112x128xf32, #tpu.memory_space<vmem>> -> memref<1x128xf32, #tpu.memory_space<vmem>>
      %450 = tpu.memref_squeeze %449 : memref<1x128xf32, #tpu.memory_space<vmem>> -> memref<128xf32, #tpu.memory_space<vmem>>
      %451 = tpu.memref_slice %arg8[%c0_i32_40] : memref<2x!tpu.dma_semaphore, #tpu.memory_space<semaphore_mem>> -> memref<1x!tpu.dma_semaphore, #tpu.memory_space<semaphore_mem>>
      %452 = tpu.memref_squeeze %451 : memref<1x!tpu.dma_semaphore, #tpu.memory_space<semaphore_mem>> -> memref<!tpu.dma_semaphore, #tpu.memory_space<semaphore_mem>>
      tpu.enqueue_dma source(%448 : memref<128xf32, #tpu.memory_space<any>>) target(%450 : memref<128xf32, #tpu.memory_space<vmem>>) target_semaphore(%452 : memref<!tpu.dma_semaphore, #tpu.memory_space<semaphore_mem>>)
      %c5_i32_191 = arith.constant 5 : i32
      %453 = arith.muli %412, %c5_i32_191 : i32
      %c2_i32_192 = arith.constant 2 : i32
      %454 = arith.addi %453, %c2_i32_192 : i32
      %455 = arith.index_cast %454 : i32 to index
      %456 = memref.load %arg3[%455] : memref<120xi32, #tpu.memory_space<smem>>
      %c32_i32_193 = arith.constant 32 : i32
      %457 = arith.addi %c32_i32_193, %411 : i32
      %c0_i32_194 = arith.constant 0 : i32
      %458 = tpu.memref_slice %arg5[%456, %c0_i32_194] : memref<64x128xf32, #tpu.memory_space<any>> -> memref<1x128xf32, #tpu.memory_space<any>>
      %459 = tpu.memref_squeeze %458 : memref<1x128xf32, #tpu.memory_space<any>> -> memref<128xf32, #tpu.memory_space<any>>
      %c0_i32_195 = arith.constant 0 : i32
      %460 = tpu.memref_slice %arg7[%457, %c0_i32_195] : memref<112x128xf32, #tpu.memory_space<vmem>> -> memref<1x128xf32, #tpu.memory_space<vmem>>
      %461 = tpu.memref_squeeze %460 : memref<1x128xf32, #tpu.memory_space<vmem>> -> memref<128xf32, #tpu.memory_space<vmem>>
      %462 = tpu.memref_slice %arg8[%c0_i32_40] : memref<2x!tpu.dma_semaphore, #tpu.memory_space<semaphore_mem>> -> memref<1x!tpu.dma_semaphore, #tpu.memory_space<semaphore_mem>>
      %463 = tpu.memref_squeeze %462 : memref<1x!tpu.dma_semaphore, #tpu.memory_space<semaphore_mem>> -> memref<!tpu.dma_semaphore, #tpu.memory_space<semaphore_mem>>
      tpu.enqueue_dma source(%459 : memref<128xf32, #tpu.memory_space<any>>) target(%461 : memref<128xf32, #tpu.memory_space<vmem>>) target_semaphore(%463 : memref<!tpu.dma_semaphore, #tpu.memory_space<semaphore_mem>>)
      %c5_i32_196 = arith.constant 5 : i32
      %464 = arith.muli %412, %c5_i32_196 : i32
      %c3_i32_197 = arith.constant 3 : i32
      %465 = arith.addi %464, %c3_i32_197 : i32
      %466 = arith.index_cast %465 : i32 to index
      %467 = memref.load %arg3[%466] : memref<120xi32, #tpu.memory_space<smem>>
      %c40_i32_198 = arith.constant 40 : i32
      %468 = arith.addi %c40_i32_198, %411 : i32
      %c0_i32_199 = arith.constant 0 : i32
      %469 = tpu.memref_slice %arg5[%467, %c0_i32_199] : memref<64x128xf32, #tpu.memory_space<any>> -> memref<1x128xf32, #tpu.memory_space<any>>
      %470 = tpu.memref_squeeze %469 : memref<1x128xf32, #tpu.memory_space<any>> -> memref<128xf32, #tpu.memory_space<any>>
      %c0_i32_200 = arith.constant 0 : i32
      %471 = tpu.memref_slice %arg7[%468, %c0_i32_200] : memref<112x128xf32, #tpu.memory_space<vmem>> -> memref<1x128xf32, #tpu.memory_space<vmem>>
      %472 = tpu.memref_squeeze %471 : memref<1x128xf32, #tpu.memory_space<vmem>> -> memref<128xf32, #tpu.memory_space<vmem>>
      %473 = tpu.memref_slice %arg8[%c0_i32_40] : memref<2x!tpu.dma_semaphore, #tpu.memory_space<semaphore_mem>> -> memref<1x!tpu.dma_semaphore, #tpu.memory_space<semaphore_mem>>
      %474 = tpu.memref_squeeze %473 : memref<1x!tpu.dma_semaphore, #tpu.memory_space<semaphore_mem>> -> memref<!tpu.dma_semaphore, #tpu.memory_space<semaphore_mem>>
      tpu.enqueue_dma source(%470 : memref<128xf32, #tpu.memory_space<any>>) target(%472 : memref<128xf32, #tpu.memory_space<vmem>>) target_semaphore(%474 : memref<!tpu.dma_semaphore, #tpu.memory_space<semaphore_mem>>)
      %c5_i32_201 = arith.constant 5 : i32
      %475 = arith.muli %412, %c5_i32_201 : i32
      %c4_i32_202 = arith.constant 4 : i32
      %476 = arith.addi %475, %c4_i32_202 : i32
      %477 = arith.index_cast %476 : i32 to index
      %478 = memref.load %arg3[%477] : memref<120xi32, #tpu.memory_space<smem>>
      %c48_i32_203 = arith.constant 48 : i32
      %479 = arith.addi %c48_i32_203, %411 : i32
      %c0_i32_204 = arith.constant 0 : i32
      %480 = tpu.memref_slice %arg5[%478, %c0_i32_204] : memref<64x128xf32, #tpu.memory_space<any>> -> memref<1x128xf32, #tpu.memory_space<any>>
      %481 = tpu.memref_squeeze %480 : memref<1x128xf32, #tpu.memory_space<any>> -> memref<128xf32, #tpu.memory_space<any>>
      %c0_i32_205 = arith.constant 0 : i32
      %482 = tpu.memref_slice %arg7[%479, %c0_i32_205] : memref<112x128xf32, #tpu.memory_space<vmem>> -> memref<1x128xf32, #tpu.memory_space<vmem>>
      %483 = tpu.memref_squeeze %482 : memref<1x128xf32, #tpu.memory_space<vmem>> -> memref<128xf32, #tpu.memory_space<vmem>>
      %484 = tpu.memref_slice %arg8[%c0_i32_40] : memref<2x!tpu.dma_semaphore, #tpu.memory_space<semaphore_mem>> -> memref<1x!tpu.dma_semaphore, #tpu.memory_space<semaphore_mem>>
      %485 = tpu.memref_squeeze %484 : memref<1x!tpu.dma_semaphore, #tpu.memory_space<semaphore_mem>> -> memref<!tpu.dma_semaphore, #tpu.memory_space<semaphore_mem>>
      tpu.enqueue_dma source(%481 : memref<128xf32, #tpu.memory_space<any>>) target(%483 : memref<128xf32, #tpu.memory_space<vmem>>) target_semaphore(%485 : memref<!tpu.dma_semaphore, #tpu.memory_space<semaphore_mem>>)
      %c5_i32_206 = arith.constant 5 : i32
      %486 = arith.addi %110, %c5_i32_206 : i32
      %c0_i32_207 = arith.constant 0 : i32
      %487 = arith.addi %c0_i32_207, %486 : i32
      %488 = arith.index_cast %487 : i32 to index
      %489 = memref.load %arg1[%488] : memref<24xi32, #tpu.memory_space<smem>>
      %c0_i32_208 = arith.constant 0 : i32
      %490 = arith.addi %c0_i32_208, %486 : i32
      %c0_i32_209 = arith.constant 0 : i32
      %491 = tpu.memref_slice %arg4[%489, %c0_i32_209] : memref<64x128xf32, #tpu.memory_space<any>> -> memref<1x128xf32, #tpu.memory_space<any>>
      %492 = tpu.memref_squeeze %491 : memref<1x128xf32, #tpu.memory_space<any>> -> memref<128xf32, #tpu.memory_space<any>>
      %c0_i32_210 = arith.constant 0 : i32
      %493 = tpu.memref_slice %arg7[%490, %c0_i32_210] : memref<112x128xf32, #tpu.memory_space<vmem>> -> memref<1x128xf32, #tpu.memory_space<vmem>>
      %494 = tpu.memref_squeeze %493 : memref<1x128xf32, #tpu.memory_space<vmem>> -> memref<128xf32, #tpu.memory_space<vmem>>
      %495 = tpu.memref_slice %arg8[%c0_i32_40] : memref<2x!tpu.dma_semaphore, #tpu.memory_space<semaphore_mem>> -> memref<1x!tpu.dma_semaphore, #tpu.memory_space<semaphore_mem>>
      %496 = tpu.memref_squeeze %495 : memref<1x!tpu.dma_semaphore, #tpu.memory_space<semaphore_mem>> -> memref<!tpu.dma_semaphore, #tpu.memory_space<semaphore_mem>>
      tpu.enqueue_dma source(%492 : memref<128xf32, #tpu.memory_space<any>>) target(%494 : memref<128xf32, #tpu.memory_space<vmem>>) target_semaphore(%496 : memref<!tpu.dma_semaphore, #tpu.memory_space<semaphore_mem>>)
      %497 = arith.index_cast %487 : i32 to index
      %498 = memref.load %arg2[%497] : memref<24xi32, #tpu.memory_space<smem>>
      %c8_i32_211 = arith.constant 8 : i32
      %499 = arith.addi %c8_i32_211, %486 : i32
      %c0_i32_212 = arith.constant 0 : i32
      %500 = tpu.memref_slice %arg5[%498, %c0_i32_212] : memref<64x128xf32, #tpu.memory_space<any>> -> memref<1x128xf32, #tpu.memory_space<any>>
      %501 = tpu.memref_squeeze %500 : memref<1x128xf32, #tpu.memory_space<any>> -> memref<128xf32, #tpu.memory_space<any>>
      %c0_i32_213 = arith.constant 0 : i32
      %502 = tpu.memref_slice %arg7[%499, %c0_i32_213] : memref<112x128xf32, #tpu.memory_space<vmem>> -> memref<1x128xf32, #tpu.memory_space<vmem>>
      %503 = tpu.memref_squeeze %502 : memref<1x128xf32, #tpu.memory_space<vmem>> -> memref<128xf32, #tpu.memory_space<vmem>>
      %504 = tpu.memref_slice %arg8[%c0_i32_40] : memref<2x!tpu.dma_semaphore, #tpu.memory_space<semaphore_mem>> -> memref<1x!tpu.dma_semaphore, #tpu.memory_space<semaphore_mem>>
      %505 = tpu.memref_squeeze %504 : memref<1x!tpu.dma_semaphore, #tpu.memory_space<semaphore_mem>> -> memref<!tpu.dma_semaphore, #tpu.memory_space<semaphore_mem>>
      tpu.enqueue_dma source(%501 : memref<128xf32, #tpu.memory_space<any>>) target(%503 : memref<128xf32, #tpu.memory_space<vmem>>) target_semaphore(%505 : memref<!tpu.dma_semaphore, #tpu.memory_space<semaphore_mem>>)
      %c5_i32_214 = arith.constant 5 : i32
      %506 = arith.muli %487, %c5_i32_214 : i32
      %c0_i32_215 = arith.constant 0 : i32
      %507 = arith.addi %506, %c0_i32_215 : i32
      %508 = arith.index_cast %507 : i32 to index
      %509 = memref.load %arg3[%508] : memref<120xi32, #tpu.memory_space<smem>>
      %c16_i32_216 = arith.constant 16 : i32
      %510 = arith.addi %c16_i32_216, %486 : i32
      %c0_i32_217 = arith.constant 0 : i32
      %511 = tpu.memref_slice %arg5[%509, %c0_i32_217] : memref<64x128xf32, #tpu.memory_space<any>> -> memref<1x128xf32, #tpu.memory_space<any>>
      %512 = tpu.memref_squeeze %511 : memref<1x128xf32, #tpu.memory_space<any>> -> memref<128xf32, #tpu.memory_space<any>>
      %c0_i32_218 = arith.constant 0 : i32
      %513 = tpu.memref_slice %arg7[%510, %c0_i32_218] : memref<112x128xf32, #tpu.memory_space<vmem>> -> memref<1x128xf32, #tpu.memory_space<vmem>>
      %514 = tpu.memref_squeeze %513 : memref<1x128xf32, #tpu.memory_space<vmem>> -> memref<128xf32, #tpu.memory_space<vmem>>
      %515 = tpu.memref_slice %arg8[%c0_i32_40] : memref<2x!tpu.dma_semaphore, #tpu.memory_space<semaphore_mem>> -> memref<1x!tpu.dma_semaphore, #tpu.memory_space<semaphore_mem>>
      %516 = tpu.memref_squeeze %515 : memref<1x!tpu.dma_semaphore, #tpu.memory_space<semaphore_mem>> -> memref<!tpu.dma_semaphore, #tpu.memory_space<semaphore_mem>>
      tpu.enqueue_dma source(%512 : memref<128xf32, #tpu.memory_space<any>>) target(%514 : memref<128xf32, #tpu.memory_space<vmem>>) target_semaphore(%516 : memref<!tpu.dma_semaphore, #tpu.memory_space<semaphore_mem>>)
      %c5_i32_219 = arith.constant 5 : i32
      %517 = arith.muli %487, %c5_i32_219 : i32
      %c1_i32_220 = arith.constant 1 : i32
      %518 = arith.addi %517, %c1_i32_220 : i32
      %519 = arith.index_cast %518 : i32 to index
      %520 = memref.load %arg3[%519] : memref<120xi32, #tpu.memory_space<smem>>
      %c24_i32_221 = arith.constant 24 : i32
      %521 = arith.addi %c24_i32_221, %486 : i32
      %c0_i32_222 = arith.constant 0 : i32
      %522 = tpu.memref_slice %arg5[%520, %c0_i32_222] : memref<64x128xf32, #tpu.memory_space<any>> -> memref<1x128xf32, #tpu.memory_space<any>>
      %523 = tpu.memref_squeeze %522 : memref<1x128xf32, #tpu.memory_space<any>> -> memref<128xf32, #tpu.memory_space<any>>
      %c0_i32_223 = arith.constant 0 : i32
      %524 = tpu.memref_slice %arg7[%521, %c0_i32_223] : memref<112x128xf32, #tpu.memory_space<vmem>> -> memref<1x128xf32, #tpu.memory_space<vmem>>
      %525 = tpu.memref_squeeze %524 : memref<1x128xf32, #tpu.memory_space<vmem>> -> memref<128xf32, #tpu.memory_space<vmem>>
      %526 = tpu.memref_slice %arg8[%c0_i32_40] : memref<2x!tpu.dma_semaphore, #tpu.memory_space<semaphore_mem>> -> memref<1x!tpu.dma_semaphore, #tpu.memory_space<semaphore_mem>>
      %527 = tpu.memref_squeeze %526 : memref<1x!tpu.dma_semaphore, #tpu.memory_space<semaphore_mem>> -> memref<!tpu.dma_semaphore, #tpu.memory_space<semaphore_mem>>
      tpu.enqueue_dma source(%523 : memref<128xf32, #tpu.memory_space<any>>) target(%525 : memref<128xf32, #tpu.memory_space<vmem>>) target_semaphore(%527 : memref<!tpu.dma_semaphore, #tpu.memory_space<semaphore_mem>>)
      %c5_i32_224 = arith.constant 5 : i32
      %528 = arith.muli %487, %c5_i32_224 : i32
      %c2_i32_225 = arith.constant 2 : i32
      %529 = arith.addi %528, %c2_i32_225 : i32
      %530 = arith.index_cast %529 : i32 to index
      %531 = memref.load %arg3[%530] : memref<120xi32, #tpu.memory_space<smem>>
      %c32_i32_226 = arith.constant 32 : i32
      %532 = arith.addi %c32_i32_226, %486 : i32
      %c0_i32_227 = arith.constant 0 : i32
      %533 = tpu.memref_slice %arg5[%531, %c0_i32_227] : memref<64x128xf32, #tpu.memory_space<any>> -> memref<1x128xf32, #tpu.memory_space<any>>
      %534 = tpu.memref_squeeze %533 : memref<1x128xf32, #tpu.memory_space<any>> -> memref<128xf32, #tpu.memory_space<any>>
      %c0_i32_228 = arith.constant 0 : i32
      %535 = tpu.memref_slice %arg7[%532, %c0_i32_228] : memref<112x128xf32, #tpu.memory_space<vmem>> -> memref<1x128xf32, #tpu.memory_space<vmem>>
      %536 = tpu.memref_squeeze %535 : memref<1x128xf32, #tpu.memory_space<vmem>> -> memref<128xf32, #tpu.memory_space<vmem>>
      %537 = tpu.memref_slice %arg8[%c0_i32_40] : memref<2x!tpu.dma_semaphore, #tpu.memory_space<semaphore_mem>> -> memref<1x!tpu.dma_semaphore, #tpu.memory_space<semaphore_mem>>
      %538 = tpu.memref_squeeze %537 : memref<1x!tpu.dma_semaphore, #tpu.memory_space<semaphore_mem>> -> memref<!tpu.dma_semaphore, #tpu.memory_space<semaphore_mem>>
      tpu.enqueue_dma source(%534 : memref<128xf32, #tpu.memory_space<any>>) target(%536 : memref<128xf32, #tpu.memory_space<vmem>>) target_semaphore(%538 : memref<!tpu.dma_semaphore, #tpu.memory_space<semaphore_mem>>)
      %c5_i32_229 = arith.constant 5 : i32
      %539 = arith.muli %487, %c5_i32_229 : i32
      %c3_i32_230 = arith.constant 3 : i32
      %540 = arith.addi %539, %c3_i32_230 : i32
      %541 = arith.index_cast %540 : i32 to index
      %542 = memref.load %arg3[%541] : memref<120xi32, #tpu.memory_space<smem>>
      %c40_i32_231 = arith.constant 40 : i32
      %543 = arith.addi %c40_i32_231, %486 : i32
      %c0_i32_232 = arith.constant 0 : i32
      %544 = tpu.memref_slice %arg5[%542, %c0_i32_232] : memref<64x128xf32, #tpu.memory_space<any>> -> memref<1x128xf32, #tpu.memory_space<any>>
      %545 = tpu.memref_squeeze %544 : memref<1x128xf32, #tpu.memory_space<any>> -> memref<128xf32, #tpu.memory_space<any>>
      %c0_i32_233 = arith.constant 0 : i32
      %546 = tpu.memref_slice %arg7[%543, %c0_i32_233] : memref<112x128xf32, #tpu.memory_space<vmem>> -> memref<1x128xf32, #tpu.memory_space<vmem>>
      %547 = tpu.memref_squeeze %546 : memref<1x128xf32, #tpu.memory_space<vmem>> -> memref<128xf32, #tpu.memory_space<vmem>>
      %548 = tpu.memref_slice %arg8[%c0_i32_40] : memref<2x!tpu.dma_semaphore, #tpu.memory_space<semaphore_mem>> -> memref<1x!tpu.dma_semaphore, #tpu.memory_space<semaphore_mem>>
      %549 = tpu.memref_squeeze %548 : memref<1x!tpu.dma_semaphore, #tpu.memory_space<semaphore_mem>> -> memref<!tpu.dma_semaphore, #tpu.memory_space<semaphore_mem>>
      tpu.enqueue_dma source(%545 : memref<128xf32, #tpu.memory_space<any>>) target(%547 : memref<128xf32, #tpu.memory_space<vmem>>) target_semaphore(%549 : memref<!tpu.dma_semaphore, #tpu.memory_space<semaphore_mem>>)
      %c5_i32_234 = arith.constant 5 : i32
      %550 = arith.muli %487, %c5_i32_234 : i32
      %c4_i32_235 = arith.constant 4 : i32
      %551 = arith.addi %550, %c4_i32_235 : i32
      %552 = arith.index_cast %551 : i32 to index
      %553 = memref.load %arg3[%552] : memref<120xi32, #tpu.memory_space<smem>>
      %c48_i32_236 = arith.constant 48 : i32
      %554 = arith.addi %c48_i32_236, %486 : i32
      %c0_i32_237 = arith.constant 0 : i32
      %555 = tpu.memref_slice %arg5[%553, %c0_i32_237] : memref<64x128xf32, #tpu.memory_space<any>> -> memref<1x128xf32, #tpu.memory_space<any>>
      %556 = tpu.memref_squeeze %555 : memref<1x128xf32, #tpu.memory_space<any>> -> memref<128xf32, #tpu.memory_space<any>>
      %c0_i32_238 = arith.constant 0 : i32
      %557 = tpu.memref_slice %arg7[%554, %c0_i32_238] : memref<112x128xf32, #tpu.memory_space<vmem>> -> memref<1x128xf32, #tpu.memory_space<vmem>>
      %558 = tpu.memref_squeeze %557 : memref<1x128xf32, #tpu.memory_space<vmem>> -> memref<128xf32, #tpu.memory_space<vmem>>
      %559 = tpu.memref_slice %arg8[%c0_i32_40] : memref<2x!tpu.dma_semaphore, #tpu.memory_space<semaphore_mem>> -> memref<1x!tpu.dma_semaphore, #tpu.memory_space<semaphore_mem>>
      %560 = tpu.memref_squeeze %559 : memref<1x!tpu.dma_semaphore, #tpu.memory_space<semaphore_mem>> -> memref<!tpu.dma_semaphore, #tpu.memory_space<semaphore_mem>>
      tpu.enqueue_dma source(%556 : memref<128xf32, #tpu.memory_space<any>>) target(%558 : memref<128xf32, #tpu.memory_space<vmem>>) target_semaphore(%560 : memref<!tpu.dma_semaphore, #tpu.memory_space<semaphore_mem>>)
      %c6_i32 = arith.constant 6 : i32
      %561 = arith.addi %110, %c6_i32 : i32
      %c0_i32_239 = arith.constant 0 : i32
      %562 = arith.addi %c0_i32_239, %561 : i32
      %563 = arith.index_cast %562 : i32 to index
      %564 = memref.load %arg1[%563] : memref<24xi32, #tpu.memory_space<smem>>
      %c0_i32_240 = arith.constant 0 : i32
      %565 = arith.addi %c0_i32_240, %561 : i32
      %c0_i32_241 = arith.constant 0 : i32
      %566 = tpu.memref_slice %arg4[%564, %c0_i32_241] : memref<64x128xf32, #tpu.memory_space<any>> -> memref<1x128xf32, #tpu.memory_space<any>>
      %567 = tpu.memref_squeeze %566 : memref<1x128xf32, #tpu.memory_space<any>> -> memref<128xf32, #tpu.memory_space<any>>
      %c0_i32_242 = arith.constant 0 : i32
      %568 = tpu.memref_slice %arg7[%565, %c0_i32_242] : memref<112x128xf32, #tpu.memory_space<vmem>> -> memref<1x128xf32, #tpu.memory_space<vmem>>
      %569 = tpu.memref_squeeze %568 : memref<1x128xf32, #tpu.memory_space<vmem>> -> memref<128xf32, #tpu.memory_space<vmem>>
      %570 = tpu.memref_slice %arg8[%c0_i32_40] : memref<2x!tpu.dma_semaphore, #tpu.memory_space<semaphore_mem>> -> memref<1x!tpu.dma_semaphore, #tpu.memory_space<semaphore_mem>>
      %571 = tpu.memref_squeeze %570 : memref<1x!tpu.dma_semaphore, #tpu.memory_space<semaphore_mem>> -> memref<!tpu.dma_semaphore, #tpu.memory_space<semaphore_mem>>
      tpu.enqueue_dma source(%567 : memref<128xf32, #tpu.memory_space<any>>) target(%569 : memref<128xf32, #tpu.memory_space<vmem>>) target_semaphore(%571 : memref<!tpu.dma_semaphore, #tpu.memory_space<semaphore_mem>>)
      %572 = arith.index_cast %562 : i32 to index
      %573 = memref.load %arg2[%572] : memref<24xi32, #tpu.memory_space<smem>>
      %c8_i32_243 = arith.constant 8 : i32
      %574 = arith.addi %c8_i32_243, %561 : i32
      %c0_i32_244 = arith.constant 0 : i32
      %575 = tpu.memref_slice %arg5[%573, %c0_i32_244] : memref<64x128xf32, #tpu.memory_space<any>> -> memref<1x128xf32, #tpu.memory_space<any>>
      %576 = tpu.memref_squeeze %575 : memref<1x128xf32, #tpu.memory_space<any>> -> memref<128xf32, #tpu.memory_space<any>>
      %c0_i32_245 = arith.constant 0 : i32
      %577 = tpu.memref_slice %arg7[%574, %c0_i32_245] : memref<112x128xf32, #tpu.memory_space<vmem>> -> memref<1x128xf32, #tpu.memory_space<vmem>>
      %578 = tpu.memref_squeeze %577 : memref<1x128xf32, #tpu.memory_space<vmem>> -> memref<128xf32, #tpu.memory_space<vmem>>
      %579 = tpu.memref_slice %arg8[%c0_i32_40] : memref<2x!tpu.dma_semaphore, #tpu.memory_space<semaphore_mem>> -> memref<1x!tpu.dma_semaphore, #tpu.memory_space<semaphore_mem>>
      %580 = tpu.memref_squeeze %579 : memref<1x!tpu.dma_semaphore, #tpu.memory_space<semaphore_mem>> -> memref<!tpu.dma_semaphore, #tpu.memory_space<semaphore_mem>>
      tpu.enqueue_dma source(%576 : memref<128xf32, #tpu.memory_space<any>>) target(%578 : memref<128xf32, #tpu.memory_space<vmem>>) target_semaphore(%580 : memref<!tpu.dma_semaphore, #tpu.memory_space<semaphore_mem>>)
      %c5_i32_246 = arith.constant 5 : i32
      %581 = arith.muli %562, %c5_i32_246 : i32
      %c0_i32_247 = arith.constant 0 : i32
      %582 = arith.addi %581, %c0_i32_247 : i32
      %583 = arith.index_cast %582 : i32 to index
      %584 = memref.load %arg3[%583] : memref<120xi32, #tpu.memory_space<smem>>
      %c16_i32_248 = arith.constant 16 : i32
      %585 = arith.addi %c16_i32_248, %561 : i32
      %c0_i32_249 = arith.constant 0 : i32
      %586 = tpu.memref_slice %arg5[%584, %c0_i32_249] : memref<64x128xf32, #tpu.memory_space<any>> -> memref<1x128xf32, #tpu.memory_space<any>>
      %587 = tpu.memref_squeeze %586 : memref<1x128xf32, #tpu.memory_space<any>> -> memref<128xf32, #tpu.memory_space<any>>
      %c0_i32_250 = arith.constant 0 : i32
      %588 = tpu.memref_slice %arg7[%585, %c0_i32_250] : memref<112x128xf32, #tpu.memory_space<vmem>> -> memref<1x128xf32, #tpu.memory_space<vmem>>
      %589 = tpu.memref_squeeze %588 : memref<1x128xf32, #tpu.memory_space<vmem>> -> memref<128xf32, #tpu.memory_space<vmem>>
      %590 = tpu.memref_slice %arg8[%c0_i32_40] : memref<2x!tpu.dma_semaphore, #tpu.memory_space<semaphore_mem>> -> memref<1x!tpu.dma_semaphore, #tpu.memory_space<semaphore_mem>>
      %591 = tpu.memref_squeeze %590 : memref<1x!tpu.dma_semaphore, #tpu.memory_space<semaphore_mem>> -> memref<!tpu.dma_semaphore, #tpu.memory_space<semaphore_mem>>
      tpu.enqueue_dma source(%587 : memref<128xf32, #tpu.memory_space<any>>) target(%589 : memref<128xf32, #tpu.memory_space<vmem>>) target_semaphore(%591 : memref<!tpu.dma_semaphore, #tpu.memory_space<semaphore_mem>>)
      %c5_i32_251 = arith.constant 5 : i32
      %592 = arith.muli %562, %c5_i32_251 : i32
      %c1_i32_252 = arith.constant 1 : i32
      %593 = arith.addi %592, %c1_i32_252 : i32
      %594 = arith.index_cast %593 : i32 to index
      %595 = memref.load %arg3[%594] : memref<120xi32, #tpu.memory_space<smem>>
      %c24_i32_253 = arith.constant 24 : i32
      %596 = arith.addi %c24_i32_253, %561 : i32
      %c0_i32_254 = arith.constant 0 : i32
      %597 = tpu.memref_slice %arg5[%595, %c0_i32_254] : memref<64x128xf32, #tpu.memory_space<any>> -> memref<1x128xf32, #tpu.memory_space<any>>
      %598 = tpu.memref_squeeze %597 : memref<1x128xf32, #tpu.memory_space<any>> -> memref<128xf32, #tpu.memory_space<any>>
      %c0_i32_255 = arith.constant 0 : i32
      %599 = tpu.memref_slice %arg7[%596, %c0_i32_255] : memref<112x128xf32, #tpu.memory_space<vmem>> -> memref<1x128xf32, #tpu.memory_space<vmem>>
      %600 = tpu.memref_squeeze %599 : memref<1x128xf32, #tpu.memory_space<vmem>> -> memref<128xf32, #tpu.memory_space<vmem>>
      %601 = tpu.memref_slice %arg8[%c0_i32_40] : memref<2x!tpu.dma_semaphore, #tpu.memory_space<semaphore_mem>> -> memref<1x!tpu.dma_semaphore, #tpu.memory_space<semaphore_mem>>
      %602 = tpu.memref_squeeze %601 : memref<1x!tpu.dma_semaphore, #tpu.memory_space<semaphore_mem>> -> memref<!tpu.dma_semaphore, #tpu.memory_space<semaphore_mem>>
      tpu.enqueue_dma source(%598 : memref<128xf32, #tpu.memory_space<any>>) target(%600 : memref<128xf32, #tpu.memory_space<vmem>>) target_semaphore(%602 : memref<!tpu.dma_semaphore, #tpu.memory_space<semaphore_mem>>)
      %c5_i32_256 = arith.constant 5 : i32
      %603 = arith.muli %562, %c5_i32_256 : i32
      %c2_i32_257 = arith.constant 2 : i32
      %604 = arith.addi %603, %c2_i32_257 : i32
      %605 = arith.index_cast %604 : i32 to index
      %606 = memref.load %arg3[%605] : memref<120xi32, #tpu.memory_space<smem>>
      %c32_i32_258 = arith.constant 32 : i32
      %607 = arith.addi %c32_i32_258, %561 : i32
      %c0_i32_259 = arith.constant 0 : i32
      %608 = tpu.memref_slice %arg5[%606, %c0_i32_259] : memref<64x128xf32, #tpu.memory_space<any>> -> memref<1x128xf32, #tpu.memory_space<any>>
      %609 = tpu.memref_squeeze %608 : memref<1x128xf32, #tpu.memory_space<any>> -> memref<128xf32, #tpu.memory_space<any>>
      %c0_i32_260 = arith.constant 0 : i32
      %610 = tpu.memref_slice %arg7[%607, %c0_i32_260] : memref<112x128xf32, #tpu.memory_space<vmem>> -> memref<1x128xf32, #tpu.memory_space<vmem>>
      %611 = tpu.memref_squeeze %610 : memref<1x128xf32, #tpu.memory_space<vmem>> -> memref<128xf32, #tpu.memory_space<vmem>>
      %612 = tpu.memref_slice %arg8[%c0_i32_40] : memref<2x!tpu.dma_semaphore, #tpu.memory_space<semaphore_mem>> -> memref<1x!tpu.dma_semaphore, #tpu.memory_space<semaphore_mem>>
      %613 = tpu.memref_squeeze %612 : memref<1x!tpu.dma_semaphore, #tpu.memory_space<semaphore_mem>> -> memref<!tpu.dma_semaphore, #tpu.memory_space<semaphore_mem>>
      tpu.enqueue_dma source(%609 : memref<128xf32, #tpu.memory_space<any>>) target(%611 : memref<128xf32, #tpu.memory_space<vmem>>) target_semaphore(%613 : memref<!tpu.dma_semaphore, #tpu.memory_space<semaphore_mem>>)
      %c5_i32_261 = arith.constant 5 : i32
      %614 = arith.muli %562, %c5_i32_261 : i32
      %c3_i32_262 = arith.constant 3 : i32
      %615 = arith.addi %614, %c3_i32_262 : i32
      %616 = arith.index_cast %615 : i32 to index
      %617 = memref.load %arg3[%616] : memref<120xi32, #tpu.memory_space<smem>>
      %c40_i32_263 = arith.constant 40 : i32
      %618 = arith.addi %c40_i32_263, %561 : i32
      %c0_i32_264 = arith.constant 0 : i32
      %619 = tpu.memref_slice %arg5[%617, %c0_i32_264] : memref<64x128xf32, #tpu.memory_space<any>> -> memref<1x128xf32, #tpu.memory_space<any>>
      %620 = tpu.memref_squeeze %619 : memref<1x128xf32, #tpu.memory_space<any>> -> memref<128xf32, #tpu.memory_space<any>>
      %c0_i32_265 = arith.constant 0 : i32
      %621 = tpu.memref_slice %arg7[%618, %c0_i32_265] : memref<112x128xf32, #tpu.memory_space<vmem>> -> memref<1x128xf32, #tpu.memory_space<vmem>>
      %622 = tpu.memref_squeeze %621 : memref<1x128xf32, #tpu.memory_space<vmem>> -> memref<128xf32, #tpu.memory_space<vmem>>
      %623 = tpu.memref_slice %arg8[%c0_i32_40] : memref<2x!tpu.dma_semaphore, #tpu.memory_space<semaphore_mem>> -> memref<1x!tpu.dma_semaphore, #tpu.memory_space<semaphore_mem>>
      %624 = tpu.memref_squeeze %623 : memref<1x!tpu.dma_semaphore, #tpu.memory_space<semaphore_mem>> -> memref<!tpu.dma_semaphore, #tpu.memory_space<semaphore_mem>>
      tpu.enqueue_dma source(%620 : memref<128xf32, #tpu.memory_space<any>>) target(%622 : memref<128xf32, #tpu.memory_space<vmem>>) target_semaphore(%624 : memref<!tpu.dma_semaphore, #tpu.memory_space<semaphore_mem>>)
      %c5_i32_266 = arith.constant 5 : i32
      %625 = arith.muli %562, %c5_i32_266 : i32
      %c4_i32_267 = arith.constant 4 : i32
      %626 = arith.addi %625, %c4_i32_267 : i32
      %627 = arith.index_cast %626 : i32 to index
      %628 = memref.load %arg3[%627] : memref<120xi32, #tpu.memory_space<smem>>
      %c48_i32_268 = arith.constant 48 : i32
      %629 = arith.addi %c48_i32_268, %561 : i32
      %c0_i32_269 = arith.constant 0 : i32
      %630 = tpu.memref_slice %arg5[%628, %c0_i32_269] : memref<64x128xf32, #tpu.memory_space<any>> -> memref<1x128xf32, #tpu.memory_space<any>>
      %631 = tpu.memref_squeeze %630 : memref<1x128xf32, #tpu.memory_space<any>> -> memref<128xf32, #tpu.memory_space<any>>
      %c0_i32_270 = arith.constant 0 : i32
      %632 = tpu.memref_slice %arg7[%629, %c0_i32_270] : memref<112x128xf32, #tpu.memory_space<vmem>> -> memref<1x128xf32, #tpu.memory_space<vmem>>
      %633 = tpu.memref_squeeze %632 : memref<1x128xf32, #tpu.memory_space<vmem>> -> memref<128xf32, #tpu.memory_space<vmem>>
      %634 = tpu.memref_slice %arg8[%c0_i32_40] : memref<2x!tpu.dma_semaphore, #tpu.memory_space<semaphore_mem>> -> memref<1x!tpu.dma_semaphore, #tpu.memory_space<semaphore_mem>>
      %635 = tpu.memref_squeeze %634 : memref<1x!tpu.dma_semaphore, #tpu.memory_space<semaphore_mem>> -> memref<!tpu.dma_semaphore, #tpu.memory_space<semaphore_mem>>
      tpu.enqueue_dma source(%631 : memref<128xf32, #tpu.memory_space<any>>) target(%633 : memref<128xf32, #tpu.memory_space<vmem>>) target_semaphore(%635 : memref<!tpu.dma_semaphore, #tpu.memory_space<semaphore_mem>>)
      %c7_i32 = arith.constant 7 : i32
      %636 = arith.addi %110, %c7_i32 : i32
      %c0_i32_271 = arith.constant 0 : i32
      %637 = arith.addi %c0_i32_271, %636 : i32
      %638 = arith.index_cast %637 : i32 to index
      %639 = memref.load %arg1[%638] : memref<24xi32, #tpu.memory_space<smem>>
      %c0_i32_272 = arith.constant 0 : i32
      %640 = arith.addi %c0_i32_272, %636 : i32
      %c0_i32_273 = arith.constant 0 : i32
      %641 = tpu.memref_slice %arg4[%639, %c0_i32_273] : memref<64x128xf32, #tpu.memory_space<any>> -> memref<1x128xf32, #tpu.memory_space<any>>
      %642 = tpu.memref_squeeze %641 : memref<1x128xf32, #tpu.memory_space<any>> -> memref<128xf32, #tpu.memory_space<any>>
      %c0_i32_274 = arith.constant 0 : i32
      %643 = tpu.memref_slice %arg7[%640, %c0_i32_274] : memref<112x128xf32, #tpu.memory_space<vmem>> -> memref<1x128xf32, #tpu.memory_space<vmem>>
      %644 = tpu.memref_squeeze %643 : memref<1x128xf32, #tpu.memory_space<vmem>> -> memref<128xf32, #tpu.memory_space<vmem>>
      %645 = tpu.memref_slice %arg8[%c0_i32_40] : memref<2x!tpu.dma_semaphore, #tpu.memory_space<semaphore_mem>> -> memref<1x!tpu.dma_semaphore, #tpu.memory_space<semaphore_mem>>
      %646 = tpu.memref_squeeze %645 : memref<1x!tpu.dma_semaphore, #tpu.memory_space<semaphore_mem>> -> memref<!tpu.dma_semaphore, #tpu.memory_space<semaphore_mem>>
      tpu.enqueue_dma source(%642 : memref<128xf32, #tpu.memory_space<any>>) target(%644 : memref<128xf32, #tpu.memory_space<vmem>>) target_semaphore(%646 : memref<!tpu.dma_semaphore, #tpu.memory_space<semaphore_mem>>)
      %647 = arith.index_cast %637 : i32 to index
      %648 = memref.load %arg2[%647] : memref<24xi32, #tpu.memory_space<smem>>
      %c8_i32_275 = arith.constant 8 : i32
      %649 = arith.addi %c8_i32_275, %636 : i32
      %c0_i32_276 = arith.constant 0 : i32
      %650 = tpu.memref_slice %arg5[%648, %c0_i32_276] : memref<64x128xf32, #tpu.memory_space<any>> -> memref<1x128xf32, #tpu.memory_space<any>>
      %651 = tpu.memref_squeeze %650 : memref<1x128xf32, #tpu.memory_space<any>> -> memref<128xf32, #tpu.memory_space<any>>
      %c0_i32_277 = arith.constant 0 : i32
      %652 = tpu.memref_slice %arg7[%649, %c0_i32_277] : memref<112x128xf32, #tpu.memory_space<vmem>> -> memref<1x128xf32, #tpu.memory_space<vmem>>
      %653 = tpu.memref_squeeze %652 : memref<1x128xf32, #tpu.memory_space<vmem>> -> memref<128xf32, #tpu.memory_space<vmem>>
      %654 = tpu.memref_slice %arg8[%c0_i32_40] : memref<2x!tpu.dma_semaphore, #tpu.memory_space<semaphore_mem>> -> memref<1x!tpu.dma_semaphore, #tpu.memory_space<semaphore_mem>>
      %655 = tpu.memref_squeeze %654 : memref<1x!tpu.dma_semaphore, #tpu.memory_space<semaphore_mem>> -> memref<!tpu.dma_semaphore, #tpu.memory_space<semaphore_mem>>
      tpu.enqueue_dma source(%651 : memref<128xf32, #tpu.memory_space<any>>) target(%653 : memref<128xf32, #tpu.memory_space<vmem>>) target_semaphore(%655 : memref<!tpu.dma_semaphore, #tpu.memory_space<semaphore_mem>>)
      %c5_i32_278 = arith.constant 5 : i32
      %656 = arith.muli %637, %c5_i32_278 : i32
      %c0_i32_279 = arith.constant 0 : i32
      %657 = arith.addi %656, %c0_i32_279 : i32
      %658 = arith.index_cast %657 : i32 to index
      %659 = memref.load %arg3[%658] : memref<120xi32, #tpu.memory_space<smem>>
      %c16_i32_280 = arith.constant 16 : i32
      %660 = arith.addi %c16_i32_280, %636 : i32
      %c0_i32_281 = arith.constant 0 : i32
      %661 = tpu.memref_slice %arg5[%659, %c0_i32_281] : memref<64x128xf32, #tpu.memory_space<any>> -> memref<1x128xf32, #tpu.memory_space<any>>
      %662 = tpu.memref_squeeze %661 : memref<1x128xf32, #tpu.memory_space<any>> -> memref<128xf32, #tpu.memory_space<any>>
      %c0_i32_282 = arith.constant 0 : i32
      %663 = tpu.memref_slice %arg7[%660, %c0_i32_282] : memref<112x128xf32, #tpu.memory_space<vmem>> -> memref<1x128xf32, #tpu.memory_space<vmem>>
      %664 = tpu.memref_squeeze %663 : memref<1x128xf32, #tpu.memory_space<vmem>> -> memref<128xf32, #tpu.memory_space<vmem>>
      %665 = tpu.memref_slice %arg8[%c0_i32_40] : memref<2x!tpu.dma_semaphore, #tpu.memory_space<semaphore_mem>> -> memref<1x!tpu.dma_semaphore, #tpu.memory_space<semaphore_mem>>
      %666 = tpu.memref_squeeze %665 : memref<1x!tpu.dma_semaphore, #tpu.memory_space<semaphore_mem>> -> memref<!tpu.dma_semaphore, #tpu.memory_space<semaphore_mem>>
      tpu.enqueue_dma source(%662 : memref<128xf32, #tpu.memory_space<any>>) target(%664 : memref<128xf32, #tpu.memory_space<vmem>>) target_semaphore(%666 : memref<!tpu.dma_semaphore, #tpu.memory_space<semaphore_mem>>)
      %c5_i32_283 = arith.constant 5 : i32
      %667 = arith.muli %637, %c5_i32_283 : i32
      %c1_i32_284 = arith.constant 1 : i32
      %668 = arith.addi %667, %c1_i32_284 : i32
      %669 = arith.index_cast %668 : i32 to index
      %670 = memref.load %arg3[%669] : memref<120xi32, #tpu.memory_space<smem>>
      %c24_i32_285 = arith.constant 24 : i32
      %671 = arith.addi %c24_i32_285, %636 : i32
      %c0_i32_286 = arith.constant 0 : i32
      %672 = tpu.memref_slice %arg5[%670, %c0_i32_286] : memref<64x128xf32, #tpu.memory_space<any>> -> memref<1x128xf32, #tpu.memory_space<any>>
      %673 = tpu.memref_squeeze %672 : memref<1x128xf32, #tpu.memory_space<any>> -> memref<128xf32, #tpu.memory_space<any>>
      %c0_i32_287 = arith.constant 0 : i32
      %674 = tpu.memref_slice %arg7[%671, %c0_i32_287] : memref<112x128xf32, #tpu.memory_space<vmem>> -> memref<1x128xf32, #tpu.memory_space<vmem>>
      %675 = tpu.memref_squeeze %674 : memref<1x128xf32, #tpu.memory_space<vmem>> -> memref<128xf32, #tpu.memory_space<vmem>>
      %676 = tpu.memref_slice %arg8[%c0_i32_40] : memref<2x!tpu.dma_semaphore, #tpu.memory_space<semaphore_mem>> -> memref<1x!tpu.dma_semaphore, #tpu.memory_space<semaphore_mem>>
      %677 = tpu.memref_squeeze %676 : memref<1x!tpu.dma_semaphore, #tpu.memory_space<semaphore_mem>> -> memref<!tpu.dma_semaphore, #tpu.memory_space<semaphore_mem>>
      tpu.enqueue_dma source(%673 : memref<128xf32, #tpu.memory_space<any>>) target(%675 : memref<128xf32, #tpu.memory_space<vmem>>) target_semaphore(%677 : memref<!tpu.dma_semaphore, #tpu.memory_space<semaphore_mem>>)
      %c5_i32_288 = arith.constant 5 : i32
      %678 = arith.muli %637, %c5_i32_288 : i32
      %c2_i32_289 = arith.constant 2 : i32
      %679 = arith.addi %678, %c2_i32_289 : i32
      %680 = arith.index_cast %679 : i32 to index
      %681 = memref.load %arg3[%680] : memref<120xi32, #tpu.memory_space<smem>>
      %c32_i32_290 = arith.constant 32 : i32
      %682 = arith.addi %c32_i32_290, %636 : i32
      %c0_i32_291 = arith.constant 0 : i32
      %683 = tpu.memref_slice %arg5[%681, %c0_i32_291] : memref<64x128xf32, #tpu.memory_space<any>> -> memref<1x128xf32, #tpu.memory_space<any>>
      %684 = tpu.memref_squeeze %683 : memref<1x128xf32, #tpu.memory_space<any>> -> memref<128xf32, #tpu.memory_space<any>>
      %c0_i32_292 = arith.constant 0 : i32
      %685 = tpu.memref_slice %arg7[%682, %c0_i32_292] : memref<112x128xf32, #tpu.memory_space<vmem>> -> memref<1x128xf32, #tpu.memory_space<vmem>>
      %686 = tpu.memref_squeeze %685 : memref<1x128xf32, #tpu.memory_space<vmem>> -> memref<128xf32, #tpu.memory_space<vmem>>
      %687 = tpu.memref_slice %arg8[%c0_i32_40] : memref<2x!tpu.dma_semaphore, #tpu.memory_space<semaphore_mem>> -> memref<1x!tpu.dma_semaphore, #tpu.memory_space<semaphore_mem>>
      %688 = tpu.memref_squeeze %687 : memref<1x!tpu.dma_semaphore, #tpu.memory_space<semaphore_mem>> -> memref<!tpu.dma_semaphore, #tpu.memory_space<semaphore_mem>>
      tpu.enqueue_dma source(%684 : memref<128xf32, #tpu.memory_space<any>>) target(%686 : memref<128xf32, #tpu.memory_space<vmem>>) target_semaphore(%688 : memref<!tpu.dma_semaphore, #tpu.memory_space<semaphore_mem>>)
      %c5_i32_293 = arith.constant 5 : i32
      %689 = arith.muli %637, %c5_i32_293 : i32
      %c3_i32_294 = arith.constant 3 : i32
      %690 = arith.addi %689, %c3_i32_294 : i32
      %691 = arith.index_cast %690 : i32 to index
      %692 = memref.load %arg3[%691] : memref<120xi32, #tpu.memory_space<smem>>
      %c40_i32_295 = arith.constant 40 : i32
      %693 = arith.addi %c40_i32_295, %636 : i32
      %c0_i32_296 = arith.constant 0 : i32
      %694 = tpu.memref_slice %arg5[%692, %c0_i32_296] : memref<64x128xf32, #tpu.memory_space<any>> -> memref<1x128xf32, #tpu.memory_space<any>>
      %695 = tpu.memref_squeeze %694 : memref<1x128xf32, #tpu.memory_space<any>> -> memref<128xf32, #tpu.memory_space<any>>
      %c0_i32_297 = arith.constant 0 : i32
      %696 = tpu.memref_slice %arg7[%693, %c0_i32_297] : memref<112x128xf32, #tpu.memory_space<vmem>> -> memref<1x128xf32, #tpu.memory_space<vmem>>
      %697 = tpu.memref_squeeze %696 : memref<1x128xf32, #tpu.memory_space<vmem>> -> memref<128xf32, #tpu.memory_space<vmem>>
      %698 = tpu.memref_slice %arg8[%c0_i32_40] : memref<2x!tpu.dma_semaphore, #tpu.memory_space<semaphore_mem>> -> memref<1x!tpu.dma_semaphore, #tpu.memory_space<semaphore_mem>>
      %699 = tpu.memref_squeeze %698 : memref<1x!tpu.dma_semaphore, #tpu.memory_space<semaphore_mem>> -> memref<!tpu.dma_semaphore, #tpu.memory_space<semaphore_mem>>
      tpu.enqueue_dma source(%695 : memref<128xf32, #tpu.memory_space<any>>) target(%697 : memref<128xf32, #tpu.memory_space<vmem>>) target_semaphore(%699 : memref<!tpu.dma_semaphore, #tpu.memory_space<semaphore_mem>>)
      %c5_i32_298 = arith.constant 5 : i32
      %700 = arith.muli %637, %c5_i32_298 : i32
      %c4_i32_299 = arith.constant 4 : i32
      %701 = arith.addi %700, %c4_i32_299 : i32
      %702 = arith.index_cast %701 : i32 to index
      %703 = memref.load %arg3[%702] : memref<120xi32, #tpu.memory_space<smem>>
      %c48_i32_300 = arith.constant 48 : i32
      %704 = arith.addi %c48_i32_300, %636 : i32
      %c0_i32_301 = arith.constant 0 : i32
      %705 = tpu.memref_slice %arg5[%703, %c0_i32_301] : memref<64x128xf32, #tpu.memory_space<any>> -> memref<1x128xf32, #tpu.memory_space<any>>
      %706 = tpu.memref_squeeze %705 : memref<1x128xf32, #tpu.memory_space<any>> -> memref<128xf32, #tpu.memory_space<any>>
      %c0_i32_302 = arith.constant 0 : i32
      %707 = tpu.memref_slice %arg7[%704, %c0_i32_302] : memref<112x128xf32, #tpu.memory_space<vmem>> -> memref<1x128xf32, #tpu.memory_space<vmem>>
      %708 = tpu.memref_squeeze %707 : memref<1x128xf32, #tpu.memory_space<vmem>> -> memref<128xf32, #tpu.memory_space<vmem>>
      %709 = tpu.memref_slice %arg8[%c0_i32_40] : memref<2x!tpu.dma_semaphore, #tpu.memory_space<semaphore_mem>> -> memref<1x!tpu.dma_semaphore, #tpu.memory_space<semaphore_mem>>
      %710 = tpu.memref_squeeze %709 : memref<1x!tpu.dma_semaphore, #tpu.memory_space<semaphore_mem>> -> memref<!tpu.dma_semaphore, #tpu.memory_space<semaphore_mem>>
      tpu.enqueue_dma source(%706 : memref<128xf32, #tpu.memory_space<any>>) target(%708 : memref<128xf32, #tpu.memory_space<vmem>>) target_semaphore(%710 : memref<!tpu.dma_semaphore, #tpu.memory_space<semaphore_mem>>)
      %c1_i32_303 = arith.constant 1 : i32
    } else {
    }
    %c1_i32_5 = arith.constant 1 : i32
    %13 = arith.addi %arg0, %c1_i32_5 : i32
    %c3_i32 = arith.constant 3 : i32
    %14 = arith.cmpi slt, %13, %c3_i32 : i32
    %15 = arith.extui %14 : i1 to i32
    %c0_i32_6 = arith.constant 0 : i32
    %16 = arith.cmpi ne, %15, %c0_i32_6 : i32
    scf.if %16 {
      %c1_i32_37 = arith.constant 1 : i32
      %108 = arith.addi %arg0, %c1_i32_37 : i32
      %c1_i32_38 = arith.constant 1 : i32
      %109 = arith.subi %c1_i32_38, %9 : i32
      %c8_i32_39 = arith.constant 8 : i32
      %110 = arith.muli %108, %c8_i32_39 : i32
      %c56_i32_40 = arith.constant 56 : i32
      %111 = arith.muli %109, %c56_i32_40 : i32
      %c0_i32_41 = arith.constant 0 : i32
      %c8_i32_42 = arith.constant 8 : i32
      %112 = arith.muli %c0_i32_41, %c8_i32_42 : i32
      %c0_i32_43 = arith.constant 0 : i32
      %113 = arith.addi %112, %c0_i32_43 : i32
      %114 = arith.addi %110, %113 : i32
      %115 = arith.index_cast %114 : i32 to index
      %116 = memref.load %arg1[%115] : memref<24xi32, #tpu.memory_space<smem>>
      %117 = arith.addi %111, %113 : i32
      %c0_i32_44 = arith.constant 0 : i32
      %118 = tpu.memref_slice %arg4[%116, %c0_i32_44] : memref<64x128xf32, #tpu.memory_space<any>> -> memref<1x128xf32, #tpu.memory_space<any>>
      %119 = tpu.memref_squeeze %118 : memref<1x128xf32, #tpu.memory_space<any>> -> memref<128xf32, #tpu.memory_space<any>>
      %c0_i32_45 = arith.constant 0 : i32
      %120 = tpu.memref_slice %arg7[%117, %c0_i32_45] : memref<112x128xf32, #tpu.memory_space<vmem>> -> memref<1x128xf32, #tpu.memory_space<vmem>>
      %121 = tpu.memref_squeeze %120 : memref<1x128xf32, #tpu.memory_space<vmem>> -> memref<128xf32, #tpu.memory_space<vmem>>
      %122 = tpu.memref_slice %arg8[%109] : memref<2x!tpu.dma_semaphore, #tpu.memory_space<semaphore_mem>> -> memref<1x!tpu.dma_semaphore, #tpu.memory_space<semaphore_mem>>
      %123 = tpu.memref_squeeze %122 : memref<1x!tpu.dma_semaphore, #tpu.memory_space<semaphore_mem>> -> memref<!tpu.dma_semaphore, #tpu.memory_space<semaphore_mem>>
      tpu.enqueue_dma source(%119 : memref<128xf32, #tpu.memory_space<any>>) target(%121 : memref<128xf32, #tpu.memory_space<vmem>>) target_semaphore(%123 : memref<!tpu.dma_semaphore, #tpu.memory_space<semaphore_mem>>)
      %124 = arith.index_cast %114 : i32 to index
      %125 = memref.load %arg2[%124] : memref<24xi32, #tpu.memory_space<smem>>
      %c8_i32_46 = arith.constant 8 : i32
      %126 = arith.addi %111, %c8_i32_46 : i32
      %127 = arith.addi %126, %113 : i32
      %c0_i32_47 = arith.constant 0 : i32
      %128 = tpu.memref_slice %arg5[%125, %c0_i32_47] : memref<64x128xf32, #tpu.memory_space<any>> -> memref<1x128xf32, #tpu.memory_space<any>>
      %129 = tpu.memref_squeeze %128 : memref<1x128xf32, #tpu.memory_space<any>> -> memref<128xf32, #tpu.memory_space<any>>
      %c0_i32_48 = arith.constant 0 : i32
      %130 = tpu.memref_slice %arg7[%127, %c0_i32_48] : memref<112x128xf32, #tpu.memory_space<vmem>> -> memref<1x128xf32, #tpu.memory_space<vmem>>
      %131 = tpu.memref_squeeze %130 : memref<1x128xf32, #tpu.memory_space<vmem>> -> memref<128xf32, #tpu.memory_space<vmem>>
      %132 = tpu.memref_slice %arg8[%109] : memref<2x!tpu.dma_semaphore, #tpu.memory_space<semaphore_mem>> -> memref<1x!tpu.dma_semaphore, #tpu.memory_space<semaphore_mem>>
      %133 = tpu.memref_squeeze %132 : memref<1x!tpu.dma_semaphore, #tpu.memory_space<semaphore_mem>> -> memref<!tpu.dma_semaphore, #tpu.memory_space<semaphore_mem>>
      tpu.enqueue_dma source(%129 : memref<128xf32, #tpu.memory_space<any>>) target(%131 : memref<128xf32, #tpu.memory_space<vmem>>) target_semaphore(%133 : memref<!tpu.dma_semaphore, #tpu.memory_space<semaphore_mem>>)
      %c5_i32 = arith.constant 5 : i32
      %134 = arith.muli %114, %c5_i32 : i32
      %c0_i32_49 = arith.constant 0 : i32
      %135 = arith.addi %134, %c0_i32_49 : i32
      %136 = arith.index_cast %135 : i32 to index
      %137 = memref.load %arg3[%136] : memref<120xi32, #tpu.memory_space<smem>>
      %c16_i32_50 = arith.constant 16 : i32
      %138 = arith.addi %111, %c16_i32_50 : i32
      %139 = arith.addi %138, %113 : i32
      %c0_i32_51 = arith.constant 0 : i32
      %140 = tpu.memref_slice %arg5[%137, %c0_i32_51] : memref<64x128xf32, #tpu.memory_space<any>> -> memref<1x128xf32, #tpu.memory_space<any>>
      %141 = tpu.memref_squeeze %140 : memref<1x128xf32, #tpu.memory_space<any>> -> memref<128xf32, #tpu.memory_space<any>>
      %c0_i32_52 = arith.constant 0 : i32
      %142 = tpu.memref_slice %arg7[%139, %c0_i32_52] : memref<112x128xf32, #tpu.memory_space<vmem>> -> memref<1x128xf32, #tpu.memory_space<vmem>>
      %143 = tpu.memref_squeeze %142 : memref<1x128xf32, #tpu.memory_space<vmem>> -> memref<128xf32, #tpu.memory_space<vmem>>
      %144 = tpu.memref_slice %arg8[%109] : memref<2x!tpu.dma_semaphore, #tpu.memory_space<semaphore_mem>> -> memref<1x!tpu.dma_semaphore, #tpu.memory_space<semaphore_mem>>
      %145 = tpu.memref_squeeze %144 : memref<1x!tpu.dma_semaphore, #tpu.memory_space<semaphore_mem>> -> memref<!tpu.dma_semaphore, #tpu.memory_space<semaphore_mem>>
      tpu.enqueue_dma source(%141 : memref<128xf32, #tpu.memory_space<any>>) target(%143 : memref<128xf32, #tpu.memory_space<vmem>>) target_semaphore(%145 : memref<!tpu.dma_semaphore, #tpu.memory_space<semaphore_mem>>)
      %c5_i32_53 = arith.constant 5 : i32
      %146 = arith.muli %114, %c5_i32_53 : i32
      %c1_i32_54 = arith.constant 1 : i32
      %147 = arith.addi %146, %c1_i32_54 : i32
      %148 = arith.index_cast %147 : i32 to index
      %149 = memref.load %arg3[%148] : memref<120xi32, #tpu.memory_space<smem>>
      %c24_i32_55 = arith.constant 24 : i32
      %150 = arith.addi %111, %c24_i32_55 : i32
      %151 = arith.addi %150, %113 : i32
      %c0_i32_56 = arith.constant 0 : i32
      %152 = tpu.memref_slice %arg5[%149, %c0_i32_56] : memref<64x128xf32, #tpu.memory_space<any>> -> memref<1x128xf32, #tpu.memory_space<any>>
      %153 = tpu.memref_squeeze %152 : memref<1x128xf32, #tpu.memory_space<any>> -> memref<128xf32, #tpu.memory_space<any>>
      %c0_i32_57 = arith.constant 0 : i32
      %154 = tpu.memref_slice %arg7[%151, %c0_i32_57] : memref<112x128xf32, #tpu.memory_space<vmem>> -> memref<1x128xf32, #tpu.memory_space<vmem>>
      %155 = tpu.memref_squeeze %154 : memref<1x128xf32, #tpu.memory_space<vmem>> -> memref<128xf32, #tpu.memory_space<vmem>>
      %156 = tpu.memref_slice %arg8[%109] : memref<2x!tpu.dma_semaphore, #tpu.memory_space<semaphore_mem>> -> memref<1x!tpu.dma_semaphore, #tpu.memory_space<semaphore_mem>>
      %157 = tpu.memref_squeeze %156 : memref<1x!tpu.dma_semaphore, #tpu.memory_space<semaphore_mem>> -> memref<!tpu.dma_semaphore, #tpu.memory_space<semaphore_mem>>
      tpu.enqueue_dma source(%153 : memref<128xf32, #tpu.memory_space<any>>) target(%155 : memref<128xf32, #tpu.memory_space<vmem>>) target_semaphore(%157 : memref<!tpu.dma_semaphore, #tpu.memory_space<semaphore_mem>>)
      %c5_i32_58 = arith.constant 5 : i32
      %158 = arith.muli %114, %c5_i32_58 : i32
      %c2_i32_59 = arith.constant 2 : i32
      %159 = arith.addi %158, %c2_i32_59 : i32
      %160 = arith.index_cast %159 : i32 to index
      %161 = memref.load %arg3[%160] : memref<120xi32, #tpu.memory_space<smem>>
      %c32_i32_60 = arith.constant 32 : i32
      %162 = arith.addi %111, %c32_i32_60 : i32
      %163 = arith.addi %162, %113 : i32
      %c0_i32_61 = arith.constant 0 : i32
      %164 = tpu.memref_slice %arg5[%161, %c0_i32_61] : memref<64x128xf32, #tpu.memory_space<any>> -> memref<1x128xf32, #tpu.memory_space<any>>
      %165 = tpu.memref_squeeze %164 : memref<1x128xf32, #tpu.memory_space<any>> -> memref<128xf32, #tpu.memory_space<any>>
      %c0_i32_62 = arith.constant 0 : i32
      %166 = tpu.memref_slice %arg7[%163, %c0_i32_62] : memref<112x128xf32, #tpu.memory_space<vmem>> -> memref<1x128xf32, #tpu.memory_space<vmem>>
      %167 = tpu.memref_squeeze %166 : memref<1x128xf32, #tpu.memory_space<vmem>> -> memref<128xf32, #tpu.memory_space<vmem>>
      %168 = tpu.memref_slice %arg8[%109] : memref<2x!tpu.dma_semaphore, #tpu.memory_space<semaphore_mem>> -> memref<1x!tpu.dma_semaphore, #tpu.memory_space<semaphore_mem>>
      %169 = tpu.memref_squeeze %168 : memref<1x!tpu.dma_semaphore, #tpu.memory_space<semaphore_mem>> -> memref<!tpu.dma_semaphore, #tpu.memory_space<semaphore_mem>>
      tpu.enqueue_dma source(%165 : memref<128xf32, #tpu.memory_space<any>>) target(%167 : memref<128xf32, #tpu.memory_space<vmem>>) target_semaphore(%169 : memref<!tpu.dma_semaphore, #tpu.memory_space<semaphore_mem>>)
      %c5_i32_63 = arith.constant 5 : i32
      %170 = arith.muli %114, %c5_i32_63 : i32
      %c3_i32_64 = arith.constant 3 : i32
      %171 = arith.addi %170, %c3_i32_64 : i32
      %172 = arith.index_cast %171 : i32 to index
      %173 = memref.load %arg3[%172] : memref<120xi32, #tpu.memory_space<smem>>
      %c40_i32_65 = arith.constant 40 : i32
      %174 = arith.addi %111, %c40_i32_65 : i32
      %175 = arith.addi %174, %113 : i32
      %c0_i32_66 = arith.constant 0 : i32
      %176 = tpu.memref_slice %arg5[%173, %c0_i32_66] : memref<64x128xf32, #tpu.memory_space<any>> -> memref<1x128xf32, #tpu.memory_space<any>>
      %177 = tpu.memref_squeeze %176 : memref<1x128xf32, #tpu.memory_space<any>> -> memref<128xf32, #tpu.memory_space<any>>
      %c0_i32_67 = arith.constant 0 : i32
      %178 = tpu.memref_slice %arg7[%175, %c0_i32_67] : memref<112x128xf32, #tpu.memory_space<vmem>> -> memref<1x128xf32, #tpu.memory_space<vmem>>
      %179 = tpu.memref_squeeze %178 : memref<1x128xf32, #tpu.memory_space<vmem>> -> memref<128xf32, #tpu.memory_space<vmem>>
      %180 = tpu.memref_slice %arg8[%109] : memref<2x!tpu.dma_semaphore, #tpu.memory_space<semaphore_mem>> -> memref<1x!tpu.dma_semaphore, #tpu.memory_space<semaphore_mem>>
      %181 = tpu.memref_squeeze %180 : memref<1x!tpu.dma_semaphore, #tpu.memory_space<semaphore_mem>> -> memref<!tpu.dma_semaphore, #tpu.memory_space<semaphore_mem>>
      tpu.enqueue_dma source(%177 : memref<128xf32, #tpu.memory_space<any>>) target(%179 : memref<128xf32, #tpu.memory_space<vmem>>) target_semaphore(%181 : memref<!tpu.dma_semaphore, #tpu.memory_space<semaphore_mem>>)
      %c5_i32_68 = arith.constant 5 : i32
      %182 = arith.muli %114, %c5_i32_68 : i32
      %c4_i32 = arith.constant 4 : i32
      %183 = arith.addi %182, %c4_i32 : i32
      %184 = arith.index_cast %183 : i32 to index
      %185 = memref.load %arg3[%184] : memref<120xi32, #tpu.memory_space<smem>>
      %c48_i32_69 = arith.constant 48 : i32
      %186 = arith.addi %111, %c48_i32_69 : i32
      %187 = arith.addi %186, %113 : i32
      %c0_i32_70 = arith.constant 0 : i32
      %188 = tpu.memref_slice %arg5[%185, %c0_i32_70] : memref<64x128xf32, #tpu.memory_space<any>> -> memref<1x128xf32, #tpu.memory_space<any>>
      %189 = tpu.memref_squeeze %188 : memref<1x128xf32, #tpu.memory_space<any>> -> memref<128xf32, #tpu.memory_space<any>>
      %c0_i32_71 = arith.constant 0 : i32
      %190 = tpu.memref_slice %arg7[%187, %c0_i32_71] : memref<112x128xf32, #tpu.memory_space<vmem>> -> memref<1x128xf32, #tpu.memory_space<vmem>>
      %191 = tpu.memref_squeeze %190 : memref<1x128xf32, #tpu.memory_space<vmem>> -> memref<128xf32, #tpu.memory_space<vmem>>
      %192 = tpu.memref_slice %arg8[%109] : memref<2x!tpu.dma_semaphore, #tpu.memory_space<semaphore_mem>> -> memref<1x!tpu.dma_semaphore, #tpu.memory_space<semaphore_mem>>
      %193 = tpu.memref_squeeze %192 : memref<1x!tpu.dma_semaphore, #tpu.memory_space<semaphore_mem>> -> memref<!tpu.dma_semaphore, #tpu.memory_space<semaphore_mem>>
      tpu.enqueue_dma source(%189 : memref<128xf32, #tpu.memory_space<any>>) target(%191 : memref<128xf32, #tpu.memory_space<vmem>>) target_semaphore(%193 : memref<!tpu.dma_semaphore, #tpu.memory_space<semaphore_mem>>)
      %c1_i32_72 = arith.constant 1 : i32
      %194 = arith.addi %112, %c1_i32_72 : i32
      %195 = arith.addi %110, %194 : i32
      %196 = arith.index_cast %195 : i32 to index
      %197 = memref.load %arg1[%196] : memref<24xi32, #tpu.memory_space<smem>>
      %198 = arith.addi %111, %194 : i32
      %c0_i32_73 = arith.constant 0 : i32
      %199 = tpu.memref_slice %arg4[%197, %c0_i32_73] : memref<64x128xf32, #tpu.memory_space<any>> -> memref<1x128xf32, #tpu.memory_space<any>>
      %200 = tpu.memref_squeeze %199 : memref<1x128xf32, #tpu.memory_space<any>> -> memref<128xf32, #tpu.memory_space<any>>
      %c0_i32_74 = arith.constant 0 : i32
      %201 = tpu.memref_slice %arg7[%198, %c0_i32_74] : memref<112x128xf32, #tpu.memory_space<vmem>> -> memref<1x128xf32, #tpu.memory_space<vmem>>
      %202 = tpu.memref_squeeze %201 : memref<1x128xf32, #tpu.memory_space<vmem>> -> memref<128xf32, #tpu.memory_space<vmem>>
      %203 = tpu.memref_slice %arg8[%109] : memref<2x!tpu.dma_semaphore, #tpu.memory_space<semaphore_mem>> -> memref<1x!tpu.dma_semaphore, #tpu.memory_space<semaphore_mem>>
      %204 = tpu.memref_squeeze %203 : memref<1x!tpu.dma_semaphore, #tpu.memory_space<semaphore_mem>> -> memref<!tpu.dma_semaphore, #tpu.memory_space<semaphore_mem>>
      tpu.enqueue_dma source(%200 : memref<128xf32, #tpu.memory_space<any>>) target(%202 : memref<128xf32, #tpu.memory_space<vmem>>) target_semaphore(%204 : memref<!tpu.dma_semaphore, #tpu.memory_space<semaphore_mem>>)
      %205 = arith.index_cast %195 : i32 to index
      %206 = memref.load %arg2[%205] : memref<24xi32, #tpu.memory_space<smem>>
      %c8_i32_75 = arith.constant 8 : i32
      %207 = arith.addi %111, %c8_i32_75 : i32
      %208 = arith.addi %207, %194 : i32
      %c0_i32_76 = arith.constant 0 : i32
      %209 = tpu.memref_slice %arg5[%206, %c0_i32_76] : memref<64x128xf32, #tpu.memory_space<any>> -> memref<1x128xf32, #tpu.memory_space<any>>
      %210 = tpu.memref_squeeze %209 : memref<1x128xf32, #tpu.memory_space<any>> -> memref<128xf32, #tpu.memory_space<any>>
      %c0_i32_77 = arith.constant 0 : i32
      %211 = tpu.memref_slice %arg7[%208, %c0_i32_77] : memref<112x128xf32, #tpu.memory_space<vmem>> -> memref<1x128xf32, #tpu.memory_space<vmem>>
      %212 = tpu.memref_squeeze %211 : memref<1x128xf32, #tpu.memory_space<vmem>> -> memref<128xf32, #tpu.memory_space<vmem>>
      %213 = tpu.memref_slice %arg8[%109] : memref<2x!tpu.dma_semaphore, #tpu.memory_space<semaphore_mem>> -> memref<1x!tpu.dma_semaphore, #tpu.memory_space<semaphore_mem>>
      %214 = tpu.memref_squeeze %213 : memref<1x!tpu.dma_semaphore, #tpu.memory_space<semaphore_mem>> -> memref<!tpu.dma_semaphore, #tpu.memory_space<semaphore_mem>>
      tpu.enqueue_dma source(%210 : memref<128xf32, #tpu.memory_space<any>>) target(%212 : memref<128xf32, #tpu.memory_space<vmem>>) target_semaphore(%214 : memref<!tpu.dma_semaphore, #tpu.memory_space<semaphore_mem>>)
      %c5_i32_78 = arith.constant 5 : i32
      %215 = arith.muli %195, %c5_i32_78 : i32
      %c0_i32_79 = arith.constant 0 : i32
      %216 = arith.addi %215, %c0_i32_79 : i32
      %217 = arith.index_cast %216 : i32 to index
      %218 = memref.load %arg3[%217] : memref<120xi32, #tpu.memory_space<smem>>
      %c16_i32_80 = arith.constant 16 : i32
      %219 = arith.addi %111, %c16_i32_80 : i32
      %220 = arith.addi %219, %194 : i32
      %c0_i32_81 = arith.constant 0 : i32
      %221 = tpu.memref_slice %arg5[%218, %c0_i32_81] : memref<64x128xf32, #tpu.memory_space<any>> -> memref<1x128xf32, #tpu.memory_space<any>>
      %222 = tpu.memref_squeeze %221 : memref<1x128xf32, #tpu.memory_space<any>> -> memref<128xf32, #tpu.memory_space<any>>
      %c0_i32_82 = arith.constant 0 : i32
      %223 = tpu.memref_slice %arg7[%220, %c0_i32_82] : memref<112x128xf32, #tpu.memory_space<vmem>> -> memref<1x128xf32, #tpu.memory_space<vmem>>
      %224 = tpu.memref_squeeze %223 : memref<1x128xf32, #tpu.memory_space<vmem>> -> memref<128xf32, #tpu.memory_space<vmem>>
      %225 = tpu.memref_slice %arg8[%109] : memref<2x!tpu.dma_semaphore, #tpu.memory_space<semaphore_mem>> -> memref<1x!tpu.dma_semaphore, #tpu.memory_space<semaphore_mem>>
      %226 = tpu.memref_squeeze %225 : memref<1x!tpu.dma_semaphore, #tpu.memory_space<semaphore_mem>> -> memref<!tpu.dma_semaphore, #tpu.memory_space<semaphore_mem>>
      tpu.enqueue_dma source(%222 : memref<128xf32, #tpu.memory_space<any>>) target(%224 : memref<128xf32, #tpu.memory_space<vmem>>) target_semaphore(%226 : memref<!tpu.dma_semaphore, #tpu.memory_space<semaphore_mem>>)
      %c5_i32_83 = arith.constant 5 : i32
      %227 = arith.muli %195, %c5_i32_83 : i32
      %c1_i32_84 = arith.constant 1 : i32
      %228 = arith.addi %227, %c1_i32_84 : i32
      %229 = arith.index_cast %228 : i32 to index
      %230 = memref.load %arg3[%229] : memref<120xi32, #tpu.memory_space<smem>>
      %c24_i32_85 = arith.constant 24 : i32
      %231 = arith.addi %111, %c24_i32_85 : i32
      %232 = arith.addi %231, %194 : i32
      %c0_i32_86 = arith.constant 0 : i32
      %233 = tpu.memref_slice %arg5[%230, %c0_i32_86] : memref<64x128xf32, #tpu.memory_space<any>> -> memref<1x128xf32, #tpu.memory_space<any>>
      %234 = tpu.memref_squeeze %233 : memref<1x128xf32, #tpu.memory_space<any>> -> memref<128xf32, #tpu.memory_space<any>>
      %c0_i32_87 = arith.constant 0 : i32
      %235 = tpu.memref_slice %arg7[%232, %c0_i32_87] : memref<112x128xf32, #tpu.memory_space<vmem>> -> memref<1x128xf32, #tpu.memory_space<vmem>>
      %236 = tpu.memref_squeeze %235 : memref<1x128xf32, #tpu.memory_space<vmem>> -> memref<128xf32, #tpu.memory_space<vmem>>
      %237 = tpu.memref_slice %arg8[%109] : memref<2x!tpu.dma_semaphore, #tpu.memory_space<semaphore_mem>> -> memref<1x!tpu.dma_semaphore, #tpu.memory_space<semaphore_mem>>
      %238 = tpu.memref_squeeze %237 : memref<1x!tpu.dma_semaphore, #tpu.memory_space<semaphore_mem>> -> memref<!tpu.dma_semaphore, #tpu.memory_space<semaphore_mem>>
      tpu.enqueue_dma source(%234 : memref<128xf32, #tpu.memory_space<any>>) target(%236 : memref<128xf32, #tpu.memory_space<vmem>>) target_semaphore(%238 : memref<!tpu.dma_semaphore, #tpu.memory_space<semaphore_mem>>)
      %c5_i32_88 = arith.constant 5 : i32
      %239 = arith.muli %195, %c5_i32_88 : i32
      %c2_i32_89 = arith.constant 2 : i32
      %240 = arith.addi %239, %c2_i32_89 : i32
      %241 = arith.index_cast %240 : i32 to index
      %242 = memref.load %arg3[%241] : memref<120xi32, #tpu.memory_space<smem>>
      %c32_i32_90 = arith.constant 32 : i32
      %243 = arith.addi %111, %c32_i32_90 : i32
      %244 = arith.addi %243, %194 : i32
      %c0_i32_91 = arith.constant 0 : i32
      %245 = tpu.memref_slice %arg5[%242, %c0_i32_91] : memref<64x128xf32, #tpu.memory_space<any>> -> memref<1x128xf32, #tpu.memory_space<any>>
      %246 = tpu.memref_squeeze %245 : memref<1x128xf32, #tpu.memory_space<any>> -> memref<128xf32, #tpu.memory_space<any>>
      %c0_i32_92 = arith.constant 0 : i32
      %247 = tpu.memref_slice %arg7[%244, %c0_i32_92] : memref<112x128xf32, #tpu.memory_space<vmem>> -> memref<1x128xf32, #tpu.memory_space<vmem>>
      %248 = tpu.memref_squeeze %247 : memref<1x128xf32, #tpu.memory_space<vmem>> -> memref<128xf32, #tpu.memory_space<vmem>>
      %249 = tpu.memref_slice %arg8[%109] : memref<2x!tpu.dma_semaphore, #tpu.memory_space<semaphore_mem>> -> memref<1x!tpu.dma_semaphore, #tpu.memory_space<semaphore_mem>>
      %250 = tpu.memref_squeeze %249 : memref<1x!tpu.dma_semaphore, #tpu.memory_space<semaphore_mem>> -> memref<!tpu.dma_semaphore, #tpu.memory_space<semaphore_mem>>
      tpu.enqueue_dma source(%246 : memref<128xf32, #tpu.memory_space<any>>) target(%248 : memref<128xf32, #tpu.memory_space<vmem>>) target_semaphore(%250 : memref<!tpu.dma_semaphore, #tpu.memory_space<semaphore_mem>>)
      %c5_i32_93 = arith.constant 5 : i32
      %251 = arith.muli %195, %c5_i32_93 : i32
      %c3_i32_94 = arith.constant 3 : i32
      %252 = arith.addi %251, %c3_i32_94 : i32
      %253 = arith.index_cast %252 : i32 to index
      %254 = memref.load %arg3[%253] : memref<120xi32, #tpu.memory_space<smem>>
      %c40_i32_95 = arith.constant 40 : i32
      %255 = arith.addi %111, %c40_i32_95 : i32
      %256 = arith.addi %255, %194 : i32
      %c0_i32_96 = arith.constant 0 : i32
      %257 = tpu.memref_slice %arg5[%254, %c0_i32_96] : memref<64x128xf32, #tpu.memory_space<any>> -> memref<1x128xf32, #tpu.memory_space<any>>
      %258 = tpu.memref_squeeze %257 : memref<1x128xf32, #tpu.memory_space<any>> -> memref<128xf32, #tpu.memory_space<any>>
      %c0_i32_97 = arith.constant 0 : i32
      %259 = tpu.memref_slice %arg7[%256, %c0_i32_97] : memref<112x128xf32, #tpu.memory_space<vmem>> -> memref<1x128xf32, #tpu.memory_space<vmem>>
      %260 = tpu.memref_squeeze %259 : memref<1x128xf32, #tpu.memory_space<vmem>> -> memref<128xf32, #tpu.memory_space<vmem>>
      %261 = tpu.memref_slice %arg8[%109] : memref<2x!tpu.dma_semaphore, #tpu.memory_space<semaphore_mem>> -> memref<1x!tpu.dma_semaphore, #tpu.memory_space<semaphore_mem>>
      %262 = tpu.memref_squeeze %261 : memref<1x!tpu.dma_semaphore, #tpu.memory_space<semaphore_mem>> -> memref<!tpu.dma_semaphore, #tpu.memory_space<semaphore_mem>>
      tpu.enqueue_dma source(%258 : memref<128xf32, #tpu.memory_space<any>>) target(%260 : memref<128xf32, #tpu.memory_space<vmem>>) target_semaphore(%262 : memref<!tpu.dma_semaphore, #tpu.memory_space<semaphore_mem>>)
      %c5_i32_98 = arith.constant 5 : i32
      %263 = arith.muli %195, %c5_i32_98 : i32
      %c4_i32_99 = arith.constant 4 : i32
      %264 = arith.addi %263, %c4_i32_99 : i32
      %265 = arith.index_cast %264 : i32 to index
      %266 = memref.load %arg3[%265] : memref<120xi32, #tpu.memory_space<smem>>
      %c48_i32_100 = arith.constant 48 : i32
      %267 = arith.addi %111, %c48_i32_100 : i32
      %268 = arith.addi %267, %194 : i32
      %c0_i32_101 = arith.constant 0 : i32
      %269 = tpu.memref_slice %arg5[%266, %c0_i32_101] : memref<64x128xf32, #tpu.memory_space<any>> -> memref<1x128xf32, #tpu.memory_space<any>>
      %270 = tpu.memref_squeeze %269 : memref<1x128xf32, #tpu.memory_space<any>> -> memref<128xf32, #tpu.memory_space<any>>
      %c0_i32_102 = arith.constant 0 : i32
      %271 = tpu.memref_slice %arg7[%268, %c0_i32_102] : memref<112x128xf32, #tpu.memory_space<vmem>> -> memref<1x128xf32, #tpu.memory_space<vmem>>
      %272 = tpu.memref_squeeze %271 : memref<1x128xf32, #tpu.memory_space<vmem>> -> memref<128xf32, #tpu.memory_space<vmem>>
      %273 = tpu.memref_slice %arg8[%109] : memref<2x!tpu.dma_semaphore, #tpu.memory_space<semaphore_mem>> -> memref<1x!tpu.dma_semaphore, #tpu.memory_space<semaphore_mem>>
      %274 = tpu.memref_squeeze %273 : memref<1x!tpu.dma_semaphore, #tpu.memory_space<semaphore_mem>> -> memref<!tpu.dma_semaphore, #tpu.memory_space<semaphore_mem>>
      tpu.enqueue_dma source(%270 : memref<128xf32, #tpu.memory_space<any>>) target(%272 : memref<128xf32, #tpu.memory_space<vmem>>) target_semaphore(%274 : memref<!tpu.dma_semaphore, #tpu.memory_space<semaphore_mem>>)
      %c2_i32_103 = arith.constant 2 : i32
      %275 = arith.addi %112, %c2_i32_103 : i32
      %276 = arith.addi %110, %275 : i32
      %277 = arith.index_cast %276 : i32 to index
      %278 = memref.load %arg1[%277] : memref<24xi32, #tpu.memory_space<smem>>
      %279 = arith.addi %111, %275 : i32
      %c0_i32_104 = arith.constant 0 : i32
      %280 = tpu.memref_slice %arg4[%278, %c0_i32_104] : memref<64x128xf32, #tpu.memory_space<any>> -> memref<1x128xf32, #tpu.memory_space<any>>
      %281 = tpu.memref_squeeze %280 : memref<1x128xf32, #tpu.memory_space<any>> -> memref<128xf32, #tpu.memory_space<any>>
      %c0_i32_105 = arith.constant 0 : i32
      %282 = tpu.memref_slice %arg7[%279, %c0_i32_105] : memref<112x128xf32, #tpu.memory_space<vmem>> -> memref<1x128xf32, #tpu.memory_space<vmem>>
      %283 = tpu.memref_squeeze %282 : memref<1x128xf32, #tpu.memory_space<vmem>> -> memref<128xf32, #tpu.memory_space<vmem>>
      %284 = tpu.memref_slice %arg8[%109] : memref<2x!tpu.dma_semaphore, #tpu.memory_space<semaphore_mem>> -> memref<1x!tpu.dma_semaphore, #tpu.memory_space<semaphore_mem>>
      %285 = tpu.memref_squeeze %284 : memref<1x!tpu.dma_semaphore, #tpu.memory_space<semaphore_mem>> -> memref<!tpu.dma_semaphore, #tpu.memory_space<semaphore_mem>>
      tpu.enqueue_dma source(%281 : memref<128xf32, #tpu.memory_space<any>>) target(%283 : memref<128xf32, #tpu.memory_space<vmem>>) target_semaphore(%285 : memref<!tpu.dma_semaphore, #tpu.memory_space<semaphore_mem>>)
      %286 = arith.index_cast %276 : i32 to index
      %287 = memref.load %arg2[%286] : memref<24xi32, #tpu.memory_space<smem>>
      %c8_i32_106 = arith.constant 8 : i32
      %288 = arith.addi %111, %c8_i32_106 : i32
      %289 = arith.addi %288, %275 : i32
      %c0_i32_107 = arith.constant 0 : i32
      %290 = tpu.memref_slice %arg5[%287, %c0_i32_107] : memref<64x128xf32, #tpu.memory_space<any>> -> memref<1x128xf32, #tpu.memory_space<any>>
      %291 = tpu.memref_squeeze %290 : memref<1x128xf32, #tpu.memory_space<any>> -> memref<128xf32, #tpu.memory_space<any>>
      %c0_i32_108 = arith.constant 0 : i32
      %292 = tpu.memref_slice %arg7[%289, %c0_i32_108] : memref<112x128xf32, #tpu.memory_space<vmem>> -> memref<1x128xf32, #tpu.memory_space<vmem>>
      %293 = tpu.memref_squeeze %292 : memref<1x128xf32, #tpu.memory_space<vmem>> -> memref<128xf32, #tpu.memory_space<vmem>>
      %294 = tpu.memref_slice %arg8[%109] : memref<2x!tpu.dma_semaphore, #tpu.memory_space<semaphore_mem>> -> memref<1x!tpu.dma_semaphore, #tpu.memory_space<semaphore_mem>>
      %295 = tpu.memref_squeeze %294 : memref<1x!tpu.dma_semaphore, #tpu.memory_space<semaphore_mem>> -> memref<!tpu.dma_semaphore, #tpu.memory_space<semaphore_mem>>
      tpu.enqueue_dma source(%291 : memref<128xf32, #tpu.memory_space<any>>) target(%293 : memref<128xf32, #tpu.memory_space<vmem>>) target_semaphore(%295 : memref<!tpu.dma_semaphore, #tpu.memory_space<semaphore_mem>>)
      %c5_i32_109 = arith.constant 5 : i32
      %296 = arith.muli %276, %c5_i32_109 : i32
      %c0_i32_110 = arith.constant 0 : i32
      %297 = arith.addi %296, %c0_i32_110 : i32
      %298 = arith.index_cast %297 : i32 to index
      %299 = memref.load %arg3[%298] : memref<120xi32, #tpu.memory_space<smem>>
      %c16_i32_111 = arith.constant 16 : i32
      %300 = arith.addi %111, %c16_i32_111 : i32
      %301 = arith.addi %300, %275 : i32
      %c0_i32_112 = arith.constant 0 : i32
      %302 = tpu.memref_slice %arg5[%299, %c0_i32_112] : memref<64x128xf32, #tpu.memory_space<any>> -> memref<1x128xf32, #tpu.memory_space<any>>
      %303 = tpu.memref_squeeze %302 : memref<1x128xf32, #tpu.memory_space<any>> -> memref<128xf32, #tpu.memory_space<any>>
      %c0_i32_113 = arith.constant 0 : i32
      %304 = tpu.memref_slice %arg7[%301, %c0_i32_113] : memref<112x128xf32, #tpu.memory_space<vmem>> -> memref<1x128xf32, #tpu.memory_space<vmem>>
      %305 = tpu.memref_squeeze %304 : memref<1x128xf32, #tpu.memory_space<vmem>> -> memref<128xf32, #tpu.memory_space<vmem>>
      %306 = tpu.memref_slice %arg8[%109] : memref<2x!tpu.dma_semaphore, #tpu.memory_space<semaphore_mem>> -> memref<1x!tpu.dma_semaphore, #tpu.memory_space<semaphore_mem>>
      %307 = tpu.memref_squeeze %306 : memref<1x!tpu.dma_semaphore, #tpu.memory_space<semaphore_mem>> -> memref<!tpu.dma_semaphore, #tpu.memory_space<semaphore_mem>>
      tpu.enqueue_dma source(%303 : memref<128xf32, #tpu.memory_space<any>>) target(%305 : memref<128xf32, #tpu.memory_space<vmem>>) target_semaphore(%307 : memref<!tpu.dma_semaphore, #tpu.memory_space<semaphore_mem>>)
      %c5_i32_114 = arith.constant 5 : i32
      %308 = arith.muli %276, %c5_i32_114 : i32
      %c1_i32_115 = arith.constant 1 : i32
      %309 = arith.addi %308, %c1_i32_115 : i32
      %310 = arith.index_cast %309 : i32 to index
      %311 = memref.load %arg3[%310] : memref<120xi32, #tpu.memory_space<smem>>
      %c24_i32_116 = arith.constant 24 : i32
      %312 = arith.addi %111, %c24_i32_116 : i32
      %313 = arith.addi %312, %275 : i32
      %c0_i32_117 = arith.constant 0 : i32
      %314 = tpu.memref_slice %arg5[%311, %c0_i32_117] : memref<64x128xf32, #tpu.memory_space<any>> -> memref<1x128xf32, #tpu.memory_space<any>>
      %315 = tpu.memref_squeeze %314 : memref<1x128xf32, #tpu.memory_space<any>> -> memref<128xf32, #tpu.memory_space<any>>
      %c0_i32_118 = arith.constant 0 : i32
      %316 = tpu.memref_slice %arg7[%313, %c0_i32_118] : memref<112x128xf32, #tpu.memory_space<vmem>> -> memref<1x128xf32, #tpu.memory_space<vmem>>
      %317 = tpu.memref_squeeze %316 : memref<1x128xf32, #tpu.memory_space<vmem>> -> memref<128xf32, #tpu.memory_space<vmem>>
      %318 = tpu.memref_slice %arg8[%109] : memref<2x!tpu.dma_semaphore, #tpu.memory_space<semaphore_mem>> -> memref<1x!tpu.dma_semaphore, #tpu.memory_space<semaphore_mem>>
      %319 = tpu.memref_squeeze %318 : memref<1x!tpu.dma_semaphore, #tpu.memory_space<semaphore_mem>> -> memref<!tpu.dma_semaphore, #tpu.memory_space<semaphore_mem>>
      tpu.enqueue_dma source(%315 : memref<128xf32, #tpu.memory_space<any>>) target(%317 : memref<128xf32, #tpu.memory_space<vmem>>) target_semaphore(%319 : memref<!tpu.dma_semaphore, #tpu.memory_space<semaphore_mem>>)
      %c5_i32_119 = arith.constant 5 : i32
      %320 = arith.muli %276, %c5_i32_119 : i32
      %c2_i32_120 = arith.constant 2 : i32
      %321 = arith.addi %320, %c2_i32_120 : i32
      %322 = arith.index_cast %321 : i32 to index
      %323 = memref.load %arg3[%322] : memref<120xi32, #tpu.memory_space<smem>>
      %c32_i32_121 = arith.constant 32 : i32
      %324 = arith.addi %111, %c32_i32_121 : i32
      %325 = arith.addi %324, %275 : i32
      %c0_i32_122 = arith.constant 0 : i32
      %326 = tpu.memref_slice %arg5[%323, %c0_i32_122] : memref<64x128xf32, #tpu.memory_space<any>> -> memref<1x128xf32, #tpu.memory_space<any>>
      %327 = tpu.memref_squeeze %326 : memref<1x128xf32, #tpu.memory_space<any>> -> memref<128xf32, #tpu.memory_space<any>>
      %c0_i32_123 = arith.constant 0 : i32
      %328 = tpu.memref_slice %arg7[%325, %c0_i32_123] : memref<112x128xf32, #tpu.memory_space<vmem>> -> memref<1x128xf32, #tpu.memory_space<vmem>>
      %329 = tpu.memref_squeeze %328 : memref<1x128xf32, #tpu.memory_space<vmem>> -> memref<128xf32, #tpu.memory_space<vmem>>
      %330 = tpu.memref_slice %arg8[%109] : memref<2x!tpu.dma_semaphore, #tpu.memory_space<semaphore_mem>> -> memref<1x!tpu.dma_semaphore, #tpu.memory_space<semaphore_mem>>
      %331 = tpu.memref_squeeze %330 : memref<1x!tpu.dma_semaphore, #tpu.memory_space<semaphore_mem>> -> memref<!tpu.dma_semaphore, #tpu.memory_space<semaphore_mem>>
      tpu.enqueue_dma source(%327 : memref<128xf32, #tpu.memory_space<any>>) target(%329 : memref<128xf32, #tpu.memory_space<vmem>>) target_semaphore(%331 : memref<!tpu.dma_semaphore, #tpu.memory_space<semaphore_mem>>)
      %c5_i32_124 = arith.constant 5 : i32
      %332 = arith.muli %276, %c5_i32_124 : i32
      %c3_i32_125 = arith.constant 3 : i32
      %333 = arith.addi %332, %c3_i32_125 : i32
      %334 = arith.index_cast %333 : i32 to index
      %335 = memref.load %arg3[%334] : memref<120xi32, #tpu.memory_space<smem>>
      %c40_i32_126 = arith.constant 40 : i32
      %336 = arith.addi %111, %c40_i32_126 : i32
      %337 = arith.addi %336, %275 : i32
      %c0_i32_127 = arith.constant 0 : i32
      %338 = tpu.memref_slice %arg5[%335, %c0_i32_127] : memref<64x128xf32, #tpu.memory_space<any>> -> memref<1x128xf32, #tpu.memory_space<any>>
      %339 = tpu.memref_squeeze %338 : memref<1x128xf32, #tpu.memory_space<any>> -> memref<128xf32, #tpu.memory_space<any>>
      %c0_i32_128 = arith.constant 0 : i32
      %340 = tpu.memref_slice %arg7[%337, %c0_i32_128] : memref<112x128xf32, #tpu.memory_space<vmem>> -> memref<1x128xf32, #tpu.memory_space<vmem>>
      %341 = tpu.memref_squeeze %340 : memref<1x128xf32, #tpu.memory_space<vmem>> -> memref<128xf32, #tpu.memory_space<vmem>>
      %342 = tpu.memref_slice %arg8[%109] : memref<2x!tpu.dma_semaphore, #tpu.memory_space<semaphore_mem>> -> memref<1x!tpu.dma_semaphore, #tpu.memory_space<semaphore_mem>>
      %343 = tpu.memref_squeeze %342 : memref<1x!tpu.dma_semaphore, #tpu.memory_space<semaphore_mem>> -> memref<!tpu.dma_semaphore, #tpu.memory_space<semaphore_mem>>
      tpu.enqueue_dma source(%339 : memref<128xf32, #tpu.memory_space<any>>) target(%341 : memref<128xf32, #tpu.memory_space<vmem>>) target_semaphore(%343 : memref<!tpu.dma_semaphore, #tpu.memory_space<semaphore_mem>>)
      %c5_i32_129 = arith.constant 5 : i32
      %344 = arith.muli %276, %c5_i32_129 : i32
      %c4_i32_130 = arith.constant 4 : i32
      %345 = arith.addi %344, %c4_i32_130 : i32
      %346 = arith.index_cast %345 : i32 to index
      %347 = memref.load %arg3[%346] : memref<120xi32, #tpu.memory_space<smem>>
      %c48_i32_131 = arith.constant 48 : i32
      %348 = arith.addi %111, %c48_i32_131 : i32
      %349 = arith.addi %348, %275 : i32
      %c0_i32_132 = arith.constant 0 : i32
      %350 = tpu.memref_slice %arg5[%347, %c0_i32_132] : memref<64x128xf32, #tpu.memory_space<any>> -> memref<1x128xf32, #tpu.memory_space<any>>
      %351 = tpu.memref_squeeze %350 : memref<1x128xf32, #tpu.memory_space<any>> -> memref<128xf32, #tpu.memory_space<any>>
      %c0_i32_133 = arith.constant 0 : i32
      %352 = tpu.memref_slice %arg7[%349, %c0_i32_133] : memref<112x128xf32, #tpu.memory_space<vmem>> -> memref<1x128xf32, #tpu.memory_space<vmem>>
      %353 = tpu.memref_squeeze %352 : memref<1x128xf32, #tpu.memory_space<vmem>> -> memref<128xf32, #tpu.memory_space<vmem>>
      %354 = tpu.memref_slice %arg8[%109] : memref<2x!tpu.dma_semaphore, #tpu.memory_space<semaphore_mem>> -> memref<1x!tpu.dma_semaphore, #tpu.memory_space<semaphore_mem>>
      %355 = tpu.memref_squeeze %354 : memref<1x!tpu.dma_semaphore, #tpu.memory_space<semaphore_mem>> -> memref<!tpu.dma_semaphore, #tpu.memory_space<semaphore_mem>>
      tpu.enqueue_dma source(%351 : memref<128xf32, #tpu.memory_space<any>>) target(%353 : memref<128xf32, #tpu.memory_space<vmem>>) target_semaphore(%355 : memref<!tpu.dma_semaphore, #tpu.memory_space<semaphore_mem>>)
      %c3_i32_134 = arith.constant 3 : i32
      %356 = arith.addi %112, %c3_i32_134 : i32
      %357 = arith.addi %110, %356 : i32
      %358 = arith.index_cast %357 : i32 to index
      %359 = memref.load %arg1[%358] : memref<24xi32, #tpu.memory_space<smem>>
      %360 = arith.addi %111, %356 : i32
      %c0_i32_135 = arith.constant 0 : i32
      %361 = tpu.memref_slice %arg4[%359, %c0_i32_135] : memref<64x128xf32, #tpu.memory_space<any>> -> memref<1x128xf32, #tpu.memory_space<any>>
      %362 = tpu.memref_squeeze %361 : memref<1x128xf32, #tpu.memory_space<any>> -> memref<128xf32, #tpu.memory_space<any>>
      %c0_i32_136 = arith.constant 0 : i32
      %363 = tpu.memref_slice %arg7[%360, %c0_i32_136] : memref<112x128xf32, #tpu.memory_space<vmem>> -> memref<1x128xf32, #tpu.memory_space<vmem>>
      %364 = tpu.memref_squeeze %363 : memref<1x128xf32, #tpu.memory_space<vmem>> -> memref<128xf32, #tpu.memory_space<vmem>>
      %365 = tpu.memref_slice %arg8[%109] : memref<2x!tpu.dma_semaphore, #tpu.memory_space<semaphore_mem>> -> memref<1x!tpu.dma_semaphore, #tpu.memory_space<semaphore_mem>>
      %366 = tpu.memref_squeeze %365 : memref<1x!tpu.dma_semaphore, #tpu.memory_space<semaphore_mem>> -> memref<!tpu.dma_semaphore, #tpu.memory_space<semaphore_mem>>
      tpu.enqueue_dma source(%362 : memref<128xf32, #tpu.memory_space<any>>) target(%364 : memref<128xf32, #tpu.memory_space<vmem>>) target_semaphore(%366 : memref<!tpu.dma_semaphore, #tpu.memory_space<semaphore_mem>>)
      %367 = arith.index_cast %357 : i32 to index
      %368 = memref.load %arg2[%367] : memref<24xi32, #tpu.memory_space<smem>>
      %c8_i32_137 = arith.constant 8 : i32
      %369 = arith.addi %111, %c8_i32_137 : i32
      %370 = arith.addi %369, %356 : i32
      %c0_i32_138 = arith.constant 0 : i32
      %371 = tpu.memref_slice %arg5[%368, %c0_i32_138] : memref<64x128xf32, #tpu.memory_space<any>> -> memref<1x128xf32, #tpu.memory_space<any>>
      %372 = tpu.memref_squeeze %371 : memref<1x128xf32, #tpu.memory_space<any>> -> memref<128xf32, #tpu.memory_space<any>>
      %c0_i32_139 = arith.constant 0 : i32
      %373 = tpu.memref_slice %arg7[%370, %c0_i32_139] : memref<112x128xf32, #tpu.memory_space<vmem>> -> memref<1x128xf32, #tpu.memory_space<vmem>>
      %374 = tpu.memref_squeeze %373 : memref<1x128xf32, #tpu.memory_space<vmem>> -> memref<128xf32, #tpu.memory_space<vmem>>
      %375 = tpu.memref_slice %arg8[%109] : memref<2x!tpu.dma_semaphore, #tpu.memory_space<semaphore_mem>> -> memref<1x!tpu.dma_semaphore, #tpu.memory_space<semaphore_mem>>
      %376 = tpu.memref_squeeze %375 : memref<1x!tpu.dma_semaphore, #tpu.memory_space<semaphore_mem>> -> memref<!tpu.dma_semaphore, #tpu.memory_space<semaphore_mem>>
      tpu.enqueue_dma source(%372 : memref<128xf32, #tpu.memory_space<any>>) target(%374 : memref<128xf32, #tpu.memory_space<vmem>>) target_semaphore(%376 : memref<!tpu.dma_semaphore, #tpu.memory_space<semaphore_mem>>)
      %c5_i32_140 = arith.constant 5 : i32
      %377 = arith.muli %357, %c5_i32_140 : i32
      %c0_i32_141 = arith.constant 0 : i32
      %378 = arith.addi %377, %c0_i32_141 : i32
      %379 = arith.index_cast %378 : i32 to index
      %380 = memref.load %arg3[%379] : memref<120xi32, #tpu.memory_space<smem>>
      %c16_i32_142 = arith.constant 16 : i32
      %381 = arith.addi %111, %c16_i32_142 : i32
      %382 = arith.addi %381, %356 : i32
      %c0_i32_143 = arith.constant 0 : i32
      %383 = tpu.memref_slice %arg5[%380, %c0_i32_143] : memref<64x128xf32, #tpu.memory_space<any>> -> memref<1x128xf32, #tpu.memory_space<any>>
      %384 = tpu.memref_squeeze %383 : memref<1x128xf32, #tpu.memory_space<any>> -> memref<128xf32, #tpu.memory_space<any>>
      %c0_i32_144 = arith.constant 0 : i32
      %385 = tpu.memref_slice %arg7[%382, %c0_i32_144] : memref<112x128xf32, #tpu.memory_space<vmem>> -> memref<1x128xf32, #tpu.memory_space<vmem>>
      %386 = tpu.memref_squeeze %385 : memref<1x128xf32, #tpu.memory_space<vmem>> -> memref<128xf32, #tpu.memory_space<vmem>>
      %387 = tpu.memref_slice %arg8[%109] : memref<2x!tpu.dma_semaphore, #tpu.memory_space<semaphore_mem>> -> memref<1x!tpu.dma_semaphore, #tpu.memory_space<semaphore_mem>>
      %388 = tpu.memref_squeeze %387 : memref<1x!tpu.dma_semaphore, #tpu.memory_space<semaphore_mem>> -> memref<!tpu.dma_semaphore, #tpu.memory_space<semaphore_mem>>
      tpu.enqueue_dma source(%384 : memref<128xf32, #tpu.memory_space<any>>) target(%386 : memref<128xf32, #tpu.memory_space<vmem>>) target_semaphore(%388 : memref<!tpu.dma_semaphore, #tpu.memory_space<semaphore_mem>>)
      %c5_i32_145 = arith.constant 5 : i32
      %389 = arith.muli %357, %c5_i32_145 : i32
      %c1_i32_146 = arith.constant 1 : i32
      %390 = arith.addi %389, %c1_i32_146 : i32
      %391 = arith.index_cast %390 : i32 to index
      %392 = memref.load %arg3[%391] : memref<120xi32, #tpu.memory_space<smem>>
      %c24_i32_147 = arith.constant 24 : i32
      %393 = arith.addi %111, %c24_i32_147 : i32
      %394 = arith.addi %393, %356 : i32
      %c0_i32_148 = arith.constant 0 : i32
      %395 = tpu.memref_slice %arg5[%392, %c0_i32_148] : memref<64x128xf32, #tpu.memory_space<any>> -> memref<1x128xf32, #tpu.memory_space<any>>
      %396 = tpu.memref_squeeze %395 : memref<1x128xf32, #tpu.memory_space<any>> -> memref<128xf32, #tpu.memory_space<any>>
      %c0_i32_149 = arith.constant 0 : i32
      %397 = tpu.memref_slice %arg7[%394, %c0_i32_149] : memref<112x128xf32, #tpu.memory_space<vmem>> -> memref<1x128xf32, #tpu.memory_space<vmem>>
      %398 = tpu.memref_squeeze %397 : memref<1x128xf32, #tpu.memory_space<vmem>> -> memref<128xf32, #tpu.memory_space<vmem>>
      %399 = tpu.memref_slice %arg8[%109] : memref<2x!tpu.dma_semaphore, #tpu.memory_space<semaphore_mem>> -> memref<1x!tpu.dma_semaphore, #tpu.memory_space<semaphore_mem>>
      %400 = tpu.memref_squeeze %399 : memref<1x!tpu.dma_semaphore, #tpu.memory_space<semaphore_mem>> -> memref<!tpu.dma_semaphore, #tpu.memory_space<semaphore_mem>>
      tpu.enqueue_dma source(%396 : memref<128xf32, #tpu.memory_space<any>>) target(%398 : memref<128xf32, #tpu.memory_space<vmem>>) target_semaphore(%400 : memref<!tpu.dma_semaphore, #tpu.memory_space<semaphore_mem>>)
      %c5_i32_150 = arith.constant 5 : i32
      %401 = arith.muli %357, %c5_i32_150 : i32
      %c2_i32_151 = arith.constant 2 : i32
      %402 = arith.addi %401, %c2_i32_151 : i32
      %403 = arith.index_cast %402 : i32 to index
      %404 = memref.load %arg3[%403] : memref<120xi32, #tpu.memory_space<smem>>
      %c32_i32_152 = arith.constant 32 : i32
      %405 = arith.addi %111, %c32_i32_152 : i32
      %406 = arith.addi %405, %356 : i32
      %c0_i32_153 = arith.constant 0 : i32
      %407 = tpu.memref_slice %arg5[%404, %c0_i32_153] : memref<64x128xf32, #tpu.memory_space<any>> -> memref<1x128xf32, #tpu.memory_space<any>>
      %408 = tpu.memref_squeeze %407 : memref<1x128xf32, #tpu.memory_space<any>> -> memref<128xf32, #tpu.memory_space<any>>
      %c0_i32_154 = arith.constant 0 : i32
      %409 = tpu.memref_slice %arg7[%406, %c0_i32_154] : memref<112x128xf32, #tpu.memory_space<vmem>> -> memref<1x128xf32, #tpu.memory_space<vmem>>
      %410 = tpu.memref_squeeze %409 : memref<1x128xf32, #tpu.memory_space<vmem>> -> memref<128xf32, #tpu.memory_space<vmem>>
      %411 = tpu.memref_slice %arg8[%109] : memref<2x!tpu.dma_semaphore, #tpu.memory_space<semaphore_mem>> -> memref<1x!tpu.dma_semaphore, #tpu.memory_space<semaphore_mem>>
      %412 = tpu.memref_squeeze %411 : memref<1x!tpu.dma_semaphore, #tpu.memory_space<semaphore_mem>> -> memref<!tpu.dma_semaphore, #tpu.memory_space<semaphore_mem>>
      tpu.enqueue_dma source(%408 : memref<128xf32, #tpu.memory_space<any>>) target(%410 : memref<128xf32, #tpu.memory_space<vmem>>) target_semaphore(%412 : memref<!tpu.dma_semaphore, #tpu.memory_space<semaphore_mem>>)
      %c5_i32_155 = arith.constant 5 : i32
      %413 = arith.muli %357, %c5_i32_155 : i32
      %c3_i32_156 = arith.constant 3 : i32
      %414 = arith.addi %413, %c3_i32_156 : i32
      %415 = arith.index_cast %414 : i32 to index
      %416 = memref.load %arg3[%415] : memref<120xi32, #tpu.memory_space<smem>>
      %c40_i32_157 = arith.constant 40 : i32
      %417 = arith.addi %111, %c40_i32_157 : i32
      %418 = arith.addi %417, %356 : i32
      %c0_i32_158 = arith.constant 0 : i32
      %419 = tpu.memref_slice %arg5[%416, %c0_i32_158] : memref<64x128xf32, #tpu.memory_space<any>> -> memref<1x128xf32, #tpu.memory_space<any>>
      %420 = tpu.memref_squeeze %419 : memref<1x128xf32, #tpu.memory_space<any>> -> memref<128xf32, #tpu.memory_space<any>>
      %c0_i32_159 = arith.constant 0 : i32
      %421 = tpu.memref_slice %arg7[%418, %c0_i32_159] : memref<112x128xf32, #tpu.memory_space<vmem>> -> memref<1x128xf32, #tpu.memory_space<vmem>>
      %422 = tpu.memref_squeeze %421 : memref<1x128xf32, #tpu.memory_space<vmem>> -> memref<128xf32, #tpu.memory_space<vmem>>
      %423 = tpu.memref_slice %arg8[%109] : memref<2x!tpu.dma_semaphore, #tpu.memory_space<semaphore_mem>> -> memref<1x!tpu.dma_semaphore, #tpu.memory_space<semaphore_mem>>
      %424 = tpu.memref_squeeze %423 : memref<1x!tpu.dma_semaphore, #tpu.memory_space<semaphore_mem>> -> memref<!tpu.dma_semaphore, #tpu.memory_space<semaphore_mem>>
      tpu.enqueue_dma source(%420 : memref<128xf32, #tpu.memory_space<any>>) target(%422 : memref<128xf32, #tpu.memory_space<vmem>>) target_semaphore(%424 : memref<!tpu.dma_semaphore, #tpu.memory_space<semaphore_mem>>)
      %c5_i32_160 = arith.constant 5 : i32
      %425 = arith.muli %357, %c5_i32_160 : i32
      %c4_i32_161 = arith.constant 4 : i32
      %426 = arith.addi %425, %c4_i32_161 : i32
      %427 = arith.index_cast %426 : i32 to index
      %428 = memref.load %arg3[%427] : memref<120xi32, #tpu.memory_space<smem>>
      %c48_i32_162 = arith.constant 48 : i32
      %429 = arith.addi %111, %c48_i32_162 : i32
      %430 = arith.addi %429, %356 : i32
      %c0_i32_163 = arith.constant 0 : i32
      %431 = tpu.memref_slice %arg5[%428, %c0_i32_163] : memref<64x128xf32, #tpu.memory_space<any>> -> memref<1x128xf32, #tpu.memory_space<any>>
      %432 = tpu.memref_squeeze %431 : memref<1x128xf32, #tpu.memory_space<any>> -> memref<128xf32, #tpu.memory_space<any>>
      %c0_i32_164 = arith.constant 0 : i32
      %433 = tpu.memref_slice %arg7[%430, %c0_i32_164] : memref<112x128xf32, #tpu.memory_space<vmem>> -> memref<1x128xf32, #tpu.memory_space<vmem>>
      %434 = tpu.memref_squeeze %433 : memref<1x128xf32, #tpu.memory_space<vmem>> -> memref<128xf32, #tpu.memory_space<vmem>>
      %435 = tpu.memref_slice %arg8[%109] : memref<2x!tpu.dma_semaphore, #tpu.memory_space<semaphore_mem>> -> memref<1x!tpu.dma_semaphore, #tpu.memory_space<semaphore_mem>>
      %436 = tpu.memref_squeeze %435 : memref<1x!tpu.dma_semaphore, #tpu.memory_space<semaphore_mem>> -> memref<!tpu.dma_semaphore, #tpu.memory_space<semaphore_mem>>
      tpu.enqueue_dma source(%432 : memref<128xf32, #tpu.memory_space<any>>) target(%434 : memref<128xf32, #tpu.memory_space<vmem>>) target_semaphore(%436 : memref<!tpu.dma_semaphore, #tpu.memory_space<semaphore_mem>>)
      %c4_i32_165 = arith.constant 4 : i32
      %437 = arith.addi %112, %c4_i32_165 : i32
      %438 = arith.addi %110, %437 : i32
      %439 = arith.index_cast %438 : i32 to index
      %440 = memref.load %arg1[%439] : memref<24xi32, #tpu.memory_space<smem>>
      %441 = arith.addi %111, %437 : i32
      %c0_i32_166 = arith.constant 0 : i32
      %442 = tpu.memref_slice %arg4[%440, %c0_i32_166] : memref<64x128xf32, #tpu.memory_space<any>> -> memref<1x128xf32, #tpu.memory_space<any>>
      %443 = tpu.memref_squeeze %442 : memref<1x128xf32, #tpu.memory_space<any>> -> memref<128xf32, #tpu.memory_space<any>>
      %c0_i32_167 = arith.constant 0 : i32
      %444 = tpu.memref_slice %arg7[%441, %c0_i32_167] : memref<112x128xf32, #tpu.memory_space<vmem>> -> memref<1x128xf32, #tpu.memory_space<vmem>>
      %445 = tpu.memref_squeeze %444 : memref<1x128xf32, #tpu.memory_space<vmem>> -> memref<128xf32, #tpu.memory_space<vmem>>
      %446 = tpu.memref_slice %arg8[%109] : memref<2x!tpu.dma_semaphore, #tpu.memory_space<semaphore_mem>> -> memref<1x!tpu.dma_semaphore, #tpu.memory_space<semaphore_mem>>
      %447 = tpu.memref_squeeze %446 : memref<1x!tpu.dma_semaphore, #tpu.memory_space<semaphore_mem>> -> memref<!tpu.dma_semaphore, #tpu.memory_space<semaphore_mem>>
      tpu.enqueue_dma source(%443 : memref<128xf32, #tpu.memory_space<any>>) target(%445 : memref<128xf32, #tpu.memory_space<vmem>>) target_semaphore(%447 : memref<!tpu.dma_semaphore, #tpu.memory_space<semaphore_mem>>)
      %448 = arith.index_cast %438 : i32 to index
      %449 = memref.load %arg2[%448] : memref<24xi32, #tpu.memory_space<smem>>
      %c8_i32_168 = arith.constant 8 : i32
      %450 = arith.addi %111, %c8_i32_168 : i32
      %451 = arith.addi %450, %437 : i32
      %c0_i32_169 = arith.constant 0 : i32
      %452 = tpu.memref_slice %arg5[%449, %c0_i32_169] : memref<64x128xf32, #tpu.memory_space<any>> -> memref<1x128xf32, #tpu.memory_space<any>>
      %453 = tpu.memref_squeeze %452 : memref<1x128xf32, #tpu.memory_space<any>> -> memref<128xf32, #tpu.memory_space<any>>
      %c0_i32_170 = arith.constant 0 : i32
      %454 = tpu.memref_slice %arg7[%451, %c0_i32_170] : memref<112x128xf32, #tpu.memory_space<vmem>> -> memref<1x128xf32, #tpu.memory_space<vmem>>
      %455 = tpu.memref_squeeze %454 : memref<1x128xf32, #tpu.memory_space<vmem>> -> memref<128xf32, #tpu.memory_space<vmem>>
      %456 = tpu.memref_slice %arg8[%109] : memref<2x!tpu.dma_semaphore, #tpu.memory_space<semaphore_mem>> -> memref<1x!tpu.dma_semaphore, #tpu.memory_space<semaphore_mem>>
      %457 = tpu.memref_squeeze %456 : memref<1x!tpu.dma_semaphore, #tpu.memory_space<semaphore_mem>> -> memref<!tpu.dma_semaphore, #tpu.memory_space<semaphore_mem>>
      tpu.enqueue_dma source(%453 : memref<128xf32, #tpu.memory_space<any>>) target(%455 : memref<128xf32, #tpu.memory_space<vmem>>) target_semaphore(%457 : memref<!tpu.dma_semaphore, #tpu.memory_space<semaphore_mem>>)
      %c5_i32_171 = arith.constant 5 : i32
      %458 = arith.muli %438, %c5_i32_171 : i32
      %c0_i32_172 = arith.constant 0 : i32
      %459 = arith.addi %458, %c0_i32_172 : i32
      %460 = arith.index_cast %459 : i32 to index
      %461 = memref.load %arg3[%460] : memref<120xi32, #tpu.memory_space<smem>>
      %c16_i32_173 = arith.constant 16 : i32
      %462 = arith.addi %111, %c16_i32_173 : i32
      %463 = arith.addi %462, %437 : i32
      %c0_i32_174 = arith.constant 0 : i32
      %464 = tpu.memref_slice %arg5[%461, %c0_i32_174] : memref<64x128xf32, #tpu.memory_space<any>> -> memref<1x128xf32, #tpu.memory_space<any>>
      %465 = tpu.memref_squeeze %464 : memref<1x128xf32, #tpu.memory_space<any>> -> memref<128xf32, #tpu.memory_space<any>>
      %c0_i32_175 = arith.constant 0 : i32
      %466 = tpu.memref_slice %arg7[%463, %c0_i32_175] : memref<112x128xf32, #tpu.memory_space<vmem>> -> memref<1x128xf32, #tpu.memory_space<vmem>>
      %467 = tpu.memref_squeeze %466 : memref<1x128xf32, #tpu.memory_space<vmem>> -> memref<128xf32, #tpu.memory_space<vmem>>
      %468 = tpu.memref_slice %arg8[%109] : memref<2x!tpu.dma_semaphore, #tpu.memory_space<semaphore_mem>> -> memref<1x!tpu.dma_semaphore, #tpu.memory_space<semaphore_mem>>
      %469 = tpu.memref_squeeze %468 : memref<1x!tpu.dma_semaphore, #tpu.memory_space<semaphore_mem>> -> memref<!tpu.dma_semaphore, #tpu.memory_space<semaphore_mem>>
      tpu.enqueue_dma source(%465 : memref<128xf32, #tpu.memory_space<any>>) target(%467 : memref<128xf32, #tpu.memory_space<vmem>>) target_semaphore(%469 : memref<!tpu.dma_semaphore, #tpu.memory_space<semaphore_mem>>)
      %c5_i32_176 = arith.constant 5 : i32
      %470 = arith.muli %438, %c5_i32_176 : i32
      %c1_i32_177 = arith.constant 1 : i32
      %471 = arith.addi %470, %c1_i32_177 : i32
      %472 = arith.index_cast %471 : i32 to index
      %473 = memref.load %arg3[%472] : memref<120xi32, #tpu.memory_space<smem>>
      %c24_i32_178 = arith.constant 24 : i32
      %474 = arith.addi %111, %c24_i32_178 : i32
      %475 = arith.addi %474, %437 : i32
      %c0_i32_179 = arith.constant 0 : i32
      %476 = tpu.memref_slice %arg5[%473, %c0_i32_179] : memref<64x128xf32, #tpu.memory_space<any>> -> memref<1x128xf32, #tpu.memory_space<any>>
      %477 = tpu.memref_squeeze %476 : memref<1x128xf32, #tpu.memory_space<any>> -> memref<128xf32, #tpu.memory_space<any>>
      %c0_i32_180 = arith.constant 0 : i32
      %478 = tpu.memref_slice %arg7[%475, %c0_i32_180] : memref<112x128xf32, #tpu.memory_space<vmem>> -> memref<1x128xf32, #tpu.memory_space<vmem>>
      %479 = tpu.memref_squeeze %478 : memref<1x128xf32, #tpu.memory_space<vmem>> -> memref<128xf32, #tpu.memory_space<vmem>>
      %480 = tpu.memref_slice %arg8[%109] : memref<2x!tpu.dma_semaphore, #tpu.memory_space<semaphore_mem>> -> memref<1x!tpu.dma_semaphore, #tpu.memory_space<semaphore_mem>>
      %481 = tpu.memref_squeeze %480 : memref<1x!tpu.dma_semaphore, #tpu.memory_space<semaphore_mem>> -> memref<!tpu.dma_semaphore, #tpu.memory_space<semaphore_mem>>
      tpu.enqueue_dma source(%477 : memref<128xf32, #tpu.memory_space<any>>) target(%479 : memref<128xf32, #tpu.memory_space<vmem>>) target_semaphore(%481 : memref<!tpu.dma_semaphore, #tpu.memory_space<semaphore_mem>>)
      %c5_i32_181 = arith.constant 5 : i32
      %482 = arith.muli %438, %c5_i32_181 : i32
      %c2_i32_182 = arith.constant 2 : i32
      %483 = arith.addi %482, %c2_i32_182 : i32
      %484 = arith.index_cast %483 : i32 to index
      %485 = memref.load %arg3[%484] : memref<120xi32, #tpu.memory_space<smem>>
      %c32_i32_183 = arith.constant 32 : i32
      %486 = arith.addi %111, %c32_i32_183 : i32
      %487 = arith.addi %486, %437 : i32
      %c0_i32_184 = arith.constant 0 : i32
      %488 = tpu.memref_slice %arg5[%485, %c0_i32_184] : memref<64x128xf32, #tpu.memory_space<any>> -> memref<1x128xf32, #tpu.memory_space<any>>
      %489 = tpu.memref_squeeze %488 : memref<1x128xf32, #tpu.memory_space<any>> -> memref<128xf32, #tpu.memory_space<any>>
      %c0_i32_185 = arith.constant 0 : i32
      %490 = tpu.memref_slice %arg7[%487, %c0_i32_185] : memref<112x128xf32, #tpu.memory_space<vmem>> -> memref<1x128xf32, #tpu.memory_space<vmem>>
      %491 = tpu.memref_squeeze %490 : memref<1x128xf32, #tpu.memory_space<vmem>> -> memref<128xf32, #tpu.memory_space<vmem>>
      %492 = tpu.memref_slice %arg8[%109] : memref<2x!tpu.dma_semaphore, #tpu.memory_space<semaphore_mem>> -> memref<1x!tpu.dma_semaphore, #tpu.memory_space<semaphore_mem>>
      %493 = tpu.memref_squeeze %492 : memref<1x!tpu.dma_semaphore, #tpu.memory_space<semaphore_mem>> -> memref<!tpu.dma_semaphore, #tpu.memory_space<semaphore_mem>>
      tpu.enqueue_dma source(%489 : memref<128xf32, #tpu.memory_space<any>>) target(%491 : memref<128xf32, #tpu.memory_space<vmem>>) target_semaphore(%493 : memref<!tpu.dma_semaphore, #tpu.memory_space<semaphore_mem>>)
      %c5_i32_186 = arith.constant 5 : i32
      %494 = arith.muli %438, %c5_i32_186 : i32
      %c3_i32_187 = arith.constant 3 : i32
      %495 = arith.addi %494, %c3_i32_187 : i32
      %496 = arith.index_cast %495 : i32 to index
      %497 = memref.load %arg3[%496] : memref<120xi32, #tpu.memory_space<smem>>
      %c40_i32_188 = arith.constant 40 : i32
      %498 = arith.addi %111, %c40_i32_188 : i32
      %499 = arith.addi %498, %437 : i32
      %c0_i32_189 = arith.constant 0 : i32
      %500 = tpu.memref_slice %arg5[%497, %c0_i32_189] : memref<64x128xf32, #tpu.memory_space<any>> -> memref<1x128xf32, #tpu.memory_space<any>>
      %501 = tpu.memref_squeeze %500 : memref<1x128xf32, #tpu.memory_space<any>> -> memref<128xf32, #tpu.memory_space<any>>
      %c0_i32_190 = arith.constant 0 : i32
      %502 = tpu.memref_slice %arg7[%499, %c0_i32_190] : memref<112x128xf32, #tpu.memory_space<vmem>> -> memref<1x128xf32, #tpu.memory_space<vmem>>
      %503 = tpu.memref_squeeze %502 : memref<1x128xf32, #tpu.memory_space<vmem>> -> memref<128xf32, #tpu.memory_space<vmem>>
      %504 = tpu.memref_slice %arg8[%109] : memref<2x!tpu.dma_semaphore, #tpu.memory_space<semaphore_mem>> -> memref<1x!tpu.dma_semaphore, #tpu.memory_space<semaphore_mem>>
      %505 = tpu.memref_squeeze %504 : memref<1x!tpu.dma_semaphore, #tpu.memory_space<semaphore_mem>> -> memref<!tpu.dma_semaphore, #tpu.memory_space<semaphore_mem>>
      tpu.enqueue_dma source(%501 : memref<128xf32, #tpu.memory_space<any>>) target(%503 : memref<128xf32, #tpu.memory_space<vmem>>) target_semaphore(%505 : memref<!tpu.dma_semaphore, #tpu.memory_space<semaphore_mem>>)
      %c5_i32_191 = arith.constant 5 : i32
      %506 = arith.muli %438, %c5_i32_191 : i32
      %c4_i32_192 = arith.constant 4 : i32
      %507 = arith.addi %506, %c4_i32_192 : i32
      %508 = arith.index_cast %507 : i32 to index
      %509 = memref.load %arg3[%508] : memref<120xi32, #tpu.memory_space<smem>>
      %c48_i32_193 = arith.constant 48 : i32
      %510 = arith.addi %111, %c48_i32_193 : i32
      %511 = arith.addi %510, %437 : i32
      %c0_i32_194 = arith.constant 0 : i32
      %512 = tpu.memref_slice %arg5[%509, %c0_i32_194] : memref<64x128xf32, #tpu.memory_space<any>> -> memref<1x128xf32, #tpu.memory_space<any>>
      %513 = tpu.memref_squeeze %512 : memref<1x128xf32, #tpu.memory_space<any>> -> memref<128xf32, #tpu.memory_space<any>>
      %c0_i32_195 = arith.constant 0 : i32
      %514 = tpu.memref_slice %arg7[%511, %c0_i32_195] : memref<112x128xf32, #tpu.memory_space<vmem>> -> memref<1x128xf32, #tpu.memory_space<vmem>>
      %515 = tpu.memref_squeeze %514 : memref<1x128xf32, #tpu.memory_space<vmem>> -> memref<128xf32, #tpu.memory_space<vmem>>
      %516 = tpu.memref_slice %arg8[%109] : memref<2x!tpu.dma_semaphore, #tpu.memory_space<semaphore_mem>> -> memref<1x!tpu.dma_semaphore, #tpu.memory_space<semaphore_mem>>
      %517 = tpu.memref_squeeze %516 : memref<1x!tpu.dma_semaphore, #tpu.memory_space<semaphore_mem>> -> memref<!tpu.dma_semaphore, #tpu.memory_space<semaphore_mem>>
      tpu.enqueue_dma source(%513 : memref<128xf32, #tpu.memory_space<any>>) target(%515 : memref<128xf32, #tpu.memory_space<vmem>>) target_semaphore(%517 : memref<!tpu.dma_semaphore, #tpu.memory_space<semaphore_mem>>)
      %c5_i32_196 = arith.constant 5 : i32
      %518 = arith.addi %112, %c5_i32_196 : i32
      %519 = arith.addi %110, %518 : i32
      %520 = arith.index_cast %519 : i32 to index
      %521 = memref.load %arg1[%520] : memref<24xi32, #tpu.memory_space<smem>>
      %522 = arith.addi %111, %518 : i32
      %c0_i32_197 = arith.constant 0 : i32
      %523 = tpu.memref_slice %arg4[%521, %c0_i32_197] : memref<64x128xf32, #tpu.memory_space<any>> -> memref<1x128xf32, #tpu.memory_space<any>>
      %524 = tpu.memref_squeeze %523 : memref<1x128xf32, #tpu.memory_space<any>> -> memref<128xf32, #tpu.memory_space<any>>
      %c0_i32_198 = arith.constant 0 : i32
      %525 = tpu.memref_slice %arg7[%522, %c0_i32_198] : memref<112x128xf32, #tpu.memory_space<vmem>> -> memref<1x128xf32, #tpu.memory_space<vmem>>
      %526 = tpu.memref_squeeze %525 : memref<1x128xf32, #tpu.memory_space<vmem>> -> memref<128xf32, #tpu.memory_space<vmem>>
      %527 = tpu.memref_slice %arg8[%109] : memref<2x!tpu.dma_semaphore, #tpu.memory_space<semaphore_mem>> -> memref<1x!tpu.dma_semaphore, #tpu.memory_space<semaphore_mem>>
      %528 = tpu.memref_squeeze %527 : memref<1x!tpu.dma_semaphore, #tpu.memory_space<semaphore_mem>> -> memref<!tpu.dma_semaphore, #tpu.memory_space<semaphore_mem>>
      tpu.enqueue_dma source(%524 : memref<128xf32, #tpu.memory_space<any>>) target(%526 : memref<128xf32, #tpu.memory_space<vmem>>) target_semaphore(%528 : memref<!tpu.dma_semaphore, #tpu.memory_space<semaphore_mem>>)
      %529 = arith.index_cast %519 : i32 to index
      %530 = memref.load %arg2[%529] : memref<24xi32, #tpu.memory_space<smem>>
      %c8_i32_199 = arith.constant 8 : i32
      %531 = arith.addi %111, %c8_i32_199 : i32
      %532 = arith.addi %531, %518 : i32
      %c0_i32_200 = arith.constant 0 : i32
      %533 = tpu.memref_slice %arg5[%530, %c0_i32_200] : memref<64x128xf32, #tpu.memory_space<any>> -> memref<1x128xf32, #tpu.memory_space<any>>
      %534 = tpu.memref_squeeze %533 : memref<1x128xf32, #tpu.memory_space<any>> -> memref<128xf32, #tpu.memory_space<any>>
      %c0_i32_201 = arith.constant 0 : i32
      %535 = tpu.memref_slice %arg7[%532, %c0_i32_201] : memref<112x128xf32, #tpu.memory_space<vmem>> -> memref<1x128xf32, #tpu.memory_space<vmem>>
      %536 = tpu.memref_squeeze %535 : memref<1x128xf32, #tpu.memory_space<vmem>> -> memref<128xf32, #tpu.memory_space<vmem>>
      %537 = tpu.memref_slice %arg8[%109] : memref<2x!tpu.dma_semaphore, #tpu.memory_space<semaphore_mem>> -> memref<1x!tpu.dma_semaphore, #tpu.memory_space<semaphore_mem>>
      %538 = tpu.memref_squeeze %537 : memref<1x!tpu.dma_semaphore, #tpu.memory_space<semaphore_mem>> -> memref<!tpu.dma_semaphore, #tpu.memory_space<semaphore_mem>>
      tpu.enqueue_dma source(%534 : memref<128xf32, #tpu.memory_space<any>>) target(%536 : memref<128xf32, #tpu.memory_space<vmem>>) target_semaphore(%538 : memref<!tpu.dma_semaphore, #tpu.memory_space<semaphore_mem>>)
      %c5_i32_202 = arith.constant 5 : i32
      %539 = arith.muli %519, %c5_i32_202 : i32
      %c0_i32_203 = arith.constant 0 : i32
      %540 = arith.addi %539, %c0_i32_203 : i32
      %541 = arith.index_cast %540 : i32 to index
      %542 = memref.load %arg3[%541] : memref<120xi32, #tpu.memory_space<smem>>
      %c16_i32_204 = arith.constant 16 : i32
      %543 = arith.addi %111, %c16_i32_204 : i32
      %544 = arith.addi %543, %518 : i32
      %c0_i32_205 = arith.constant 0 : i32
      %545 = tpu.memref_slice %arg5[%542, %c0_i32_205] : memref<64x128xf32, #tpu.memory_space<any>> -> memref<1x128xf32, #tpu.memory_space<any>>
      %546 = tpu.memref_squeeze %545 : memref<1x128xf32, #tpu.memory_space<any>> -> memref<128xf32, #tpu.memory_space<any>>
      %c0_i32_206 = arith.constant 0 : i32
      %547 = tpu.memref_slice %arg7[%544, %c0_i32_206] : memref<112x128xf32, #tpu.memory_space<vmem>> -> memref<1x128xf32, #tpu.memory_space<vmem>>
      %548 = tpu.memref_squeeze %547 : memref<1x128xf32, #tpu.memory_space<vmem>> -> memref<128xf32, #tpu.memory_space<vmem>>
      %549 = tpu.memref_slice %arg8[%109] : memref<2x!tpu.dma_semaphore, #tpu.memory_space<semaphore_mem>> -> memref<1x!tpu.dma_semaphore, #tpu.memory_space<semaphore_mem>>
      %550 = tpu.memref_squeeze %549 : memref<1x!tpu.dma_semaphore, #tpu.memory_space<semaphore_mem>> -> memref<!tpu.dma_semaphore, #tpu.memory_space<semaphore_mem>>
      tpu.enqueue_dma source(%546 : memref<128xf32, #tpu.memory_space<any>>) target(%548 : memref<128xf32, #tpu.memory_space<vmem>>) target_semaphore(%550 : memref<!tpu.dma_semaphore, #tpu.memory_space<semaphore_mem>>)
      %c5_i32_207 = arith.constant 5 : i32
      %551 = arith.muli %519, %c5_i32_207 : i32
      %c1_i32_208 = arith.constant 1 : i32
      %552 = arith.addi %551, %c1_i32_208 : i32
      %553 = arith.index_cast %552 : i32 to index
      %554 = memref.load %arg3[%553] : memref<120xi32, #tpu.memory_space<smem>>
      %c24_i32_209 = arith.constant 24 : i32
      %555 = arith.addi %111, %c24_i32_209 : i32
      %556 = arith.addi %555, %518 : i32
      %c0_i32_210 = arith.constant 0 : i32
      %557 = tpu.memref_slice %arg5[%554, %c0_i32_210] : memref<64x128xf32, #tpu.memory_space<any>> -> memref<1x128xf32, #tpu.memory_space<any>>
      %558 = tpu.memref_squeeze %557 : memref<1x128xf32, #tpu.memory_space<any>> -> memref<128xf32, #tpu.memory_space<any>>
      %c0_i32_211 = arith.constant 0 : i32
      %559 = tpu.memref_slice %arg7[%556, %c0_i32_211] : memref<112x128xf32, #tpu.memory_space<vmem>> -> memref<1x128xf32, #tpu.memory_space<vmem>>
      %560 = tpu.memref_squeeze %559 : memref<1x128xf32, #tpu.memory_space<vmem>> -> memref<128xf32, #tpu.memory_space<vmem>>
      %561 = tpu.memref_slice %arg8[%109] : memref<2x!tpu.dma_semaphore, #tpu.memory_space<semaphore_mem>> -> memref<1x!tpu.dma_semaphore, #tpu.memory_space<semaphore_mem>>
      %562 = tpu.memref_squeeze %561 : memref<1x!tpu.dma_semaphore, #tpu.memory_space<semaphore_mem>> -> memref<!tpu.dma_semaphore, #tpu.memory_space<semaphore_mem>>
      tpu.enqueue_dma source(%558 : memref<128xf32, #tpu.memory_space<any>>) target(%560 : memref<128xf32, #tpu.memory_space<vmem>>) target_semaphore(%562 : memref<!tpu.dma_semaphore, #tpu.memory_space<semaphore_mem>>)
      %c5_i32_212 = arith.constant 5 : i32
      %563 = arith.muli %519, %c5_i32_212 : i32
      %c2_i32_213 = arith.constant 2 : i32
      %564 = arith.addi %563, %c2_i32_213 : i32
      %565 = arith.index_cast %564 : i32 to index
      %566 = memref.load %arg3[%565] : memref<120xi32, #tpu.memory_space<smem>>
      %c32_i32_214 = arith.constant 32 : i32
      %567 = arith.addi %111, %c32_i32_214 : i32
      %568 = arith.addi %567, %518 : i32
      %c0_i32_215 = arith.constant 0 : i32
      %569 = tpu.memref_slice %arg5[%566, %c0_i32_215] : memref<64x128xf32, #tpu.memory_space<any>> -> memref<1x128xf32, #tpu.memory_space<any>>
      %570 = tpu.memref_squeeze %569 : memref<1x128xf32, #tpu.memory_space<any>> -> memref<128xf32, #tpu.memory_space<any>>
      %c0_i32_216 = arith.constant 0 : i32
      %571 = tpu.memref_slice %arg7[%568, %c0_i32_216] : memref<112x128xf32, #tpu.memory_space<vmem>> -> memref<1x128xf32, #tpu.memory_space<vmem>>
      %572 = tpu.memref_squeeze %571 : memref<1x128xf32, #tpu.memory_space<vmem>> -> memref<128xf32, #tpu.memory_space<vmem>>
      %573 = tpu.memref_slice %arg8[%109] : memref<2x!tpu.dma_semaphore, #tpu.memory_space<semaphore_mem>> -> memref<1x!tpu.dma_semaphore, #tpu.memory_space<semaphore_mem>>
      %574 = tpu.memref_squeeze %573 : memref<1x!tpu.dma_semaphore, #tpu.memory_space<semaphore_mem>> -> memref<!tpu.dma_semaphore, #tpu.memory_space<semaphore_mem>>
      tpu.enqueue_dma source(%570 : memref<128xf32, #tpu.memory_space<any>>) target(%572 : memref<128xf32, #tpu.memory_space<vmem>>) target_semaphore(%574 : memref<!tpu.dma_semaphore, #tpu.memory_space<semaphore_mem>>)
      %c5_i32_217 = arith.constant 5 : i32
      %575 = arith.muli %519, %c5_i32_217 : i32
      %c3_i32_218 = arith.constant 3 : i32
      %576 = arith.addi %575, %c3_i32_218 : i32
      %577 = arith.index_cast %576 : i32 to index
      %578 = memref.load %arg3[%577] : memref<120xi32, #tpu.memory_space<smem>>
      %c40_i32_219 = arith.constant 40 : i32
      %579 = arith.addi %111, %c40_i32_219 : i32
      %580 = arith.addi %579, %518 : i32
      %c0_i32_220 = arith.constant 0 : i32
      %581 = tpu.memref_slice %arg5[%578, %c0_i32_220] : memref<64x128xf32, #tpu.memory_space<any>> -> memref<1x128xf32, #tpu.memory_space<any>>
      %582 = tpu.memref_squeeze %581 : memref<1x128xf32, #tpu.memory_space<any>> -> memref<128xf32, #tpu.memory_space<any>>
      %c0_i32_221 = arith.constant 0 : i32
      %583 = tpu.memref_slice %arg7[%580, %c0_i32_221] : memref<112x128xf32, #tpu.memory_space<vmem>> -> memref<1x128xf32, #tpu.memory_space<vmem>>
      %584 = tpu.memref_squeeze %583 : memref<1x128xf32, #tpu.memory_space<vmem>> -> memref<128xf32, #tpu.memory_space<vmem>>
      %585 = tpu.memref_slice %arg8[%109] : memref<2x!tpu.dma_semaphore, #tpu.memory_space<semaphore_mem>> -> memref<1x!tpu.dma_semaphore, #tpu.memory_space<semaphore_mem>>
      %586 = tpu.memref_squeeze %585 : memref<1x!tpu.dma_semaphore, #tpu.memory_space<semaphore_mem>> -> memref<!tpu.dma_semaphore, #tpu.memory_space<semaphore_mem>>
      tpu.enqueue_dma source(%582 : memref<128xf32, #tpu.memory_space<any>>) target(%584 : memref<128xf32, #tpu.memory_space<vmem>>) target_semaphore(%586 : memref<!tpu.dma_semaphore, #tpu.memory_space<semaphore_mem>>)
      %c5_i32_222 = arith.constant 5 : i32
      %587 = arith.muli %519, %c5_i32_222 : i32
      %c4_i32_223 = arith.constant 4 : i32
      %588 = arith.addi %587, %c4_i32_223 : i32
      %589 = arith.index_cast %588 : i32 to index
      %590 = memref.load %arg3[%589] : memref<120xi32, #tpu.memory_space<smem>>
      %c48_i32_224 = arith.constant 48 : i32
      %591 = arith.addi %111, %c48_i32_224 : i32
      %592 = arith.addi %591, %518 : i32
      %c0_i32_225 = arith.constant 0 : i32
      %593 = tpu.memref_slice %arg5[%590, %c0_i32_225] : memref<64x128xf32, #tpu.memory_space<any>> -> memref<1x128xf32, #tpu.memory_space<any>>
      %594 = tpu.memref_squeeze %593 : memref<1x128xf32, #tpu.memory_space<any>> -> memref<128xf32, #tpu.memory_space<any>>
      %c0_i32_226 = arith.constant 0 : i32
      %595 = tpu.memref_slice %arg7[%592, %c0_i32_226] : memref<112x128xf32, #tpu.memory_space<vmem>> -> memref<1x128xf32, #tpu.memory_space<vmem>>
      %596 = tpu.memref_squeeze %595 : memref<1x128xf32, #tpu.memory_space<vmem>> -> memref<128xf32, #tpu.memory_space<vmem>>
      %597 = tpu.memref_slice %arg8[%109] : memref<2x!tpu.dma_semaphore, #tpu.memory_space<semaphore_mem>> -> memref<1x!tpu.dma_semaphore, #tpu.memory_space<semaphore_mem>>
      %598 = tpu.memref_squeeze %597 : memref<1x!tpu.dma_semaphore, #tpu.memory_space<semaphore_mem>> -> memref<!tpu.dma_semaphore, #tpu.memory_space<semaphore_mem>>
      tpu.enqueue_dma source(%594 : memref<128xf32, #tpu.memory_space<any>>) target(%596 : memref<128xf32, #tpu.memory_space<vmem>>) target_semaphore(%598 : memref<!tpu.dma_semaphore, #tpu.memory_space<semaphore_mem>>)
      %c6_i32 = arith.constant 6 : i32
      %599 = arith.addi %112, %c6_i32 : i32
      %600 = arith.addi %110, %599 : i32
      %601 = arith.index_cast %600 : i32 to index
      %602 = memref.load %arg1[%601] : memref<24xi32, #tpu.memory_space<smem>>
      %603 = arith.addi %111, %599 : i32
      %c0_i32_227 = arith.constant 0 : i32
      %604 = tpu.memref_slice %arg4[%602, %c0_i32_227] : memref<64x128xf32, #tpu.memory_space<any>> -> memref<1x128xf32, #tpu.memory_space<any>>
      %605 = tpu.memref_squeeze %604 : memref<1x128xf32, #tpu.memory_space<any>> -> memref<128xf32, #tpu.memory_space<any>>
      %c0_i32_228 = arith.constant 0 : i32
      %606 = tpu.memref_slice %arg7[%603, %c0_i32_228] : memref<112x128xf32, #tpu.memory_space<vmem>> -> memref<1x128xf32, #tpu.memory_space<vmem>>
      %607 = tpu.memref_squeeze %606 : memref<1x128xf32, #tpu.memory_space<vmem>> -> memref<128xf32, #tpu.memory_space<vmem>>
      %608 = tpu.memref_slice %arg8[%109] : memref<2x!tpu.dma_semaphore, #tpu.memory_space<semaphore_mem>> -> memref<1x!tpu.dma_semaphore, #tpu.memory_space<semaphore_mem>>
      %609 = tpu.memref_squeeze %608 : memref<1x!tpu.dma_semaphore, #tpu.memory_space<semaphore_mem>> -> memref<!tpu.dma_semaphore, #tpu.memory_space<semaphore_mem>>
      tpu.enqueue_dma source(%605 : memref<128xf32, #tpu.memory_space<any>>) target(%607 : memref<128xf32, #tpu.memory_space<vmem>>) target_semaphore(%609 : memref<!tpu.dma_semaphore, #tpu.memory_space<semaphore_mem>>)
      %610 = arith.index_cast %600 : i32 to index
      %611 = memref.load %arg2[%610] : memref<24xi32, #tpu.memory_space<smem>>
      %c8_i32_229 = arith.constant 8 : i32
      %612 = arith.addi %111, %c8_i32_229 : i32
      %613 = arith.addi %612, %599 : i32
      %c0_i32_230 = arith.constant 0 : i32
      %614 = tpu.memref_slice %arg5[%611, %c0_i32_230] : memref<64x128xf32, #tpu.memory_space<any>> -> memref<1x128xf32, #tpu.memory_space<any>>
      %615 = tpu.memref_squeeze %614 : memref<1x128xf32, #tpu.memory_space<any>> -> memref<128xf32, #tpu.memory_space<any>>
      %c0_i32_231 = arith.constant 0 : i32
      %616 = tpu.memref_slice %arg7[%613, %c0_i32_231] : memref<112x128xf32, #tpu.memory_space<vmem>> -> memref<1x128xf32, #tpu.memory_space<vmem>>
      %617 = tpu.memref_squeeze %616 : memref<1x128xf32, #tpu.memory_space<vmem>> -> memref<128xf32, #tpu.memory_space<vmem>>
      %618 = tpu.memref_slice %arg8[%109] : memref<2x!tpu.dma_semaphore, #tpu.memory_space<semaphore_mem>> -> memref<1x!tpu.dma_semaphore, #tpu.memory_space<semaphore_mem>>
      %619 = tpu.memref_squeeze %618 : memref<1x!tpu.dma_semaphore, #tpu.memory_space<semaphore_mem>> -> memref<!tpu.dma_semaphore, #tpu.memory_space<semaphore_mem>>
      tpu.enqueue_dma source(%615 : memref<128xf32, #tpu.memory_space<any>>) target(%617 : memref<128xf32, #tpu.memory_space<vmem>>) target_semaphore(%619 : memref<!tpu.dma_semaphore, #tpu.memory_space<semaphore_mem>>)
      %c5_i32_232 = arith.constant 5 : i32
      %620 = arith.muli %600, %c5_i32_232 : i32
      %c0_i32_233 = arith.constant 0 : i32
      %621 = arith.addi %620, %c0_i32_233 : i32
      %622 = arith.index_cast %621 : i32 to index
      %623 = memref.load %arg3[%622] : memref<120xi32, #tpu.memory_space<smem>>
      %c16_i32_234 = arith.constant 16 : i32
      %624 = arith.addi %111, %c16_i32_234 : i32
      %625 = arith.addi %624, %599 : i32
      %c0_i32_235 = arith.constant 0 : i32
      %626 = tpu.memref_slice %arg5[%623, %c0_i32_235] : memref<64x128xf32, #tpu.memory_space<any>> -> memref<1x128xf32, #tpu.memory_space<any>>
      %627 = tpu.memref_squeeze %626 : memref<1x128xf32, #tpu.memory_space<any>> -> memref<128xf32, #tpu.memory_space<any>>
      %c0_i32_236 = arith.constant 0 : i32
      %628 = tpu.memref_slice %arg7[%625, %c0_i32_236] : memref<112x128xf32, #tpu.memory_space<vmem>> -> memref<1x128xf32, #tpu.memory_space<vmem>>
      %629 = tpu.memref_squeeze %628 : memref<1x128xf32, #tpu.memory_space<vmem>> -> memref<128xf32, #tpu.memory_space<vmem>>
      %630 = tpu.memref_slice %arg8[%109] : memref<2x!tpu.dma_semaphore, #tpu.memory_space<semaphore_mem>> -> memref<1x!tpu.dma_semaphore, #tpu.memory_space<semaphore_mem>>
      %631 = tpu.memref_squeeze %630 : memref<1x!tpu.dma_semaphore, #tpu.memory_space<semaphore_mem>> -> memref<!tpu.dma_semaphore, #tpu.memory_space<semaphore_mem>>
      tpu.enqueue_dma source(%627 : memref<128xf32, #tpu.memory_space<any>>) target(%629 : memref<128xf32, #tpu.memory_space<vmem>>) target_semaphore(%631 : memref<!tpu.dma_semaphore, #tpu.memory_space<semaphore_mem>>)
      %c5_i32_237 = arith.constant 5 : i32
      %632 = arith.muli %600, %c5_i32_237 : i32
      %c1_i32_238 = arith.constant 1 : i32
      %633 = arith.addi %632, %c1_i32_238 : i32
      %634 = arith.index_cast %633 : i32 to index
      %635 = memref.load %arg3[%634] : memref<120xi32, #tpu.memory_space<smem>>
      %c24_i32_239 = arith.constant 24 : i32
      %636 = arith.addi %111, %c24_i32_239 : i32
      %637 = arith.addi %636, %599 : i32
      %c0_i32_240 = arith.constant 0 : i32
      %638 = tpu.memref_slice %arg5[%635, %c0_i32_240] : memref<64x128xf32, #tpu.memory_space<any>> -> memref<1x128xf32, #tpu.memory_space<any>>
      %639 = tpu.memref_squeeze %638 : memref<1x128xf32, #tpu.memory_space<any>> -> memref<128xf32, #tpu.memory_space<any>>
      %c0_i32_241 = arith.constant 0 : i32
      %640 = tpu.memref_slice %arg7[%637, %c0_i32_241] : memref<112x128xf32, #tpu.memory_space<vmem>> -> memref<1x128xf32, #tpu.memory_space<vmem>>
      %641 = tpu.memref_squeeze %640 : memref<1x128xf32, #tpu.memory_space<vmem>> -> memref<128xf32, #tpu.memory_space<vmem>>
      %642 = tpu.memref_slice %arg8[%109] : memref<2x!tpu.dma_semaphore, #tpu.memory_space<semaphore_mem>> -> memref<1x!tpu.dma_semaphore, #tpu.memory_space<semaphore_mem>>
      %643 = tpu.memref_squeeze %642 : memref<1x!tpu.dma_semaphore, #tpu.memory_space<semaphore_mem>> -> memref<!tpu.dma_semaphore, #tpu.memory_space<semaphore_mem>>
      tpu.enqueue_dma source(%639 : memref<128xf32, #tpu.memory_space<any>>) target(%641 : memref<128xf32, #tpu.memory_space<vmem>>) target_semaphore(%643 : memref<!tpu.dma_semaphore, #tpu.memory_space<semaphore_mem>>)
      %c5_i32_242 = arith.constant 5 : i32
      %644 = arith.muli %600, %c5_i32_242 : i32
      %c2_i32_243 = arith.constant 2 : i32
      %645 = arith.addi %644, %c2_i32_243 : i32
      %646 = arith.index_cast %645 : i32 to index
      %647 = memref.load %arg3[%646] : memref<120xi32, #tpu.memory_space<smem>>
      %c32_i32_244 = arith.constant 32 : i32
      %648 = arith.addi %111, %c32_i32_244 : i32
      %649 = arith.addi %648, %599 : i32
      %c0_i32_245 = arith.constant 0 : i32
      %650 = tpu.memref_slice %arg5[%647, %c0_i32_245] : memref<64x128xf32, #tpu.memory_space<any>> -> memref<1x128xf32, #tpu.memory_space<any>>
      %651 = tpu.memref_squeeze %650 : memref<1x128xf32, #tpu.memory_space<any>> -> memref<128xf32, #tpu.memory_space<any>>
      %c0_i32_246 = arith.constant 0 : i32
      %652 = tpu.memref_slice %arg7[%649, %c0_i32_246] : memref<112x128xf32, #tpu.memory_space<vmem>> -> memref<1x128xf32, #tpu.memory_space<vmem>>
      %653 = tpu.memref_squeeze %652 : memref<1x128xf32, #tpu.memory_space<vmem>> -> memref<128xf32, #tpu.memory_space<vmem>>
      %654 = tpu.memref_slice %arg8[%109] : memref<2x!tpu.dma_semaphore, #tpu.memory_space<semaphore_mem>> -> memref<1x!tpu.dma_semaphore, #tpu.memory_space<semaphore_mem>>
      %655 = tpu.memref_squeeze %654 : memref<1x!tpu.dma_semaphore, #tpu.memory_space<semaphore_mem>> -> memref<!tpu.dma_semaphore, #tpu.memory_space<semaphore_mem>>
      tpu.enqueue_dma source(%651 : memref<128xf32, #tpu.memory_space<any>>) target(%653 : memref<128xf32, #tpu.memory_space<vmem>>) target_semaphore(%655 : memref<!tpu.dma_semaphore, #tpu.memory_space<semaphore_mem>>)
      %c5_i32_247 = arith.constant 5 : i32
      %656 = arith.muli %600, %c5_i32_247 : i32
      %c3_i32_248 = arith.constant 3 : i32
      %657 = arith.addi %656, %c3_i32_248 : i32
      %658 = arith.index_cast %657 : i32 to index
      %659 = memref.load %arg3[%658] : memref<120xi32, #tpu.memory_space<smem>>
      %c40_i32_249 = arith.constant 40 : i32
      %660 = arith.addi %111, %c40_i32_249 : i32
      %661 = arith.addi %660, %599 : i32
      %c0_i32_250 = arith.constant 0 : i32
      %662 = tpu.memref_slice %arg5[%659, %c0_i32_250] : memref<64x128xf32, #tpu.memory_space<any>> -> memref<1x128xf32, #tpu.memory_space<any>>
      %663 = tpu.memref_squeeze %662 : memref<1x128xf32, #tpu.memory_space<any>> -> memref<128xf32, #tpu.memory_space<any>>
      %c0_i32_251 = arith.constant 0 : i32
      %664 = tpu.memref_slice %arg7[%661, %c0_i32_251] : memref<112x128xf32, #tpu.memory_space<vmem>> -> memref<1x128xf32, #tpu.memory_space<vmem>>
      %665 = tpu.memref_squeeze %664 : memref<1x128xf32, #tpu.memory_space<vmem>> -> memref<128xf32, #tpu.memory_space<vmem>>
      %666 = tpu.memref_slice %arg8[%109] : memref<2x!tpu.dma_semaphore, #tpu.memory_space<semaphore_mem>> -> memref<1x!tpu.dma_semaphore, #tpu.memory_space<semaphore_mem>>
      %667 = tpu.memref_squeeze %666 : memref<1x!tpu.dma_semaphore, #tpu.memory_space<semaphore_mem>> -> memref<!tpu.dma_semaphore, #tpu.memory_space<semaphore_mem>>
      tpu.enqueue_dma source(%663 : memref<128xf32, #tpu.memory_space<any>>) target(%665 : memref<128xf32, #tpu.memory_space<vmem>>) target_semaphore(%667 : memref<!tpu.dma_semaphore, #tpu.memory_space<semaphore_mem>>)
      %c5_i32_252 = arith.constant 5 : i32
      %668 = arith.muli %600, %c5_i32_252 : i32
      %c4_i32_253 = arith.constant 4 : i32
      %669 = arith.addi %668, %c4_i32_253 : i32
      %670 = arith.index_cast %669 : i32 to index
      %671 = memref.load %arg3[%670] : memref<120xi32, #tpu.memory_space<smem>>
      %c48_i32_254 = arith.constant 48 : i32
      %672 = arith.addi %111, %c48_i32_254 : i32
      %673 = arith.addi %672, %599 : i32
      %c0_i32_255 = arith.constant 0 : i32
      %674 = tpu.memref_slice %arg5[%671, %c0_i32_255] : memref<64x128xf32, #tpu.memory_space<any>> -> memref<1x128xf32, #tpu.memory_space<any>>
      %675 = tpu.memref_squeeze %674 : memref<1x128xf32, #tpu.memory_space<any>> -> memref<128xf32, #tpu.memory_space<any>>
      %c0_i32_256 = arith.constant 0 : i32
      %676 = tpu.memref_slice %arg7[%673, %c0_i32_256] : memref<112x128xf32, #tpu.memory_space<vmem>> -> memref<1x128xf32, #tpu.memory_space<vmem>>
      %677 = tpu.memref_squeeze %676 : memref<1x128xf32, #tpu.memory_space<vmem>> -> memref<128xf32, #tpu.memory_space<vmem>>
      %678 = tpu.memref_slice %arg8[%109] : memref<2x!tpu.dma_semaphore, #tpu.memory_space<semaphore_mem>> -> memref<1x!tpu.dma_semaphore, #tpu.memory_space<semaphore_mem>>
      %679 = tpu.memref_squeeze %678 : memref<1x!tpu.dma_semaphore, #tpu.memory_space<semaphore_mem>> -> memref<!tpu.dma_semaphore, #tpu.memory_space<semaphore_mem>>
      tpu.enqueue_dma source(%675 : memref<128xf32, #tpu.memory_space<any>>) target(%677 : memref<128xf32, #tpu.memory_space<vmem>>) target_semaphore(%679 : memref<!tpu.dma_semaphore, #tpu.memory_space<semaphore_mem>>)
      %c7_i32 = arith.constant 7 : i32
      %680 = arith.addi %112, %c7_i32 : i32
      %681 = arith.addi %110, %680 : i32
      %682 = arith.index_cast %681 : i32 to index
      %683 = memref.load %arg1[%682] : memref<24xi32, #tpu.memory_space<smem>>
      %684 = arith.addi %111, %680 : i32
      %c0_i32_257 = arith.constant 0 : i32
      %685 = tpu.memref_slice %arg4[%683, %c0_i32_257] : memref<64x128xf32, #tpu.memory_space<any>> -> memref<1x128xf32, #tpu.memory_space<any>>
      %686 = tpu.memref_squeeze %685 : memref<1x128xf32, #tpu.memory_space<any>> -> memref<128xf32, #tpu.memory_space<any>>
      %c0_i32_258 = arith.constant 0 : i32
      %687 = tpu.memref_slice %arg7[%684, %c0_i32_258] : memref<112x128xf32, #tpu.memory_space<vmem>> -> memref<1x128xf32, #tpu.memory_space<vmem>>
      %688 = tpu.memref_squeeze %687 : memref<1x128xf32, #tpu.memory_space<vmem>> -> memref<128xf32, #tpu.memory_space<vmem>>
      %689 = tpu.memref_slice %arg8[%109] : memref<2x!tpu.dma_semaphore, #tpu.memory_space<semaphore_mem>> -> memref<1x!tpu.dma_semaphore, #tpu.memory_space<semaphore_mem>>
      %690 = tpu.memref_squeeze %689 : memref<1x!tpu.dma_semaphore, #tpu.memory_space<semaphore_mem>> -> memref<!tpu.dma_semaphore, #tpu.memory_space<semaphore_mem>>
      tpu.enqueue_dma source(%686 : memref<128xf32, #tpu.memory_space<any>>) target(%688 : memref<128xf32, #tpu.memory_space<vmem>>) target_semaphore(%690 : memref<!tpu.dma_semaphore, #tpu.memory_space<semaphore_mem>>)
      %691 = arith.index_cast %681 : i32 to index
      %692 = memref.load %arg2[%691] : memref<24xi32, #tpu.memory_space<smem>>
      %c8_i32_259 = arith.constant 8 : i32
      %693 = arith.addi %111, %c8_i32_259 : i32
      %694 = arith.addi %693, %680 : i32
      %c0_i32_260 = arith.constant 0 : i32
      %695 = tpu.memref_slice %arg5[%692, %c0_i32_260] : memref<64x128xf32, #tpu.memory_space<any>> -> memref<1x128xf32, #tpu.memory_space<any>>
      %696 = tpu.memref_squeeze %695 : memref<1x128xf32, #tpu.memory_space<any>> -> memref<128xf32, #tpu.memory_space<any>>
      %c0_i32_261 = arith.constant 0 : i32
      %697 = tpu.memref_slice %arg7[%694, %c0_i32_261] : memref<112x128xf32, #tpu.memory_space<vmem>> -> memref<1x128xf32, #tpu.memory_space<vmem>>
      %698 = tpu.memref_squeeze %697 : memref<1x128xf32, #tpu.memory_space<vmem>> -> memref<128xf32, #tpu.memory_space<vmem>>
      %699 = tpu.memref_slice %arg8[%109] : memref<2x!tpu.dma_semaphore, #tpu.memory_space<semaphore_mem>> -> memref<1x!tpu.dma_semaphore, #tpu.memory_space<semaphore_mem>>
      %700 = tpu.memref_squeeze %699 : memref<1x!tpu.dma_semaphore, #tpu.memory_space<semaphore_mem>> -> memref<!tpu.dma_semaphore, #tpu.memory_space<semaphore_mem>>
      tpu.enqueue_dma source(%696 : memref<128xf32, #tpu.memory_space<any>>) target(%698 : memref<128xf32, #tpu.memory_space<vmem>>) target_semaphore(%700 : memref<!tpu.dma_semaphore, #tpu.memory_space<semaphore_mem>>)
      %c5_i32_262 = arith.constant 5 : i32
      %701 = arith.muli %681, %c5_i32_262 : i32
      %c0_i32_263 = arith.constant 0 : i32
      %702 = arith.addi %701, %c0_i32_263 : i32
      %703 = arith.index_cast %702 : i32 to index
      %704 = memref.load %arg3[%703] : memref<120xi32, #tpu.memory_space<smem>>
      %c16_i32_264 = arith.constant 16 : i32
      %705 = arith.addi %111, %c16_i32_264 : i32
      %706 = arith.addi %705, %680 : i32
      %c0_i32_265 = arith.constant 0 : i32
      %707 = tpu.memref_slice %arg5[%704, %c0_i32_265] : memref<64x128xf32, #tpu.memory_space<any>> -> memref<1x128xf32, #tpu.memory_space<any>>
      %708 = tpu.memref_squeeze %707 : memref<1x128xf32, #tpu.memory_space<any>> -> memref<128xf32, #tpu.memory_space<any>>
      %c0_i32_266 = arith.constant 0 : i32
      %709 = tpu.memref_slice %arg7[%706, %c0_i32_266] : memref<112x128xf32, #tpu.memory_space<vmem>> -> memref<1x128xf32, #tpu.memory_space<vmem>>
      %710 = tpu.memref_squeeze %709 : memref<1x128xf32, #tpu.memory_space<vmem>> -> memref<128xf32, #tpu.memory_space<vmem>>
      %711 = tpu.memref_slice %arg8[%109] : memref<2x!tpu.dma_semaphore, #tpu.memory_space<semaphore_mem>> -> memref<1x!tpu.dma_semaphore, #tpu.memory_space<semaphore_mem>>
      %712 = tpu.memref_squeeze %711 : memref<1x!tpu.dma_semaphore, #tpu.memory_space<semaphore_mem>> -> memref<!tpu.dma_semaphore, #tpu.memory_space<semaphore_mem>>
      tpu.enqueue_dma source(%708 : memref<128xf32, #tpu.memory_space<any>>) target(%710 : memref<128xf32, #tpu.memory_space<vmem>>) target_semaphore(%712 : memref<!tpu.dma_semaphore, #tpu.memory_space<semaphore_mem>>)
      %c5_i32_267 = arith.constant 5 : i32
      %713 = arith.muli %681, %c5_i32_267 : i32
      %c1_i32_268 = arith.constant 1 : i32
      %714 = arith.addi %713, %c1_i32_268 : i32
      %715 = arith.index_cast %714 : i32 to index
      %716 = memref.load %arg3[%715] : memref<120xi32, #tpu.memory_space<smem>>
      %c24_i32_269 = arith.constant 24 : i32
      %717 = arith.addi %111, %c24_i32_269 : i32
      %718 = arith.addi %717, %680 : i32
      %c0_i32_270 = arith.constant 0 : i32
      %719 = tpu.memref_slice %arg5[%716, %c0_i32_270] : memref<64x128xf32, #tpu.memory_space<any>> -> memref<1x128xf32, #tpu.memory_space<any>>
      %720 = tpu.memref_squeeze %719 : memref<1x128xf32, #tpu.memory_space<any>> -> memref<128xf32, #tpu.memory_space<any>>
      %c0_i32_271 = arith.constant 0 : i32
      %721 = tpu.memref_slice %arg7[%718, %c0_i32_271] : memref<112x128xf32, #tpu.memory_space<vmem>> -> memref<1x128xf32, #tpu.memory_space<vmem>>
      %722 = tpu.memref_squeeze %721 : memref<1x128xf32, #tpu.memory_space<vmem>> -> memref<128xf32, #tpu.memory_space<vmem>>
      %723 = tpu.memref_slice %arg8[%109] : memref<2x!tpu.dma_semaphore, #tpu.memory_space<semaphore_mem>> -> memref<1x!tpu.dma_semaphore, #tpu.memory_space<semaphore_mem>>
      %724 = tpu.memref_squeeze %723 : memref<1x!tpu.dma_semaphore, #tpu.memory_space<semaphore_mem>> -> memref<!tpu.dma_semaphore, #tpu.memory_space<semaphore_mem>>
      tpu.enqueue_dma source(%720 : memref<128xf32, #tpu.memory_space<any>>) target(%722 : memref<128xf32, #tpu.memory_space<vmem>>) target_semaphore(%724 : memref<!tpu.dma_semaphore, #tpu.memory_space<semaphore_mem>>)
      %c5_i32_272 = arith.constant 5 : i32
      %725 = arith.muli %681, %c5_i32_272 : i32
      %c2_i32_273 = arith.constant 2 : i32
      %726 = arith.addi %725, %c2_i32_273 : i32
      %727 = arith.index_cast %726 : i32 to index
      %728 = memref.load %arg3[%727] : memref<120xi32, #tpu.memory_space<smem>>
      %c32_i32_274 = arith.constant 32 : i32
      %729 = arith.addi %111, %c32_i32_274 : i32
      %730 = arith.addi %729, %680 : i32
      %c0_i32_275 = arith.constant 0 : i32
      %731 = tpu.memref_slice %arg5[%728, %c0_i32_275] : memref<64x128xf32, #tpu.memory_space<any>> -> memref<1x128xf32, #tpu.memory_space<any>>
      %732 = tpu.memref_squeeze %731 : memref<1x128xf32, #tpu.memory_space<any>> -> memref<128xf32, #tpu.memory_space<any>>
      %c0_i32_276 = arith.constant 0 : i32
      %733 = tpu.memref_slice %arg7[%730, %c0_i32_276] : memref<112x128xf32, #tpu.memory_space<vmem>> -> memref<1x128xf32, #tpu.memory_space<vmem>>
      %734 = tpu.memref_squeeze %733 : memref<1x128xf32, #tpu.memory_space<vmem>> -> memref<128xf32, #tpu.memory_space<vmem>>
      %735 = tpu.memref_slice %arg8[%109] : memref<2x!tpu.dma_semaphore, #tpu.memory_space<semaphore_mem>> -> memref<1x!tpu.dma_semaphore, #tpu.memory_space<semaphore_mem>>
      %736 = tpu.memref_squeeze %735 : memref<1x!tpu.dma_semaphore, #tpu.memory_space<semaphore_mem>> -> memref<!tpu.dma_semaphore, #tpu.memory_space<semaphore_mem>>
      tpu.enqueue_dma source(%732 : memref<128xf32, #tpu.memory_space<any>>) target(%734 : memref<128xf32, #tpu.memory_space<vmem>>) target_semaphore(%736 : memref<!tpu.dma_semaphore, #tpu.memory_space<semaphore_mem>>)
      %c5_i32_277 = arith.constant 5 : i32
      %737 = arith.muli %681, %c5_i32_277 : i32
      %c3_i32_278 = arith.constant 3 : i32
      %738 = arith.addi %737, %c3_i32_278 : i32
      %739 = arith.index_cast %738 : i32 to index
      %740 = memref.load %arg3[%739] : memref<120xi32, #tpu.memory_space<smem>>
      %c40_i32_279 = arith.constant 40 : i32
      %741 = arith.addi %111, %c40_i32_279 : i32
      %742 = arith.addi %741, %680 : i32
      %c0_i32_280 = arith.constant 0 : i32
      %743 = tpu.memref_slice %arg5[%740, %c0_i32_280] : memref<64x128xf32, #tpu.memory_space<any>> -> memref<1x128xf32, #tpu.memory_space<any>>
      %744 = tpu.memref_squeeze %743 : memref<1x128xf32, #tpu.memory_space<any>> -> memref<128xf32, #tpu.memory_space<any>>
      %c0_i32_281 = arith.constant 0 : i32
      %745 = tpu.memref_slice %arg7[%742, %c0_i32_281] : memref<112x128xf32, #tpu.memory_space<vmem>> -> memref<1x128xf32, #tpu.memory_space<vmem>>
      %746 = tpu.memref_squeeze %745 : memref<1x128xf32, #tpu.memory_space<vmem>> -> memref<128xf32, #tpu.memory_space<vmem>>
      %747 = tpu.memref_slice %arg8[%109] : memref<2x!tpu.dma_semaphore, #tpu.memory_space<semaphore_mem>> -> memref<1x!tpu.dma_semaphore, #tpu.memory_space<semaphore_mem>>
      %748 = tpu.memref_squeeze %747 : memref<1x!tpu.dma_semaphore, #tpu.memory_space<semaphore_mem>> -> memref<!tpu.dma_semaphore, #tpu.memory_space<semaphore_mem>>
      tpu.enqueue_dma source(%744 : memref<128xf32, #tpu.memory_space<any>>) target(%746 : memref<128xf32, #tpu.memory_space<vmem>>) target_semaphore(%748 : memref<!tpu.dma_semaphore, #tpu.memory_space<semaphore_mem>>)
      %c5_i32_282 = arith.constant 5 : i32
      %749 = arith.muli %681, %c5_i32_282 : i32
      %c4_i32_283 = arith.constant 4 : i32
      %750 = arith.addi %749, %c4_i32_283 : i32
      %751 = arith.index_cast %750 : i32 to index
      %752 = memref.load %arg3[%751] : memref<120xi32, #tpu.memory_space<smem>>
      %c48_i32_284 = arith.constant 48 : i32
      %753 = arith.addi %111, %c48_i32_284 : i32
      %754 = arith.addi %753, %680 : i32
      %c0_i32_285 = arith.constant 0 : i32
      %755 = tpu.memref_slice %arg5[%752, %c0_i32_285] : memref<64x128xf32, #tpu.memory_space<any>> -> memref<1x128xf32, #tpu.memory_space<any>>
      %756 = tpu.memref_squeeze %755 : memref<1x128xf32, #tpu.memory_space<any>> -> memref<128xf32, #tpu.memory_space<any>>
      %c0_i32_286 = arith.constant 0 : i32
      %757 = tpu.memref_slice %arg7[%754, %c0_i32_286] : memref<112x128xf32, #tpu.memory_space<vmem>> -> memref<1x128xf32, #tpu.memory_space<vmem>>
      %758 = tpu.memref_squeeze %757 : memref<1x128xf32, #tpu.memory_space<vmem>> -> memref<128xf32, #tpu.memory_space<vmem>>
      %759 = tpu.memref_slice %arg8[%109] : memref<2x!tpu.dma_semaphore, #tpu.memory_space<semaphore_mem>> -> memref<1x!tpu.dma_semaphore, #tpu.memory_space<semaphore_mem>>
      %760 = tpu.memref_squeeze %759 : memref<1x!tpu.dma_semaphore, #tpu.memory_space<semaphore_mem>> -> memref<!tpu.dma_semaphore, #tpu.memory_space<semaphore_mem>>
      tpu.enqueue_dma source(%756 : memref<128xf32, #tpu.memory_space<any>>) target(%758 : memref<128xf32, #tpu.memory_space<vmem>>) target_semaphore(%760 : memref<!tpu.dma_semaphore, #tpu.memory_space<semaphore_mem>>)
      %c1_i32_287 = arith.constant 1 : i32
    } else {
    }
    %c56_i32 = arith.constant 56 : i32
    %17 = arith.muli %9, %c56_i32 : i32
    %18 = tpu.assume_multiple %17, 8 : i32
    %c0_i32_7 = arith.constant 0 : i32
    %19 = tpu.memref_slice %arg7[%18, %c0_i32_7] : memref<112x128xf32, #tpu.memory_space<vmem>> -> memref<56x128xf32, #tpu.memory_space<vmem>>
    %c0_i32_8 = arith.constant 0 : i32
    %20 = tpu.memref_slice %arg7[%18, %c0_i32_8] : memref<112x128xf32, #tpu.memory_space<vmem>> -> memref<56x128xf32, #tpu.memory_space<vmem>>
    %21 = tpu.memref_slice %arg8[%9] : memref<2x!tpu.dma_semaphore, #tpu.memory_space<semaphore_mem>> -> memref<1x!tpu.dma_semaphore, #tpu.memory_space<semaphore_mem>>
    %22 = tpu.memref_squeeze %21 : memref<1x!tpu.dma_semaphore, #tpu.memory_space<semaphore_mem>> -> memref<!tpu.dma_semaphore, #tpu.memory_space<semaphore_mem>>
    tpu.wait_dma2 semaphore(%22 : memref<!tpu.dma_semaphore, #tpu.memory_space<semaphore_mem>>) src(%19 : memref<56x128xf32, #tpu.memory_space<vmem>>) dst(%20 : memref<56x128xf32, #tpu.memory_space<vmem>>)
    %c56_i32_9 = arith.constant 56 : i32
    %23 = arith.muli %9, %c56_i32_9 : i32
    %24 = tpu.assume_multiple %23, 8 : i32
    %25 = arith.index_cast %24 : i32 to index
    %c0 = arith.constant 0 : index
    %26 = vector.load %arg7[%25, %c0] : memref<112x128xf32, #tpu.memory_space<vmem>>, vector<8x128xf32>
    %c8_i32 = arith.constant 8 : i32
    %27 = arith.addi %24, %c8_i32 : i32
    %28 = arith.index_cast %27 : i32 to index
    %c0_10 = arith.constant 0 : index
    %29 = vector.load %arg7[%28, %c0_10] : memref<112x128xf32, #tpu.memory_space<vmem>>, vector<8x128xf32>
    %30 = arith.mulf %29, %26 : vector<8x128xf32>
    %31 = vector.shape_cast %30 : vector<8x128xf32> to vector<1x8x128xf32>
    %cst = arith.constant dense<0.000000e+00> : vector<1x8xf32>
    %32 = vector.multi_reduction <add>, %31, %cst [2] : vector<1x8x128xf32> to vector<1x8xf32>
    %c16_i32 = arith.constant 16 : i32
    %33 = arith.addi %24, %c16_i32 : i32
    %34 = tpu.assume_multiple %33, 8 : i32
    %35 = arith.index_cast %34 : i32 to index
    %c0_11 = arith.constant 0 : index
    %36 = vector.load %arg7[%35, %c0_11] : memref<112x128xf32, #tpu.memory_space<vmem>>, vector<8x128xf32>
    %37 = arith.mulf %36, %26 : vector<8x128xf32>
    %38 = vector.shape_cast %37 : vector<8x128xf32> to vector<1x8x128xf32>
    %cst_12 = arith.constant dense<0.000000e+00> : vector<1x8xf32>
    %39 = vector.multi_reduction <add>, %38, %cst_12 [2] : vector<1x8x128xf32> to vector<1x8xf32>
    %cst_13 = arith.constant 0.000000e+00 : f32
    %40 = vector.broadcast %cst_13 : f32 to vector<1x8xf32>
    %41 = arith.subf %40, %39 : vector<1x8xf32>
    %c24_i32 = arith.constant 24 : i32
    %42 = arith.addi %24, %c24_i32 : i32
    %43 = tpu.assume_multiple %42, 8 : i32
    %44 = arith.index_cast %43 : i32 to index
    %c0_14 = arith.constant 0 : index
    %45 = vector.load %arg7[%44, %c0_14] : memref<112x128xf32, #tpu.memory_space<vmem>>, vector<8x128xf32>
    %46 = arith.mulf %45, %26 : vector<8x128xf32>
    %47 = vector.shape_cast %46 : vector<8x128xf32> to vector<1x8x128xf32>
    %cst_15 = arith.constant dense<0.000000e+00> : vector<1x8xf32>
    %48 = vector.multi_reduction <add>, %47, %cst_15 [2] : vector<1x8x128xf32> to vector<1x8xf32>
    %cst_16 = arith.constant 0.000000e+00 : f32
    %49 = vector.broadcast %cst_16 : f32 to vector<1x8xf32>
    %50 = arith.subf %49, %48 : vector<1x8xf32>
    %c32_i32 = arith.constant 32 : i32
    %51 = arith.addi %24, %c32_i32 : i32
    %52 = tpu.assume_multiple %51, 8 : i32
    %53 = arith.index_cast %52 : i32 to index
    %c0_17 = arith.constant 0 : index
    %54 = vector.load %arg7[%53, %c0_17] : memref<112x128xf32, #tpu.memory_space<vmem>>, vector<8x128xf32>
    %55 = arith.mulf %54, %26 : vector<8x128xf32>
    %56 = vector.shape_cast %55 : vector<8x128xf32> to vector<1x8x128xf32>
    %cst_18 = arith.constant dense<0.000000e+00> : vector<1x8xf32>
    %57 = vector.multi_reduction <add>, %56, %cst_18 [2] : vector<1x8x128xf32> to vector<1x8xf32>
    %cst_19 = arith.constant 0.000000e+00 : f32
    %58 = vector.broadcast %cst_19 : f32 to vector<1x8xf32>
    %59 = arith.subf %58, %57 : vector<1x8xf32>
    %c40_i32 = arith.constant 40 : i32
    %60 = arith.addi %24, %c40_i32 : i32
    %61 = tpu.assume_multiple %60, 8 : i32
    %62 = arith.index_cast %61 : i32 to index
    %c0_20 = arith.constant 0 : index
    %63 = vector.load %arg7[%62, %c0_20] : memref<112x128xf32, #tpu.memory_space<vmem>>, vector<8x128xf32>
    %64 = arith.mulf %63, %26 : vector<8x128xf32>
    %65 = vector.shape_cast %64 : vector<8x128xf32> to vector<1x8x128xf32>
    %cst_21 = arith.constant dense<0.000000e+00> : vector<1x8xf32>
    %66 = vector.multi_reduction <add>, %65, %cst_21 [2] : vector<1x8x128xf32> to vector<1x8xf32>
    %cst_22 = arith.constant 0.000000e+00 : f32
    %67 = vector.broadcast %cst_22 : f32 to vector<1x8xf32>
    %68 = arith.subf %67, %66 : vector<1x8xf32>
    %c48_i32 = arith.constant 48 : i32
    %69 = arith.addi %24, %c48_i32 : i32
    %70 = tpu.assume_multiple %69, 8 : i32
    %71 = arith.index_cast %70 : i32 to index
    %c0_23 = arith.constant 0 : index
    %72 = vector.load %arg7[%71, %c0_23] : memref<112x128xf32, #tpu.memory_space<vmem>>, vector<8x128xf32>
    %73 = arith.mulf %72, %26 : vector<8x128xf32>
    %74 = vector.shape_cast %73 : vector<8x128xf32> to vector<1x8x128xf32>
    %cst_24 = arith.constant dense<0.000000e+00> : vector<1x8xf32>
    %75 = vector.multi_reduction <add>, %74, %cst_24 [2] : vector<1x8x128xf32> to vector<1x8xf32>
    %cst_25 = arith.constant 0.000000e+00 : f32
    %76 = vector.broadcast %cst_25 : f32 to vector<1x8xf32>
    %77 = arith.subf %76, %75 : vector<1x8xf32>
    %78 = tpu.concatenate %32, %41, %50, %59, %68, %77 in 0 : vector<1x8xf32>, vector<1x8xf32>, vector<1x8xf32>, vector<1x8xf32>, vector<1x8xf32>, vector<1x8xf32> -> vector<6x8xf32>
    %cst_26 = arith.constant 0.000000e+00 : f32
    %79 = vector.broadcast %cst_26 : f32 to vector<6x8xf32>
    %80 = arith.minimumf %78, %79 : vector<6x8xf32>
    %81 = math.absf %78 : vector<6x8xf32>
    %cst_27 = arith.constant 0.000000e+00 : f32
    %82 = vector.broadcast %cst_27 : f32 to vector<6x8xf32>
    %83 = arith.subf %82, %81 : vector<6x8xf32>
    %84 = math.exp %83 : vector<6x8xf32>
    %85 = math.log1p %84 : vector<6x8xf32>
    %86 = arith.subf %80, %85 : vector<6x8xf32>
    %c8_i32_28 = arith.constant 8 : i32
    %87 = arith.muli %arg0, %c8_i32_28 : i32
    %88 = tpu.iota {dimensions = array<i32: 1>} : vector<1x8xi32>
    %89 = vector.broadcast %87 : i32 to vector<1x8xi32>
    %90 = arith.addi %89, %88 : vector<1x8xi32>
    %c20_i32 = arith.constant 20 : i32
    %91 = vector.broadcast %c20_i32 : i32 to vector<1x8xi32>
    %92 = arith.cmpi slt, %90, %91 : vector<1x8xi32>
    %cst_29 = arith.constant 0.000000e+00 : f32
    %93 = vector.shape_cast %92 : vector<1x8xi1> to vector<1x8xi1>
    %94 = vector.broadcast %93 : vector<1x8xi1> to vector<6x8xi1>
    %95 = vector.broadcast %cst_29 : f32 to vector<6x8xf32>
    %96 = arith.select %94, %86, %95 : vector<6x8xi1>, vector<6x8xf32>
    %c0_30 = arith.constant 0 : index
    %c0_31 = arith.constant 0 : index
    %97 = vector.load %arg6[%c0_30, %c0_31] : memref<1x1xf32, #tpu.memory_space<vmem>>, vector<1x1xf32>
    %98 = vector.shape_cast %96 : vector<6x8xf32> to vector<1x6x8xf32>
    %cst_32 = arith.constant dense<0.000000e+00> : vector<1xf32>
    %99 = vector.multi_reduction <add>, %98, %cst_32 [1, 2] : vector<1x6x8xf32> to vector<1xf32>
    %100 = vector.shape_cast %99 : vector<1xf32> to vector<1x1x1xf32>
    %101 = vector.extract %100[0, 0, 0] : f32 from vector<1x1x1xf32>
    %102 = vector.broadcast %101 : f32 to vector<1x1xf32>
    %103 = arith.addf %97, %102 : vector<1x1xf32>
    %c0_33 = arith.constant 0 : index
    %c0_34 = arith.constant 0 : index
    %104 = vector.load %arg6[%c0_33, %c0_34] : memref<1x1xf32, #tpu.memory_space<vmem>>, vector<1x1xf32>
    tpu.vector_store %arg6[%c0_33, %c0_34], %103 {strides = array<i32>} : memref<1x1xf32, #tpu.memory_space<vmem>>, vector<1x1xf32>,
    %c2_i32_35 = arith.constant 2 : i32
    %105 = arith.cmpi eq, %arg0, %c2_i32_35 : i32
    %106 = arith.extui %105 : i1 to i32
    %c0_i32_36 = arith.constant 0 : i32
    %107 = arith.cmpi ne, %106, %c0_i32_36 : i32
    scf.if %107 {
      %c0_37 = arith.constant 0 : index
      %c0_38 = arith.constant 0 : index
      %108 = vector.load %arg6[%c0_37, %c0_38] : memref<1x1xf32, #tpu.memory_space<vmem>>, vector<1x1xf32>
      %cst_39 = arith.constant 0.000000e+00 : f32
      %109 = vector.broadcast %cst_39 : f32 to vector<1x1xf32>
      %110 = arith.subf %109, %108 : vector<1x1xf32>
      %cst_40 = arith.constant 2.000000e+01 : f32
      %111 = vector.broadcast %cst_40 : f32 to vector<1x1xf32>
      %112 = arith.divf %110, %111 : vector<1x1xf32>
      %c0_41 = arith.constant 0 : index
      %c0_42 = arith.constant 0 : index
      %113 = vector.load %arg6[%c0_41, %c0_42] : memref<1x1xf32, #tpu.memory_space<vmem>>, vector<1x1xf32>
      tpu.vector_store %arg6[%c0_41, %c0_42], %112 {strides = array<i32>} : memref<1x1xf32, #tpu.memory_space<vmem>>, vector<1x1xf32>,
    } else {
    }
    return
  }
  func.func @transform_2(%arg0: i32, %arg1: memref<24xi32, #tpu.memory_space<smem>>, %arg2: memref<24xi32, #tpu.memory_space<smem>>, %arg3: memref<120xi32, #tpu.memory_space<smem>>) -> (i32, i32) {
    %c0_i32 = arith.constant 0 : i32
    %c0_i32_0 = arith.constant 0 : i32
    %c0_i32_1 = arith.constant 0 : i32
    return %c0_i32, %c0_i32_0 : i32, i32
  }
}

</mosaic_0001>

<bundles_post_ra>
// kernel: tpu_custom_call.1
= control target key start
LH: loop header
LB: loop body
LE: loop exit
PB: predicated region body
PF: predicated region fallthrough
CT: control target
= control target key end

     0   :  { %s5380_s24 = smov [#allocation5]   ;;  %s5381_s25 = smov [#allocation6]   ;;  %s7292_s0 = inlined_call_operand.hbm [shape: s32[24], index: 0, kind: input, shape index: {}]   ;;  %s7293_s3 = inlined_call_operand.hbm [shape: f32[64,128], index: 3, kind: input, shape index: {}]   ;;  %s7294_s4 = inlined_call_operand.hbm [shape: f32[64,128], index: 4, kind: input, shape index: {}]   ;;  %s7295_s5 = inlined_call_operand.hbm [shape: f32[1,1], index: 5, kind: output, shape index: {}]   ;;  %s7296_s1 = inlined_call_operand.hbm [shape: s32[24], index: 1, kind: input, shape index: {}]   ;;  %s7297_s2 = inlined_call_operand.vmem [shape: s32[120], index: 2, kind: input, shape index: {}]  }
   0x1   :  { %s11_s20 = sshll.u32 %s7292_s0, 4  ;;  %s16_s23 = sshll.u32 %s7296_s1, 4  ;;  %s12_s20 = int_to_ptr.hbm [resolvable:$true] %s11_s20  ;;  %s17_s23 = int_to_ptr.hbm [resolvable:$true] %s16_s23 }
   0x2   :  { %14 = dma.hbm_to_smem %s12_s20, 16, %s5380_s24, [#allocation4] }
   0x3   :  { %19 = dma.hbm_to_smem %s17_s23, 16, %s5381_s25, [#allocation4] }
   0x4   :  { %s21_s28 = sshll.u32 %s7297_s2, 4  ;;  %s5382_s29 = smov [#allocation7]   ;;  %s22_s28 = int_to_ptr.vmem [resolvable:$true] %s21_s28 }
   0x5   :  { %24 = dma.vmem_to_smem %s22_s28, 16, %s5382_s29, [#allocation4] }
   0x6   :  { %5368 = dma.done.wait [#allocation4], 48 }
   0x7   :  { %5369 = vsyncadd [#allocation4], 4294967248 }
   0x8   :  { %27 = sfence }
   0x9   :  { %28 = vsyncpa [#allocation9], 0  ;;  %s5482_s0 = smov 0  }
   0xa LB: > { %p2452_p0 = scmp.ge.s32.totalorder %s5378_s0, 3  ;;  %s5378_s0 = sphi %s5482_s0, %s34_s0  }
   0xb   : > { %p57_p1 = scmp.lt.s32.totalorder (!%p2452_p0), %s5378_s0, 0  ;;  %s58_s1 = ssub.s32 (!%p2452_p0), 0, %s5378_s0 }
   0xc   : > { %54 = sbr.rel (%p2452_p0) target bundleno = 2317 (0x90d), region = 12  ;;  %s2453_s2 = smin.u32 (!%p2452_p0), %s5378_s0, %s58_s1 }
   0xd   : > { %s60_s30 = sand.u32 (!%p2452_p0), 1, %s2453_s2   ;;  %p2456_p3 = scmp.ne.s32.totalorder (!%p2452_p0), %s5378_s0, 0 }
   0xe   : > { %s61_s6 = ssub.s32 (!%p2452_p0), 0, %s60_s30 }
  0x11   : > { %s7299_s6 = smov (!%p57_p1, %s61_s6), %s60_s30  ;;  %72 = sbr.rel (%p2456_p3) target bundleno = 720 (0x2d0), region = 16 }
  0x12   : > { %p2455_p2 = scmp.lt.s32.totalorder %s7299_s6, 0  ;;  %s67_s7 = sadd.s32 2, %s7299_s6 }
  0x13   : > { %s75_s8 = sld [smem:[#allocation5]] (!%p2456_p3)  ;;  %s5383_s9 = smov (!%p2456_p3), [#allocation2]  }
  0x14   : > { %s7301_s7 = smov (!%p2455_p2, %s67_s7), %s7299_s6  ;;  %s86_s10 = sshll.u32 (!%p2456_p3), %s5383_s9, 4  ;;  %s87_s10 = int_to_ptr.vmem [resolvable:$true] %s86_s10 }
  0x15   : > { %s90_s11 = sld [smem:[#allocation6]] (!%p2456_p3)  ;;  %s5384_s12 = smov (!%p2456_p3), [#allocation2 + $0x8]  }
  0x16   : > { %s5494_s13 = sshll.u32 %s5384_s12, 4  ;;  %s5496_s14 = sld [smem:[#allocation7]]  ;;  %s103_s13 = int_to_ptr.vmem [resolvable:$true] %s5494_s13 }
  0x17   : > { %s5385_s15 = smov [#allocation2 + $0x10]   ;;  %s5501_s17 = sld [smem:[#allocation7 + $0x1]] }
  0x18   : > { %s5499_s16 = sshll.u32 %s5385_s15, 4  ;;  %s5513_s1 = scalar_lea.hbm %s7293_s3, 64  ;;  %s119_s16 = int_to_ptr.vmem [resolvable:$true] %s5499_s16 }
  0x19   : > { %s76_s20 = scalar_lea.hbm %s7293_s3, %s75_s8 }
  0x1a   : > { %s84_s21 = sshll.u32 %s76_s20, 4  ;;  %s85_s21 = int_to_ptr.hbm [resolvable:$true] %s84_s21 }
  0x1b   : > { %s91_s24 = scalar_lea.hbm %s7294_s4, %s90_s11  ;;  %s2648_s26 = sshra.s32 %s85_s21, 4  ;;  %s2649_s26 = int_to_ptr.hbm [resolvable:$true] %s2648_s26 }
  0x1c   : > { %s100_s25 = sshll.u32 %s91_s24, 4  ;;  %s2650_s27 = scalar_lea.hbm %s2649_s26, 1  ;;  %s101_s25 = int_to_ptr.hbm [resolvable:$true] %s100_s25 }
  0x1d   : > { %p2651_p4 = scmp.ne.s32.totalorder %s2649_s26, %s2650_s27  ;;  %p2653_p5 = scmp.lt.s32.totalorder %s2649_s26, %s7293_s3 }
  0x1e   : > { %p2654_p6 = scmp.lt.s32.totalorder %s5513_s1, %s2650_s27 }
  0x20   : > { %p2655_p7 = por %p2654_p6, %p2653_p5 }
  0x22   : > { %p2656_p8 = pnand %p2655_p7, %p2651_p4 }
  0x24   : > { %2659 = shalt.err (!%p2656_p8)  }
  0x25   : > { %89 = dma.hbm_to_vmem [thread:$0]  %s85_s21, 16, %s87_s10, [#allocation3] }
  0x26   : > { %s107_s9 = scalar_lea.hbm %s7294_s4, %s5496_s14  ;;  %s2672_s11 = sshra.s32 %s101_s25, 4  ;;  %s2673_s11 = int_to_ptr.hbm [resolvable:$true] %s2672_s11 }
  0x27   : > { %s2674_s12 = scalar_lea.hbm %s2673_s11, 1  ;;  %s5526_s19 = scalar_lea.hbm %s7294_s4, 64 }
  0x28   : > { %p2675_p9 = scmp.ne.s32.totalorder %s2673_s11, %s2674_s12  ;;  %p2677_p10 = scmp.lt.s32.totalorder %s2673_s11, %s7294_s4 }
  0x29   : > { %p2678_p11 = scmp.lt.s32.totalorder %s5526_s19, %s2674_s12 }
  0x2b   : > { %p2679_p12 = por %p2678_p11, %p2677_p10 }
  0x2d   : > { %p2680_p13 = pnand %p2679_p12, %p2675_p9 }
  0x2f   : > { %2683 = shalt.err (!%p2680_p13)  }
  0x30   : > { %105 = dma.hbm_to_vmem [thread:$0]  %s101_s25, 16, %s103_s13, [#allocation3] }
  0x31   : > { %s116_s10 = sshll.u32 %s107_s9, 4  ;;  %s123_s23 = scalar_lea.hbm %s7294_s4, %s5501_s17  ;;  %s117_s10 = int_to_ptr.hbm [resolvable:$true] %s116_s10 }
  0x32   : > { %s132_s24 = sshll.u32 %s123_s23, 4  ;;  %s2696_s26 = sshra.s32 %s117_s10, 4  ;;  %s2697_s26 = int_to_ptr.hbm [resolvable:$true] %s2696_s26  ;;  %s133_s24 = int_to_ptr.hbm [resolvable:$true] %s132_s24 }
  0x33   : > { %s2698_s27 = scalar_lea.hbm %s2697_s26, 1  ;;  %p2701_p1 = scmp.lt.s32.totalorder %s2697_s26, %s7294_s4 }
  0x34   : > { %p2699_p0 = scmp.ne.s32.totalorder %s2697_s26, %s2698_s27  ;;  %p2702_p2 = scmp.lt.s32.totalorder %s5526_s19, %s2698_s27 }
  0x36   : > { %p2703_p3 = por %p2702_p2, %p2701_p1 }
  0x38   : > { %p2704_p4 = pnand %p2703_p3, %p2699_p0 }
  0x3a   : > { %2707 = shalt.err (!%p2704_p4)  }
  0x3b   : > { %121 = dma.hbm_to_vmem [thread:$0]  %s117_s10, 16, %s119_s16, [#allocation3] }
  0x3c   : > { %s5386_s13 = smov [#allocation2 + $0x18]   ;;  %s2458_s25 = sld [smem:[#allocation7 + $0x2]] }
  0x3d   : > { %s134_s17 = sshll.u32 %s5386_s13, 4  ;;  %s2720_s2 = sshra.s32 %s133_s24, 4  ;;  %s135_s17 = int_to_ptr.vmem [resolvable:$true] %s134_s17  ;;  %s2721_s2 = int_to_ptr.hbm [resolvable:$true] %s2720_s2 }
  0x3e   : > { %s2722_s30 = scalar_lea.hbm %s2721_s2, 1  ;;  %p2725_p6 = scmp.lt.s32.totalorder %s2721_s2, %s7294_s4 }
  0x3f   : > { %p2723_p5 = scmp.ne.s32.totalorder %s2721_s2, %s2722_s30  ;;  %p2726_p7 = scmp.lt.s32.totalorder %s5526_s19, %s2722_s30 }
  0x41   : > { %p2727_p8 = por %p2726_p7, %p2725_p6 }
  0x43   : > { %p2728_p9 = pnand %p2727_p8, %p2723_p5 }
  0x45   : > { %2731 = shalt.err (!%p2728_p9)  }
  0x46   : > { %137 = dma.hbm_to_vmem [thread:$0]  %s133_s24, 16, %s135_s17, [#allocation3] }
  0x47   : > { %s5387_s9 = smov [#allocation2 + $0x20]   ;;  %s2459_s11 = sld [smem:[#allocation7 + $0x3]] }
  0x48   : > { %s150_s16 = sshll.u32 %s5387_s9, 4  ;;  %s5388_s12 = smov [#allocation2 + $0x28]   ;;  %s151_s16 = int_to_ptr.vmem [resolvable:$true] %s150_s16 }
  0x49   : > { %s5548_s15 = sshll.u32 %s5388_s12, 4  ;;  %s2460_s18 = sld [smem:[#allocation7 + $0x4]]  ;;  %s167_s15 = int_to_ptr.vmem [resolvable:$true] %s5548_s15 }
  0x4a   : > { %s139_s10 = scalar_lea.hbm %s7294_s4, %s2458_s25  ;;  %s5389_s21 = smov [#allocation2 + $0x30]  }
  0x4b   : > { %s148_s14 = sshll.u32 %s139_s10, 4  ;;  %s5554_s23 = sshll.u32 %s5389_s21, 4  ;;  %s149_s14 = int_to_ptr.hbm [resolvable:$true] %s148_s14  ;;  %s183_s23 = int_to_ptr.vmem [resolvable:$true] %s5554_s23 }
  0x4c   : > { %s2744_s24 = sshra.s32 %s149_s14, 4  ;;  %s2745_s24 = int_to_ptr.hbm [resolvable:$true] %s2744_s24 }
  0x4d   : > { %s2746_s26 = scalar_lea.hbm %s2745_s24, 1  ;;  %p2749_p11 = scmp.lt.s32.totalorder %s2745_s24, %s7294_s4 }
  0x4e   : > { %p2747_p10 = scmp.ne.s32.totalorder %s2745_s24, %s2746_s26  ;;  %p2750_p12 = scmp.lt.s32.totalorder %s5526_s19, %s2746_s26 }
  0x50   : > { %p2751_p13 = por %p2750_p12, %p2749_p11 }
  0x52   : > { %p2752_p0 = pnand %p2751_p13, %p2747_p10 }
  0x54   : > { %2755 = shalt.err (!%p2752_p0)  }
  0x55   : > { %153 = dma.hbm_to_vmem [thread:$0]  %s149_s14, 16, %s151_s16, [#allocation3] }
  0x56   : > { %s155_s17 = scalar_lea.hbm %s7294_s4, %s2459_s11  ;;  %s171_s6 = scalar_lea.hbm %s7294_s4, %s2460_s18 }
  0x57   : > { %s164_s25 = sshll.u32 %s155_s17, 4  ;;  %s180_s8 = sshll.u32 %s171_s6, 4  ;;  %s165_s25 = int_to_ptr.hbm [resolvable:$true] %s164_s25  ;;  %s181_s8 = int_to_ptr.hbm [resolvable:$true] %s180_s8 }
  0x58   : > { %s2768_s9 = sshra.s32 %s165_s25, 4  ;;  %s2769_s9 = int_to_ptr.hbm [resolvable:$true] %s2768_s9 }
  0x59   : > { %s2770_s12 = scalar_lea.hbm %s2769_s9, 1  ;;  %p2773_p2 = scmp.lt.s32.totalorder %s2769_s9, %s7294_s4 }
  0x5a   : > { %p2771_p1 = scmp.ne.s32.totalorder %s2769_s9, %s2770_s12  ;;  %p2774_p3 = scmp.lt.s32.totalorder %s5526_s19, %s2770_s12 }
  0x5c   : > { %p2775_p4 = por %p2774_p3, %p2773_p2 }
  0x5e   : > { %p2776_p5 = pnand %p2775_p4, %p2771_p1 }
  0x60   : > { %2779 = shalt.err (!%p2776_p5)  }
  0x61   : > { %169 = dma.hbm_to_vmem [thread:$0]  %s165_s25, 16, %s167_s15, [#allocation3] }
  0x62   : > { %s2461_s11 = sld [smem:[#allocation5 + $0x1]]  ;;  %s2792_s18 = sshra.s32 %s181_s8, 4  ;;  %s2793_s18 = int_to_ptr.hbm [resolvable:$true] %s2792_s18 }
  0x63   : > { %s2794_s22 = scalar_lea.hbm %s2793_s18, 1  ;;  %p2797_p7 = scmp.lt.s32.totalorder %s2793_s18, %s7294_s4 }
  0x64   : > { %p2795_p6 = scmp.ne.s32.totalorder %s2793_s18, %s2794_s22  ;;  %p2798_p8 = scmp.lt.s32.totalorder %s5526_s19, %s2794_s22 }
  0x66   : > { %p2799_p9 = por %p2798_p8, %p2797_p7 }
  0x68   : > { %p2800_p10 = pnand %p2799_p9, %p2795_p6 }
  0x6a   : > { %2803 = shalt.err (!%p2800_p10)  }
  0x6b   : > { %185 = dma.hbm_to_vmem [thread:$0]  %s181_s8, 16, %s183_s23, [#allocation3] }
  0x6c   : > { %s2462_s21 = sld [smem:[#allocation6 + $0x1]]  ;;  %s5390_s24 = smov [#allocation2 + $0x1]  }
  0x6d   : > { %s198_s26 = sshll.u32 %s5390_s24, 4  ;;  %s5391_s15 = smov [#allocation2 + $0x9]   ;;  %s199_s26 = int_to_ptr.vmem [resolvable:$true] %s198_s26 }
  0x6e   : > { %s5577_s27 = sshll.u32 %s5391_s15, 4  ;;  %s5580_s28 = sld [smem:[#allocation7 + $0x5]]  ;;  %s215_s27 = int_to_ptr.vmem [resolvable:$true] %s5577_s27 }
  0x6f   : > { %s187_s17 = scalar_lea.hbm %s7293_s3, %s2461_s11  ;;  %s5392_s2 = smov [#allocation2 + $0x11]  }
  0x70   : > { %s196_s25 = sshll.u32 %s187_s17, 4  ;;  %s5585_s30 = sshll.u32 %s5392_s2, 4  ;;  %s197_s25 = int_to_ptr.hbm [resolvable:$true] %s196_s25  ;;  %s231_s30 = int_to_ptr.vmem [resolvable:$true] %s5585_s30 }
  0x71   : > { %s2816_s9 = sshra.s32 %s197_s25, 4  ;;  %s2817_s9 = int_to_ptr.hbm [resolvable:$true] %s2816_s9 }
  0x72   : > { %s203_s8 = scalar_lea.hbm %s7294_s4, %s2462_s21  ;;  %s2818_s12 = scalar_lea.hbm %s2817_s9, 1 }
  0x73   : > { %p2819_p11 = scmp.ne.s32.totalorder %s2817_s9, %s2818_s12  ;;  %p2821_p12 = scmp.lt.s32.totalorder %s2817_s9, %s7293_s3 }
  0x74   : > { %p2822_p13 = scmp.lt.s32.totalorder %s5513_s1, %s2818_s12 }
  0x76   : > { %p2823_p0 = por %p2822_p13, %p2821_p12 }
  0x78   : > { %p2824_p1 = pnand %p2823_p0, %p2819_p11 }
  0x7a   : > { %2827 = shalt.err (!%p2824_p1)  }
  0x7b   : > { %201 = dma.hbm_to_vmem [thread:$0]  %s197_s25, 16, %s199_s26, [#allocation3] }
  0x7c   : > { %s212_s11 = sshll.u32 %s203_s8, 4  ;;  %s219_s10 = scalar_lea.hbm %s7294_s4, %s5580_s28  ;;  %s213_s11 = int_to_ptr.hbm [resolvable:$true] %s212_s11 }
  0x7d   : > { %s2840_s14 = sshra.s32 %s213_s11, 4  ;;  %s2841_s14 = int_to_ptr.hbm [resolvable:$true] %s2840_s14 }
  0x7e   : > { %s2842_s21 = scalar_lea.hbm %s2841_s14, 1  ;;  %p2845_p3 = scmp.lt.s32.totalorder %s2841_s14, %s7294_s4 }
  0x7f   : > { %p2843_p2 = scmp.ne.s32.totalorder %s2841_s14, %s2842_s21  ;;  %p2846_p4 = scmp.lt.s32.totalorder %s5526_s19, %s2842_s21 }
  0x81   : > { %p2847_p5 = por %p2846_p4, %p2845_p3 }
  0x83   : > { %p2848_p6 = pnand %p2847_p5, %p2843_p2 }
  0x85   : > { %2851 = shalt.err (!%p2848_p6)  }
  0x86   : > { %217 = dma.hbm_to_vmem [thread:$0]  %s213_s11, 16, %s215_s27, [#allocation3] }
  0x87   : > { %s228_s26 = sshll.u32 %s219_s10, 4  ;;  %s2464_s29 = sld [smem:[#allocation7 + $0x6]]  ;;  %s229_s26 = int_to_ptr.hbm [resolvable:$true] %s228_s26 }
  0x88   : > { %s2864_s28 = sshra.s32 %s229_s26, 4  ;;  %s2865_s28 = int_to_ptr.hbm [resolvable:$true] %s2864_s28 }
  0x89   : > { %s2866_s13 = scalar_lea.hbm %s2865_s28, 1  ;;  %p2869_p8 = scmp.lt.s32.totalorder %s2865_s28, %s7294_s4 }
  0x8a   : > { %p2867_p7 = scmp.ne.s32.totalorder %s2865_s28, %s2866_s13  ;;  %p2870_p9 = scmp.lt.s32.totalorder %s5526_s19, %s2866_s13 }
  0x8c   : > { %p2871_p10 = por %p2870_p9, %p2869_p8 }
  0x8e   : > { %p2872_p11 = pnand %p2871_p10, %p2867_p7 }
  0x90   : > { %2875 = shalt.err (!%p2872_p11)  }
  0x91   : > { %233 = dma.hbm_to_vmem [thread:$0]  %s229_s26, 16, %s231_s30, [#allocation3] }
  0x92   : > { %s5393_s2 = smov [#allocation2 + $0x19]   ;;  %s2465_s6 = sld [smem:[#allocation7 + $0x7]] }
  0x93   : > { %s246_s23 = sshll.u32 %s5393_s2, 4  ;;  %s5394_s27 = smov [#allocation2 + $0x21]   ;;  %s247_s23 = int_to_ptr.vmem [resolvable:$true] %s246_s23 }
  0x94   : > { %s5609_s8 = sshll.u32 %s5394_s27, 4  ;;  %s2466_s9 = sld [smem:[#allocation7 + $0x8]]  ;;  %s263_s8 = int_to_ptr.vmem [resolvable:$true] %s5609_s8 }
  0x95   : > { %s235_s16 = scalar_lea.hbm %s7294_s4, %s2464_s29  ;;  %s5395_s18 = smov [#allocation2 + $0x29]  }
  0x96   : > { %s244_s11 = sshll.u32 %s235_s16, 4  ;;  %s5615_s22 = sshll.u32 %s5395_s18, 4  ;;  %s245_s11 = int_to_ptr.hbm [resolvable:$true] %s244_s11  ;;  %s279_s22 = int_to_ptr.vmem [resolvable:$true] %s5615_s22 }
  0x97   : > { %s2888_s30 = sshra.s32 %s245_s11, 4  ;;  %s2889_s30 = int_to_ptr.hbm [resolvable:$true] %s2888_s30 }
  0x98   : > { %s2890_s10 = scalar_lea.hbm %s2889_s30, 1  ;;  %p2893_p13 = scmp.lt.s32.totalorder %s2889_s30, %s7294_s4 }
  0x99   : > { %p2891_p12 = scmp.ne.s32.totalorder %s2889_s30, %s2890_s10  ;;  %p2894_p0 = scmp.lt.s32.totalorder %s5526_s19, %s2890_s10 }
  0x9b   : > { %p2895_p1 = por %p2894_p0, %p2893_p13 }
  0x9d   : > { %p2896_p2 = pnand %p2895_p1, %p2891_p12 }
  0x9f   : > { %2899 = shalt.err (!%p2896_p2)  }
  0xa0   : > { %249 = dma.hbm_to_vmem [thread:$0]  %s245_s11, 16, %s247_s23, [#allocation3] }
  0xa1   : > { %s251_s26 = scalar_lea.hbm %s7294_s4, %s2465_s6  ;;  %s267_s17 = scalar_lea.hbm %s7294_s4, %s2466_s9 }
  0xa2   : > { %s260_s29 = sshll.u32 %s251_s26, 4  ;;  %s276_s25 = sshll.u32 %s267_s17, 4  ;;  %s261_s29 = int_to_ptr.hbm [resolvable:$true] %s260_s29  ;;  %s277_s25 = int_to_ptr.hbm [resolvable:$true] %s276_s25 }
  0xa3   : > { %s2912_s2 = sshra.s32 %s261_s29, 4  ;;  %s2913_s2 = int_to_ptr.hbm [resolvable:$true] %s2912_s2 }
  0xa4   : > { %s2914_s27 = scalar_lea.hbm %s2913_s2, 1  ;;  %p2917_p4 = scmp.lt.s32.totalorder %s2913_s2, %s7294_s4 }
  0xa5   : > { %p2915_p3 = scmp.ne.s32.totalorder %s2913_s2, %s2914_s27  ;;  %p2918_p5 = scmp.lt.s32.totalorder %s5526_s19, %s2914_s27 }
  0xa7   : > { %p2919_p6 = por %p2918_p5, %p2917_p4 }
  0xa9   : > { %p2920_p7 = pnand %p2919_p6, %p2915_p3 }
  0xab   : > { %2923 = shalt.err (!%p2920_p7)  }
  0xac   : > { %265 = dma.hbm_to_vmem [thread:$0]  %s261_s29, 16, %s263_s8, [#allocation3] }
  0xad   : > { %s2467_s6 = sld [smem:[#allocation7 + $0x9]]  ;;  %s2936_s9 = sshra.s32 %s277_s25, 4  ;;  %s2937_s9 = int_to_ptr.hbm [resolvable:$true] %s2936_s9 }
  0xae   : > { %s2938_s20 = scalar_lea.hbm %s2937_s9, 1  ;;  %p2941_p9 = scmp.lt.s32.totalorder %s2937_s9, %s7294_s4 }
  0xaf   : > { %p2939_p8 = scmp.ne.s32.totalorder %s2937_s9, %s2938_s20  ;;  %p2942_p10 = scmp.lt.s32.totalorder %s5526_s19, %s2938_s20 }
  0xb1   : > { %p2943_p11 = por %p2942_p10, %p2941_p9 }
  0xb3   : > { %p2944_p12 = pnand %p2943_p11, %p2939_p8 }
  0xb5   : > { %2947 = shalt.err (!%p2944_p12)  }
  0xb6   : > { %281 = dma.hbm_to_vmem [thread:$0]  %s277_s25, 16, %s279_s22, [#allocation3] }
  0xb7   : > { %s2468_s18 = sld [smem:[#allocation5 + $0x2]]  ;;  %s5396_s30 = smov [#allocation2 + $0x31]  }
  0xb8   : > { %s294_s10 = sshll.u32 %s5396_s30, 4  ;;  %s5397_s8 = smov [#allocation2 + $0x2]   ;;  %s295_s10 = int_to_ptr.vmem [resolvable:$true] %s294_s10 }
  0xb9   : > { %s5638_s14 = sshll.u32 %s5397_s8, 4  ;;  %s5641_s21 = sld [smem:[#allocation6 + $0x2]]  ;;  %s311_s14 = int_to_ptr.vmem [resolvable:$true] %s5638_s14 }
  0xba   : > { %s283_s26 = scalar_lea.hbm %s7294_s4, %s2467_s6  ;;  %s5398_s28 = smov [#allocation2 + $0xa]  }
  0xbb   : > { %s292_s29 = sshll.u32 %s283_s26, 4  ;;  %s5646_s13 = sshll.u32 %s5398_s28, 4  ;;  %s293_s29 = int_to_ptr.hbm [resolvable:$true] %s292_s29  ;;  %s327_s13 = int_to_ptr.vmem [resolvable:$true] %s5646_s13 }
  0xbc   : > { %s2960_s2 = sshra.s32 %s293_s29, 4  ;;  %s2961_s2 = int_to_ptr.hbm [resolvable:$true] %s2960_s2 }
  0xbd   : > { %s299_s25 = scalar_lea.hbm %s7293_s3, %s2468_s18  ;;  %s2962_s27 = scalar_lea.hbm %s2961_s2, 1 }
  0xbe   : > { %p2963_p13 = scmp.ne.s32.totalorder %s2961_s2, %s2962_s27  ;;  %p2965_p0 = scmp.lt.s32.totalorder %s2961_s2, %s7294_s4 }
  0xbf   : > { %p2966_p1 = scmp.lt.s32.totalorder %s5526_s19, %s2962_s27 }
  0xc1   : > { %p2967_p2 = por %p2966_p1, %p2965_p0 }
  0xc3   : > { %p2968_p3 = pnand %p2967_p2, %p2963_p13 }
  0xc5   : > { %2971 = shalt.err (!%p2968_p3)  }
  0xc6   : > { %297 = dma.hbm_to_vmem [thread:$0]  %s293_s29, 16, %s295_s10, [#allocation3] }
  0xc7   : > { %s308_s6 = sshll.u32 %s299_s25, 4  ;;  %s315_s16 = scalar_lea.hbm %s7294_s4, %s5641_s21  ;;  %s309_s6 = int_to_ptr.hbm [resolvable:$true] %s308_s6 }
  0xc8   : > { %s2984_s11 = sshra.s32 %s309_s6, 4  ;;  %s2985_s11 = int_to_ptr.hbm [resolvable:$true] %s2984_s11 }
  0xc9   : > { %s2986_s18 = scalar_lea.hbm %s2985_s11, 1  ;;  %p2989_p5 = scmp.lt.s32.totalorder %s2985_s11, %s7293_s3 }
  0xca   : > { %p2987_p4 = scmp.ne.s32.totalorder %s2985_s11, %s2986_s18  ;;  %p2990_p6 = scmp.lt.s32.totalorder %s5513_s1, %s2986_s18 }
  0xcc   : > { %p2991_p7 = por %p2990_p6, %p2989_p5 }
  0xce   : > { %p2992_p8 = pnand %p2991_p7, %p2987_p4 }
  0xd0   : > { %2995 = shalt.err (!%p2992_p8)  }
  0xd1   : > { %313 = dma.hbm_to_vmem [thread:$0]  %s309_s6, 16, %s311_s14, [#allocation3] }
  0xd2   : > { %s324_s10 = sshll.u32 %s315_s16, 4  ;;  %s2470_s24 = sld [smem:[#allocation7 + $0xa]]  ;;  %s325_s10 = int_to_ptr.hbm [resolvable:$true] %s324_s10 }
  0xd3   : > { %s3008_s21 = sshra.s32 %s325_s10, 4  ;;  %s3009_s21 = int_to_ptr.hbm [resolvable:$true] %s3008_s21 }
  0xd4   : > { %s3010_s15 = scalar_lea.hbm %s3009_s21, 1  ;;  %p3013_p10 = scmp.lt.s32.totalorder %s3009_s21, %s7294_s4 }
  0xd5   : > { %p3011_p9 = scmp.ne.s32.totalorder %s3009_s21, %s3010_s15  ;;  %p3014_p11 = scmp.lt.s32.totalorder %s5526_s19, %s3010_s15 }
  0xd7   : > { %p3015_p12 = por %p3014_p11, %p3013_p10 }
  0xd9   : > { %p3016_p13 = pnand %p3015_p12, %p3011_p9 }
  0xdb   : > { %3019 = shalt.err (!%p3016_p13)  }
  0xdc   : > { %329 = dma.hbm_to_vmem [thread:$0]  %s325_s10, 16, %s327_s13, [#allocation3] }
  0xdd   : > { %s5399_s28 = smov [#allocation2 + $0x12]   ;;  %s2471_s17 = sld [smem:[#allocation7 + $0xb]] }
  0xde   : > { %s342_s22 = sshll.u32 %s5399_s28, 4  ;;  %s5400_s14 = smov [#allocation2 + $0x1a]   ;;  %s343_s22 = int_to_ptr.vmem [resolvable:$true] %s342_s22 }
  0xdf   : > { %s5670_s25 = sshll.u32 %s5400_s14, 4  ;;  %s2472_s2 = sld [smem:[#allocation7 + $0xc]]  ;;  %s359_s25 = int_to_ptr.vmem [resolvable:$true] %s5670_s25 }
  0xe0   : > { %s331_s23 = scalar_lea.hbm %s7294_s4, %s2470_s24  ;;  %s5401_s9 = smov [#allocation2 + $0x22]  }
  0xe1   : > { %s340_s6 = sshll.u32 %s331_s23, 4  ;;  %s5676_s20 = sshll.u32 %s5401_s9, 4  ;;  %s341_s6 = int_to_ptr.hbm [resolvable:$true] %s340_s6  ;;  %s375_s20 = int_to_ptr.vmem [resolvable:$true] %s5676_s20 }
  0xe2   : > { %s3032_s13 = sshra.s32 %s341_s6, 4  ;;  %s3033_s13 = int_to_ptr.hbm [resolvable:$true] %s3032_s13 }
  0xe3   : > { %s3034_s16 = scalar_lea.hbm %s3033_s13, 1  ;;  %p3037_p1 = scmp.lt.s32.totalorder %s3033_s13, %s7294_s4 }
  0xe4   : > { %p3035_p0 = scmp.ne.s32.totalorder %s3033_s13, %s3034_s16  ;;  %p3038_p2 = scmp.lt.s32.totalorder %s5526_s19, %s3034_s16 }
  0xe6   : > { %p3039_p3 = por %p3038_p2, %p3037_p1 }
  0xe8   : > { %p3040_p4 = pnand %p3039_p3, %p3035_p0 }
  0xea   : > { %3043 = shalt.err (!%p3040_p4)  }
  0xeb   : > { %345 = dma.hbm_to_vmem [thread:$0]  %s341_s6, 16, %s343_s22, [#allocation3] }
  0xec   : > { %s347_s10 = scalar_lea.hbm %s7294_s4, %s2471_s17  ;;  %s363_s26 = scalar_lea.hbm %s7294_s4, %s2472_s2 }
  0xed   : > { %s356_s24 = sshll.u32 %s347_s10, 4  ;;  %s372_s29 = sshll.u32 %s363_s26, 4  ;;  %s357_s24 = int_to_ptr.hbm [resolvable:$true] %s356_s24  ;;  %s373_s29 = int_to_ptr.hbm [resolvable:$true] %s372_s29 }
  0xee   : > { %s3056_s28 = sshra.s32 %s357_s24, 4  ;;  %s3057_s28 = int_to_ptr.hbm [resolvable:$true] %s3056_s28 }
  0xef   : > { %s3058_s14 = scalar_lea.hbm %s3057_s28, 1  ;;  %p3061_p6 = scmp.lt.s32.totalorder %s3057_s28, %s7294_s4 }
  0xf0   : > { %p3059_p5 = scmp.ne.s32.totalorder %s3057_s28, %s3058_s14  ;;  %p3062_p7 = scmp.lt.s32.totalorder %s5526_s19, %s3058_s14 }
  0xf2   : > { %p3063_p8 = por %p3062_p7, %p3061_p6 }
  0xf4   : > { %p3064_p9 = pnand %p3063_p8, %p3059_p5 }
  0xf6   : > { %3067 = shalt.err (!%p3064_p9)  }
  0xf7   : > { %361 = dma.hbm_to_vmem [thread:$0]  %s357_s24, 16, %s359_s25, [#allocation3] }
  0xf8   : > { %s2473_s17 = sld [smem:[#allocation7 + $0xd]]  ;;  %s3080_s2 = sshra.s32 %s373_s29, 4  ;;  %s3081_s2 = int_to_ptr.hbm [resolvable:$true] %s3080_s2 }
  0xf9   : > { %s3082_s12 = scalar_lea.hbm %s3081_s2, 1  ;;  %p3085_p11 = scmp.lt.s32.totalorder %s3081_s2, %s7294_s4 }
  0xfa   : > { %p3083_p10 = scmp.ne.s32.totalorder %s3081_s2, %s3082_s12  ;;  %p3086_p12 = scmp.lt.s32.totalorder %s5526_s19, %s3082_s12 }
  0xfc   : > { %p3087_p13 = por %p3086_p12, %p3085_p11 }
  0xfe   : > { %p3088_p0 = pnand %p3087_p13, %p3083_p10 }
 0x100   : > { %3091 = shalt.err (!%p3088_p0)  }
 0x101   : > { %377 = dma.hbm_to_vmem [thread:$0]  %s373_s29, 16, %s375_s20, [#allocation3] }
 0x102   : > { %s2474_s9 = sld [smem:[#allocation7 + $0xe]]  ;;  %s5402_s13 = smov [#allocation2 + $0x2a]  }
 0x103   : > { %s390_s16 = sshll.u32 %s5402_s13, 4  ;;  %s5403_s25 = smov [#allocation2 + $0x32]   ;;  %s391_s16 = int_to_ptr.vmem [resolvable:$true] %s390_s16 }
 0x104   : > { %s5699_s11 = sshll.u32 %s5403_s25, 4  ;;  %s5702_s18 = sld [smem:[#allocation5 + $0x3]]  ;;  %s407_s11 = int_to_ptr.vmem [resolvable:$true] %s5699_s11 }
 0x105   : > { %s379_s10 = scalar_lea.hbm %s7294_s4, %s2473_s17  ;;  %s5404_s21 = smov [#allocation2 + $0x3]  }
 0x106   : > { %s388_s24 = sshll.u32 %s379_s10, 4  ;;  %s5707_s15 = sshll.u32 %s5404_s21, 4  ;;  %s389_s24 = int_to_ptr.hbm [resolvable:$true] %s388_s24  ;;  %s423_s15 = int_to_ptr.vmem [resolvable:$true] %s5707_s15 }
 0x107   : > { %s3104_s28 = sshra.s32 %s389_s24, 4  ;;  %s3105_s28 = int_to_ptr.hbm [resolvable:$true] %s3104_s28 }
 0x108   : > { %s395_s29 = scalar_lea.hbm %s7294_s4, %s2474_s9  ;;  %s3106_s14 = scalar_lea.hbm %s3105_s28, 1 }
 0x109   : > { %p3107_p1 = scmp.ne.s32.totalorder %s3105_s28, %s3106_s14  ;;  %p3109_p2 = scmp.lt.s32.totalorder %s3105_s28, %s7294_s4 }
 0x10a   : > { %p3110_p3 = scmp.lt.s32.totalorder %s5526_s19, %s3106_s14 }
 0x10c   : > { %p3111_p4 = por %p3110_p3, %p3109_p2 }
 0x10e   : > { %p3112_p5 = pnand %p3111_p4, %p3107_p1 }
 0x110   : > { %3115 = shalt.err (!%p3112_p5)  }
 0x111   : > { %393 = dma.hbm_to_vmem [thread:$0]  %s389_s24, 16, %s391_s16, [#allocation3] }
 0x112   : > { %s404_s17 = sshll.u32 %s395_s29, 4  ;;  %s411_s23 = scalar_lea.hbm %s7293_s3, %s5702_s18  ;;  %s405_s17 = int_to_ptr.hbm [resolvable:$true] %s404_s17 }
 0x113   : > { %s3128_s6 = sshra.s32 %s405_s17, 4  ;;  %s3129_s6 = int_to_ptr.hbm [resolvable:$true] %s3128_s6 }
 0x114   : > { %s3130_s9 = scalar_lea.hbm %s3129_s6, 1  ;;  %p3133_p7 = scmp.lt.s32.totalorder %s3129_s6, %s7294_s4 }
 0x115   : > { %p3131_p6 = scmp.ne.s32.totalorder %s3129_s6, %s3130_s9  ;;  %p3134_p8 = scmp.lt.s32.totalorder %s5526_s19, %s3130_s9 }
 0x117   : > { %p3135_p9 = por %p3134_p8, %p3133_p7 }
 0x119   : > { %p3136_p10 = pnand %p3135_p9, %p3131_p6 }
 0x11b   : > { %3139 = shalt.err (!%p3136_p10)  }
 0x11c   : > { %409 = dma.hbm_to_vmem [thread:$0]  %s405_s17, 16, %s407_s11, [#allocation3] }
 0x11d   : > { %s420_s16 = sshll.u32 %s411_s23, 4  ;;  %s2476_s30 = sld [smem:[#allocation6 + $0x3]]  ;;  %s421_s16 = int_to_ptr.hbm [resolvable:$true] %s420_s16 }
 0x11e   : > { %s3152_s18 = sshra.s32 %s421_s16, 4  ;;  %s3153_s18 = int_to_ptr.hbm [resolvable:$true] %s3152_s18 }
 0x11f   : > { %s3154_s8 = scalar_lea.hbm %s3153_s18, 1  ;;  %p3157_p12 = scmp.lt.s32.totalorder %s3153_s18, %s7293_s3 }
 0x120   : > { %p3155_p11 = scmp.ne.s32.totalorder %s3153_s18, %s3154_s8  ;;  %p3158_p13 = scmp.lt.s32.totalorder %s5513_s1, %s3154_s8 }
 0x122   : > { %p3159_p0 = por %p3158_p13, %p3157_p12 }
 0x124   : > { %p3160_p1 = pnand %p3159_p0, %p3155_p11 }
 0x126   : > { %3163 = shalt.err (!%p3160_p1)  }
 0x127   : > { %425 = dma.hbm_to_vmem [thread:$0]  %s421_s16, 16, %s423_s15, [#allocation3] }
 0x128   : > { %s5405_s21 = smov [#allocation2 + $0xb]   ;;  %s2477_s26 = sld [smem:[#allocation7 + $0xf]] }
 0x129   : > { %s438_s20 = sshll.u32 %s5405_s21, 4  ;;  %s5406_s11 = smov [#allocation2 + $0x13]   ;;  %s439_s20 = int_to_ptr.vmem [resolvable:$true] %s438_s20 }
 0x12a   : > { %s5731_s29 = sshll.u32 %s5406_s11, 4  ;;  %s2478_s28 = sld [smem:[#allocation7 + $0x10]]  ;;  %s455_s29 = int_to_ptr.vmem [resolvable:$true] %s5731_s29 }
 0x12b   : > { %s427_s22 = scalar_lea.hbm %s7294_s4, %s2476_s30  ;;  %s5407_s2 = smov [#allocation2 + $0x1b]  }
 0x12c   : > { %s436_s17 = sshll.u32 %s427_s22, 4  ;;  %s5737_s12 = sshll.u32 %s5407_s2, 4  ;;  %s437_s17 = int_to_ptr.hbm [resolvable:$true] %s436_s17  ;;  %s471_s12 = int_to_ptr.vmem [resolvable:$true] %s5737_s12 }
 0x12d   : > { %s3176_s15 = sshra.s32 %s437_s17, 4  ;;  %s3177_s15 = int_to_ptr.hbm [resolvable:$true] %s3176_s15 }
 0x12e   : > { %s3178_s23 = scalar_lea.hbm %s3177_s15, 1  ;;  %p3181_p3 = scmp.lt.s32.totalorder %s3177_s15, %s7294_s4 }
 0x12f   : > { %p3179_p2 = scmp.ne.s32.totalorder %s3177_s15, %s3178_s23  ;;  %p3182_p4 = scmp.lt.s32.totalorder %s5526_s19, %s3178_s23 }
 0x131   : > { %p3183_p5 = por %p3182_p4, %p3181_p3 }
 0x133   : > { %p3184_p6 = pnand %p3183_p5, %p3179_p2 }
 0x135   : > { %3187 = shalt.err (!%p3184_p6)  }
 0x136   : > { %441 = dma.hbm_to_vmem [thread:$0]  %s437_s17, 16, %s439_s20, [#allocation3] }
 0x137   : > { %s443_s16 = scalar_lea.hbm %s7294_s4, %s2477_s26  ;;  %s459_s10 = scalar_lea.hbm %s7294_s4, %s2478_s28 }
 0x138   : > { %s452_s30 = sshll.u32 %s443_s16, 4  ;;  %s468_s24 = sshll.u32 %s459_s10, 4  ;;  %s453_s30 = int_to_ptr.hbm [resolvable:$true] %s452_s30  ;;  %s469_s24 = int_to_ptr.hbm [resolvable:$true] %s468_s24 }
 0x139   : > { %s3200_s21 = sshra.s32 %s453_s30, 4  ;;  %s3201_s21 = int_to_ptr.hbm [resolvable:$true] %s3200_s21 }
 0x13a   : > { %s3202_s11 = scalar_lea.hbm %s3201_s21, 1  ;;  %p3205_p8 = scmp.lt.s32.totalorder %s3201_s21, %s7294_s4 }
 0x13b   : > { %p3203_p7 = scmp.ne.s32.totalorder %s3201_s21, %s3202_s11  ;;  %p3206_p9 = scmp.lt.s32.totalorder %s5526_s19, %s3202_s11 }
 0x13d   : > { %p3207_p10 = por %p3206_p9, %p3205_p8 }
 0x13f   : > { %p3208_p11 = pnand %p3207_p10, %p3203_p7 }
 0x141   : > { %3211 = shalt.err (!%p3208_p11)  }
 0x142   : > { %457 = dma.hbm_to_vmem [thread:$0]  %s453_s30, 16, %s455_s29, [#allocation3] }
 0x143   : > { %s2479_s26 = sld [smem:[#allocation7 + $0x11]]  ;;  %s3224_s28 = sshra.s32 %s469_s24, 4  ;;  %s3225_s28 = int_to_ptr.hbm [resolvable:$true] %s3224_s28 }
 0x144   : > { %s3226_s27 = scalar_lea.hbm %s3225_s28, 1  ;;  %p3229_p13 = scmp.lt.s32.totalorder %s3225_s28, %s7294_s4 }
 0x145   : > { %p3227_p12 = scmp.ne.s32.totalorder %s3225_s28, %s3226_s27  ;;  %p3230_p0 = scmp.lt.s32.totalorder %s5526_s19, %s3226_s27 }
 0x147   : > { %p3231_p1 = por %p3230_p0, %p3229_p13 }
 0x149   : > { %p3232_p2 = pnand %p3231_p1, %p3227_p12 }
 0x14b   : > { %3235 = shalt.err (!%p3232_p2)  }
 0x14c   : > { %473 = dma.hbm_to_vmem [thread:$0]  %s469_s24, 16, %s471_s12, [#allocation3] }
 0x14d   : > { %s2480_s2 = sld [smem:[#allocation7 + $0x12]]  ;;  %s5408_s15 = smov [#allocation2 + $0x23]  }
 0x14e   : > { %s486_s23 = sshll.u32 %s5408_s15, 4  ;;  %s5409_s29 = smov [#allocation2 + $0x2b]   ;;  %s487_s23 = int_to_ptr.vmem [resolvable:$true] %s486_s23 }
 0x14f   : > { %s5760_s6 = sshll.u32 %s5409_s29, 4  ;;  %s5763_s9 = sld [smem:[#allocation7 + $0x13]]  ;;  %s503_s6 = int_to_ptr.vmem [resolvable:$true] %s5760_s6 }
 0x150   : > { %s475_s16 = scalar_lea.hbm %s7294_s4, %s2479_s26  ;;  %s5410_s18 = smov [#allocation2 + $0x33]  }
 0x151   : > { %s484_s30 = sshll.u32 %s475_s16, 4  ;;  %s5768_s8 = sshll.u32 %s5410_s18, 4  ;;  %s485_s30 = int_to_ptr.hbm [resolvable:$true] %s484_s30  ;;  %s519_s8 = int_to_ptr.vmem [resolvable:$true] %s5768_s8 }
 0x152   : > { %s3248_s21 = sshra.s32 %s485_s30, 4  ;;  %s3249_s21 = int_to_ptr.hbm [resolvable:$true] %s3248_s21 }
 0x153   : > { %s491_s24 = scalar_lea.hbm %s7294_s4, %s2480_s2  ;;  %s3250_s11 = scalar_lea.hbm %s3249_s21, 1 }
 0x154   : > { %p3251_p3 = scmp.ne.s32.totalorder %s3249_s21, %s3250_s11  ;;  %p3253_p4 = scmp.lt.s32.totalorder %s3249_s21, %s7294_s4 }
 0x155   : > { %p3254_p5 = scmp.lt.s32.totalorder %s5526_s19, %s3250_s11 }
 0x157   : > { %p3255_p6 = por %p3254_p5, %p3253_p4 }
 0x159   : > { %p3256_p7 = pnand %p3255_p6, %p3251_p3 }
 0x15b   : > { %3259 = shalt.err (!%p3256_p7)  }
 0x15c   : > { %489 = dma.hbm_to_vmem [thread:$0]  %s485_s30, 16, %s487_s23, [#allocation3] }
 0x15d   : > { %s500_s26 = sshll.u32 %s491_s24, 4  ;;  %s507_s22 = scalar_lea.hbm %s7294_s4, %s5763_s9  ;;  %s501_s26 = int_to_ptr.hbm [resolvable:$true] %s500_s26 }
 0x15e   : > { %s3272_s17 = sshra.s32 %s501_s26, 4  ;;  %s3273_s17 = int_to_ptr.hbm [resolvable:$true] %s3272_s17 }
 0x15f   : > { %s3274_s2 = scalar_lea.hbm %s3273_s17, 1  ;;  %p3277_p9 = scmp.lt.s32.totalorder %s3273_s17, %s7294_s4 }
 0x160   : > { %p3275_p8 = scmp.ne.s32.totalorder %s3273_s17, %s3274_s2  ;;  %p3278_p10 = scmp.lt.s32.totalorder %s5526_s19, %s3274_s2 }
 0x162   : > { %p3279_p11 = por %p3278_p10, %p3277_p9 }
 0x164   : > { %p3280_p12 = pnand %p3279_p11, %p3275_p8 }
 0x166   : > { %3283 = shalt.err (!%p3280_p12)  }
 0x167   : > { %505 = dma.hbm_to_vmem [thread:$0]  %s501_s26, 16, %s503_s6, [#allocation3] }
 0x168   : > { %s516_s23 = sshll.u32 %s507_s22, 4  ;;  %s2482_s13 = sld [smem:[#allocation5 + $0x4]]  ;;  %s517_s23 = int_to_ptr.hbm [resolvable:$true] %s516_s23 }
 0x169   : > { %s3296_s9 = sshra.s32 %s517_s23, 4  ;;  %s3297_s9 = int_to_ptr.hbm [resolvable:$true] %s3296_s9 }
 0x16a   : > { %s3298_s25 = scalar_lea.hbm %s3297_s9, 1  ;;  %p3301_p0 = scmp.lt.s32.totalorder %s3297_s9, %s7294_s4 }
 0x16b   : > { %p3299_p13 = scmp.ne.s32.totalorder %s3297_s9, %s3298_s25  ;;  %p3302_p1 = scmp.lt.s32.totalorder %s5526_s19, %s3298_s25 }
 0x16d   : > { %p3303_p2 = por %p3302_p1, %p3301_p0 }
 0x16f   : > { %p3304_p3 = pnand %p3303_p2, %p3299_p13 }
 0x171   : > { %3307 = shalt.err (!%p3304_p3)  }
 0x172   : > { %521 = dma.hbm_to_vmem [thread:$0]  %s517_s23, 16, %s519_s8, [#allocation3] }
 0x173   : > { %s5411_s18 = smov [#allocation2 + $0x4]   ;;  %s2483_s10 = sld [smem:[#allocation6 + $0x4]] }
 0x174   : > { %s534_s12 = sshll.u32 %s5411_s18, 4  ;;  %s5412_s6 = smov [#allocation2 + $0xc]   ;;  %s535_s12 = int_to_ptr.vmem [resolvable:$true] %s534_s12 }
 0x175   : > { %s5792_s24 = sshll.u32 %s5412_s6, 4  ;;  %s2484_s21 = sld [smem:[#allocation7 + $0x14]]  ;;  %s551_s24 = int_to_ptr.vmem [resolvable:$true] %s5792_s24 }
 0x176   : > { %s523_s20 = scalar_lea.hbm %s7293_s3, %s2482_s13  ;;  %s5413_s28 = smov [#allocation2 + $0x14]  }
 0x177   : > { %s532_s26 = sshll.u32 %s523_s20, 4  ;;  %s5798_s27 = sshll.u32 %s5413_s28, 4  ;;  %s533_s26 = int_to_ptr.hbm [resolvable:$true] %s532_s26  ;;  %s567_s27 = int_to_ptr.vmem [resolvable:$true] %s5798_s27 }
 0x178   : > { %s3320_s8 = sshra.s32 %s533_s26, 4  ;;  %s3321_s8 = int_to_ptr.hbm [resolvable:$true] %s3320_s8 }
 0x179   : > { %s3322_s22 = scalar_lea.hbm %s3321_s8, 1  ;;  %p3325_p5 = scmp.lt.s32.totalorder %s3321_s8, %s7293_s3 }
 0x17a   : > { %p3323_p4 = scmp.ne.s32.totalorder %s3321_s8, %s3322_s22  ;;  %p3326_p6 = scmp.lt.s32.totalorder %s5513_s1, %s3322_s22 }
 0x17c   : > { %p3327_p7 = por %p3326_p6, %p3325_p5 }
 0x17e   : > { %p3328_p8 = pnand %p3327_p7, %p3323_p4 }
 0x180   : > { %3331 = shalt.err (!%p3328_p8)  }
 0x181   : > { %537 = dma.hbm_to_vmem [thread:$0]  %s533_s26, 16, %s535_s12, [#allocation3] }
 0x182   : > { %s539_s23 = scalar_lea.hbm %s7294_s4, %s2483_s10  ;;  %s555_s16 = scalar_lea.hbm %s7294_s4, %s2484_s21 }
 0x183   : > { %s548_s13 = sshll.u32 %s539_s23, 4  ;;  %s564_s30 = sshll.u32 %s555_s16, 4  ;;  %s549_s13 = int_to_ptr.hbm [resolvable:$true] %s548_s13  ;;  %s565_s30 = int_to_ptr.hbm [resolvable:$true] %s564_s30 }
 0x184   : > { %s3344_s18 = sshra.s32 %s549_s13, 4  ;;  %s3345_s18 = int_to_ptr.hbm [resolvable:$true] %s3344_s18 }
 0x185   : > { %s3346_s6 = scalar_lea.hbm %s3345_s18, 1  ;;  %p3349_p10 = scmp.lt.s32.totalorder %s3345_s18, %s7294_s4 }
 0x186   : > { %p3347_p9 = scmp.ne.s32.totalorder %s3345_s18, %s3346_s6  ;;  %p3350_p11 = scmp.lt.s32.totalorder %s5526_s19, %s3346_s6 }
 0x188   : > { %p3351_p12 = por %p3350_p11, %p3349_p10 }
 0x18a   : > { %p3352_p13 = pnand %p3351_p12, %p3347_p9 }
 0x18c   : > { %3355 = shalt.err (!%p3352_p13)  }
 0x18d   : > { %553 = dma.hbm_to_vmem [thread:$0]  %s549_s13, 16, %s551_s24, [#allocation3] }
 0x18e   : > { %s2485_s10 = sld [smem:[#allocation7 + $0x15]]  ;;  %s3368_s21 = sshra.s32 %s565_s30, 4  ;;  %s3369_s21 = int_to_ptr.hbm [resolvable:$true] %s3368_s21 }
 0x18f   : > { %s3370_s14 = scalar_lea.hbm %s3369_s21, 1  ;;  %p3373_p1 = scmp.lt.s32.totalorder %s3369_s21, %s7294_s4 }
 0x190   : > { %p3371_p0 = scmp.ne.s32.totalorder %s3369_s21, %s3370_s14  ;;  %p3374_p2 = scmp.lt.s32.totalorder %s5526_s19, %s3370_s14 }
 0x192   : > { %p3375_p3 = por %p3374_p2, %p3373_p1 }
 0x194   : > { %p3376_p4 = pnand %p3375_p3, %p3371_p0 }
 0x196   : > { %3379 = shalt.err (!%p3376_p4)  }
 0x197   : > { %569 = dma.hbm_to_vmem [thread:$0]  %s565_s30, 16, %s567_s27, [#allocation3] }
 0x198   : > { %s2486_s28 = sld [smem:[#allocation7 + $0x16]]  ;;  %s5414_s8 = smov [#allocation2 + $0x1c]  }
 0x199   : > { %s582_s22 = sshll.u32 %s5414_s8, 4  ;;  %s5415_s24 = smov [#allocation2 + $0x24]   ;;  %s583_s22 = int_to_ptr.vmem [resolvable:$true] %s582_s22 }
 0x19a   : > { %s5821_s17 = sshll.u32 %s5415_s24, 4  ;;  %s5824_s2 = sld [smem:[#allocation7 + $0x17]]  ;;  %s599_s17 = int_to_ptr.vmem [resolvable:$true] %s5821_s17 }
 0x19b   : > { %s571_s23 = scalar_lea.hbm %s7294_s4, %s2485_s10  ;;  %s5416_s9 = smov [#allocation2 + $0x2c]  }
 0x19c   : > { %s580_s13 = sshll.u32 %s571_s23, 4  ;;  %s5829_s25 = sshll.u32 %s5416_s9, 4  ;;  %s581_s13 = int_to_ptr.hbm [resolvable:$true] %s580_s13  ;;  %s615_s25 = int_to_ptr.vmem [resolvable:$true] %s5829_s25 }
 0x19d   : > { %s3392_s18 = sshra.s32 %s581_s13, 4  ;;  %s3393_s18 = int_to_ptr.hbm [resolvable:$true] %s3392_s18 }
 0x19e   : > { %s587_s30 = scalar_lea.hbm %s7294_s4, %s2486_s28  ;;  %s3394_s6 = scalar_lea.hbm %s3393_s18, 1 }
 0x19f   : > { %p3395_p5 = scmp.ne.s32.totalorder %s3393_s18, %s3394_s6  ;;  %p3397_p6 = scmp.lt.s32.totalorder %s3393_s18, %s7294_s4 }
 0x1a0   : > { %p3398_p7 = scmp.lt.s32.totalorder %s5526_s19, %s3394_s6 }
 0x1a2   : > { %p3399_p8 = por %p3398_p7, %p3397_p6 }
 0x1a4   : > { %p3400_p9 = pnand %p3399_p8, %p3395_p5 }
 0x1a6   : > { %3403 = shalt.err (!%p3400_p9)  }
 0x1a7   : > { %585 = dma.hbm_to_vmem [thread:$0]  %s581_s13, 16, %s583_s22, [#allocation3] }
 0x1a8   : > { %s596_s10 = sshll.u32 %s587_s30, 4  ;;  %s603_s20 = scalar_lea.hbm %s7294_s4, %s5824_s2  ;;  %s597_s10 = int_to_ptr.hbm [resolvable:$true] %s596_s10 }
 0x1a9   : > { %s3416_s26 = sshra.s32 %s597_s10, 4  ;;  %s3417_s26 = int_to_ptr.hbm [resolvable:$true] %s3416_s26 }
 0x1aa   : > { %s3418_s28 = scalar_lea.hbm %s3417_s26, 1  ;;  %p3421_p11 = scmp.lt.s32.totalorder %s3417_s26, %s7294_s4 }
 0x1ab   : > { %p3419_p10 = scmp.ne.s32.totalorder %s3417_s26, %s3418_s28  ;;  %p3422_p12 = scmp.lt.s32.totalorder %s5526_s19, %s3418_s28 }
 0x1ad   : > { %p3423_p13 = por %p3422_p12, %p3421_p11 }
 0x1af   : > { %p3424_p0 = pnand %p3423_p13, %p3419_p10 }
 0x1b1   : > { %3427 = shalt.err (!%p3424_p0)  }
 0x1b2   : > { %601 = dma.hbm_to_vmem [thread:$0]  %s597_s10, 16, %s599_s17, [#allocation3] }
 0x1b3   : > { %s612_s22 = sshll.u32 %s603_s20, 4  ;;  %s2488_s15 = sld [smem:[#allocation7 + $0x18]]  ;;  %s613_s22 = int_to_ptr.hbm [resolvable:$true] %s612_s22 }
 0x1b4   : > { %s3440_s2 = sshra.s32 %s613_s22, 4  ;;  %s3441_s2 = int_to_ptr.hbm [resolvable:$true] %s3440_s2 }
 0x1b5   : > { %s3442_s29 = scalar_lea.hbm %s3441_s2, 1  ;;  %p3445_p2 = scmp.lt.s32.totalorder %s3441_s2, %s7294_s4 }
 0x1b6   : > { %p3443_p1 = scmp.ne.s32.totalorder %s3441_s2, %s3442_s29  ;;  %p3446_p3 = scmp.lt.s32.totalorder %s5526_s19, %s3442_s29 }
 0x1b8   : > { %p3447_p4 = por %p3446_p3, %p3445_p2 }
 0x1ba   : > { %p3448_p5 = pnand %p3447_p4, %p3443_p1 }
 0x1bc   : > { %3451 = shalt.err (!%p3448_p5)  }
 0x1bd   : > { %617 = dma.hbm_to_vmem [thread:$0]  %s613_s22, 16, %s615_s25, [#allocation3] }
 0x1be   : > { %s5417_s9 = smov [#allocation2 + $0x34]   ;;  %s2489_s16 = sld [smem:[#allocation5 + $0x5]] }
 0x1bf   : > { %s630_s27 = sshll.u32 %s5417_s9, 4  ;;  %s5418_s17 = smov [#allocation2 + $0x5]   ;;  %s631_s27 = int_to_ptr.vmem [resolvable:$true] %s630_s27 }
 0x1c0   : > { %s5853_s30 = sshll.u32 %s5418_s17, 4  ;;  %s2490_s18 = sld [smem:[#allocation6 + $0x5]]  ;;  %s647_s30 = int_to_ptr.vmem [resolvable:$true] %s5853_s30 }
 0x1c1   : > { %s619_s12 = scalar_lea.hbm %s7294_s4, %s2488_s15  ;;  %s5419_s21 = smov [#allocation2 + $0xd]  }
 0x1c2   : > { %s628_s10 = sshll.u32 %s619_s12, 4  ;;  %s5859_s14 = sshll.u32 %s5419_s21, 4  ;;  %s629_s10 = int_to_ptr.hbm [resolvable:$true] %s628_s10  ;;  %s663_s14 = int_to_ptr.vmem [resolvable:$true] %s5859_s14 }
 0x1c3   : > { %s3464_s25 = sshra.s32 %s629_s10, 4  ;;  %s3465_s25 = int_to_ptr.hbm [resolvable:$true] %s3464_s25 }
 0x1c4   : > { %s3466_s20 = scalar_lea.hbm %s3465_s25, 1  ;;  %p3469_p7 = scmp.lt.s32.totalorder %s3465_s25, %s7294_s4 }
 0x1c5   : > { %p3467_p6 = scmp.ne.s32.totalorder %s3465_s25, %s3466_s20  ;;  %p3470_p8 = scmp.lt.s32.totalorder %s5526_s19, %s3466_s20 }
 0x1c7   : > { %p3471_p9 = por %p3470_p8, %p3469_p7 }
 0x1c9   : > { %p3472_p10 = pnand %p3471_p9, %p3467_p6 }
 0x1cb   : > { %3475 = shalt.err (!%p3472_p10)  }
 0x1cc   : > { %633 = dma.hbm_to_vmem [thread:$0]  %s629_s10, 16, %s631_s27, [#allocation3] }
 0x1cd   : > { %s635_s22 = scalar_lea.hbm %s7293_s3, %s2489_s16  ;;  %s651_s23 = scalar_lea.hbm %s7294_s4, %s2490_s18 }
 0x1ce   : > { %s644_s15 = sshll.u32 %s635_s22, 4  ;;  %s660_s13 = sshll.u32 %s651_s23, 4  ;;  %s645_s15 = int_to_ptr.hbm [resolvable:$true] %s644_s15  ;;  %s661_s13 = int_to_ptr.hbm [resolvable:$true] %s660_s13 }
 0x1cf   : > { %s3488_s9 = sshra.s32 %s645_s15, 4  ;;  %s3489_s9 = int_to_ptr.hbm [resolvable:$true] %s3488_s9 }
 0x1d0   : > { %s3490_s17 = scalar_lea.hbm %s3489_s9, 1  ;;  %p3493_p12 = scmp.lt.s32.totalorder %s3489_s9, %s7293_s3 }
 0x1d1   : > { %p3491_p11 = scmp.ne.s32.totalorder %s3489_s9, %s3490_s17  ;;  %p3494_p13 = scmp.lt.s32.totalorder %s5513_s1, %s3490_s17 }
 0x1d3   : > { %p3495_p0 = por %p3494_p13, %p3493_p12 }
 0x1d5   : > { %p3496_p1 = pnand %p3495_p0, %p3491_p11 }
 0x1d7   : > { %3499 = shalt.err (!%p3496_p1)  }
 0x1d8   : > { %649 = dma.hbm_to_vmem [thread:$0]  %s645_s15, 16, %s647_s30, [#allocation3] }
 0x1d9   : > { %s2491_s16 = sld [smem:[#allocation7 + $0x19]]  ;;  %s3512_s18 = sshra.s32 %s661_s13, 4  ;;  %s3513_s18 = int_to_ptr.hbm [resolvable:$true] %s3512_s18 }
 0x1da   : > { %s3514_s11 = scalar_lea.hbm %s3513_s18, 1  ;;  %p3517_p3 = scmp.lt.s32.totalorder %s3513_s18, %s7294_s4 }
 0x1db   : > { %p3515_p2 = scmp.ne.s32.totalorder %s3513_s18, %s3514_s11  ;;  %p3518_p4 = scmp.lt.s32.totalorder %s5526_s19, %s3514_s11 }
 0x1dd   : > { %p3519_p5 = por %p3518_p4, %p3517_p3 }
 0x1df   : > { %p3520_p6 = pnand %p3519_p5, %p3515_p2 }
 0x1e1   : > { %3523 = shalt.err (!%p3520_p6)  }
 0x1e2   : > { %665 = dma.hbm_to_vmem [thread:$0]  %s661_s13, 16, %s663_s14, [#allocation3] }
 0x1e3   : > { %s2492_s21 = sld [smem:[#allocation7 + $0x1a]]  ;;  %s5420_s25 = smov [#allocation2 + $0x15]  }
 0x1e4   : > { %s678_s20 = sshll.u32 %s5420_s25, 4  ;;  %s5421_s30 = smov [#allocation2 + $0x1d]   ;;  %s679_s20 = int_to_ptr.vmem [resolvable:$true] %s678_s20 }
 0x1e5   : > { %s5882_s26 = sshll.u32 %s5421_s30, 4  ;;  %s5885_s28 = sld [smem:[#allocation7 + $0x1b]]  ;;  %s695_s26 = int_to_ptr.vmem [resolvable:$true] %s5882_s26 }
 0x1e6   : > { %s667_s22 = scalar_lea.hbm %s7294_s4, %s2491_s16  ;;  %s5422_s2 = smov [#allocation2 + $0x25]  }
 0x1e7   : > { %s676_s15 = sshll.u32 %s667_s22, 4  ;;  %s5890_s29 = sshll.u32 %s5422_s2, 4  ;;  %s677_s15 = int_to_ptr.hbm [resolvable:$true] %s676_s15  ;;  %s711_s29 = int_to_ptr.vmem [resolvable:$true] %s5890_s29 }
 0x1e8   : > { %s3536_s9 = sshra.s32 %s677_s15, 4  ;;  %s3537_s9 = int_to_ptr.hbm [resolvable:$true] %s3536_s9 }
 0x1e9   : > { %s683_s13 = scalar_lea.hbm %s7294_s4, %s2492_s21  ;;  %s3538_s17 = scalar_lea.hbm %s3537_s9, 1 }
 0x1ea   : > { %p3539_p7 = scmp.ne.s32.totalorder %s3537_s9, %s3538_s17  ;;  %p3541_p8 = scmp.lt.s32.totalorder %s3537_s9, %s7294_s4 }
 0x1eb   : > { %p3542_p9 = scmp.lt.s32.totalorder %s5526_s19, %s3538_s17 }
 0x1ed   : > { %p3543_p10 = por %p3542_p9, %p3541_p8 }
 0x1ef   : > { %p3544_p11 = pnand %p3543_p10, %p3539_p7 }
 0x1f1   : > { %3547 = shalt.err (!%p3544_p11)  }
 0x1f2   : > { %681 = dma.hbm_to_vmem [thread:$0]  %s677_s15, 16, %s679_s20, [#allocation3] }
 0x1f3   : > { %s692_s16 = sshll.u32 %s683_s13, 4  ;;  %s699_s12 = scalar_lea.hbm %s7294_s4, %s5885_s28  ;;  %s693_s16 = int_to_ptr.hbm [resolvable:$true] %s692_s16 }
 0x1f4   : > { %s3560_s10 = sshra.s32 %s693_s16, 4  ;;  %s3561_s10 = int_to_ptr.hbm [resolvable:$true] %s3560_s10 }
 0x1f5   : > { %s3562_s21 = scalar_lea.hbm %s3561_s10, 1  ;;  %p3565_p13 = scmp.lt.s32.totalorder %s3561_s10, %s7294_s4 }
 0x1f6   : > { %p3563_p12 = scmp.ne.s32.totalorder %s3561_s10, %s3562_s21  ;;  %p3566_p0 = scmp.lt.s32.totalorder %s5526_s19, %s3562_s21 }
 0x1f8   : > { %p3567_p1 = por %p3566_p0, %p3565_p13 }
 0x1fa   : > { %p3568_p2 = pnand %p3567_p1, %p3563_p12 }
 0x1fc   : > { %3571 = shalt.err (!%p3568_p2)  }
 0x1fd   : > { %697 = dma.hbm_to_vmem [thread:$0]  %s693_s16, 16, %s695_s26, [#allocation3] }
 0x1fe   : > { %s708_s20 = sshll.u32 %s699_s12, 4  ;;  %s2494_s8 = sld [smem:[#allocation7 + $0x1c]]  ;;  %s709_s20 = int_to_ptr.hbm [resolvable:$true] %s708_s20 }
 0x1ff   : > { %s3584_s28 = sshra.s32 %s709_s20, 4  ;;  %s3585_s28 = int_to_ptr.hbm [resolvable:$true] %s3584_s28 }
 0x200   : > { %s3586_s24 = scalar_lea.hbm %s3585_s28, 1  ;;  %p3589_p4 = scmp.lt.s32.totalorder %s3585_s28, %s7294_s4 }
 0x201   : > { %p3587_p3 = scmp.ne.s32.totalorder %s3585_s28, %s3586_s24  ;;  %p3590_p5 = scmp.lt.s32.totalorder %s5526_s19, %s3586_s24 }
 0x203   : > { %p3591_p6 = por %p3590_p5, %p3589_p4 }
 0x205   : > { %p3592_p7 = pnand %p3591_p6, %p3587_p3 }
 0x207   : > { %3595 = shalt.err (!%p3592_p7)  }
 0x208   : > { %713 = dma.hbm_to_vmem [thread:$0]  %s709_s20, 16, %s711_s29, [#allocation3] }
 0x209   : > { %s5423_s2 = smov [#allocation2 + $0x2d]   ;;  %s2495_s23 = sld [smem:[#allocation7 + $0x1d]] }
 0x20a   : > { %s726_s14 = sshll.u32 %s5423_s2, 4  ;;  %s5424_s26 = smov [#allocation2 + $0x35]   ;;  %s727_s14 = int_to_ptr.vmem [resolvable:$true] %s726_s14 }
 0x20b   : > { %s5914_s13 = sshll.u32 %s5424_s26, 4  ;;  %s2496_s9 = sld [smem:[#allocation5 + $0x6]]  ;;  %s743_s13 = int_to_ptr.vmem [resolvable:$true] %s5914_s13 }
 0x20c   : > { %s715_s27 = scalar_lea.hbm %s7294_s4, %s2494_s8  ;;  %s5425_s18 = smov [#allocation2 + $0x6]  }
 0x20d   : > { %s724_s16 = sshll.u32 %s715_s27, 4  ;;  %s5920_s11 = sshll.u32 %s5425_s18, 4  ;;  %s725_s16 = int_to_ptr.hbm [resolvable:$true] %s724_s16  ;;  %s759_s11 = int_to_ptr.vmem [resolvable:$true] %s5920_s11 }
 0x20e   : > { %s3608_s29 = sshra.s32 %s725_s16, 4  ;;  %s3609_s29 = int_to_ptr.hbm [resolvable:$true] %s3608_s29 }
 0x20f   : > { %s3610_s12 = scalar_lea.hbm %s3609_s29, 1  ;;  %p3613_p9 = scmp.lt.s32.totalorder %s3609_s29, %s7294_s4 }
 0x210   : > { %p3611_p8 = scmp.ne.s32.totalorder %s3609_s29, %s3610_s12  ;;  %p3614_p10 = scmp.lt.s32.totalorder %s5526_s19, %s3610_s12 }
 0x212   : > { %p3615_p11 = por %p3614_p10, %p3613_p9 }
 0x214   : > { %p3616_p12 = pnand %p3615_p11, %p3611_p8 }
 0x216   : > { %3619 = shalt.err (!%p3616_p12)  }
 0x217   : > { %729 = dma.hbm_to_vmem [thread:$0]  %s725_s16, 16, %s727_s14, [#allocation3] }
 0x218   : > { %s731_s20 = scalar_lea.hbm %s7294_s4, %s2495_s23  ;;  %s747_s22 = scalar_lea.hbm %s7293_s3, %s2496_s9 }
 0x219   : > { %s740_s8 = sshll.u32 %s731_s20, 4  ;;  %s756_s15 = sshll.u32 %s747_s22, 4  ;;  %s741_s8 = int_to_ptr.hbm [resolvable:$true] %s740_s8  ;;  %s757_s15 = int_to_ptr.hbm [resolvable:$true] %s756_s15 }
 0x21a   : > { %s3632_s2 = sshra.s32 %s741_s8, 4  ;;  %s3633_s2 = int_to_ptr.hbm [resolvable:$true] %s3632_s2 }
 0x21b   : > { %s3634_s26 = scalar_lea.hbm %s3633_s2, 1  ;;  %p3637_p0 = scmp.lt.s32.totalorder %s3633_s2, %s7294_s4 }
 0x21c   : > { %p3635_p13 = scmp.ne.s32.totalorder %s3633_s2, %s3634_s26  ;;  %p3638_p1 = scmp.lt.s32.totalorder %s5526_s19, %s3634_s26 }
 0x21e   : > { %p3639_p2 = por %p3638_p1, %p3637_p0 }
 0x220   : > { %p3640_p3 = pnand %p3639_p2, %p3635_p13 }
 0x222   : > { %3643 = shalt.err (!%p3640_p3)  }
 0x223   : > { %745 = dma.hbm_to_vmem [thread:$0]  %s741_s8, 16, %s743_s13, [#allocation3] }
 0x224   : > { %s2497_s23 = sld [smem:[#allocation6 + $0x6]]  ;;  %s3656_s9 = sshra.s32 %s757_s15, 4  ;;  %s3657_s9 = int_to_ptr.hbm [resolvable:$true] %s3656_s9 }
 0x225   : > { %s3658_s6 = scalar_lea.hbm %s3657_s9, 1  ;;  %p3661_p5 = scmp.lt.s32.totalorder %s3657_s9, %s7293_s3 }
 0x226   : > { %p3659_p4 = scmp.ne.s32.totalorder %s3657_s9, %s3658_s6  ;;  %p3662_p6 = scmp.lt.s32.totalorder %s5513_s1, %s3658_s6 }
 0x228   : > { %p3663_p7 = por %p3662_p6, %p3661_p5 }
 0x22a   : > { %p3664_p8 = pnand %p3663_p7, %p3659_p4 }
 0x22c   : > { %3667 = shalt.err (!%p3664_p8)  }
 0x22d   : > { %761 = dma.hbm_to_vmem [thread:$0]  %s757_s15, 16, %s759_s11, [#allocation3] }
 0x22e   : > { %s2498_s18 = sld [smem:[#allocation7 + $0x1e]]  ;;  %s5426_s29 = smov [#allocation2 + $0xe]  }
 0x22f   : > { %s774_s12 = sshll.u32 %s5426_s29, 4  ;;  %s5427_s13 = smov [#allocation2 + $0x16]   ;;  %s775_s12 = int_to_ptr.vmem [resolvable:$true] %s774_s12 }
 0x230   : > { %s5943_s10 = sshll.u32 %s5427_s13, 4  ;;  %s5946_s21 = sld [smem:[#allocation7 + $0x1f]]  ;;  %s791_s10 = int_to_ptr.vmem [resolvable:$true] %s5943_s10 }
 0x231   : > { %s763_s20 = scalar_lea.hbm %s7294_s4, %s2497_s23  ;;  %s5428_s28 = smov [#allocation2 + $0x1e]  }
 0x232   : > { %s772_s8 = sshll.u32 %s763_s20, 4  ;;  %s5951_s24 = sshll.u32 %s5428_s28, 4  ;;  %s773_s8 = int_to_ptr.hbm [resolvable:$true] %s772_s8  ;;  %s807_s24 = int_to_ptr.vmem [resolvable:$true] %s5951_s24 }
 0x233   : > { %s3680_s2 = sshra.s32 %s773_s8, 4  ;;  %s3681_s2 = int_to_ptr.hbm [resolvable:$true] %s3680_s2 }
 0x234   : > { %s779_s15 = scalar_lea.hbm %s7294_s4, %s2498_s18  ;;  %s3682_s26 = scalar_lea.hbm %s3681_s2, 1 }
 0x235   : > { %p3683_p9 = scmp.ne.s32.totalorder %s3681_s2, %s3682_s26  ;;  %p3685_p10 = scmp.lt.s32.totalorder %s3681_s2, %s7294_s4 }
 0x236   : > { %p3686_p11 = scmp.lt.s32.totalorder %s5526_s19, %s3682_s26 }
 0x238   : > { %p3687_p12 = por %p3686_p11, %p3685_p10 }
 0x23a   : > { %p3688_p13 = pnand %p3687_p12, %p3683_p9 }
 0x23c   : > { %3691 = shalt.err (!%p3688_p13)  }
 0x23d   : > { %777 = dma.hbm_to_vmem [thread:$0]  %s773_s8, 16, %s775_s12, [#allocation3] }
 0x23e   : > { %s788_s23 = sshll.u32 %s779_s15, 4  ;;  %s795_s27 = scalar_lea.hbm %s7294_s4, %s5946_s21  ;;  %s789_s23 = int_to_ptr.hbm [resolvable:$true] %s788_s23 }
 0x23f   : > { %s3704_s16 = sshra.s32 %s789_s23, 4  ;;  %s3705_s16 = int_to_ptr.hbm [resolvable:$true] %s3704_s16 }
 0x240   : > { %s3706_s18 = scalar_lea.hbm %s3705_s16, 1  ;;  %p3709_p1 = scmp.lt.s32.totalorder %s3705_s16, %s7294_s4 }
 0x241   : > { %p3707_p0 = scmp.ne.s32.totalorder %s3705_s16, %s3706_s18  ;;  %p3710_p2 = scmp.lt.s32.totalorder %s5526_s19, %s3706_s18 }
 0x243   : > { %p3711_p3 = por %p3710_p2, %p3709_p1 }
 0x245   : > { %p3712_p4 = pnand %p3711_p3, %p3707_p0 }
 0x247   : > { %3715 = shalt.err (!%p3712_p4)  }
 0x248   : > { %793 = dma.hbm_to_vmem [thread:$0]  %s789_s23, 16, %s791_s10, [#allocation3] }
 0x249   : > { %s804_s12 = sshll.u32 %s795_s27, 4  ;;  %s2500_s25 = sld [smem:[#allocation7 + $0x20]]  ;;  %s805_s12 = int_to_ptr.hbm [resolvable:$true] %s804_s12 }
 0x24a   : > { %s3728_s21 = sshra.s32 %s805_s12, 4  ;;  %s3729_s21 = int_to_ptr.hbm [resolvable:$true] %s3728_s21 }
 0x24b   : > { %s3730_s30 = scalar_lea.hbm %s3729_s21, 1  ;;  %p3733_p6 = scmp.lt.s32.totalorder %s3729_s21, %s7294_s4 }
 0x24c   : > { %p3731_p5 = scmp.ne.s32.totalorder %s3729_s21, %s3730_s30  ;;  %p3734_p7 = scmp.lt.s32.totalorder %s5526_s19, %s3730_s30 }
 0x24e   : > { %p3735_p8 = por %p3734_p7, %p3733_p6 }
 0x250   : > { %p3736_p9 = pnand %p3735_p8, %p3731_p5 }
 0x252   : > { %3739 = shalt.err (!%p3736_p9)  }
 0x253   : > { %809 = dma.hbm_to_vmem [thread:$0]  %s805_s12, 16, %s807_s24, [#allocation3] }
 0x254   : > { %s5429_s28 = smov [#allocation2 + $0x26]   ;;  %s2501_s22 = sld [smem:[#allocation7 + $0x21]] }
 0x255   : > { %s822_s11 = sshll.u32 %s5429_s28, 4  ;;  %s5430_s10 = smov [#allocation2 + $0x2e]   ;;  %s823_s11 = int_to_ptr.vmem [resolvable:$true] %s822_s11 }
 0x256   : > { %s5975_s15 = sshll.u32 %s5430_s10, 4  ;;  %s2502_s2 = sld [smem:[#allocation7 + $0x22]]  ;;  %s839_s15 = int_to_ptr.vmem [resolvable:$true] %s5975_s15 }
 0x257   : > { %s811_s14 = scalar_lea.hbm %s7294_s4, %s2500_s25  ;;  %s5431_s9 = smov [#allocation2 + $0x36]  }
 0x258   : > { %s820_s23 = sshll.u32 %s811_s14, 4  ;;  %s5981_s6 = sshll.u32 %s5431_s9, 4  ;;  %s821_s23 = int_to_ptr.hbm [resolvable:$true] %s820_s23  ;;  %s855_s6 = int_to_ptr.vmem [resolvable:$true] %s5981_s6 }
 0x259   : > { %s3752_s24 = sshra.s32 %s821_s23, 4  ;;  %s3753_s24 = int_to_ptr.hbm [resolvable:$true] %s3752_s24 }
 0x25a   : > { %s3754_s27 = scalar_lea.hbm %s3753_s24, 1  ;;  %p3757_p11 = scmp.lt.s32.totalorder %s3753_s24, %s7294_s4 }
 0x25b   : > { %p3755_p10 = scmp.ne.s32.totalorder %s3753_s24, %s3754_s27  ;;  %p3758_p12 = scmp.lt.s32.totalorder %s5526_s19, %s3754_s27 }
 0x25d   : > { %p3759_p13 = por %p3758_p12, %p3757_p11 }
 0x25f   : > { %p3760_p0 = pnand %p3759_p13, %p3755_p10 }
 0x261   : > { %3763 = shalt.err (!%p3760_p0)  }
 0x262   : > { %825 = dma.hbm_to_vmem [thread:$0]  %s821_s23, 16, %s823_s11, [#allocation3]  ;;  %vm73_vm0 = vcmask 0   ;;  %v5432_v0 = vmov 0.0  }
 0x263   : > { %s827_s12 = scalar_lea.hbm %s7294_s4, %s2501_s22  ;;  %s843_s20 = scalar_lea.hbm %s7294_s4, %s2502_s2  ;;  %74 = vst.msk [vmem:[#allocation8] sm:$0x1] %vm73_vm0, %v5432_v0 }
 0x264   : > { %s836_s25 = sshll.u32 %s827_s12, 4  ;;  %s852_s8 = sshll.u32 %s843_s20, 4  ;;  %s837_s25 = int_to_ptr.hbm [resolvable:$true] %s836_s25  ;;  %s853_s8 = int_to_ptr.hbm [resolvable:$true] %s852_s8 }
 0x265   : > { %s3776_s28 = sshra.s32 %s837_s25, 4  ;;  %s3777_s28 = int_to_ptr.hbm [resolvable:$true] %s3776_s28 }
 0x266   : > { %s3778_s11 = scalar_lea.hbm %s3777_s28, 1  ;;  %p3781_p2 = scmp.lt.s32.totalorder %s3777_s28, %s7294_s4 }
 0x267   : > { %p3779_p1 = scmp.ne.s32.totalorder %s3777_s28, %s3778_s11  ;;  %p3782_p3 = scmp.lt.s32.totalorder %s5526_s19, %s3778_s11 }
 0x269   : > { %p3783_p4 = por %p3782_p3, %p3781_p2 }
 0x26b   : > { %p3784_p5 = pnand %p3783_p4, %p3779_p1 }
 0x26d   : > { %3787 = shalt.err (!%p3784_p5)  }
 0x26e   : > { %841 = dma.hbm_to_vmem [thread:$0]  %s837_s25, 16, %s839_s15, [#allocation3] }
 0x26f   : > { %s2503_s22 = sld [smem:[#allocation5 + $0x7]]  ;;  %s3800_s2 = sshra.s32 %s853_s8, 4  ;;  %s3801_s2 = int_to_ptr.hbm [resolvable:$true] %s3800_s2 }
 0x270   : > { %s3802_s17 = scalar_lea.hbm %s3801_s2, 1  ;;  %p3805_p7 = scmp.lt.s32.totalorder %s3801_s2, %s7294_s4 }
 0x271   : > { %p3803_p6 = scmp.ne.s32.totalorder %s3801_s2, %s3802_s17  ;;  %p3806_p8 = scmp.lt.s32.totalorder %s5526_s19, %s3802_s17 }
 0x273   : > { %p3807_p9 = por %p3806_p8, %p3805_p7 }
 0x275   : > { %p3808_p10 = pnand %p3807_p9, %p3803_p6 }
 0x277   : > { %3811 = shalt.err (!%p3808_p10)  }
 0x278   : > { %857 = dma.hbm_to_vmem [thread:$0]  %s853_s8, 16, %s855_s6, [#allocation3] }
 0x279   : > { %s2504_s9 = sld [smem:[#allocation6 + $0x7]]  ;;  %s5433_s24 = smov [#allocation2 + $0x7]  }
 0x27a   : > { %s870_s15 = sshll.u32 %s5433_s24, 4  ;;  %s5434_s27 = smov [#allocation2 + $0xf]   ;;  %s871_s15 = int_to_ptr.vmem [resolvable:$true] %s870_s15 }
 0x27b   : > { %s6006_s16 = sshll.u32 %s5434_s27, 4  ;;  %s6009_s18 = sld [smem:[#allocation7 + $0x23]]  ;;  %s887_s16 = int_to_ptr.vmem [resolvable:$true] %s6006_s16 }
 0x27c   : > { %s859_s12 = scalar_lea.hbm %s7293_s3, %s2503_s22  ;;  %s5435_s21 = smov [#allocation2 + $0x17]  }
 0x27d   : > { %s868_s25 = sshll.u32 %s859_s12, 4  ;;  %s6014_s30 = sshll.u32 %s5435_s21, 4  ;;  %s869_s25 = int_to_ptr.hbm [resolvable:$true] %s868_s25  ;;  %s903_s30 = int_to_ptr.vmem [resolvable:$true] %s6014_s30 }
 0x27e   : > { %s3824_s28 = sshra.s32 %s869_s25, 4  ;;  %s3825_s28 = int_to_ptr.hbm [resolvable:$true] %s3824_s28 }
 0x27f   : > { %s875_s8 = scalar_lea.hbm %s7294_s4, %s2504_s9  ;;  %s3826_s11 = scalar_lea.hbm %s3825_s28, 1 }
 0x280   : > { %p3827_p11 = scmp.ne.s32.totalorder %s3825_s28, %s3826_s11  ;;  %p3829_p12 = scmp.lt.s32.totalorder %s3825_s28, %s7293_s3 }
 0x281   : > { %p3830_p13 = scmp.lt.s32.totalorder %s5513_s1, %s3826_s11 }
 0x283   : > { %p3831_p0 = por %p3830_p13, %p3829_p12 }
 0x285   : > { %p3832_p1 = pnand %p3831_p0, %p3827_p11 }
 0x287   : > { %3835 = shalt.err (!%p3832_p1)  }
 0x288   : > { %873 = dma.hbm_to_vmem [thread:$0]  %s869_s25, 16, %s871_s15, [#allocation3] }
 0x289   : > { %s884_s22 = sshll.u32 %s875_s8, 4  ;;  %s891_s14 = scalar_lea.hbm %s7294_s4, %s6009_s18  ;;  %s885_s22 = int_to_ptr.hbm [resolvable:$true] %s884_s22 }
 0x28a   : > { %s3848_s23 = sshra.s32 %s885_s22, 4  ;;  %s3849_s23 = int_to_ptr.hbm [resolvable:$true] %s3848_s23 }
 0x28b   : > { %s3850_s9 = scalar_lea.hbm %s3849_s23, 1  ;;  %p3853_p3 = scmp.lt.s32.totalorder %s3849_s23, %s7294_s4 }
 0x28c   : > { %p3851_p2 = scmp.ne.s32.totalorder %s3849_s23, %s3850_s9  ;;  %p3854_p4 = scmp.lt.s32.totalorder %s5526_s19, %s3850_s9 }
 0x28e   : > { %p3855_p5 = por %p3854_p4, %p3853_p3 }
 0x290   : > { %p3856_p6 = pnand %p3855_p5, %p3851_p2 }
 0x292   : > { %3859 = shalt.err (!%p3856_p6)  }
 0x293   : > { %889 = dma.hbm_to_vmem [thread:$0]  %s885_s22, 16, %s887_s16, [#allocation3] }
 0x294   : > { %s900_s15 = sshll.u32 %s891_s14, 4  ;;  %s2506_s27 = sld [smem:[#allocation7 + $0x24]]  ;;  %s901_s15 = int_to_ptr.hbm [resolvable:$true] %s900_s15 }
 0x295   : > { %s3872_s18 = sshra.s32 %s901_s15, 4  ;;  %s3873_s18 = int_to_ptr.hbm [resolvable:$true] %s3872_s18 }
 0x296   : > { %s3874_s29 = scalar_lea.hbm %s3873_s18, 1  ;;  %p3877_p8 = scmp.lt.s32.totalorder %s3873_s18, %s7294_s4 }
 0x297   : > { %p3875_p7 = scmp.ne.s32.totalorder %s3873_s18, %s3874_s29  ;;  %p3878_p9 = scmp.lt.s32.totalorder %s5526_s19, %s3874_s29 }
 0x299   : > { %p3879_p10 = por %p3878_p9, %p3877_p8 }
 0x29b   : > { %p3880_p11 = pnand %p3879_p10, %p3875_p7 }
 0x29d   : > { %3883 = shalt.err (!%p3880_p11)  }
 0x29e   : > { %905 = dma.hbm_to_vmem [thread:$0]  %s901_s15, 16, %s903_s30, [#allocation3] }
 0x29f   : > { %s5436_s25 = smov [#allocation2 + $0x1f]   ;;  %s2507_s6 = sld [smem:[#allocation7 + $0x25]] }
 0x2a0   : > { %s918_s21 = sshll.u32 %s5436_s25, 4  ;;  %s5437_s16 = smov [#allocation2 + $0x27]   ;;  %s919_s21 = int_to_ptr.vmem [resolvable:$true] %s918_s21 }
 0x2a1   : > { %s6038_s20 = sshll.u32 %s5437_s16, 4  ;;  %s2508_s8 = sld [smem:[#allocation7 + $0x26]]  ;;  %s935_s20 = int_to_ptr.vmem [resolvable:$true] %s6038_s20 }
 0x2a2   : > { %s907_s10 = scalar_lea.hbm %s7294_s4, %s2506_s27  ;;  %s5438_s22 = smov [#allocation2 + $0x2f]  }
 0x2a3   : > { %s916_s26 = sshll.u32 %s907_s10, 4  ;;  %s6044_s2 = sshll.u32 %s5438_s22, 4  ;;  %s917_s26 = int_to_ptr.hbm [resolvable:$true] %s916_s26  ;;  %s951_s2 = int_to_ptr.vmem [resolvable:$true] %s6044_s2 }
 0x2a4   : > { %s3896_s30 = sshra.s32 %s917_s26, 4  ;;  %s3897_s30 = int_to_ptr.hbm [resolvable:$true] %s3896_s30 }
 0x2a5   : > { %s3898_s17 = scalar_lea.hbm %s3897_s30, 1  ;;  %p3901_p13 = scmp.lt.s32.totalorder %s3897_s30, %s7294_s4 }
 0x2a6   : > { %p3899_p12 = scmp.ne.s32.totalorder %s3897_s30, %s3898_s17  ;;  %p3902_p0 = scmp.lt.s32.totalorder %s5526_s19, %s3898_s17 }
 0x2a8   : > { %p3903_p1 = por %p3902_p0, %p3901_p13 }
 0x2aa   : > { %p3904_p2 = pnand %p3903_p1, %p3899_p12 }
 0x2ac   : > { %3907 = shalt.err (!%p3904_p2)  }
 0x2ad   : > { %921 = dma.hbm_to_vmem [thread:$0]  %s917_s26, 16, %s919_s21, [#allocation3] }
 0x2ae   : > { %s923_s1 = scalar_lea.hbm %s7294_s4, %s2507_s6  ;;  %s939_s29 = scalar_lea.hbm %s7294_s4, %s2508_s8 }
 0x2af   : > { %s932_s15 = sshll.u32 %s923_s1, 4  ;;  %s948_s13 = sshll.u32 %s939_s29, 4  ;;  %s933_s15 = int_to_ptr.hbm [resolvable:$true] %s932_s15  ;;  %s949_s13 = int_to_ptr.hbm [resolvable:$true] %s948_s13 }
 0x2b0   : > { %s3920_s12 = sshra.s32 %s933_s15, 4  ;;  %s3921_s12 = int_to_ptr.hbm [resolvable:$true] %s3920_s12 }
 0x2b1   : > { %s3922_s25 = scalar_lea.hbm %s3921_s12, 1  ;;  %p3925_p4 = scmp.lt.s32.totalorder %s3921_s12, %s7294_s4 }
 0x2b2   : > { %p3923_p3 = scmp.ne.s32.totalorder %s3921_s12, %s3922_s25  ;;  %p3926_p5 = scmp.lt.s32.totalorder %s5526_s19, %s3922_s25 }
 0x2b4   : > { %p3927_p6 = por %p3926_p5, %p3925_p4 }
 0x2b6   : > { %p3928_p7 = pnand %p3927_p6, %p3923_p3 }
 0x2b8   : > { %3931 = shalt.err (!%p3928_p7)  }
 0x2b9   : > { %937 = dma.hbm_to_vmem [thread:$0]  %s933_s15, 16, %s935_s20, [#allocation3] }
 0x2ba   : > { %s2509_s6 = sld [smem:[#allocation7 + $0x27]]  ;;  %s3944_s8 = sshra.s32 %s949_s13, 4  ;;  %s3945_s8 = int_to_ptr.hbm [resolvable:$true] %s3944_s8 }
 0x2bb   : > { %s3946_s28 = scalar_lea.hbm %s3945_s8, 1  ;;  %p3949_p9 = scmp.lt.s32.totalorder %s3945_s8, %s7294_s4 }
 0x2bc   : > { %p3947_p8 = scmp.ne.s32.totalorder %s3945_s8, %s3946_s28  ;;  %p3950_p10 = scmp.lt.s32.totalorder %s5526_s19, %s3946_s28 }
 0x2be   : > { %p3951_p11 = por %p3950_p10, %p3949_p9 }
 0x2c0   : > { %p3952_p12 = pnand %p3951_p11, %p3947_p8 }
 0x2c2   : > { %3955 = shalt.err (!%p3952_p12)  }
 0x2c3   : > { %953 = dma.hbm_to_vmem [thread:$0]  %s949_s13, 16, %s951_s2, [#allocation3] }
 0x2c4   : > { %s5439_s26 = smov [#allocation2 + $0x37]   ;;  %s955_s17 = scalar_lea.hbm %s7294_s4, %s2509_s6 }
 0x2c5   : > { %s966_s22 = sshll.u32 %s5439_s26, 4  ;;  %s964_s14 = sshll.u32 %s955_s17, 4  ;;  %s967_s22 = int_to_ptr.vmem [resolvable:$true] %s966_s22  ;;  %s965_s14 = int_to_ptr.hbm [resolvable:$true] %s964_s14 }
 0x2c6   : > { %s3968_s23 = sshra.s32 %s965_s14, 4  ;;  %s3969_s23 = int_to_ptr.hbm [resolvable:$true] %s3968_s23 }
 0x2c7   : > { %s3970_s9 = scalar_lea.hbm %s3969_s23, 1  ;;  %p3973_p0 = scmp.lt.s32.totalorder %s3969_s23, %s7294_s4 }
 0x2c8   : > { %p3971_p13 = scmp.ne.s32.totalorder %s3969_s23, %s3970_s9  ;;  %p3974_p1 = scmp.lt.s32.totalorder %s5526_s19, %s3970_s9 }
 0x2ca   : > { %p3975_p2 = por %p3974_p1, %p3973_p0 }
 0x2cc   : > { %p3976_p3 = pnand %p3975_p2, %p3971_p13 }
 0x2ce   : > { %3979 = shalt.err (!%p3976_p3)  }
 0x2cf   : > { %969 = dma.hbm_to_vmem [thread:$0]  %s965_s14, 16, %s967_s22, [#allocation3] }
 0x2d0 PF: > { %s970_s2 = sadd.s32 1, %s5378_s0 }
 0x2d1   : > { %p2510_p4 = scmp.ge.s32.totalorder %s970_s2, 3 }
 0x2d2   : > { %s975_s15 = ssub.s32 (!%p2510_p4), 1, %s7301_s7  ;;  %s2526_s27 = sshll.u32 (!%p2510_p4), %s5378_s0, 3 }
 0x2d3   : > { %974 = sbr.rel (%p2510_p4) target bundleno = 1943 (0x797), region = 244  ;;  %s6077_s18 = sadd.s32 (!%p2510_p4), 8, %s2526_s27 }
 0x2d4   : > { %s977_s29 = smul.u32 (!%p2510_p4), 56, %s975_s15  ;;  %s978_s13 = sld [smem:[#allocation5 + %s6077_s18]] (!%p2510_p4) }
 0x2d5   : > { %s995_s19 = sld [smem:[#allocation6 + %s6077_s18]] (!%p2510_p4)  ;;  %s6090_s6 = smul.u32 (!%p2510_p4), 40, %s970_s2 }
 0x2d6   : > { %s6081_s12 = scalar_lea.vmem (!%p2510_p4), [#allocation2], %s977_s29  ;;  %s6105_s9 = scalar_lea.sflag (!%p2510_p4), [#allocation3], %s975_s15 }
 0x2d7   : > { %s991_s25 = sshll.u32 (!%p2510_p4), %s6081_s12, 4  ;;  %s2209_s16 = scalar_lea.vmem (!%p2510_p4), %s6081_s12, 8 [#allocation2]  ;;  %s6085_s25 = int_to_ptr.vmem [resolvable:$true] %s991_s25 }
 0x2d8   : > { %s6087_s21 = sshll.u32 %s2209_s16, 4  ;;  %s2213_s8 = scalar_lea.vmem %s6081_s12, 16 [#allocation2]  ;;  %s1009_s21 = int_to_ptr.vmem [resolvable:$true] %s6087_s21 }
 0x2d9   : > { %s2217_s28 = scalar_lea.vmem %s6081_s12, 24 [#allocation2]  ;;  %s6098_s22 = sld [smem:[#allocation7 + %s6090_s6]] }
 0x2da   : > { %s979_s26 = scalar_lea.hbm %s7293_s3, %s978_s13  ;;  %s6110_s29 = scalar_lea.hbm %s7293_s3, 64 }
 0x2db   : > { %s989_s30 = sshll.u32 %s979_s26, 4  ;;  %s997_s14 = scalar_lea.hbm %s7294_s4, %s995_s19  ;;  %s990_s30 = int_to_ptr.hbm [resolvable:$true] %s989_s30 }
 0x2dc   : > { %s6103_s23 = sshll.u32 %s997_s14, 4  ;;  %s3992_s24 = sshra.s32 %s990_s30, 4  ;;  %s3993_s24 = int_to_ptr.hbm [resolvable:$true] %s3992_s24  ;;  %s1007_s23 = int_to_ptr.hbm [resolvable:$true] %s6103_s23 }
 0x2dd   : > { %s3994_s1 = scalar_lea.hbm %s3993_s24, 1  ;;  %p3997_p6 = scmp.lt.s32.totalorder %s3993_s24, %s7293_s3 }
 0x2de   : > { %p3995_p5 = scmp.ne.s32.totalorder %s3993_s24, %s3994_s1  ;;  %p3998_p7 = scmp.lt.s32.totalorder %s6110_s29, %s3994_s1 }
 0x2e0   : > { %p3999_p8 = por %p3998_p7, %p3997_p6 }
 0x2e2   : > { %p4000_p9 = pnand %p3999_p8, %p3995_p5 }
 0x2e4   : > { %4003 = shalt.err (!%p4000_p9)  }
 0x2e5   : > { %s4004_s15 = sshra.s32 %s6085_s25, 4  ;;  %s5440_s11 = smov [#allocation2]   ;;  %s4005_s15 = int_to_ptr.vmem [resolvable:$true] %s4004_s15 }
 0x2e6   : > { %s4006_s19 = scalar_lea.vmem %s4005_s15, 1  ;;  %s6117_s10 = scalar_lea.vmem %s5440_s11, 112 }
 0x2e7   : > { %p4007_p10 = scmp.ne.s32.totalorder %s4005_s15, %s4006_s19  ;;  %p4009_p11 = scmp.lt.s32.totalorder %s4005_s15, [#allocation2] }
 0x2e8   : > { %p4010_p12 = scmp.lt.s32.totalorder %s6117_s10, %s4006_s19 }
 0x2ea   : > { %p4011_p13 = por %p4010_p12, %p4009_p11 }
 0x2ec   : > { %p4012_p0 = pnand %p4011_p13, %p4007_p10 }
 0x2ee   : > { %4015 = shalt.err (!%p4012_p0)  }
 0x2ef   : > { %994 = dma.hbm_to_vmem [thread:$0]  %s990_s30, 16, %s6085_s25, %s6105_s9 }
 0x2f0   : > { %s6125_s26 = sshll.u32 %s2213_s8, 4  ;;  %s4016_s20 = sshra.s32 %s1007_s23, 4  ;;  %s4017_s20 = int_to_ptr.hbm [resolvable:$true] %s4016_s20  ;;  %s1027_s26 = int_to_ptr.vmem [resolvable:$true] %s6125_s26 }
 0x2f1   : > { %s4018_s17 = scalar_lea.hbm %s4017_s20, 1  ;;  %s6130_s1 = scalar_lea.hbm %s7294_s4, 64 }
 0x2f2   : > { %p4019_p1 = scmp.ne.s32.totalorder %s4017_s20, %s4018_s17  ;;  %p4021_p2 = scmp.lt.s32.totalorder %s4017_s20, %s7294_s4 }
 0x2f3   : > { %p4022_p3 = scmp.lt.s32.totalorder %s6130_s1, %s4018_s17 }
 0x2f5   : > { %p4023_p4 = por %p4022_p3, %p4021_p2 }
 0x2f7   : > { %p4024_p5 = pnand %p4023_p4, %p4019_p1 }
 0x2f9   : > { %4027 = shalt.err (!%p4024_p5)  }
 0x2fa   : > { %s4028_s25 = sshra.s32 %s1009_s21, 4  ;;  %s4029_s25 = int_to_ptr.vmem [resolvable:$true] %s4028_s25 }
 0x2fb   : > { %s4030_s8 = scalar_lea.vmem %s4029_s25, 1  ;;  %p4033_p7 = scmp.lt.s32.totalorder %s4029_s25, [#allocation2] }
 0x2fc   : > { %p4031_p6 = scmp.ne.s32.totalorder %s4029_s25, %s4030_s8  ;;  %p4034_p8 = scmp.lt.s32.totalorder %s6117_s10, %s4030_s8 }
 0x2fe   : > { %p4035_p9 = por %p4034_p8, %p4033_p7 }
 0x300   : > { %p4036_p10 = pnand %p4035_p9, %p4031_p6 }
 0x302   : > { %4039 = shalt.err (!%p4036_p10)  }
 0x303   : > { %1011 = dma.hbm_to_vmem [thread:$0]  %s1007_s23, 16, %s1009_s21, %s6105_s9 }
 0x304   : > { %s1015_s16 = scalar_lea.hbm %s7294_s4, %s6098_s22  ;;  %s1030_s19 = sadd.s32 1, %s6090_s6 }
 0x305   : > { %s1024_s15 = sshll.u32 %s1015_s16, 4  ;;  %s6148_s11 = sld [smem:[#allocation7 + %s1030_s19]]  ;;  %s1025_s15 = int_to_ptr.hbm [resolvable:$true] %s1024_s15 }
 0x306   : > { %s4040_s20 = sshra.s32 %s1025_s15, 4  ;;  %s4041_s20 = int_to_ptr.hbm [resolvable:$true] %s4040_s20 }
 0x307   : > { %s4042_s17 = scalar_lea.hbm %s4041_s20, 1  ;;  %p4045_p12 = scmp.lt.s32.totalorder %s4041_s20, %s7294_s4 }
 0x308   : > { %p4043_p11 = scmp.ne.s32.totalorder %s4041_s20, %s4042_s17  ;;  %p4046_p13 = scmp.lt.s32.totalorder %s6130_s1, %s4042_s17 }
 0x30a   : > { %p4047_p0 = por %p4046_p13, %p4045_p12 }
 0x30c   : > { %p4048_p1 = pnand %p4047_p0, %p4043_p11 }
 0x30e   : > { %4051 = shalt.err (!%p4048_p1)  }
 0x30f   : > { %s4052_s21 = sshra.s32 %s1027_s26, 4  ;;  %s4053_s21 = int_to_ptr.vmem [resolvable:$true] %s4052_s21 }
 0x310   : > { %s4054_s22 = scalar_lea.vmem %s4053_s21, 1  ;;  %p4057_p3 = scmp.lt.s32.totalorder %s4053_s21, [#allocation2] }
 0x311   : > { %p4055_p2 = scmp.ne.s32.totalorder %s4053_s21, %s4054_s22  ;;  %p4058_p4 = scmp.lt.s32.totalorder %s6117_s10, %s4054_s22 }
 0x313   : > { %p4059_p5 = por %p4058_p4, %p4057_p3 }
 0x315   : > { %p4060_p6 = pnand %p4059_p5, %p4055_p2 }
 0x317   : > { %4063 = shalt.err (!%p4060_p6)  }
 0x318   : > { %1029 = dma.hbm_to_vmem [thread:$0]  %s1025_s15, 16, %s1027_s26, %s6105_s9 }
 0x319   : > { %s6158_s23 = sshll.u32 %s2217_s28, 4  ;;  %s1048_s2 = sadd.s32 2, %s6090_s6  ;;  %s1045_s23 = int_to_ptr.vmem [resolvable:$true] %s6158_s23 }
 0x31a   : > { %s6162_s27 = sld [smem:[#allocation7 + %s1048_s2]]  ;;  %s2221_s25 = scalar_lea.vmem %s6081_s12, 32 [#allocation2] }
 0x31b   : > { %s1066_s8 = sadd.s32 3, %s6090_s6  ;;  %s6166_s30 = sshll.u32 %s2221_s25, 4  ;;  %s1063_s30 = int_to_ptr.vmem [resolvable:$true] %s6166_s30 }
 0x31c   : > { %s6168_s13 = sld [smem:[#allocation7 + %s1066_s8]]  ;;  %s1033_s26 = scalar_lea.hbm %s7294_s4, %s6148_s11 }
 0x31d   : > { %s1042_s28 = sshll.u32 %s1033_s26, 4  ;;  %s2225_s15 = scalar_lea.vmem %s6081_s12, 40 [#allocation2]  ;;  %s1043_s28 = int_to_ptr.hbm [resolvable:$true] %s1042_s28 }
 0x31e   : > { %s6176_s20 = sshll.u32 %s2225_s15, 4  ;;  %s4064_s17 = sshra.s32 %s1043_s28, 4  ;;  %s4065_s17 = int_to_ptr.hbm [resolvable:$true] %s4064_s17  ;;  %s1081_s20 = int_to_ptr.vmem [resolvable:$true] %s6176_s20 }
 0x31f   : > { %s4066_s14 = scalar_lea.hbm %s4065_s17, 1  ;;  %p4069_p8 = scmp.lt.s32.totalorder %s4065_s17, %s7294_s4 }
 0x320   : > { %p4067_p7 = scmp.ne.s32.totalorder %s4065_s17, %s4066_s14  ;;  %p4070_p9 = scmp.lt.s32.totalorder %s6130_s1, %s4066_s14 }
 0x322   : > { %p4071_p10 = por %p4070_p9, %p4069_p8 }
 0x324   : > { %p4072_p11 = pnand %p4071_p10, %p4067_p7 }
 0x326   : > { %4075 = shalt.err (!%p4072_p11)  }
 0x327   : > { %s4076_s11 = sshra.s32 %s1045_s23, 4  ;;  %s4077_s11 = int_to_ptr.vmem [resolvable:$true] %s4076_s11 }
 0x328   : > { %s4078_s22 = scalar_lea.vmem %s4077_s11, 1  ;;  %p4081_p13 = scmp.lt.s32.totalorder %s4077_s11, [#allocation2] }
 0x329   : > { %p4079_p12 = scmp.ne.s32.totalorder %s4077_s11, %s4078_s22  ;;  %p4082_p0 = scmp.lt.s32.totalorder %s6117_s10, %s4078_s22 }
 0x32b   : > { %p4083_p1 = por %p4082_p0, %p4081_p13 }
 0x32d   : > { %p4084_p2 = pnand %p4083_p1, %p4079_p12 }
 0x32f   : > { %4087 = shalt.err (!%p4084_p2)  }
 0x330   : > { %1047 = dma.hbm_to_vmem [thread:$0]  %s1043_s28, 16, %s1045_s23, %s6105_s9 }
 0x331   : > { %s1051_s8 = scalar_lea.hbm %s7294_s4, %s6162_s27  ;;  %s1069_s15 = scalar_lea.hbm %s7294_s4, %s6168_s13 }
 0x332   : > { %s1060_s16 = sshll.u32 %s1051_s8, 4  ;;  %s6197_s17 = sshll.u32 %s1069_s15, 4  ;;  %s1061_s16 = int_to_ptr.hbm [resolvable:$true] %s1060_s16  ;;  %s1079_s17 = int_to_ptr.hbm [resolvable:$true] %s6197_s17 }
 0x333   : > { %s4088_s14 = sshra.s32 %s1061_s16, 4  ;;  %s4089_s14 = int_to_ptr.hbm [resolvable:$true] %s4088_s14 }
 0x334   : > { %s4090_s24 = scalar_lea.hbm %s4089_s14, 1  ;;  %p4093_p4 = scmp.lt.s32.totalorder %s4089_s14, %s7294_s4 }
 0x335   : > { %p4091_p3 = scmp.ne.s32.totalorder %s4089_s14, %s4090_s24  ;;  %p4094_p5 = scmp.lt.s32.totalorder %s6130_s1, %s4090_s24 }
 0x337   : > { %p4095_p6 = por %p4094_p5, %p4093_p4 }
 0x339   : > { %p4096_p7 = pnand %p4095_p6, %p4091_p3 }
 0x33b   : > { %4099 = shalt.err (!%p4096_p7)  }
 0x33c   : > { %s4100_s23 = sshra.s32 %s1063_s30, 4  ;;  %s4101_s23 = int_to_ptr.vmem [resolvable:$true] %s4100_s23 }
 0x33d   : > { %s4102_s27 = scalar_lea.vmem %s4101_s23, 1  ;;  %p4105_p9 = scmp.lt.s32.totalorder %s4101_s23, [#allocation2] }
 0x33e   : > { %p4103_p8 = scmp.ne.s32.totalorder %s4101_s23, %s4102_s27  ;;  %p4106_p10 = scmp.lt.s32.totalorder %s6117_s10, %s4102_s27 }
 0x340   : > { %p4107_p11 = por %p4106_p10, %p4105_p9 }
 0x342   : > { %p4108_p12 = pnand %p4107_p11, %p4103_p8 }
 0x344   : > { %4111 = shalt.err (!%p4108_p12)  }
 0x345   : > { %1065 = dma.hbm_to_vmem [thread:$0]  %s1061_s16, 16, %s1063_s30, %s6105_s9 }
 0x346   : > { %s1084_s13 = sadd.s32 4, %s6090_s6  ;;  %s4112_s28 = sshra.s32 %s1079_s17, 4  ;;  %s4113_s28 = int_to_ptr.hbm [resolvable:$true] %s4112_s28 }
 0x347   : > { %s4114_s22 = scalar_lea.hbm %s4113_s28, 1  ;;  %p4117_p0 = scmp.lt.s32.totalorder %s4113_s28, %s7294_s4 }
 0x348   : > { %p4115_p13 = scmp.ne.s32.totalorder %s4113_s28, %s4114_s22  ;;  %p4118_p1 = scmp.lt.s32.totalorder %s6130_s1, %s4114_s22 }
 0x34a   : > { %p4119_p2 = por %p4118_p1, %p4117_p0 }
 0x34c   : > { %p4120_p3 = pnand %p4119_p2, %p4115_p13 }
 0x34e   : > { %4123 = shalt.err (!%p4120_p3)  }
 0x34f   : > { %s4124_s8 = sshra.s32 %s1081_s20, 4  ;;  %s4125_s8 = int_to_ptr.vmem [resolvable:$true] %s4124_s8 }
 0x350   : > { %s4126_s30 = scalar_lea.vmem %s4125_s8, 1  ;;  %p4129_p5 = scmp.lt.s32.totalorder %s4125_s8, [#allocation2] }
 0x351   : > { %p4127_p4 = scmp.ne.s32.totalorder %s4125_s8, %s4126_s30  ;;  %p4130_p6 = scmp.lt.s32.totalorder %s6117_s10, %s4126_s30 }
 0x353   : > { %p4131_p7 = por %p4130_p6, %p4129_p5 }
 0x355   : > { %p4132_p8 = pnand %p4131_p7, %p4127_p4 }
 0x357   : > { %4135 = shalt.err (!%p4132_p8)  }
 0x358   : > { %1083 = dma.hbm_to_vmem [thread:$0]  %s1079_s17, 16, %s1081_s20, %s6105_s9 }
 0x359   : > { %s1085_s6 = sld [smem:[#allocation7 + %s1084_s13]]  ;;  %s2229_s16 = scalar_lea.vmem %s6081_s12, 48 [#allocation2] }
 0x35a   : > { %s6222_s19 = sshll.u32 %s2229_s16, 4  ;;  %s1102_s26 = sadd.s32 1, %s6077_s18  ;;  %s1099_s19 = int_to_ptr.vmem [resolvable:$true] %s6222_s19 }
 0x35b   : > { %s6226_s15 = sld [smem:[#allocation5 + %s1102_s26]]  ;;  %s2233_s14 = scalar_lea.vmem %s6081_s12, 1 [#allocation2] }
 0x35c   : > { %s6229_s24 = smul.u32 5, %s1102_s26  ;;  %s6231_s21 = sshll.u32 %s2233_s14, 4  ;;  %s1117_s21 = int_to_ptr.vmem [resolvable:$true] %s6231_s21 }
 0x35d   : > { %s6233_s11 = sld [smem:[#allocation6 + %s1102_s26]]  ;;  %s2237_s20 = scalar_lea.vmem %s6081_s12, 9 [#allocation2] }
 0x35e   : > { %s6240_s13 = sshll.u32 %s2237_s20, 4  ;;  %s1134_s13 = int_to_ptr.vmem [resolvable:$true] %s6240_s13 }
 0x35f   : > { %s1087_s27 = scalar_lea.hbm %s7294_s4, %s1085_s6 }
 0x360   : > { %s1096_s28 = sshll.u32 %s1087_s27, 4  ;;  %s1097_s28 = int_to_ptr.hbm [resolvable:$true] %s1096_s28 }
 0x361   : > { %s1105_s25 = scalar_lea.hbm %s7293_s3, %s6226_s15  ;;  %s4136_s8 = sshra.s32 %s1097_s28, 4  ;;  %s4137_s8 = int_to_ptr.hbm [resolvable:$true] %s4136_s8 }
 0x362   : > { %s4138_s30 = scalar_lea.hbm %s4137_s8, 1  ;;  %p4141_p10 = scmp.lt.s32.totalorder %s4137_s8, %s7294_s4 }
 0x363   : > { %p4139_p9 = scmp.ne.s32.totalorder %s4137_s8, %s4138_s30  ;;  %p4142_p11 = scmp.lt.s32.totalorder %s6130_s1, %s4138_s30 }
 0x365   : > { %p4143_p12 = por %p4142_p11, %p4141_p10 }
 0x367   : > { %p4144_p13 = pnand %p4143_p12, %p4139_p9 }
 0x369   : > { %4147 = shalt.err (!%p4144_p13)  }
 0x36a   : > { %s4148_s6 = sshra.s32 %s1099_s19, 4  ;;  %s4149_s6 = int_to_ptr.vmem [resolvable:$true] %s4148_s6 }
 0x36b   : > { %s4150_s14 = scalar_lea.vmem %s4149_s6, 1  ;;  %p4153_p1 = scmp.lt.s32.totalorder %s4149_s6, [#allocation2] }
 0x36c   : > { %p4151_p0 = scmp.ne.s32.totalorder %s4149_s6, %s4150_s14  ;;  %p4154_p2 = scmp.lt.s32.totalorder %s6117_s10, %s4150_s14 }
 0x36e   : > { %p4155_p3 = por %p4154_p2, %p4153_p1 }
 0x370   : > { %p4156_p4 = pnand %p4155_p3, %p4151_p0 }
 0x372   : > { %4159 = shalt.err (!%p4156_p4)  }
 0x373   : > { %1101 = dma.hbm_to_vmem [thread:$0]  %s1097_s28, 16, %s1099_s19, %s6105_s9 }
 0x374   : > { %s1114_s15 = sshll.u32 %s1105_s25, 4  ;;  %s1122_s23 = scalar_lea.hbm %s7294_s4, %s6233_s11  ;;  %s1115_s15 = int_to_ptr.hbm [resolvable:$true] %s1114_s15 }
 0x375   : > { %s6261_s27 = sshll.u32 %s1122_s23, 4  ;;  %s4160_s22 = sshra.s32 %s1115_s15, 4  ;;  %s4161_s22 = int_to_ptr.hbm [resolvable:$true] %s4160_s22  ;;  %s1132_s27 = int_to_ptr.hbm [resolvable:$true] %s6261_s27 }
 0x376   : > { %s4162_s2 = scalar_lea.hbm %s4161_s22, 1  ;;  %p4165_p6 = scmp.lt.s32.totalorder %s4161_s22, %s7293_s3 }
 0x377   : > { %p4163_p5 = scmp.ne.s32.totalorder %s4161_s22, %s4162_s2  ;;  %p4166_p7 = scmp.lt.s32.totalorder %s6110_s29, %s4162_s2 }
 0x379   : > { %p4167_p8 = por %p4166_p7, %p4165_p6 }
 0x37b   : > { %p4168_p9 = pnand %p4167_p8, %p4163_p5 }
 0x37d   : > { %4171 = shalt.err (!%p4168_p9)  }
 0x37e   : > { %s4172_s19 = sshra.s32 %s1117_s21, 4  ;;  %s4173_s19 = int_to_ptr.vmem [resolvable:$true] %s4172_s19 }
 0x37f   : > { %s4174_s11 = scalar_lea.vmem %s4173_s19, 1  ;;  %p4177_p11 = scmp.lt.s32.totalorder %s4173_s19, [#allocation2] }
 0x380   : > { %p4175_p10 = scmp.ne.s32.totalorder %s4173_s19, %s4174_s11  ;;  %p4178_p12 = scmp.lt.s32.totalorder %s6117_s10, %s4174_s11 }
 0x382   : > { %p4179_p13 = por %p4178_p12, %p4177_p11 }
 0x384   : > { %p4180_p0 = pnand %p4179_p13, %p4175_p10 }
 0x386   : > { %4183 = shalt.err (!%p4180_p0)  }
 0x387   : > { %1119 = dma.hbm_to_vmem [thread:$0]  %s1115_s15, 16, %s1117_s21, %s6105_s9 }
 0x388   : > { %s6275_s28 = sld [smem:[#allocation7 + %s6229_s24]]  ;;  %s4184_s25 = sshra.s32 %s1132_s27, 4  ;;  %s4185_s25 = int_to_ptr.hbm [resolvable:$true] %s4184_s25 }
 0x389   : > { %s4186_s16 = scalar_lea.hbm %s4185_s25, 1  ;;  %p4189_p2 = scmp.lt.s32.totalorder %s4185_s25, %s7294_s4 }
 0x38a   : > { %p4187_p1 = scmp.ne.s32.totalorder %s4185_s25, %s4186_s16  ;;  %p4190_p3 = scmp.lt.s32.totalorder %s6130_s1, %s4186_s16 }
 0x38c   : > { %p4191_p4 = por %p4190_p3, %p4189_p2 }
 0x38e   : > { %p4192_p5 = pnand %p4191_p4, %p4187_p1 }
 0x390   : > { %4195 = shalt.err (!%p4192_p5)  }
 0x391   : > { %s4196_s14 = sshra.s32 %s1134_s13, 4  ;;  %s4197_s14 = int_to_ptr.vmem [resolvable:$true] %s4196_s14 }
 0x392   : > { %s4198_s21 = scalar_lea.vmem %s4197_s14, 1  ;;  %p4201_p7 = scmp.lt.s32.totalorder %s4197_s14, [#allocation2] }
 0x393   : > { %p4199_p6 = scmp.ne.s32.totalorder %s4197_s14, %s4198_s21  ;;  %p4202_p8 = scmp.lt.s32.totalorder %s6117_s10, %s4198_s21 }
 0x395   : > { %p4203_p9 = por %p4202_p8, %p4201_p7 }
 0x397   : > { %p4204_p10 = pnand %p4203_p9, %p4199_p6 }
 0x399   : > { %4207 = shalt.err (!%p4204_p10)  }
 0x39a   : > { %1136 = dma.hbm_to_vmem [thread:$0]  %s1132_s27, 16, %s1134_s13, %s6105_s9 }
 0x39b   : > { %s2241_s15 = scalar_lea.vmem %s6081_s12, 17 [#allocation2]  ;;  %s1155_s20 = sadd.s32 1, %s6229_s24 }
 0x39c   : > { %s6289_s17 = sshll.u32 %s2241_s15, 4  ;;  %s6291_s23 = sld [smem:[#allocation7 + %s1155_s20]]  ;;  %s1152_s17 = int_to_ptr.vmem [resolvable:$true] %s6289_s17 }
 0x39d   : > { %s2245_s22 = scalar_lea.vmem %s6081_s12, 25 [#allocation2]  ;;  %s1173_s8 = sadd.s32 2, %s6229_s24 }
 0x39e   : > { %s6295_s2 = sshll.u32 %s2245_s22, 4  ;;  %s1140_s11 = scalar_lea.hbm %s7294_s4, %s6275_s28  ;;  %s1170_s2 = int_to_ptr.vmem [resolvable:$true] %s6295_s2 }
 0x39f   : > { %s1149_s13 = sshll.u32 %s1140_s11, 4  ;;  %s6303_s27 = sld [smem:[#allocation7 + %s1173_s8]]  ;;  %s1150_s13 = int_to_ptr.hbm [resolvable:$true] %s1149_s13 }
 0x3a0   : > { %s2249_s25 = scalar_lea.vmem %s6081_s12, 33 [#allocation2]  ;;  %s4208_s16 = sshra.s32 %s1150_s13, 4  ;;  %s4209_s16 = int_to_ptr.hbm [resolvable:$true] %s4208_s16 }
 0x3a1   : > { %s4210_s26 = scalar_lea.hbm %s4209_s16, 1  ;;  %p4213_p12 = scmp.lt.s32.totalorder %s4209_s16, %s7294_s4 }
 0x3a2   : > { %p4211_p11 = scmp.ne.s32.totalorder %s4209_s16, %s4210_s26  ;;  %p4214_p13 = scmp.lt.s32.totalorder %s6130_s1, %s4210_s26 }
 0x3a4   : > { %p4215_p0 = por %p4214_p13, %p4213_p12 }
 0x3a6   : > { %p4216_p1 = pnand %p4215_p0, %p4211_p11 }
 0x3a8   : > { %4219 = shalt.err (!%p4216_p1)  }
 0x3a9   : > { %s4220_s28 = sshra.s32 %s1152_s17, 4  ;;  %s4221_s28 = int_to_ptr.vmem [resolvable:$true] %s4220_s28 }
 0x3aa   : > { %s4222_s21 = scalar_lea.vmem %s4221_s28, 1  ;;  %p4225_p3 = scmp.lt.s32.totalorder %s4221_s28, [#allocation2] }
 0x3ab   : > { %p4223_p2 = scmp.ne.s32.totalorder %s4221_s28, %s4222_s21  ;;  %p4226_p4 = scmp.lt.s32.totalorder %s6117_s10, %s4222_s21 }
 0x3ad   : > { %p4227_p5 = por %p4226_p4, %p4225_p3 }
 0x3af   : > { %p4228_p6 = pnand %p4227_p5, %p4223_p2 }
 0x3b1   : > { %4231 = shalt.err (!%p4228_p6)  }
 0x3b2   : > { %1154 = dma.hbm_to_vmem [thread:$0]  %s1150_s13, 16, %s1152_s17, %s6105_s9 }
 0x3b3   : > { %s1158_s22 = scalar_lea.hbm %s7294_s4, %s6291_s23  ;;  %s6320_s8 = sshll.u32 %s2249_s25, 4  ;;  %s1188_s8 = int_to_ptr.vmem [resolvable:$true] %s6320_s8 }
 0x3b4   : > { %s1167_s30 = sshll.u32 %s1158_s22, 4  ;;  %s1191_s19 = sadd.s32 3, %s6229_s24  ;;  %s1168_s30 = int_to_ptr.hbm [resolvable:$true] %s1167_s30 }
 0x3b5   : > { %s4232_s11 = sshra.s32 %s1168_s30, 4  ;;  %s4233_s11 = int_to_ptr.hbm [resolvable:$true] %s4232_s11 }
 0x3b6   : > { %s4234_s16 = scalar_lea.hbm %s4233_s11, 1  ;;  %p4237_p8 = scmp.lt.s32.totalorder %s4233_s11, %s7294_s4 }
 0x3b7   : > { %p4235_p7 = scmp.ne.s32.totalorder %s4233_s11, %s4234_s16  ;;  %p4238_p9 = scmp.lt.s32.totalorder %s6130_s1, %s4234_s16 }
 0x3b9   : > { %p4239_p10 = por %p4238_p9, %p4237_p8 }
 0x3bb   : > { %p4240_p11 = pnand %p4239_p10, %p4235_p7 }
 0x3bd   : > { %4243 = shalt.err (!%p4240_p11)  }
 0x3be   : > { %s4244_s17 = sshra.s32 %s1170_s2, 4  ;;  %s4245_s17 = int_to_ptr.vmem [resolvable:$true] %s4244_s17 }
 0x3bf   : > { %s4246_s23 = scalar_lea.vmem %s4245_s17, 1  ;;  %p4249_p13 = scmp.lt.s32.totalorder %s4245_s17, [#allocation2] }
 0x3c0   : > { %p4247_p12 = scmp.ne.s32.totalorder %s4245_s17, %s4246_s23  ;;  %p4250_p0 = scmp.lt.s32.totalorder %s6117_s10, %s4246_s23 }
 0x3c2   : > { %p4251_p1 = por %p4250_p0, %p4249_p13 }
 0x3c4   : > { %p4252_p2 = pnand %p4251_p1, %p4247_p12 }
 0x3c6   : > { %4255 = shalt.err (!%p4252_p2)  }
 0x3c7   : > { %1172 = dma.hbm_to_vmem [thread:$0]  %s1168_s30, 16, %s1170_s2, %s6105_s9 }
 0x3c8   : > { %s1176_s14 = scalar_lea.hbm %s7294_s4, %s6303_s27  ;;  %s6338_s28 = sld [smem:[#allocation7 + %s1191_s19]] }
 0x3c9   : > { %s1185_s21 = sshll.u32 %s1176_s14, 4  ;;  %s2253_s15 = scalar_lea.vmem %s6081_s12, 41 [#allocation2]  ;;  %s1186_s21 = int_to_ptr.hbm [resolvable:$true] %s1185_s21 }
 0x3ca   : > { %s6341_s20 = sshll.u32 %s2253_s15, 4  ;;  %s4256_s22 = sshra.s32 %s1186_s21, 4  ;;  %s4257_s22 = int_to_ptr.hbm [resolvable:$true] %s4256_s22  ;;  %s1206_s20 = int_to_ptr.vmem [resolvable:$true] %s6341_s20 }
 0x3cb   : > { %s4258_s11 = scalar_lea.hbm %s4257_s22, 1  ;;  %p4261_p4 = scmp.lt.s32.totalorder %s4257_s22, %s7294_s4 }
 0x3cc   : > { %p4259_p3 = scmp.ne.s32.totalorder %s4257_s22, %s4258_s11  ;;  %p4262_p5 = scmp.lt.s32.totalorder %s6130_s1, %s4258_s11 }
 0x3ce   : > { %p4263_p6 = por %p4262_p5, %p4261_p4 }
 0x3d0   : > { %p4264_p7 = pnand %p4263_p6, %p4259_p3 }
 0x3d2   : > { %4267 = shalt.err (!%p4264_p7)  }
 0x3d3   : > { %s4268_s2 = sshra.s32 %s1188_s8, 4  ;;  %s4269_s2 = int_to_ptr.vmem [resolvable:$true] %s4268_s2 }
 0x3d4   : > { %s4270_s27 = scalar_lea.vmem %s4269_s2, 1  ;;  %p4273_p9 = scmp.lt.s32.totalorder %s4269_s2, [#allocation2] }
 0x3d5   : > { %p4271_p8 = scmp.ne.s32.totalorder %s4269_s2, %s4270_s27  ;;  %p4274_p10 = scmp.lt.s32.totalorder %s6117_s10, %s4270_s27 }
 0x3d7   : > { %p4275_p11 = por %p4274_p10, %p4273_p9 }
 0x3d9   : > { %p4276_p12 = pnand %p4275_p11, %p4271_p8 }
 0x3db   : > { %4279 = shalt.err (!%p4276_p12)  }
 0x3dc   : > { %1190 = dma.hbm_to_vmem [thread:$0]  %s1186_s21, 16, %s1188_s8, %s6105_s9 }
 0x3dd   : > { %s1209_s30 = sadd.s32 4, %s6229_s24  ;;  %s2257_s6 = scalar_lea.vmem %s6081_s12, 49 [#allocation2] }
 0x3de   : > { %s6355_s19 = sld [smem:[#allocation7 + %s1209_s30]]  ;;  %s1194_s13 = scalar_lea.hbm %s7294_s4, %s6338_s28 }
 0x3df   : > { %s6362_s25 = sshll.u32 %s2257_s6, 4  ;;  %s1203_s14 = sshll.u32 %s1194_s13, 4  ;;  %s1224_s25 = int_to_ptr.vmem [resolvable:$true] %s6362_s25  ;;  %s1204_s14 = int_to_ptr.hbm [resolvable:$true] %s1203_s14 }
 0x3e0   : > { %s6366_s15 = sadd.s32 2, %s6077_s18  ;;  %s4280_s22 = sshra.s32 %s1204_s14, 4  ;;  %s4281_s22 = int_to_ptr.hbm [resolvable:$true] %s4280_s22 }
 0x3e1   : > { %s4282_s8 = scalar_lea.hbm %s4281_s22, 1  ;;  %p4285_p0 = scmp.lt.s32.totalorder %s4281_s22, %s7294_s4 }
 0x3e2   : > { %p4283_p13 = scmp.ne.s32.totalorder %s4281_s22, %s4282_s8  ;;  %p4286_p1 = scmp.lt.s32.totalorder %s6130_s1, %s4282_s8 }
 0x3e4   : > { %p4287_p2 = por %p4286_p1, %p4285_p0 }
 0x3e6   : > { %p4288_p3 = pnand %p4287_p2, %p4283_p13 }
 0x3e8   : > { %4291 = shalt.err (!%p4288_p3)  }
 0x3e9   : > { %s4292_s28 = sshra.s32 %s1206_s20, 4  ;;  %s4293_s28 = int_to_ptr.vmem [resolvable:$true] %s4292_s28 }
 0x3ea   : > { %s4294_s11 = scalar_lea.vmem %s4293_s28, 1  ;;  %p4297_p5 = scmp.lt.s32.totalorder %s4293_s28, [#allocation2] }
 0x3eb   : > { %p4295_p4 = scmp.ne.s32.totalorder %s4293_s28, %s4294_s11  ;;  %p4298_p6 = scmp.lt.s32.totalorder %s6117_s10, %s4294_s11 }
 0x3ed   : > { %p4299_p7 = por %p4298_p6, %p4297_p5 }
 0x3ef   : > { %p4300_p8 = pnand %p4299_p7, %p4295_p4 }
 0x3f1   : > { %4303 = shalt.err (!%p4300_p8)  }
 0x3f2   : > { %1208 = dma.hbm_to_vmem [thread:$0]  %s1204_s14, 16, %s1206_s20, %s6105_s9 }
 0x3f3   : > { %s6379_s16 = sld [smem:[#allocation5 + %s6366_s15]]  ;;  %s2261_s26 = scalar_lea.vmem %s6081_s12, 2 [#allocation2] }
 0x3f4   : > { %s1212_s30 = scalar_lea.hbm %s7294_s4, %s6355_s19  ;;  %s6386_s6 = sshll.u32 %s2261_s26, 4  ;;  %s1242_s6 = int_to_ptr.vmem [resolvable:$true] %s6386_s6 }
 0x3f5   : > { %s1221_s17 = sshll.u32 %s1212_s30, 4  ;;  %s6390_s23 = smul.u32 5, %s6366_s15  ;;  %s1222_s17 = int_to_ptr.hbm [resolvable:$true] %s1221_s17 }
 0x3f6   : > { %s4304_s13 = sshra.s32 %s1222_s17, 4  ;;  %s4305_s13 = int_to_ptr.hbm [resolvable:$true] %s4304_s13 }
 0x3f7   : > { %s4306_s22 = scalar_lea.hbm %s4305_s13, 1  ;;  %p4309_p10 = scmp.lt.s32.totalorder %s4305_s13, %s7294_s4 }
 0x3f8   : > { %p4307_p9 = scmp.ne.s32.totalorder %s4305_s13, %s4306_s22  ;;  %p4310_p11 = scmp.lt.s32.totalorder %s6130_s1, %s4306_s22 }
 0x3fa   : > { %p4311_p12 = por %p4310_p11, %p4309_p10 }
 0x3fc   : > { %p4312_p13 = pnand %p4311_p12, %p4307_p9 }
 0x3fe   : > { %4315 = shalt.err (!%p4312_p13)  }
 0x3ff   : > { %s4316_s19 = sshra.s32 %s1224_s25, 4  ;;  %s4317_s19 = int_to_ptr.vmem [resolvable:$true] %s4316_s19 }
 0x400   : > { %s4318_s8 = scalar_lea.vmem %s4317_s19, 1  ;;  %p4321_p1 = scmp.lt.s32.totalorder %s4317_s19, [#allocation2] }
 0x401   : > { %p4319_p0 = scmp.ne.s32.totalorder %s4317_s19, %s4318_s8  ;;  %p4322_p2 = scmp.lt.s32.totalorder %s6117_s10, %s4318_s8 }
 0x403   : > { %p4323_p3 = por %p4322_p2, %p4321_p1 }
 0x405   : > { %p4324_p4 = pnand %p4323_p3, %p4319_p0 }
 0x407   : > { %4327 = shalt.err (!%p4324_p4)  }
 0x408   : > { %1226 = dma.hbm_to_vmem [thread:$0]  %s1222_s17, 16, %s1224_s25, %s6105_s9 }
 0x409   : > { %s6403_s24 = sld [smem:[#allocation6 + %s6366_s15]]  ;;  %s2265_s21 = scalar_lea.vmem %s6081_s12, 10 [#allocation2] }
 0x40a   : > { %s1230_s26 = scalar_lea.hbm %s7293_s3, %s6379_s16  ;;  %s6410_s2 = sshll.u32 %s2265_s21, 4  ;;  %s1259_s2 = int_to_ptr.vmem [resolvable:$true] %s6410_s2 }
 0x40b   : > { %s1239_s27 = sshll.u32 %s1230_s26, 4  ;;  %s6414_s30 = sld [smem:[#allocation7 + %s6390_s23]]  ;;  %s1240_s27 = int_to_ptr.hbm [resolvable:$true] %s1239_s27 }
 0x40c   : > { %s4328_s13 = sshra.s32 %s1240_s27, 4  ;;  %s4329_s13 = int_to_ptr.hbm [resolvable:$true] %s4328_s13 }
 0x40d   : > { %s4330_s22 = scalar_lea.hbm %s4329_s13, 1  ;;  %p4333_p6 = scmp.lt.s32.totalorder %s4329_s13, %s7293_s3 }
 0x40e   : > { %p4331_p5 = scmp.ne.s32.totalorder %s4329_s13, %s4330_s22  ;;  %p4334_p7 = scmp.lt.s32.totalorder %s6110_s29, %s4330_s22 }
 0x410   : > { %p4335_p8 = por %p4334_p7, %p4333_p6 }
 0x412   : > { %p4336_p9 = pnand %p4335_p8, %p4331_p5 }
 0x414   : > { %4339 = shalt.err (!%p4336_p9)  }
 0x415   : > { %s4340_s16 = sshra.s32 %s1242_s6, 4  ;;  %s4341_s16 = int_to_ptr.vmem [resolvable:$true] %s4340_s16 }
 0x416   : > { %s4342_s17 = scalar_lea.vmem %s4341_s16, 1  ;;  %p4345_p11 = scmp.lt.s32.totalorder %s4341_s16, [#allocation2] }
 0x417   : > { %p4343_p10 = scmp.ne.s32.totalorder %s4341_s16, %s4342_s17  ;;  %p4346_p12 = scmp.lt.s32.totalorder %s6117_s10, %s4342_s17 }
 0x419   : > { %p4347_p13 = por %p4346_p12, %p4345_p11 }
 0x41b   : > { %p4348_p0 = pnand %p4347_p13, %p4343_p10 }
 0x41d   : > { %4351 = shalt.err (!%p4348_p0)  }
 0x41e   : > { %1244 = dma.hbm_to_vmem [thread:$0]  %s1240_s27, 16, %s1242_s6, %s6105_s9 }
 0x41f   : > { %s2269_s20 = scalar_lea.vmem %s6081_s12, 18 [#allocation2]  ;;  %s1280_s14 = sadd.s32 1, %s6390_s23 }
 0x420   : > { %s1247_s21 = scalar_lea.hbm %s7294_s4, %s6403_s24  ;;  %s6432_s28 = sshll.u32 %s2269_s20, 4  ;;  %s1277_s28 = int_to_ptr.vmem [resolvable:$true] %s6432_s28 }
 0x421   : > { %s1256_s11 = sshll.u32 %s1247_s21, 4  ;;  %s6435_s26 = sld [smem:[#allocation7 + %s1280_s14]]  ;;  %s1257_s11 = int_to_ptr.hbm [resolvable:$true] %s1256_s11 }
 0x422   : > { %s4352_s13 = sshra.s32 %s1257_s11, 4  ;;  %s4353_s13 = int_to_ptr.hbm [resolvable:$true] %s4352_s13 }
 0x423   : > { %s4354_s22 = scalar_lea.hbm %s4353_s13, 1  ;;  %p4357_p2 = scmp.lt.s32.totalorder %s4353_s13, %s7294_s4 }
 0x424   : > { %p4355_p1 = scmp.ne.s32.totalorder %s4353_s13, %s4354_s22  ;;  %p4358_p3 = scmp.lt.s32.totalorder %s6130_s1, %s4354_s22 }
 0x426   : > { %p4359_p4 = por %p4358_p3, %p4357_p2 }
 0x428   : > { %p4360_p5 = pnand %p4359_p4, %p4355_p1 }
 0x42a   : > { %4363 = shalt.err (!%p4360_p5)  }
 0x42b   : > { %s4364_s24 = sshra.s32 %s1259_s2, 4  ;;  %s4365_s24 = int_to_ptr.vmem [resolvable:$true] %s4364_s24 }
 0x42c   : > { %s4366_s27 = scalar_lea.vmem %s4365_s24, 1  ;;  %p4369_p7 = scmp.lt.s32.totalorder %s4365_s24, [#allocation2] }
 0x42d   : > { %p4367_p6 = scmp.ne.s32.totalorder %s4365_s24, %s4366_s27  ;;  %p4370_p8 = scmp.lt.s32.totalorder %s6117_s10, %s4366_s27 }
 0x42f   : > { %p4371_p9 = por %p4370_p8, %p4369_p7 }
 0x431   : > { %p4372_p10 = pnand %p4371_p9, %p4367_p6 }
 0x433   : > { %4375 = shalt.err (!%p4372_p10)  }
 0x434   : > { %1261 = dma.hbm_to_vmem [thread:$0]  %s1257_s11, 16, %s1259_s2, %s6105_s9 }
 0x435   : > { %s1265_s17 = scalar_lea.hbm %s7294_s4, %s6414_s30  ;;  %s2273_s20 = scalar_lea.vmem %s6081_s12, 26 [#allocation2] }
 0x436   : > { %s1274_s14 = sshll.u32 %s1265_s17, 4  ;;  %s6452_s19 = sshll.u32 %s2273_s20, 4  ;;  %s1275_s14 = int_to_ptr.hbm [resolvable:$true] %s1274_s14  ;;  %s1295_s19 = int_to_ptr.vmem [resolvable:$true] %s6452_s19 }
 0x437   : > { %s4376_s8 = sshra.s32 %s1275_s14, 4  ;;  %s4377_s8 = int_to_ptr.hbm [resolvable:$true] %s4376_s8 }
 0x438   : > { %s4378_s21 = scalar_lea.hbm %s4377_s8, 1  ;;  %p4381_p12 = scmp.lt.s32.totalorder %s4377_s8, %s7294_s4 }
 0x439   : > { %p4379_p11 = scmp.ne.s32.totalorder %s4377_s8, %s4378_s21  ;;  %p4382_p13 = scmp.lt.s32.totalorder %s6130_s1, %s4378_s21 }
 0x43b   : > { %p4383_p0 = por %p4382_p13, %p4381_p12 }
 0x43d   : > { %p4384_p1 = pnand %p4383_p0, %p4379_p11 }
 0x43f   : > { %4387 = shalt.err (!%p4384_p1)  }
 0x440   : > { %s4388_s2 = sshra.s32 %s1277_s28, 4  ;;  %s4389_s2 = int_to_ptr.vmem [resolvable:$true] %s4388_s2 }
 0x441   : > { %s4390_s30 = scalar_lea.vmem %s4389_s2, 1  ;;  %p4393_p3 = scmp.lt.s32.totalorder %s4389_s2, [#allocation2] }
 0x442   : > { %p4391_p2 = scmp.ne.s32.totalorder %s4389_s2, %s4390_s30  ;;  %p4394_p4 = scmp.lt.s32.totalorder %s6117_s10, %s4390_s30 }
 0x444   : > { %p4395_p5 = por %p4394_p4, %p4393_p3 }
 0x446   : > { %p4396_p6 = pnand %p4395_p5, %p4391_p2 }
 0x448   : > { %4399 = shalt.err (!%p4396_p6)  }
 0x449   : > { %1279 = dma.hbm_to_vmem [thread:$0]  %s1275_s14, 16, %s1277_s28, %s6105_s9 }
 0x44a   : > { %s1283_s6 = scalar_lea.hbm %s7294_s4, %s6435_s26  ;;  %s1298_s24 = sadd.s32 2, %s6390_s23 }
 0x44b   : > { %s1292_s27 = sshll.u32 %s1283_s6, 4  ;;  %s6470_s15 = sld [smem:[#allocation7 + %s1298_s24]]  ;;  %s1293_s27 = int_to_ptr.hbm [resolvable:$true] %s1292_s27 }
 0x44c   : > { %s2277_s16 = scalar_lea.vmem %s6081_s12, 34 [#allocation2]  ;;  %s4400_s17 = sshra.s32 %s1293_s27, 4  ;;  %s4401_s17 = int_to_ptr.hbm [resolvable:$true] %s4400_s17 }
 0x44d   : > { %s4402_s20 = scalar_lea.hbm %s4401_s17, 1  ;;  %p4405_p8 = scmp.lt.s32.totalorder %s4401_s17, %s7294_s4 }
 0x44e   : > { %p4403_p7 = scmp.ne.s32.totalorder %s4401_s17, %s4402_s20  ;;  %p4406_p9 = scmp.lt.s32.totalorder %s6130_s1, %s4402_s20 }
 0x450   : > { %p4407_p10 = por %p4406_p9, %p4405_p8 }
 0x452   : > { %p4408_p11 = pnand %p4407_p10, %p4403_p7 }
 0x454   : > { %4411 = shalt.err (!%p4408_p11)  }
 0x455   : > { %s4412_s28 = sshra.s32 %s1295_s19, 4  ;;  %s4413_s28 = int_to_ptr.vmem [resolvable:$true] %s4412_s28 }
 0x456   : > { %s4414_s26 = scalar_lea.vmem %s4413_s28, 1  ;;  %p4417_p13 = scmp.lt.s32.totalorder %s4413_s28, [#allocation2] }
 0x457   : > { %p4415_p12 = scmp.ne.s32.totalorder %s4413_s28, %s4414_s26  ;;  %p4418_p0 = scmp.lt.s32.totalorder %s6117_s10, %s4414_s26 }
 0x459   : > { %p4419_p1 = por %p4418_p0, %p4417_p13 }
 0x45b   : > { %p4420_p2 = pnand %p4419_p1, %p4415_p12 }
 0x45d   : > { %4423 = shalt.err (!%p4420_p2)  }
 0x45e   : > { %1297 = dma.hbm_to_vmem [thread:$0]  %s1293_s27, 16, %s1295_s19, %s6105_s9 }
 0x45f   : > { %s6483_s14 = sshll.u32 %s2277_s16, 4  ;;  %s1316_s13 = sadd.s32 3, %s6390_s23  ;;  %s1313_s14 = int_to_ptr.vmem [resolvable:$true] %s6483_s14 }
 0x460   : > { %s6487_s22 = sld [smem:[#allocation7 + %s1316_s13]]  ;;  %s2281_s2 = scalar_lea.vmem %s6081_s12, 42 [#allocation2] }
 0x461   : > { %s1334_s30 = sadd.s32 4, %s6390_s23  ;;  %s1301_s6 = scalar_lea.hbm %s7294_s4, %s6470_s15 }
 0x462   : > { %s6495_s24 = sshll.u32 %s2281_s2, 4  ;;  %s1310_s17 = sshll.u32 %s1301_s6, 4  ;;  %s1331_s24 = int_to_ptr.vmem [resolvable:$true] %s6495_s24  ;;  %s1311_s17 = int_to_ptr.hbm [resolvable:$true] %s1310_s17 }
 0x463   : > { %s6498_s19 = sld [smem:[#allocation7 + %s1334_s30]]  ;;  %s4424_s27 = sshra.s32 %s1311_s17, 4  ;;  %s4425_s27 = int_to_ptr.hbm [resolvable:$true] %s4424_s27 }
 0x464   : > { %s4426_s16 = scalar_lea.hbm %s4425_s27, 1  ;;  %p4429_p4 = scmp.lt.s32.totalorder %s4425_s27, %s7294_s4 }
 0x465   : > { %p4427_p3 = scmp.ne.s32.totalorder %s4425_s27, %s4426_s16  ;;  %p4430_p5 = scmp.lt.s32.totalorder %s6130_s1, %s4426_s16 }
 0x467   : > { %p4431_p6 = por %p4430_p5, %p4429_p4 }
 0x469   : > { %p4432_p7 = pnand %p4431_p6, %p4427_p3 }
 0x46b   : > { %4435 = shalt.err (!%p4432_p7)  }
 0x46c   : > { %s4436_s23 = sshra.s32 %s1313_s14, 4  ;;  %s4437_s23 = int_to_ptr.vmem [resolvable:$true] %s4436_s23 }
 0x46d   : > { %s4438_s15 = scalar_lea.vmem %s4437_s23, 1  ;;  %p4441_p9 = scmp.lt.s32.totalorder %s4437_s23, [#allocation2] }
 0x46e   : > { %p4439_p8 = scmp.ne.s32.totalorder %s4437_s23, %s4438_s15  ;;  %p4442_p10 = scmp.lt.s32.totalorder %s6117_s10, %s4438_s15 }
 0x470   : > { %p4443_p11 = por %p4442_p10, %p4441_p9 }
 0x472   : > { %p4444_p12 = pnand %p4443_p11, %p4439_p8 }
 0x474   : > { %4447 = shalt.err (!%p4444_p12)  }
 0x475   : > { %1315 = dma.hbm_to_vmem [thread:$0]  %s1311_s17, 16, %s1313_s14, %s6105_s9 }
 0x476   : > { %s1319_s26 = scalar_lea.hbm %s7294_s4, %s6487_s22  ;;  %s2285_s13 = scalar_lea.vmem %s6081_s12, 50 [#allocation2] }
 0x477   : > { %s1328_s2 = sshll.u32 %s1319_s26, 4  ;;  %s6515_s30 = sshll.u32 %s2285_s13, 4  ;;  %s1329_s2 = int_to_ptr.hbm [resolvable:$true] %s1328_s2  ;;  %s1349_s30 = int_to_ptr.vmem [resolvable:$true] %s6515_s30 }
 0x478   : > { %s4448_s11 = sshra.s32 %s1329_s2, 4  ;;  %s4449_s11 = int_to_ptr.hbm [resolvable:$true] %s4448_s11 }
 0x479   : > { %s4450_s25 = scalar_lea.hbm %s4449_s11, 1  ;;  %p4453_p0 = scmp.lt.s32.totalorder %s4449_s11, %s7294_s4 }
 0x47a   : > { %p4451_p13 = scmp.ne.s32.totalorder %s4449_s11, %s4450_s25  ;;  %p4454_p1 = scmp.lt.s32.totalorder %s6130_s1, %s4450_s25 }
 0x47c   : > { %p4455_p2 = por %p4454_p1, %p4453_p0 }
 0x47e   : > { %p4456_p3 = pnand %p4455_p2, %p4451_p13 }
 0x480   : > { %4459 = shalt.err (!%p4456_p3)  }
 0x481   : > { %s4460_s14 = sshra.s32 %s1331_s24, 4  ;;  %s4461_s14 = int_to_ptr.vmem [resolvable:$true] %s4460_s14 }
 0x482   : > { %s4462_s22 = scalar_lea.vmem %s4461_s14, 1  ;;  %p4465_p5 = scmp.lt.s32.totalorder %s4461_s14, [#allocation2] }
 0x483   : > { %p4463_p4 = scmp.ne.s32.totalorder %s4461_s14, %s4462_s22  ;;  %p4466_p6 = scmp.lt.s32.totalorder %s6117_s10, %s4462_s22 }
 0x485   : > { %p4467_p7 = por %p4466_p6, %p4465_p5 }
 0x487   : > { %p4468_p8 = pnand %p4467_p7, %p4463_p4 }
 0x489   : > { %4471 = shalt.err (!%p4468_p8)  }
 0x48a   : > { %1333 = dma.hbm_to_vmem [thread:$0]  %s1329_s2, 16, %s1331_s24, %s6105_s9 }
 0x48b   : > { %s1337_s20 = scalar_lea.hbm %s7294_s4, %s6498_s19  ;;  %s1352_s8 = sadd.s32 3, %s6077_s18 }
 0x48c   : > { %s1346_s23 = sshll.u32 %s1337_s20, 4  ;;  %s6533_s15 = sld [smem:[#allocation5 + %s1352_s8]]  ;;  %s1347_s23 = int_to_ptr.hbm [resolvable:$true] %s1346_s23 }
 0x48d   : > { %s2289_s21 = scalar_lea.vmem %s6081_s12, 3 [#allocation2]  ;;  %s4472_s28 = sshra.s32 %s1347_s23, 4  ;;  %s4473_s28 = int_to_ptr.hbm [resolvable:$true] %s4472_s28 }
 0x48e   : > { %s4474_s26 = scalar_lea.hbm %s4473_s28, 1  ;;  %p4477_p10 = scmp.lt.s32.totalorder %s4473_s28, %s7294_s4 }
 0x48f   : > { %p4475_p9 = scmp.ne.s32.totalorder %s4473_s28, %s4474_s26  ;;  %p4478_p11 = scmp.lt.s32.totalorder %s6130_s1, %s4474_s26 }
 0x491   : > { %p4479_p12 = por %p4478_p11, %p4477_p10 }
 0x493   : > { %p4480_p13 = pnand %p4479_p12, %p4475_p9 }
 0x495   : > { %4483 = shalt.err (!%p4480_p13)  }
 0x496   : > { %s4484_s24 = sshra.s32 %s1349_s30, 4  ;;  %s4485_s24 = int_to_ptr.vmem [resolvable:$true] %s4484_s24 }
 0x497   : > { %s4486_s19 = scalar_lea.vmem %s4485_s24, 1  ;;  %p4489_p1 = scmp.lt.s32.totalorder %s4485_s24, [#allocation2] }
 0x498   : > { %p4487_p0 = scmp.ne.s32.totalorder %s4485_s24, %s4486_s19  ;;  %p4490_p2 = scmp.lt.s32.totalorder %s6117_s10, %s4486_s19 }
 0x49a   : > { %p4491_p3 = por %p4490_p2, %p4489_p1 }
 0x49c   : > { %p4492_p4 = pnand %p4491_p3, %p4487_p0 }
 0x49e   : > { %4495 = shalt.err (!%p4492_p4)  }
 0x49f   : > { %1351 = dma.hbm_to_vmem [thread:$0]  %s1347_s23, 16, %s1349_s30, %s6105_s9 }
 0x4a0   : > { %s6546_s2 = sshll.u32 %s2289_s21, 4  ;;  %s6548_s25 = smul.u32 5, %s1352_s8  ;;  %s1367_s2 = int_to_ptr.vmem [resolvable:$true] %s6546_s2 }
 0x4a1   : > { %s6551_s6 = sld [smem:[#allocation6 + %s1352_s8]]  ;;  %s2293_s27 = scalar_lea.vmem %s6081_s12, 11 [#allocation2] }
 0x4a2   : > { %s6555_s14 = sld [smem:[#allocation7 + %s6548_s25]]  ;;  %s1355_s16 = scalar_lea.hbm %s7293_s3, %s6533_s15 }
 0x4a3   : > { %s6561_s20 = sshll.u32 %s2293_s27, 4  ;;  %s1364_s30 = sshll.u32 %s1355_s16, 4  ;;  %s1384_s20 = int_to_ptr.vmem [resolvable:$true] %s6561_s20  ;;  %s1365_s30 = int_to_ptr.hbm [resolvable:$true] %s1364_s30 }
 0x4a4   : > { %s2297_s23 = scalar_lea.vmem %s6081_s12, 19 [#allocation2]  ;;  %s4496_s21 = sshra.s32 %s1365_s30, 4  ;;  %s4497_s21 = int_to_ptr.hbm [resolvable:$true] %s4496_s21 }
 0x4a5   : > { %s4498_s28 = scalar_lea.hbm %s4497_s21, 1  ;;  %p4501_p6 = scmp.lt.s32.totalorder %s4497_s21, %s7293_s3 }
 0x4a6   : > { %p4499_p5 = scmp.ne.s32.totalorder %s4497_s21, %s4498_s28  ;;  %p4502_p7 = scmp.lt.s32.totalorder %s6110_s29, %s4498_s28 }
 0x4a8   : > { %p4503_p8 = por %p4502_p7, %p4501_p6 }
 0x4aa   : > { %p4504_p9 = pnand %p4503_p8, %p4499_p5 }
 0x4ac   : > { %4507 = shalt.err (!%p4504_p9)  }
 0x4ad   : > { %s4508_s15 = sshra.s32 %s1367_s2, 4  ;;  %s4509_s15 = int_to_ptr.vmem [resolvable:$true] %s4508_s15 }
 0x4ae   : > { %s4510_s13 = scalar_lea.vmem %s4509_s15, 1  ;;  %p4513_p11 = scmp.lt.s32.totalorder %s4509_s15, [#allocation2] }
 0x4af   : > { %p4511_p10 = scmp.ne.s32.totalorder %s4509_s15, %s4510_s13  ;;  %p4514_p12 = scmp.lt.s32.totalorder %s6117_s10, %s4510_s13 }
 0x4b1   : > { %p4515_p13 = por %p4514_p12, %p4513_p11 }
 0x4b3   : > { %p4516_p0 = pnand %p4515_p13, %p4511_p10 }
 0x4b5   : > { %4519 = shalt.err (!%p4516_p0)  }
 0x4b6   : > { %1369 = dma.hbm_to_vmem [thread:$0]  %s1365_s30, 16, %s1367_s2, %s6105_s9 }
 0x4b7   : > { %s1372_s19 = scalar_lea.hbm %s7294_s4, %s6551_s6  ;;  %s6579_s27 = sshll.u32 %s2297_s23, 4  ;;  %s1402_s27 = int_to_ptr.vmem [resolvable:$true] %s6579_s27 }
 0x4b8   : > { %s1381_s22 = sshll.u32 %s1372_s19, 4  ;;  %s1390_s21 = scalar_lea.hbm %s7294_s4, %s6555_s14  ;;  %s1382_s22 = int_to_ptr.hbm [resolvable:$true] %s1381_s22 }
 0x4b9   : > { %s6585_s28 = sshll.u32 %s1390_s21, 4  ;;  %s4520_s8 = sshra.s32 %s1382_s22, 4  ;;  %s4521_s8 = int_to_ptr.hbm [resolvable:$true] %s4520_s8  ;;  %s1400_s28 = int_to_ptr.hbm [resolvable:$true] %s6585_s28 }
 0x4ba   : > { %s4522_s26 = scalar_lea.hbm %s4521_s8, 1  ;;  %p4525_p2 = scmp.lt.s32.totalorder %s4521_s8, %s7294_s4 }
 0x4bb   : > { %p4523_p1 = scmp.ne.s32.totalorder %s4521_s8, %s4522_s26  ;;  %p4526_p3 = scmp.lt.s32.totalorder %s6130_s1, %s4522_s26 }
 0x4bd   : > { %p4527_p4 = por %p4526_p3, %p4525_p2 }
 0x4bf   : > { %p4528_p5 = pnand %p4527_p4, %p4523_p1 }
 0x4c1   : > { %4531 = shalt.err (!%p4528_p5)  }
 0x4c2   : > { %s4532_s6 = sshra.s32 %s1384_s20, 4  ;;  %s4533_s6 = int_to_ptr.vmem [resolvable:$true] %s4532_s6 }
 0x4c3   : > { %s4534_s14 = scalar_lea.vmem %s4533_s6, 1  ;;  %p4537_p7 = scmp.lt.s32.totalorder %s4533_s6, [#allocation2] }
 0x4c4   : > { %p4535_p6 = scmp.ne.s32.totalorder %s4533_s6, %s4534_s14  ;;  %p4538_p8 = scmp.lt.s32.totalorder %s6117_s10, %s4534_s14 }
 0x4c6   : > { %p4539_p9 = por %p4538_p8, %p4537_p7 }
 0x4c8   : > { %p4540_p10 = pnand %p4539_p9, %p4535_p6 }
 0x4ca   : > { %4543 = shalt.err (!%p4540_p10)  }
 0x4cb   : > { %1386 = dma.hbm_to_vmem [thread:$0]  %s1382_s22, 16, %s1384_s20, %s6105_s9 }
 0x4cc   : > { %s4544_s30 = sshra.s32 %s1400_s28, 4  ;;  %s4545_s30 = int_to_ptr.hbm [resolvable:$true] %s4544_s30 }
 0x4cd   : > { %s4546_s23 = scalar_lea.hbm %s4545_s30, 1  ;;  %p4549_p12 = scmp.lt.s32.totalorder %s4545_s30, %s7294_s4 }
 0x4ce   : > { %p4547_p11 = scmp.ne.s32.totalorder %s4545_s30, %s4546_s23  ;;  %p4550_p13 = scmp.lt.s32.totalorder %s6130_s1, %s4546_s23 }
 0x4d0   : > { %p4551_p0 = por %p4550_p13, %p4549_p12 }
 0x4d2   : > { %p4552_p1 = pnand %p4551_p0, %p4547_p11 }
 0x4d4   : > { %4555 = shalt.err (!%p4552_p1)  }
 0x4d5   : > { %s4556_s24 = sshra.s32 %s1402_s27, 4  ;;  %s4557_s24 = int_to_ptr.vmem [resolvable:$true] %s4556_s24 }
 0x4d6   : > { %s4558_s19 = scalar_lea.vmem %s4557_s24, 1  ;;  %p4561_p3 = scmp.lt.s32.totalorder %s4557_s24, [#allocation2] }
 0x4d7   : > { %p4559_p2 = scmp.ne.s32.totalorder %s4557_s24, %s4558_s19  ;;  %p4562_p4 = scmp.lt.s32.totalorder %s6117_s10, %s4558_s19 }
 0x4d9   : > { %p4563_p5 = por %p4562_p4, %p4561_p3 }
 0x4db   : > { %p4564_p6 = pnand %p4563_p5, %p4559_p2 }
 0x4dd   : > { %4567 = shalt.err (!%p4564_p6)  }
 0x4de   : > { %1404 = dma.hbm_to_vmem [thread:$0]  %s1400_s28, 16, %s1402_s27, %s6105_s9 }
 0x4df   : > { %s1405_s20 = sadd.s32 1, %s6548_s25  ;;  %s2301_s22 = scalar_lea.vmem %s6081_s12, 27 [#allocation2] }
 0x4e0   : > { %s1406_s17 = sld [smem:[#allocation7 + %s1405_s20]]  ;;  %s6607_s16 = sshll.u32 %s2301_s22, 4  ;;  %s1420_s16 = int_to_ptr.vmem [resolvable:$true] %s6607_s16 }
 0x4e1   : > { %s1423_s21 = sadd.s32 2, %s6548_s25  ;;  %s2305_s26 = scalar_lea.vmem %s6081_s12, 35 [#allocation2] }
 0x4e2   : > { %s6611_s8 = sld [smem:[#allocation7 + %s1423_s21]]  ;;  %s6614_s15 = sshll.u32 %s2305_s26, 4  ;;  %s1438_s15 = int_to_ptr.vmem [resolvable:$true] %s6614_s15 }
 0x4e3   : > { %s1441_s2 = sadd.s32 3, %s6548_s25  ;;  %s2309_s27 = scalar_lea.vmem %s6081_s12, 43 [#allocation2] }
 0x4e4   : > { %s6618_s6 = sld [smem:[#allocation7 + %s1441_s2]]  ;;  %s1459_s28 = sadd.s32 4, %s6548_s25 }
 0x4e5   : > { %s6625_s13 = sshll.u32 %s2309_s27, 4  ;;  %s1456_s13 = int_to_ptr.vmem [resolvable:$true] %s6625_s13 }
 0x4e6   : > { %s1408_s23 = scalar_lea.hbm %s7294_s4, %s1406_s17 }
 0x4e7   : > { %s1417_s11 = sshll.u32 %s1408_s23, 4  ;;  %s1418_s11 = int_to_ptr.hbm [resolvable:$true] %s1417_s11 }
 0x4e8   : > { %s1426_s20 = scalar_lea.hbm %s7294_s4, %s6611_s8  ;;  %s4568_s22 = sshra.s32 %s1418_s11, 4  ;;  %s4569_s22 = int_to_ptr.hbm [resolvable:$true] %s4568_s22 }
 0x4e9   : > { %s4570_s21 = scalar_lea.hbm %s4569_s22, 1  ;;  %p4573_p8 = scmp.lt.s32.totalorder %s4569_s22, %s7294_s4 }
 0x4ea   : > { %p4571_p7 = scmp.ne.s32.totalorder %s4569_s22, %s4570_s21  ;;  %p4574_p9 = scmp.lt.s32.totalorder %s6130_s1, %s4570_s21 }
 0x4ec   : > { %p4575_p10 = por %p4574_p9, %p4573_p8 }
 0x4ee   : > { %p4576_p11 = pnand %p4575_p10, %p4571_p7 }
 0x4f0   : > { %4579 = shalt.err (!%p4576_p11)  }
 0x4f1   : > { %s4580_s17 = sshra.s32 %s1420_s16, 4  ;;  %s4581_s17 = int_to_ptr.vmem [resolvable:$true] %s4580_s17 }
 0x4f2   : > { %s4582_s27 = scalar_lea.vmem %s4581_s17, 1  ;;  %p4585_p13 = scmp.lt.s32.totalorder %s4581_s17, [#allocation2] }
 0x4f3   : > { %p4583_p12 = scmp.ne.s32.totalorder %s4581_s17, %s4582_s27  ;;  %p4586_p0 = scmp.lt.s32.totalorder %s6117_s10, %s4582_s27 }
 0x4f5   : > { %p4587_p1 = por %p4586_p0, %p4585_p13 }
 0x4f7   : > { %p4588_p2 = pnand %p4587_p1, %p4583_p12 }
 0x4f9   : > { %4591 = shalt.err (!%p4588_p2)  }
 0x4fa   : > { %1422 = dma.hbm_to_vmem [thread:$0]  %s1418_s11, 16, %s1420_s16, %s6105_s9 }
 0x4fb   : > { %s1435_s8 = sshll.u32 %s1426_s20, 4  ;;  %s1444_s23 = scalar_lea.hbm %s7294_s4, %s6618_s6  ;;  %s1436_s8 = int_to_ptr.hbm [resolvable:$true] %s1435_s8 }
 0x4fc   : > { %s6646_s24 = sshll.u32 %s1444_s23, 4  ;;  %s4592_s19 = sshra.s32 %s1436_s8, 4  ;;  %s4593_s19 = int_to_ptr.hbm [resolvable:$true] %s4592_s19  ;;  %s1454_s24 = int_to_ptr.hbm [resolvable:$true] %s6646_s24 }
 0x4fd   : > { %s4594_s22 = scalar_lea.hbm %s4593_s19, 1  ;;  %p4597_p4 = scmp.lt.s32.totalorder %s4593_s19, %s7294_s4 }
 0x4fe   : > { %p4595_p3 = scmp.ne.s32.totalorder %s4593_s19, %s4594_s22  ;;  %p4598_p5 = scmp.lt.s32.totalorder %s6130_s1, %s4594_s22 }
 0x500   : > { %p4599_p6 = por %p4598_p5, %p4597_p4 }
 0x502   : > { %p4600_p7 = pnand %p4599_p6, %p4595_p3 }
 0x504   : > { %4603 = shalt.err (!%p4600_p7)  }
 0x505   : > { %s4604_s16 = sshra.s32 %s1438_s15, 4  ;;  %s4605_s16 = int_to_ptr.vmem [resolvable:$true] %s4604_s16 }
 0x506   : > { %s4606_s6 = scalar_lea.vmem %s4605_s16, 1  ;;  %p4609_p9 = scmp.lt.s32.totalorder %s4605_s16, [#allocation2] }
 0x507   : > { %p4607_p8 = scmp.ne.s32.totalorder %s4605_s16, %s4606_s6  ;;  %p4610_p10 = scmp.lt.s32.totalorder %s6117_s10, %s4606_s6 }
 0x509   : > { %p4611_p11 = por %p4610_p10, %p4609_p9 }
 0x50b   : > { %p4612_p12 = pnand %p4611_p11, %p4607_p8 }
 0x50d   : > { %4615 = shalt.err (!%p4612_p12)  }
 0x50e   : > { %1440 = dma.hbm_to_vmem [thread:$0]  %s1436_s8, 16, %s1438_s15, %s6105_s9 }
 0x50f   : > { %s6661_s11 = sld [smem:[#allocation7 + %s1459_s28]]  ;;  %s4616_s20 = sshra.s32 %s1454_s24, 4  ;;  %s4617_s20 = int_to_ptr.hbm [resolvable:$true] %s4616_s20 }
 0x510   : > { %s4618_s2 = scalar_lea.hbm %s4617_s20, 1  ;;  %p4621_p0 = scmp.lt.s32.totalorder %s4617_s20, %s7294_s4 }
 0x511   : > { %p4619_p13 = scmp.ne.s32.totalorder %s4617_s20, %s4618_s2  ;;  %p4622_p1 = scmp.lt.s32.totalorder %s6130_s1, %s4618_s2 }
 0x513   : > { %p4623_p2 = por %p4622_p1, %p4621_p0 }
 0x515   : > { %p4624_p3 = pnand %p4623_p2, %p4619_p13 }
 0x517   : > { %4627 = shalt.err (!%p4624_p3)  }
 0x518   : > { %s4628_s15 = sshra.s32 %s1456_s13, 4  ;;  %s4629_s15 = int_to_ptr.vmem [resolvable:$true] %s4628_s15 }
 0x519   : > { %s4630_s25 = scalar_lea.vmem %s4629_s15, 1  ;;  %p4633_p5 = scmp.lt.s32.totalorder %s4629_s15, [#allocation2] }
 0x51a   : > { %p4631_p4 = scmp.ne.s32.totalorder %s4629_s15, %s4630_s25  ;;  %p4634_p6 = scmp.lt.s32.totalorder %s6117_s10, %s4630_s25 }
 0x51c   : > { %p4635_p7 = por %p4634_p6, %p4633_p5 }
 0x51e   : > { %p4636_p8 = pnand %p4635_p7, %p4631_p4 }
 0x520   : > { %4639 = shalt.err (!%p4636_p8)  }
 0x521   : > { %1458 = dma.hbm_to_vmem [thread:$0]  %s1454_s24, 16, %s1456_s13, %s6105_s9 }
 0x522   : > { %s2313_s28 = scalar_lea.vmem %s6081_s12, 51 [#allocation2]  ;;  %s1477_s8 = sadd.s32 4, %s6077_s18 }
 0x523   : > { %s6675_s14 = sshll.u32 %s2313_s28, 4  ;;  %s6677_s30 = sld [smem:[#allocation5 + %s1477_s8]]  ;;  %s1474_s14 = int_to_ptr.vmem [resolvable:$true] %s6675_s14 }
 0x524   : > { %s2317_s23 = scalar_lea.vmem %s6081_s12, 4 [#allocation2]  ;;  %s6683_s22 = smul.u32 5, %s1477_s8 }
 0x525   : > { %s6681_s19 = sshll.u32 %s2317_s23, 4  ;;  %s1462_s16 = scalar_lea.hbm %s7294_s4, %s6661_s11  ;;  %s1492_s19 = int_to_ptr.vmem [resolvable:$true] %s6681_s19 }
 0x526   : > { %s1471_s13 = sshll.u32 %s1462_s16, 4  ;;  %s6690_s24 = sld [smem:[#allocation6 + %s1477_s8]]  ;;  %s1472_s13 = int_to_ptr.hbm [resolvable:$true] %s1471_s13 }
 0x527   : > { %s2321_s6 = scalar_lea.vmem %s6081_s12, 12 [#allocation2]  ;;  %s4640_s20 = sshra.s32 %s1472_s13, 4  ;;  %s4641_s20 = int_to_ptr.hbm [resolvable:$true] %s4640_s20 }
 0x528   : > { %s4642_s2 = scalar_lea.hbm %s4641_s20, 1  ;;  %p4645_p10 = scmp.lt.s32.totalorder %s4641_s20, %s7294_s4 }
 0x529   : > { %p4643_p9 = scmp.ne.s32.totalorder %s4641_s20, %s4642_s2  ;;  %p4646_p11 = scmp.lt.s32.totalorder %s6130_s1, %s4642_s2 }
 0x52b   : > { %p4647_p12 = por %p4646_p11, %p4645_p10 }
 0x52d   : > { %p4648_p13 = pnand %p4647_p12, %p4643_p9 }
 0x52f   : > { %4651 = shalt.err (!%p4648_p13)  }
 0x530   : > { %s4652_s11 = sshra.s32 %s1474_s14, 4  ;;  %s4653_s11 = int_to_ptr.vmem [resolvable:$true] %s4652_s11 }
 0x531   : > { %s4654_s15 = scalar_lea.vmem %s4653_s11, 1  ;;  %p4657_p1 = scmp.lt.s32.totalorder %s4653_s11, [#allocation2] }
 0x532   : > { %p4655_p0 = scmp.ne.s32.totalorder %s4653_s11, %s4654_s15  ;;  %p4658_p2 = scmp.lt.s32.totalorder %s6117_s10, %s4654_s15 }
 0x534   : > { %p4659_p3 = por %p4658_p2, %p4657_p1 }
 0x536   : > { %p4660_p4 = pnand %p4659_p3, %p4655_p0 }
 0x538   : > { %4663 = shalt.err (!%p4660_p4)  }
 0x539   : > { %1476 = dma.hbm_to_vmem [thread:$0]  %s1472_s13, 16, %s1474_s14, %s6105_s9 }
 0x53a   : > { %s1480_s8 = scalar_lea.hbm %s7293_s3, %s6677_s30  ;;  %s6707_s23 = sshll.u32 %s2321_s6, 4  ;;  %s1509_s23 = int_to_ptr.vmem [resolvable:$true] %s6707_s23 }
 0x53b   : > { %s1489_s21 = sshll.u32 %s1480_s8, 4  ;;  %s6711_s26 = sld [smem:[#allocation7 + %s6683_s22]]  ;;  %s1490_s21 = int_to_ptr.hbm [resolvable:$true] %s1489_s21 }
 0x53c   : > { %s4664_s16 = sshra.s32 %s1490_s21, 4  ;;  %s4665_s16 = int_to_ptr.hbm [resolvable:$true] %s4664_s16 }
 0x53d   : > { %s4666_s20 = scalar_lea.hbm %s4665_s16, 1  ;;  %p4669_p6 = scmp.lt.s32.totalorder %s4665_s16, %s7293_s3 }
 0x53e   : > { %p4667_p5 = scmp.ne.s32.totalorder %s4665_s16, %s4666_s20  ;;  %p4670_p7 = scmp.lt.s32.totalorder %s6110_s29, %s4666_s20 }
 0x540   : > { %p4671_p8 = por %p4670_p7, %p4669_p6 }
 0x542   : > { %p4672_p9 = pnand %p4671_p8, %p4667_p5 }
 0x544   : > { %4675 = shalt.err (!%p4672_p9)  }
 0x545   : > { %s4676_s14 = sshra.s32 %s1492_s19, 4  ;;  %s4677_s14 = int_to_ptr.vmem [resolvable:$true] %s4676_s14 }
 0x546   : > { %s4678_s30 = scalar_lea.vmem %s4677_s14, 1  ;;  %p4681_p11 = scmp.lt.s32.totalorder %s4677_s14, [#allocation2] }
 0x547   : > { %p4679_p10 = scmp.ne.s32.totalorder %s4677_s14, %s4678_s30  ;;  %p4682_p12 = scmp.lt.s32.totalorder %s6117_s10, %s4678_s30 }
 0x549   : > { %p4683_p13 = por %p4682_p12, %p4681_p11 }
 0x54b   : > { %p4684_p0 = pnand %p4683_p13, %p4679_p10 }
 0x54d   : > { %4687 = shalt.err (!%p4684_p0)  }
 0x54e   : > { %1494 = dma.hbm_to_vmem [thread:$0]  %s1490_s21, 16, %s1492_s19, %s6105_s9 }
 0x54f   : > { %s1497_s27 = scalar_lea.hbm %s7294_s4, %s6690_s24  ;;  %s2325_s11 = scalar_lea.vmem %s6081_s12, 20 [#allocation2] }
 0x550   : > { %s1506_s15 = sshll.u32 %s1497_s27, 4  ;;  %s6728_s25 = sshll.u32 %s2325_s11, 4  ;;  %s1507_s15 = int_to_ptr.hbm [resolvable:$true] %s1506_s15  ;;  %s1527_s25 = int_to_ptr.vmem [resolvable:$true] %s6728_s25 }
 0x551   : > { %s4688_s28 = sshra.s32 %s1507_s15, 4  ;;  %s4689_s28 = int_to_ptr.hbm [resolvable:$true] %s4688_s28 }
 0x552   : > { %s4690_s8 = scalar_lea.hbm %s4689_s28, 1  ;;  %p4693_p2 = scmp.lt.s32.totalorder %s4689_s28, %s7294_s4 }
 0x553   : > { %p4691_p1 = scmp.ne.s32.totalorder %s4689_s28, %s4690_s8  ;;  %p4694_p3 = scmp.lt.s32.totalorder %s6130_s1, %s4690_s8 }
 0x555   : > { %p4695_p4 = por %p4694_p3, %p4693_p2 }
 0x557   : > { %p4696_p5 = pnand %p4695_p4, %p4691_p1 }
 0x559   : > { %4699 = shalt.err (!%p4696_p5)  }
 0x55a   : > { %s4700_s19 = sshra.s32 %s1509_s23, 4  ;;  %s4701_s19 = int_to_ptr.vmem [resolvable:$true] %s4700_s19 }
 0x55b   : > { %s4702_s24 = scalar_lea.vmem %s4701_s19, 1  ;;  %p4705_p7 = scmp.lt.s32.totalorder %s4701_s19, [#allocation2] }
 0x55c   : > { %p4703_p6 = scmp.ne.s32.totalorder %s4701_s19, %s4702_s24  ;;  %p4706_p8 = scmp.lt.s32.totalorder %s6117_s10, %s4702_s24 }
 0x55e   : > { %p4707_p9 = por %p4706_p8, %p4705_p7 }
 0x560   : > { %p4708_p10 = pnand %p4707_p9, %p4703_p6 }
 0x562   : > { %4711 = shalt.err (!%p4708_p10)  }
 0x563   : > { %1511 = dma.hbm_to_vmem [thread:$0]  %s1507_s15, 16, %s1509_s23, %s6105_s9 }
 0x564   : > { %s1515_s17 = scalar_lea.hbm %s7294_s4, %s6711_s26  ;;  %s1530_s14 = sadd.s32 1, %s6683_s22 }
 0x565   : > { %s1524_s30 = sshll.u32 %s1515_s17, 4  ;;  %s6746_s13 = sld [smem:[#allocation7 + %s1530_s14]]  ;;  %s1525_s30 = int_to_ptr.hbm [resolvable:$true] %s1524_s30 }
 0x566   : > { %s2329_s6 = scalar_lea.vmem %s6081_s12, 28 [#allocation2]  ;;  %s4712_s27 = sshra.s32 %s1525_s30, 4  ;;  %s4713_s27 = int_to_ptr.hbm [resolvable:$true] %s4712_s27 }
 0x567   : > { %s4714_s11 = scalar_lea.hbm %s4713_s27, 1  ;;  %p4717_p12 = scmp.lt.s32.totalorder %s4713_s27, %s7294_s4 }
 0x568   : > { %p4715_p11 = scmp.ne.s32.totalorder %s4713_s27, %s4714_s11  ;;  %p4718_p13 = scmp.lt.s32.totalorder %s6130_s1, %s4714_s11 }
 0x56a   : > { %p4719_p0 = por %p4718_p13, %p4717_p12 }
 0x56c   : > { %p4720_p1 = pnand %p4719_p0, %p4715_p11 }
 0x56e   : > { %4723 = shalt.err (!%p4720_p1)  }
 0x56f   : > { %s4724_s23 = sshra.s32 %s1527_s25, 4  ;;  %s4725_s23 = int_to_ptr.vmem [resolvable:$true] %s4724_s23 }
 0x570   : > { %s4726_s26 = scalar_lea.vmem %s4725_s23, 1  ;;  %p4729_p3 = scmp.lt.s32.totalorder %s4725_s23, [#allocation2] }
 0x571   : > { %p4727_p2 = scmp.ne.s32.totalorder %s4725_s23, %s4726_s26  ;;  %p4730_p4 = scmp.lt.s32.totalorder %s6117_s10, %s4726_s26 }
 0x573   : > { %p4731_p5 = por %p4730_p4, %p4729_p3 }
 0x575   : > { %p4732_p6 = pnand %p4731_p5, %p4727_p2 }
 0x577   : > { %4735 = shalt.err (!%p4732_p6)  }
 0x578   : > { %1529 = dma.hbm_to_vmem [thread:$0]  %s1525_s30, 16, %s1527_s25, %s6105_s9 }
 0x579   : > { %s6759_s15 = sshll.u32 %s2329_s6, 4  ;;  %s1548_s16 = sadd.s32 2, %s6683_s22  ;;  %s1545_s15 = int_to_ptr.vmem [resolvable:$true] %s6759_s15 }
 0x57a   : > { %s6763_s20 = sld [smem:[#allocation7 + %s1548_s16]]  ;;  %s2333_s19 = scalar_lea.vmem %s6081_s12, 36 [#allocation2] }
 0x57b   : > { %s1566_s24 = sadd.s32 3, %s6683_s22  ;;  %s1533_s17 = scalar_lea.hbm %s7294_s4, %s6746_s13 }
 0x57c   : > { %s6771_s14 = sshll.u32 %s2333_s19, 4  ;;  %s1542_s27 = sshll.u32 %s1533_s17, 4  ;;  %s1563_s14 = int_to_ptr.vmem [resolvable:$true] %s6771_s14  ;;  %s1543_s27 = int_to_ptr.hbm [resolvable:$true] %s1542_s27 }
 0x57d   : > { %s6774_s25 = sld [smem:[#allocation7 + %s1566_s24]]  ;;  %s4736_s30 = sshra.s32 %s1543_s27, 4  ;;  %s4737_s30 = int_to_ptr.hbm [resolvable:$true] %s4736_s30 }
 0x57e   : > { %s4738_s6 = scalar_lea.hbm %s4737_s30, 1  ;;  %p4741_p8 = scmp.lt.s32.totalorder %s4737_s30, %s7294_s4 }
 0x57f   : > { %p4739_p7 = scmp.ne.s32.totalorder %s4737_s30, %s4738_s6  ;;  %p4742_p9 = scmp.lt.s32.totalorder %s6130_s1, %s4738_s6 }
 0x581   : > { %p4743_p10 = por %p4742_p9, %p4741_p8 }
 0x583   : > { %p4744_p11 = pnand %p4743_p10, %p4739_p7 }
 0x585   : > { %4747 = shalt.err (!%p4744_p11)  }
 0x586   : > { %s4748_s13 = sshra.s32 %s1545_s15, 4  ;;  %s4749_s13 = int_to_ptr.vmem [resolvable:$true] %s4748_s13 }
 0x587   : > { %s4750_s8 = scalar_lea.vmem %s4749_s13, 1  ;;  %p4753_p13 = scmp.lt.s32.totalorder %s4749_s13, [#allocation2] }
 0x588   : > { %p4751_p12 = scmp.ne.s32.totalorder %s4749_s13, %s4750_s8  ;;  %p4754_p0 = scmp.lt.s32.totalorder %s6117_s10, %s4750_s8 }
 0x58a   : > { %p4755_p1 = por %p4754_p0, %p4753_p13 }
 0x58c   : > { %p4756_p2 = pnand %p4755_p1, %p4751_p12 }
 0x58e   : > { %4759 = shalt.err (!%p4756_p2)  }
 0x58f   : > { %1547 = dma.hbm_to_vmem [thread:$0]  %s1543_s27, 16, %s1545_s15, %s6105_s9 }
 0x590   : > { %s1551_s16 = scalar_lea.hbm %s7294_s4, %s6763_s20  ;;  %s2337_s19 = scalar_lea.vmem %s6081_s12, 44 [#allocation2] }
 0x591   : > { %s1560_s24 = sshll.u32 %s1551_s16, 4  ;;  %s6791_s21 = sshll.u32 %s2337_s19, 4  ;;  %s1561_s24 = int_to_ptr.hbm [resolvable:$true] %s1560_s24  ;;  %s1581_s21 = int_to_ptr.vmem [resolvable:$true] %s6791_s21 }
 0x592   : > { %s4760_s2 = sshra.s32 %s1561_s24, 4  ;;  %s4761_s2 = int_to_ptr.hbm [resolvable:$true] %s4760_s2 }
 0x593   : > { %s4762_s17 = scalar_lea.hbm %s4761_s2, 1  ;;  %p4765_p4 = scmp.lt.s32.totalorder %s4761_s2, %s7294_s4 }
 0x594   : > { %p4763_p3 = scmp.ne.s32.totalorder %s4761_s2, %s4762_s17  ;;  %p4766_p5 = scmp.lt.s32.totalorder %s6130_s1, %s4762_s17 }
 0x596   : > { %p4767_p6 = por %p4766_p5, %p4765_p4 }
 0x598   : > { %p4768_p7 = pnand %p4767_p6, %p4763_p3 }
 0x59a   : > { %4771 = shalt.err (!%p4768_p7)  }
 0x59b   : > { %s4772_s15 = sshra.s32 %s1563_s14, 4  ;;  %s4773_s15 = int_to_ptr.vmem [resolvable:$true] %s4772_s15 }
 0x59c   : > { %s4774_s20 = scalar_lea.vmem %s4773_s15, 1  ;;  %p4777_p9 = scmp.lt.s32.totalorder %s4773_s15, [#allocation2] }
 0x59d   : > { %p4775_p8 = scmp.ne.s32.totalorder %s4773_s15, %s4774_s20  ;;  %p4778_p10 = scmp.lt.s32.totalorder %s6117_s10, %s4774_s20 }
 0x59f   : > { %p4779_p11 = por %p4778_p10, %p4777_p9 }
 0x5a1   : > { %p4780_p12 = pnand %p4779_p11, %p4775_p8 }
 0x5a3   : > { %4783 = shalt.err (!%p4780_p12)  }
 0x5a4   : > { %1565 = dma.hbm_to_vmem [thread:$0]  %s1561_s24, 16, %s1563_s14, %s6105_s9 }
 0x5a5   : > { %s1569_s28 = scalar_lea.hbm %s7294_s4, %s6774_s25  ;;  %s1584_s13 = sadd.s32 4, %s6683_s22 }
 0x5a6   : > { %s1578_s8 = sshll.u32 %s1569_s28, 4  ;;  %s6809_s23 = sld [smem:[#allocation7 + %s1584_s13]]  ;;  %s1579_s8 = int_to_ptr.hbm [resolvable:$true] %s1578_s8 }
 0x5a7   : > { %s2341_s26 = scalar_lea.vmem %s6081_s12, 52 [#allocation2]  ;;  %s4784_s16 = sshra.s32 %s1579_s8, 4  ;;  %s4785_s16 = int_to_ptr.hbm [resolvable:$true] %s4784_s16 }
 0x5a8   : > { %s4786_s19 = scalar_lea.hbm %s4785_s16, 1  ;;  %p4789_p0 = scmp.lt.s32.totalorder %s4785_s16, %s7294_s4 }
 0x5a9   : > { %p4787_p13 = scmp.ne.s32.totalorder %s4785_s16, %s4786_s19  ;;  %p4790_p1 = scmp.lt.s32.totalorder %s6130_s1, %s4786_s19 }
 0x5ab   : > { %p4791_p2 = por %p4790_p1, %p4789_p0 }
 0x5ad   : > { %p4792_p3 = pnand %p4791_p2, %p4787_p13 }
 0x5af   : > { %4795 = shalt.err (!%p4792_p3)  }
 0x5b0   : > { %s4796_s22 = sshra.s32 %s1581_s21, 4  ;;  %s4797_s22 = int_to_ptr.vmem [resolvable:$true] %s4796_s22 }
 0x5b1   : > { %s4798_s14 = scalar_lea.vmem %s4797_s22, 1  ;;  %p4801_p5 = scmp.lt.s32.totalorder %s4797_s22, [#allocation2] }
 0x5b2   : > { %p4799_p4 = scmp.ne.s32.totalorder %s4797_s22, %s4798_s14  ;;  %p4802_p6 = scmp.lt.s32.totalorder %s6117_s10, %s4798_s14 }
 0x5b4   : > { %p4803_p7 = por %p4802_p6, %p4801_p5 }
 0x5b6   : > { %p4804_p8 = pnand %p4803_p7, %p4799_p4 }
 0x5b8   : > { %4807 = shalt.err (!%p4804_p8)  }
 0x5b9   : > { %1583 = dma.hbm_to_vmem [thread:$0]  %s1579_s8, 16, %s1581_s21, %s6105_s9 }
 0x5ba   : > { %s6822_s25 = sshll.u32 %s2341_s26, 4  ;;  %s1602_s24 = sadd.s32 5, %s6077_s18  ;;  %s1599_s25 = int_to_ptr.vmem [resolvable:$true] %s6822_s25 }
 0x5bb   : > { %s6826_s30 = sld [smem:[#allocation5 + %s1602_s24]]  ;;  %s2345_s6 = scalar_lea.vmem %s6081_s12, 5 [#allocation2] }
 0x5bc   : > { %s6829_s15 = smul.u32 5, %s1602_s24  ;;  %s1587_s11 = scalar_lea.hbm %s7294_s4, %s6809_s23 }
 0x5bd   : > { %s6835_s28 = sshll.u32 %s2345_s6, 4  ;;  %s1596_s13 = sshll.u32 %s1587_s11, 4  ;;  %s1617_s28 = int_to_ptr.vmem [resolvable:$true] %s6835_s28  ;;  %s1597_s13 = int_to_ptr.hbm [resolvable:$true] %s1596_s13 }
 0x5be   : > { %s6838_s21 = sld [smem:[#allocation6 + %s1602_s24]]  ;;  %s4808_s8 = sshra.s32 %s1597_s13, 4  ;;  %s4809_s8 = int_to_ptr.hbm [resolvable:$true] %s4808_s8 }
 0x5bf   : > { %s4810_s26 = scalar_lea.hbm %s4809_s8, 1  ;;  %p4813_p10 = scmp.lt.s32.totalorder %s4809_s8, %s7294_s4 }
 0x5c0   : > { %p4811_p9 = scmp.ne.s32.totalorder %s4809_s8, %s4810_s26  ;;  %p4814_p11 = scmp.lt.s32.totalorder %s6130_s1, %s4810_s26 }
 0x5c2   : > { %p4815_p12 = por %p4814_p11, %p4813_p10 }
 0x5c4   : > { %p4816_p13 = pnand %p4815_p12, %p4811_p9 }
 0x5c6   : > { %4819 = shalt.err (!%p4816_p13)  }
 0x5c7   : > { %s4820_s23 = sshra.s32 %s1599_s25, 4  ;;  %s4821_s23 = int_to_ptr.vmem [resolvable:$true] %s4820_s23 }
 0x5c8   : > { %s4822_s2 = scalar_lea.vmem %s4821_s23, 1  ;;  %p4825_p1 = scmp.lt.s32.totalorder %s4821_s23, [#allocation2] }
 0x5c9   : > { %p4823_p0 = scmp.ne.s32.totalorder %s4821_s23, %s4822_s2  ;;  %p4826_p2 = scmp.lt.s32.totalorder %s6117_s10, %s4822_s2 }
 0x5cb   : > { %p4827_p3 = por %p4826_p2, %p4825_p1 }
 0x5cd   : > { %p4828_p4 = pnand %p4827_p3, %p4823_p0 }
 0x5cf   : > { %4831 = shalt.err (!%p4828_p4)  }
 0x5d0   : > { %1601 = dma.hbm_to_vmem [thread:$0]  %s1597_s13, 16, %s1599_s25, %s6105_s9 }
 0x5d1   : > { %s1605_s14 = scalar_lea.hbm %s7293_s3, %s6826_s30  ;;  %s2349_s24 = scalar_lea.vmem %s6081_s12, 13 [#allocation2] }
 0x5d2   : > { %s1614_s6 = sshll.u32 %s1605_s14, 4  ;;  %s6855_s20 = sshll.u32 %s2349_s24, 4  ;;  %s1615_s6 = int_to_ptr.hbm [resolvable:$true] %s1614_s6  ;;  %s1634_s20 = int_to_ptr.vmem [resolvable:$true] %s6855_s20 }
 0x5d3   : > { %s4832_s27 = sshra.s32 %s1615_s6, 4  ;;  %s4833_s27 = int_to_ptr.hbm [resolvable:$true] %s4832_s27 }
 0x5d4   : > { %s4834_s11 = scalar_lea.hbm %s4833_s27, 1  ;;  %p4837_p6 = scmp.lt.s32.totalorder %s4833_s27, %s7293_s3 }
 0x5d5   : > { %p4835_p5 = scmp.ne.s32.totalorder %s4833_s27, %s4834_s11  ;;  %p4838_p7 = scmp.lt.s32.totalorder %s6110_s29, %s4834_s11 }
 0x5d7   : > { %p4839_p8 = por %p4838_p7, %p4837_p6 }
 0x5d9   : > { %p4840_p9 = pnand %p4839_p8, %p4835_p5 }
 0x5db   : > { %4843 = shalt.err (!%p4840_p9)  }
 0x5dc   : > { %s4844_s25 = sshra.s32 %s1617_s28, 4  ;;  %s4845_s25 = int_to_ptr.vmem [resolvable:$true] %s4844_s25 }
 0x5dd   : > { %s4846_s30 = scalar_lea.vmem %s4845_s25, 1  ;;  %p4849_p11 = scmp.lt.s32.totalorder %s4845_s25, [#allocation2] }
 0x5de   : > { %p4847_p10 = scmp.ne.s32.totalorder %s4845_s25, %s4846_s30  ;;  %p4850_p12 = scmp.lt.s32.totalorder %s6117_s10, %s4846_s30 }
 0x5e0   : > { %p4851_p13 = por %p4850_p12, %p4849_p11 }
 0x5e2   : > { %p4852_p0 = pnand %p4851_p13, %p4847_p10 }
 0x5e4   : > { %4855 = shalt.err (!%p4852_p0)  }
 0x5e5   : > { %1619 = dma.hbm_to_vmem [thread:$0]  %s1615_s6, 16, %s1617_s28, %s6105_s9 }
 0x5e6   : > { %s1622_s19 = scalar_lea.hbm %s7294_s4, %s6838_s21  ;;  %s6873_s23 = sld [smem:[#allocation7 + %s6829_s15]] }
 0x5e7   : > { %s1631_s2 = sshll.u32 %s1622_s19, 4  ;;  %s2353_s17 = scalar_lea.vmem %s6081_s12, 21 [#allocation2]  ;;  %s1632_s2 = int_to_ptr.hbm [resolvable:$true] %s1631_s2 }
 0x5e8   : > { %s6876_s22 = sshll.u32 %s2353_s17, 4  ;;  %s4856_s14 = sshra.s32 %s1632_s2, 4  ;;  %s4857_s14 = int_to_ptr.hbm [resolvable:$true] %s4856_s14  ;;  %s1652_s22 = int_to_ptr.vmem [resolvable:$true] %s6876_s22 }
 0x5e9   : > { %s4858_s24 = scalar_lea.hbm %s4857_s14, 1  ;;  %p4861_p2 = scmp.lt.s32.totalorder %s4857_s14, %s7294_s4 }
 0x5ea   : > { %p4859_p1 = scmp.ne.s32.totalorder %s4857_s14, %s4858_s24  ;;  %p4862_p3 = scmp.lt.s32.totalorder %s6130_s1, %s4858_s24 }
 0x5ec   : > { %p4863_p4 = por %p4862_p3, %p4861_p2 }
 0x5ee   : > { %p4864_p5 = pnand %p4863_p4, %p4859_p1 }
 0x5f0   : > { %4867 = shalt.err (!%p4864_p5)  }
 0x5f1   : > { %s4868_s28 = sshra.s32 %s1634_s20, 4  ;;  %s4869_s28 = int_to_ptr.vmem [resolvable:$true] %s4868_s28 }
 0x5f2   : > { %s4870_s21 = scalar_lea.vmem %s4869_s28, 1  ;;  %p4873_p7 = scmp.lt.s32.totalorder %s4869_s28, [#allocation2] }
 0x5f3   : > { %p4871_p6 = scmp.ne.s32.totalorder %s4869_s28, %s4870_s21  ;;  %p4874_p8 = scmp.lt.s32.totalorder %s6117_s10, %s4870_s21 }
 0x5f5   : > { %p4875_p9 = por %p4874_p8, %p4873_p7 }
 0x5f7   : > { %p4876_p10 = pnand %p4875_p9, %p4871_p6 }
 0x5f9   : > { %4879 = shalt.err (!%p4876_p10)  }
 0x5fa   : > { %1636 = dma.hbm_to_vmem [thread:$0]  %s1632_s2, 16, %s1634_s20, %s6105_s9 }
 0x5fb   : > { %s1655_s6 = sadd.s32 1, %s6829_s15  ;;  %s2357_s26 = scalar_lea.vmem %s6081_s12, 29 [#allocation2] }
 0x5fc   : > { %s6890_s8 = sld [smem:[#allocation7 + %s1655_s6]]  ;;  %s1640_s13 = scalar_lea.hbm %s7294_s4, %s6873_s23 }
 0x5fd   : > { %s6897_s16 = sshll.u32 %s2357_s26, 4  ;;  %s1649_s19 = sshll.u32 %s1640_s13, 4  ;;  %s1670_s16 = int_to_ptr.vmem [resolvable:$true] %s6897_s16  ;;  %s1650_s19 = int_to_ptr.hbm [resolvable:$true] %s1649_s19 }
 0x5fe   : > { %s1673_s17 = sadd.s32 2, %s6829_s15  ;;  %s4880_s14 = sshra.s32 %s1650_s19, 4  ;;  %s4881_s14 = int_to_ptr.hbm [resolvable:$true] %s4880_s14 }
 0x5ff   : > { %s4882_s20 = scalar_lea.hbm %s4881_s14, 1  ;;  %p4885_p12 = scmp.lt.s32.totalorder %s4881_s14, %s7294_s4 }
 0x600   : > { %p4883_p11 = scmp.ne.s32.totalorder %s4881_s14, %s4882_s20  ;;  %p4886_p13 = scmp.lt.s32.totalorder %s6130_s1, %s4882_s20 }
 0x602   : > { %p4887_p0 = por %p4886_p13, %p4885_p12 }
 0x604   : > { %p4888_p1 = pnand %p4887_p0, %p4883_p11 }
 0x606   : > { %4891 = shalt.err (!%p4888_p1)  }
 0x607   : > { %s4892_s23 = sshra.s32 %s1652_s22, 4  ;;  %s4893_s23 = int_to_ptr.vmem [resolvable:$true] %s4892_s23 }
 0x608   : > { %s4894_s27 = scalar_lea.vmem %s4893_s23, 1  ;;  %p4897_p3 = scmp.lt.s32.totalorder %s4893_s23, [#allocation2] }
 0x609   : > { %p4895_p2 = scmp.ne.s32.totalorder %s4893_s23, %s4894_s27  ;;  %p4898_p4 = scmp.lt.s32.totalorder %s6117_s10, %s4894_s27 }
 0x60b   : > { %p4899_p5 = por %p4898_p4, %p4897_p3 }
 0x60d   : > { %p4900_p6 = pnand %p4899_p5, %p4895_p2 }
 0x60f   : > { %4903 = shalt.err (!%p4900_p6)  }
 0x610   : > { %1654 = dma.hbm_to_vmem [thread:$0]  %s1650_s19, 16, %s1652_s22, %s6105_s9 }
 0x611   : > { %s6911_s11 = sld [smem:[#allocation7 + %s1673_s17]]  ;;  %s2361_s28 = scalar_lea.vmem %s6081_s12, 37 [#allocation2] }
 0x612   : > { %s1658_s26 = scalar_lea.hbm %s7294_s4, %s6890_s8  ;;  %s6918_s25 = sshll.u32 %s2361_s28, 4  ;;  %s1688_s25 = int_to_ptr.vmem [resolvable:$true] %s6918_s25 }
 0x613   : > { %s1667_s30 = sshll.u32 %s1658_s26, 4  ;;  %s1691_s13 = sadd.s32 3, %s6829_s15  ;;  %s1668_s30 = int_to_ptr.hbm [resolvable:$true] %s1667_s30 }
 0x614   : > { %s4904_s14 = sshra.s32 %s1668_s30, 4  ;;  %s4905_s14 = int_to_ptr.hbm [resolvable:$true] %s4904_s14 }
 0x615   : > { %s4906_s20 = scalar_lea.hbm %s4905_s14, 1  ;;  %p4909_p8 = scmp.lt.s32.totalorder %s4905_s14, %s7294_s4 }
 0x616   : > { %p4907_p7 = scmp.ne.s32.totalorder %s4905_s14, %s4906_s20  ;;  %p4910_p9 = scmp.lt.s32.totalorder %s6130_s1, %s4906_s20 }
 0x618   : > { %p4911_p10 = por %p4910_p9, %p4909_p8 }
 0x61a   : > { %p4912_p11 = pnand %p4911_p10, %p4907_p7 }
 0x61c   : > { %4915 = shalt.err (!%p4912_p11)  }
 0x61d   : > { %s4916_s8 = sshra.s32 %s1670_s16, 4  ;;  %s4917_s8 = int_to_ptr.vmem [resolvable:$true] %s4916_s8 }
 0x61e   : > { %s4918_s19 = scalar_lea.vmem %s4917_s8, 1  ;;  %p4921_p13 = scmp.lt.s32.totalorder %s4917_s8, [#allocation2] }
 0x61f   : > { %p4919_p12 = scmp.ne.s32.totalorder %s4917_s8, %s4918_s19  ;;  %p4922_p0 = scmp.lt.s32.totalorder %s6117_s10, %s4918_s19 }
 0x621   : > { %p4923_p1 = por %p4922_p0, %p4921_p13 }
 0x623   : > { %p4924_p2 = pnand %p4923_p1, %p4919_p12 }
 0x625   : > { %4927 = shalt.err (!%p4924_p2)  }
 0x626   : > { %1672 = dma.hbm_to_vmem [thread:$0]  %s1668_s30, 16, %s1670_s16, %s6105_s9 }
 0x627   : > { %s6932_s17 = sld [smem:[#allocation7 + %s1691_s13]]  ;;  %s2365_s24 = scalar_lea.vmem %s6081_s12, 45 [#allocation2] }
 0x628   : > { %s1676_s28 = scalar_lea.hbm %s7294_s4, %s6911_s11  ;;  %s6939_s21 = sshll.u32 %s2365_s24, 4  ;;  %s1706_s21 = int_to_ptr.vmem [resolvable:$true] %s6939_s21 }
 0x629   : > { %s1685_s6 = sshll.u32 %s1676_s28, 4  ;;  %s1709_s26 = sadd.s32 4, %s6829_s15  ;;  %s1686_s6 = int_to_ptr.hbm [resolvable:$true] %s1685_s6 }
 0x62a   : > { %s4928_s14 = sshra.s32 %s1686_s6, 4  ;;  %s4929_s14 = int_to_ptr.hbm [resolvable:$true] %s4928_s14 }
 0x62b   : > { %s4930_s20 = scalar_lea.hbm %s4929_s14, 1  ;;  %p4933_p4 = scmp.lt.s32.totalorder %s4929_s14, %s7294_s4 }
 0x62c   : > { %p4931_p3 = scmp.ne.s32.totalorder %s4929_s14, %s4930_s20  ;;  %p4934_p5 = scmp.lt.s32.totalorder %s6130_s1, %s4930_s20 }
 0x62e   : > { %p4935_p6 = por %p4934_p5, %p4933_p4 }
 0x630   : > { %p4936_p7 = pnand %p4935_p6, %p4931_p3 }
 0x632   : > { %4939 = shalt.err (!%p4936_p7)  }
 0x633   : > { %s4940_s11 = sshra.s32 %s1688_s25, 4  ;;  %s4941_s11 = int_to_ptr.vmem [resolvable:$true] %s4940_s11 }
 0x634   : > { %s4942_s30 = scalar_lea.vmem %s4941_s11, 1  ;;  %p4945_p9 = scmp.lt.s32.totalorder %s4941_s11, [#allocation2] }
 0x635   : > { %p4943_p8 = scmp.ne.s32.totalorder %s4941_s11, %s4942_s30  ;;  %p4946_p10 = scmp.lt.s32.totalorder %s6117_s10, %s4942_s30 }
 0x637   : > { %p4947_p11 = por %p4946_p10, %p4945_p9 }
 0x639   : > { %p4948_p12 = pnand %p4947_p11, %p4943_p8 }
 0x63b   : > { %4951 = shalt.err (!%p4948_p12)  }
 0x63c   : > { %1690 = dma.hbm_to_vmem [thread:$0]  %s1686_s6, 16, %s1688_s25, %s6105_s9 }
 0x63d   : > { %s6953_s15 = sld [smem:[#allocation7 + %s1709_s26]]  ;;  %s2369_s13 = scalar_lea.vmem %s6081_s12, 53 [#allocation2] }
 0x63e   : > { %s1694_s19 = scalar_lea.hbm %s7294_s4, %s6932_s17  ;;  %s6960_s24 = sshll.u32 %s2369_s13, 4  ;;  %s1724_s24 = int_to_ptr.vmem [resolvable:$true] %s6960_s24 }
 0x63f   : > { %s1703_s23 = sshll.u32 %s1694_s19, 4  ;;  %s6964_s27 = sadd.s32 6, %s6077_s18  ;;  %s1704_s23 = int_to_ptr.hbm [resolvable:$true] %s1703_s23 }
 0x640   : > { %s4952_s28 = sshra.s32 %s1704_s23, 4  ;;  %s4953_s28 = int_to_ptr.hbm [resolvable:$true] %s4952_s28 }
 0x641   : > { %s4954_s14 = scalar_lea.hbm %s4953_s28, 1  ;;  %p4957_p0 = scmp.lt.s32.totalorder %s4953_s28, %s7294_s4 }
 0x642   : > { %p4955_p13 = scmp.ne.s32.totalorder %s4953_s28, %s4954_s14  ;;  %p4958_p1 = scmp.lt.s32.totalorder %s6130_s1, %s4954_s14 }
 0x644   : > { %p4959_p2 = por %p4958_p1, %p4957_p0 }
 0x646   : > { %p4960_p3 = pnand %p4959_p2, %p4955_p13 }
 0x648   : > { %4963 = shalt.err (!%p4960_p3)  }
 0x649   : > { %s4964_s17 = sshra.s32 %s1706_s21, 4  ;;  %s4965_s17 = int_to_ptr.vmem [resolvable:$true] %s4964_s17 }
 0x64a   : > { %s4966_s26 = scalar_lea.vmem %s4965_s17, 1  ;;  %p4969_p5 = scmp.lt.s32.totalorder %s4965_s17, [#allocation2] }
 0x64b   : > { %p4967_p4 = scmp.ne.s32.totalorder %s4965_s17, %s4966_s26  ;;  %p4970_p6 = scmp.lt.s32.totalorder %s6117_s10, %s4966_s26 }
 0x64d   : > { %p4971_p7 = por %p4970_p6, %p4969_p5 }
 0x64f   : > { %p4972_p8 = pnand %p4971_p7, %p4967_p4 }
 0x651   : > { %4975 = shalt.err (!%p4972_p8)  }
 0x652   : > { %1708 = dma.hbm_to_vmem [thread:$0]  %s1704_s23, 16, %s1706_s21, %s6105_s9 }
 0x653   : > { %s6977_s20 = sld [smem:[#allocation5 + %s6964_s27]]  ;;  %s2373_s2 = scalar_lea.vmem %s6081_s12, 6 [#allocation2] }
 0x654   : > { %s1712_s30 = scalar_lea.hbm %s7294_s4, %s6953_s15  ;;  %s6984_s13 = sshll.u32 %s2373_s2, 4  ;;  %s1742_s13 = int_to_ptr.vmem [resolvable:$true] %s6984_s13 }
 0x655   : > { %s1721_s22 = sshll.u32 %s1712_s30, 4  ;;  %s6988_s8 = smul.u32 5, %s6964_s27  ;;  %s1722_s22 = int_to_ptr.hbm [resolvable:$true] %s1721_s22 }
 0x656   : > { %s4976_s19 = sshra.s32 %s1722_s22, 4  ;;  %s4977_s19 = int_to_ptr.hbm [resolvable:$true] %s4976_s19 }
 0x657   : > { %s4978_s28 = scalar_lea.hbm %s4977_s19, 1  ;;  %p4981_p10 = scmp.lt.s32.totalorder %s4977_s19, %s7294_s4 }
 0x658   : > { %p4979_p9 = scmp.ne.s32.totalorder %s4977_s19, %s4978_s28  ;;  %p4982_p11 = scmp.lt.s32.totalorder %s6130_s1, %s4978_s28 }
 0x65a   : > { %p4983_p12 = por %p4982_p11, %p4981_p10 }
 0x65c   : > { %p4984_p13 = pnand %p4983_p12, %p4979_p9 }
 0x65e   : > { %4987 = shalt.err (!%p4984_p13)  }
 0x65f   : > { %s4988_s15 = sshra.s32 %s1724_s24, 4  ;;  %s4989_s15 = int_to_ptr.vmem [resolvable:$true] %s4988_s15 }
 0x660   : > { %s4990_s14 = scalar_lea.vmem %s4989_s15, 1  ;;  %p4993_p1 = scmp.lt.s32.totalorder %s4989_s15, [#allocation2] }
 0x661   : > { %p4991_p0 = scmp.ne.s32.totalorder %s4989_s15, %s4990_s14  ;;  %p4994_p2 = scmp.lt.s32.totalorder %s6117_s10, %s4990_s14 }
 0x663   : > { %p4995_p3 = por %p4994_p2, %p4993_p1 }
 0x665   : > { %p4996_p4 = pnand %p4995_p3, %p4991_p0 }
 0x667   : > { %4999 = shalt.err (!%p4996_p4)  }
 0x668   : > { %1726 = dma.hbm_to_vmem [thread:$0]  %s1722_s22, 16, %s1724_s24, %s6105_s9 }
 0x669   : > { %s7001_s25 = sld [smem:[#allocation6 + %s6964_s27]]  ;;  %s2377_s6 = scalar_lea.vmem %s6081_s12, 14 [#allocation2] }
 0x66a   : > { %s1730_s2 = scalar_lea.hbm %s7293_s3, %s6977_s20  ;;  %s7008_s16 = sshll.u32 %s2377_s6, 4  ;;  %s1759_s16 = int_to_ptr.vmem [resolvable:$true] %s7008_s16 }
 0x66b   : > { %s1739_s11 = sshll.u32 %s1730_s2, 4  ;;  %s7012_s30 = sld [smem:[#allocation7 + %s6988_s8]]  ;;  %s1740_s11 = int_to_ptr.hbm [resolvable:$true] %s1739_s11 }
 0x66c   : > { %s5000_s19 = sshra.s32 %s1740_s11, 4  ;;  %s5001_s19 = int_to_ptr.hbm [resolvable:$true] %s5000_s19 }
 0x66d   : > { %s5002_s28 = scalar_lea.hbm %s5001_s19, 1  ;;  %p5005_p6 = scmp.lt.s32.totalorder %s5001_s19, %s7293_s3 }
 0x66e   : > { %p5003_p5 = scmp.ne.s32.totalorder %s5001_s19, %s5002_s28  ;;  %p5006_p7 = scmp.lt.s32.totalorder %s6110_s29, %s5002_s28 }
 0x670   : > { %p5007_p8 = por %p5006_p7, %p5005_p6 }
 0x672   : > { %p5008_p9 = pnand %p5007_p8, %p5003_p5 }
 0x674   : > { %5011 = shalt.err (!%p5008_p9)  }
 0x675   : > { %s5012_s20 = sshra.s32 %s1742_s13, 4  ;;  %s5013_s20 = int_to_ptr.vmem [resolvable:$true] %s5012_s20 }
 0x676   : > { %s5014_s22 = scalar_lea.vmem %s5013_s20, 1  ;;  %p5017_p11 = scmp.lt.s32.totalorder %s5013_s20, [#allocation2] }
 0x677   : > { %p5015_p10 = scmp.ne.s32.totalorder %s5013_s20, %s5014_s22  ;;  %p5018_p12 = scmp.lt.s32.totalorder %s6117_s10, %s5014_s22 }
 0x679   : > { %p5019_p13 = por %p5018_p12, %p5017_p11 }
 0x67b   : > { %p5020_p0 = pnand %p5019_p13, %p5015_p10 }
 0x67d   : > { %5023 = shalt.err (!%p5020_p0)  }
 0x67e   : > { %1744 = dma.hbm_to_vmem [thread:$0]  %s1740_s11, 16, %s1742_s13, %s6105_s9 }
 0x67f   : > { %s2381_s21 = scalar_lea.vmem %s6081_s12, 22 [#allocation2]  ;;  %s1780_s23 = sadd.s32 1, %s6988_s8 }
 0x680   : > { %s1747_s6 = scalar_lea.hbm %s7294_s4, %s7001_s25  ;;  %s7030_s17 = sshll.u32 %s2381_s21, 4  ;;  %s1777_s17 = int_to_ptr.vmem [resolvable:$true] %s7030_s17 }
 0x681   : > { %s1756_s26 = sshll.u32 %s1747_s6, 4  ;;  %s7033_s2 = sld [smem:[#allocation7 + %s1780_s23]]  ;;  %s1757_s26 = int_to_ptr.hbm [resolvable:$true] %s1756_s26 }
 0x682   : > { %s5024_s19 = sshra.s32 %s1757_s26, 4  ;;  %s5025_s19 = int_to_ptr.hbm [resolvable:$true] %s5024_s19 }
 0x683   : > { %s5026_s28 = scalar_lea.hbm %s5025_s19, 1  ;;  %p5029_p2 = scmp.lt.s32.totalorder %s5025_s19, %s7294_s4 }
 0x684   : > { %p5027_p1 = scmp.ne.s32.totalorder %s5025_s19, %s5026_s28  ;;  %p5030_p3 = scmp.lt.s32.totalorder %s6130_s1, %s5026_s28 }
 0x686   : > { %p5031_p4 = por %p5030_p3, %p5029_p2 }
 0x688   : > { %p5032_p5 = pnand %p5031_p4, %p5027_p1 }
 0x68a   : > { %5035 = shalt.err (!%p5032_p5)  }
 0x68b   : > { %s5036_s25 = sshra.s32 %s1759_s16, 4  ;;  %s5037_s25 = int_to_ptr.vmem [resolvable:$true] %s5036_s25 }
 0x68c   : > { %s5038_s11 = scalar_lea.vmem %s5037_s25, 1  ;;  %p5041_p7 = scmp.lt.s32.totalorder %s5037_s25, [#allocation2] }
 0x68d   : > { %p5039_p6 = scmp.ne.s32.totalorder %s5037_s25, %s5038_s11  ;;  %p5042_p8 = scmp.lt.s32.totalorder %s6117_s10, %s5038_s11 }
 0x68f   : > { %p5043_p9 = por %p5042_p8, %p5041_p7 }
 0x691   : > { %p5044_p10 = pnand %p5043_p9, %p5039_p6 }
 0x693   : > { %5047 = shalt.err (!%p5044_p10)  }
 0x694   : > { %1761 = dma.hbm_to_vmem [thread:$0]  %s1757_s26, 16, %s1759_s16, %s6105_s9 }
 0x695   : > { %s1765_s22 = scalar_lea.hbm %s7294_s4, %s7012_s30  ;;  %s2385_s21 = scalar_lea.vmem %s6081_s12, 30 [#allocation2] }
 0x696   : > { %s1774_s23 = sshll.u32 %s1765_s22, 4  ;;  %s7050_s15 = sshll.u32 %s2385_s21, 4  ;;  %s1775_s23 = int_to_ptr.hbm [resolvable:$true] %s1774_s23  ;;  %s1795_s15 = int_to_ptr.vmem [resolvable:$true] %s7050_s15 }
 0x697   : > { %s5048_s14 = sshra.s32 %s1775_s23, 4  ;;  %s5049_s14 = int_to_ptr.hbm [resolvable:$true] %s5048_s14 }
 0x698   : > { %s5050_s6 = scalar_lea.hbm %s5049_s14, 1  ;;  %p5053_p12 = scmp.lt.s32.totalorder %s5049_s14, %s7294_s4 }
 0x699   : > { %p5051_p11 = scmp.ne.s32.totalorder %s5049_s14, %s5050_s6  ;;  %p5054_p13 = scmp.lt.s32.totalorder %s6130_s1, %s5050_s6 }
 0x69b   : > { %p5055_p0 = por %p5054_p13, %p5053_p12 }
 0x69d   : > { %p5056_p1 = pnand %p5055_p0, %p5051_p11 }
 0x69f   : > { %5059 = shalt.err (!%p5056_p1)  }
 0x6a0   : > { %s5060_s16 = sshra.s32 %s1777_s17, 4  ;;  %s5061_s16 = int_to_ptr.vmem [resolvable:$true] %s5060_s16 }
 0x6a1   : > { %s5062_s30 = scalar_lea.vmem %s5061_s16, 1  ;;  %p5065_p3 = scmp.lt.s32.totalorder %s5061_s16, [#allocation2] }
 0x6a2   : > { %p5063_p2 = scmp.ne.s32.totalorder %s5061_s16, %s5062_s30  ;;  %p5066_p4 = scmp.lt.s32.totalorder %s6117_s10, %s5062_s30 }
 0x6a4   : > { %p5067_p5 = por %p5066_p4, %p5065_p3 }
 0x6a6   : > { %p5068_p6 = pnand %p5067_p5, %p5063_p2 }
 0x6a8   : > { %5071 = shalt.err (!%p5068_p6)  }
 0x6a9   : > { %1779 = dma.hbm_to_vmem [thread:$0]  %s1775_s23, 16, %s1777_s17, %s6105_s9 }
 0x6aa   : > { %s1783_s13 = scalar_lea.hbm %s7294_s4, %s7033_s2  ;;  %s1798_s25 = sadd.s32 2, %s6988_s8 }
 0x6ab   : > { %s1792_s11 = sshll.u32 %s1783_s13, 4  ;;  %s7068_s27 = sld [smem:[#allocation7 + %s1798_s25]]  ;;  %s1793_s11 = int_to_ptr.hbm [resolvable:$true] %s1792_s11 }
 0x6ac   : > { %s2389_s20 = scalar_lea.vmem %s6081_s12, 38 [#allocation2]  ;;  %s5072_s22 = sshra.s32 %s1793_s11, 4  ;;  %s5073_s22 = int_to_ptr.hbm [resolvable:$true] %s5072_s22 }
 0x6ad   : > { %s5074_s21 = scalar_lea.hbm %s5073_s22, 1  ;;  %p5077_p8 = scmp.lt.s32.totalorder %s5073_s22, %s7294_s4 }
 0x6ae   : > { %p5075_p7 = scmp.ne.s32.totalorder %s5073_s22, %s5074_s21  ;;  %p5078_p9 = scmp.lt.s32.totalorder %s6130_s1, %s5074_s21 }
 0x6b0   : > { %p5079_p10 = por %p5078_p9, %p5077_p8 }
 0x6b2   : > { %p5080_p11 = pnand %p5079_p10, %p5075_p7 }
 0x6b4   : > { %5083 = shalt.err (!%p5080_p11)  }
 0x6b5   : > { %s5084_s17 = sshra.s32 %s1795_s15, 4  ;;  %s5085_s17 = int_to_ptr.vmem [resolvable:$true] %s5084_s17 }
 0x6b6   : > { %s5086_s2 = scalar_lea.vmem %s5085_s17, 1  ;;  %p5089_p13 = scmp.lt.s32.totalorder %s5085_s17, [#allocation2] }
 0x6b7   : > { %p5087_p12 = scmp.ne.s32.totalorder %s5085_s17, %s5086_s2  ;;  %p5090_p0 = scmp.lt.s32.totalorder %s6117_s10, %s5086_s2 }
 0x6b9   : > { %p5091_p1 = por %p5090_p0, %p5089_p13 }
 0x6bb   : > { %p5092_p2 = pnand %p5091_p1, %p5087_p12 }
 0x6bd   : > { %5095 = shalt.err (!%p5092_p2)  }
 0x6be   : > { %1797 = dma.hbm_to_vmem [thread:$0]  %s1793_s11, 16, %s1795_s15, %s6105_s9 }
 0x6bf   : > { %s7081_s23 = sshll.u32 %s2389_s20, 4  ;;  %s1816_s19 = sadd.s32 3, %s6988_s8  ;;  %s1813_s23 = int_to_ptr.vmem [resolvable:$true] %s7081_s23 }
 0x6c0   : > { %s7085_s28 = sld [smem:[#allocation7 + %s1816_s19]]  ;;  %s2393_s16 = scalar_lea.vmem %s6081_s12, 46 [#allocation2] }
 0x6c1   : > { %s1834_s30 = sadd.s32 4, %s6988_s8  ;;  %s1801_s13 = scalar_lea.hbm %s7294_s4, %s7068_s27 }
 0x6c2   : > { %s7093_s25 = sshll.u32 %s2393_s16, 4  ;;  %s1810_s22 = sshll.u32 %s1801_s13, 4  ;;  %s1831_s25 = int_to_ptr.vmem [resolvable:$true] %s7093_s25  ;;  %s1811_s22 = int_to_ptr.hbm [resolvable:$true] %s1810_s22 }
 0x6c3   : > { %s7096_s15 = sld [smem:[#allocation7 + %s1834_s30]]  ;;  %s5096_s11 = sshra.s32 %s1811_s22, 4  ;;  %s5097_s11 = int_to_ptr.hbm [resolvable:$true] %s5096_s11 }
 0x6c4   : > { %s5098_s20 = scalar_lea.hbm %s5097_s11, 1  ;;  %p5101_p4 = scmp.lt.s32.totalorder %s5097_s11, %s7294_s4 }
 0x6c5   : > { %p5099_p3 = scmp.ne.s32.totalorder %s5097_s11, %s5098_s20  ;;  %p5102_p5 = scmp.lt.s32.totalorder %s6130_s1, %s5098_s20 }
 0x6c7   : > { %p5103_p6 = por %p5102_p5, %p5101_p4 }
 0x6c9   : > { %p5104_p7 = pnand %p5103_p6, %p5099_p3 }
 0x6cb   : > { %5107 = shalt.err (!%p5104_p7)  }
 0x6cc   : > { %s5108_s8 = sshra.s32 %s1813_s23, 4  ;;  %s5109_s8 = int_to_ptr.vmem [resolvable:$true] %s5108_s8 }
 0x6cd   : > { %s5110_s27 = scalar_lea.vmem %s5109_s8, 1  ;;  %p5113_p9 = scmp.lt.s32.totalorder %s5109_s8, [#allocation2] }
 0x6ce   : > { %p5111_p8 = scmp.ne.s32.totalorder %s5109_s8, %s5110_s27  ;;  %p5114_p10 = scmp.lt.s32.totalorder %s6117_s10, %s5110_s27 }
 0x6d0   : > { %p5115_p11 = por %p5114_p10, %p5113_p9 }
 0x6d2   : > { %p5116_p12 = pnand %p5115_p11, %p5111_p8 }
 0x6d4   : > { %5119 = shalt.err (!%p5116_p12)  }
 0x6d5   : > { %1815 = dma.hbm_to_vmem [thread:$0]  %s1811_s22, 16, %s1813_s23, %s6105_s9 }
 0x6d6   : > { %s1819_s2 = scalar_lea.hbm %s7294_s4, %s7085_s28  ;;  %s2397_s19 = scalar_lea.vmem %s6081_s12, 54 [#allocation2] }
 0x6d7   : > { %s1828_s16 = sshll.u32 %s1819_s2, 4  ;;  %s7113_s30 = sshll.u32 %s2397_s19, 4  ;;  %s1829_s16 = int_to_ptr.hbm [resolvable:$true] %s1828_s16  ;;  %s1849_s30 = int_to_ptr.vmem [resolvable:$true] %s7113_s30 }
 0x6d8   : > { %s5120_s26 = sshra.s32 %s1829_s16, 4  ;;  %s5121_s26 = int_to_ptr.hbm [resolvable:$true] %s5120_s26 }
 0x6d9   : > { %s5122_s24 = scalar_lea.hbm %s5121_s26, 1  ;;  %p5125_p0 = scmp.lt.s32.totalorder %s5121_s26, %s7294_s4 }
 0x6da   : > { %p5123_p13 = scmp.ne.s32.totalorder %s5121_s26, %s5122_s24  ;;  %p5126_p1 = scmp.lt.s32.totalorder %s6130_s1, %s5122_s24 }
 0x6dc   : > { %p5127_p2 = por %p5126_p1, %p5125_p0 }
 0x6de   : > { %p5128_p3 = pnand %p5127_p2, %p5123_p13 }
 0x6e0   : > { %5131 = shalt.err (!%p5128_p3)  }
 0x6e1   : > { %s5132_s23 = sshra.s32 %s1831_s25, 4  ;;  %s5133_s23 = int_to_ptr.vmem [resolvable:$true] %s5132_s23 }
 0x6e2   : > { %s5134_s28 = scalar_lea.vmem %s5133_s23, 1  ;;  %p5137_p5 = scmp.lt.s32.totalorder %s5133_s23, [#allocation2] }
 0x6e3   : > { %p5135_p4 = scmp.ne.s32.totalorder %s5133_s23, %s5134_s28  ;;  %p5138_p6 = scmp.lt.s32.totalorder %s6117_s10, %s5134_s28 }
 0x6e5   : > { %p5139_p7 = por %p5138_p6, %p5137_p5 }
 0x6e7   : > { %p5140_p8 = pnand %p5139_p7, %p5135_p4 }
 0x6e9   : > { %5143 = shalt.err (!%p5140_p8)  }
 0x6ea   : > { %1833 = dma.hbm_to_vmem [thread:$0]  %s1829_s16, 16, %s1831_s25, %s6105_s9 }
 0x6eb   : > { %s1837_s21 = scalar_lea.hbm %s7294_s4, %s7096_s15  ;;  %s1852_s14 = sadd.s32 7, %s6077_s18 }
 0x6ec   : > { %s1846_s8 = sshll.u32 %s1837_s21, 4  ;;  %s7131_s27 = sld [smem:[#allocation5 + %s1852_s14]]  ;;  %s1847_s8 = int_to_ptr.hbm [resolvable:$true] %s1846_s8 }
 0x6ed   : > { %s2401_s6 = scalar_lea.vmem %s6081_s12, 7 [#allocation2]  ;;  %s5144_s17 = sshra.s32 %s1847_s8, 4  ;;  %s5145_s17 = int_to_ptr.hbm [resolvable:$true] %s5144_s17 }
 0x6ee   : > { %s5146_s2 = scalar_lea.hbm %s5145_s17, 1  ;;  %p5149_p10 = scmp.lt.s32.totalorder %s5145_s17, %s7294_s4 }
 0x6ef   : > { %p5147_p9 = scmp.ne.s32.totalorder %s5145_s17, %s5146_s2  ;;  %p5150_p11 = scmp.lt.s32.totalorder %s6130_s1, %s5146_s2 }
 0x6f1   : > { %p5151_p12 = por %p5150_p11, %p5149_p10 }
 0x6f3   : > { %p5152_p13 = pnand %p5151_p12, %p5147_p9 }
 0x6f5   : > { %5155 = shalt.err (!%p5152_p13)  }
 0x6f6   : > { %s5156_s18 = sshra.s32 %s1849_s30, 4  ;;  %s5157_s18 = int_to_ptr.vmem [resolvable:$true] %s5156_s18 }
 0x6f7   : > { %s5158_s25 = scalar_lea.vmem %s5157_s18, 1  ;;  %p5161_p1 = scmp.lt.s32.totalorder %s5157_s18, [#allocation2] }
 0x6f8   : > { %p5159_p0 = scmp.ne.s32.totalorder %s5157_s18, %s5158_s25  ;;  %p5162_p2 = scmp.lt.s32.totalorder %s6117_s10, %s5158_s25 }
 0x6fa   : > { %p5163_p3 = por %p5162_p2, %p5161_p1 }
 0x6fc   : > { %p5164_p4 = pnand %p5163_p3, %p5159_p0 }
 0x6fe   : > { %5167 = shalt.err (!%p5164_p4)  }
 0x6ff   : > { %1851 = dma.hbm_to_vmem [thread:$0]  %s1847_s8, 16, %s1849_s30, %s6105_s9 }
 0x700   : > { %s7144_s15 = sshll.u32 %s2401_s6, 4  ;;  %s7146_s16 = smul.u32 5, %s1852_s14  ;;  %s1867_s15 = int_to_ptr.vmem [resolvable:$true] %s7144_s15 }
 0x701   : > { %s7149_s24 = sld [smem:[#allocation6 + %s1852_s14]]  ;;  %s2405_s13 = scalar_lea.vmem %s6081_s12, 15 [#allocation2] }
 0x702   : > { %s7153_s11 = sld [smem:[#allocation7 + %s7146_s16]]  ;;  %s1855_s22 = scalar_lea.hbm %s7293_s3, %s7131_s27 }
 0x703   : > { %s7159_s20 = sshll.u32 %s2405_s13, 4  ;;  %s1864_s30 = sshll.u32 %s1855_s22, 4  ;;  %s1884_s20 = int_to_ptr.vmem [resolvable:$true] %s7159_s20  ;;  %s1865_s30 = int_to_ptr.hbm [resolvable:$true] %s1864_s30 }
 0x704   : > { %s2409_s21 = scalar_lea.vmem %s6081_s12, 23 [#allocation2]  ;;  %s5168_s8 = sshra.s32 %s1865_s30, 4  ;;  %s5169_s8 = int_to_ptr.hbm [resolvable:$true] %s5168_s8 }
 0x705   : > { %s5170_s6 = scalar_lea.hbm %s5169_s8, 1  ;;  %p5173_p6 = scmp.lt.s32.totalorder %s5169_s8, %s7293_s3 }
 0x706   : > { %p5171_p5 = scmp.ne.s32.totalorder %s5169_s8, %s5170_s6  ;;  %p5174_p7 = scmp.lt.s32.totalorder %s6110_s29, %s5170_s6 }
 0x708   : > { %p5175_p8 = por %p5174_p7, %p5173_p6 }
 0x70a   : > { %p5176_p9 = pnand %p5175_p8, %p5171_p5 }
 0x70c   : > { %5179 = shalt.err (!%p5176_p9)  }
 0x70d   : > { %s5180_s27 = sshra.s32 %s1867_s15, 4  ;;  %s5181_s27 = int_to_ptr.vmem [resolvable:$true] %s5180_s27 }
 0x70e   : > { %s5182_s2 = scalar_lea.vmem %s5181_s27, 1  ;;  %p5185_p11 = scmp.lt.s32.totalorder %s5181_s27, [#allocation2] }
 0x70f   : > { %p5183_p10 = scmp.ne.s32.totalorder %s5181_s27, %s5182_s2  ;;  %p5186_p12 = scmp.lt.s32.totalorder %s6117_s10, %s5182_s2 }
 0x711   : > { %p5187_p13 = por %p5186_p12, %p5185_p11 }
 0x713   : > { %p5188_p0 = pnand %p5187_p13, %p5183_p10 }
 0x715   : > { %5191 = shalt.err (!%p5188_p0)  }
 0x716   : > { %1869 = dma.hbm_to_vmem [thread:$0]  %s1865_s30, 16, %s1867_s15, %s6105_s9 }
 0x717   : > { %s1872_s26 = scalar_lea.hbm %s7294_s4, %s7149_s24  ;;  %s7177_s18 = sshll.u32 %s2409_s21, 4  ;;  %s1902_s18 = int_to_ptr.vmem [resolvable:$true] %s7177_s18 }
 0x718   : > { %s1881_s25 = sshll.u32 %s1872_s26, 4  ;;  %s1890_s28 = scalar_lea.hbm %s7294_s4, %s7153_s11  ;;  %s1882_s25 = int_to_ptr.hbm [resolvable:$true] %s1881_s25 }
 0x719   : > { %s7183_s22 = sshll.u32 %s1890_s28, 4  ;;  %s5192_s8 = sshra.s32 %s1882_s25, 4  ;;  %s5193_s8 = int_to_ptr.hbm [resolvable:$true] %s5192_s8  ;;  %s1900_s22 = int_to_ptr.hbm [resolvable:$true] %s7183_s22 }
 0x71a   : > { %s5194_s6 = scalar_lea.hbm %s5193_s8, 1  ;;  %p5197_p2 = scmp.lt.s32.totalorder %s5193_s8, %s7294_s4 }
 0x71b   : > { %p5195_p1 = scmp.ne.s32.totalorder %s5193_s8, %s5194_s6  ;;  %p5198_p3 = scmp.lt.s32.totalorder %s6130_s1, %s5194_s6 }
 0x71d   : > { %p5199_p4 = por %p5198_p3, %p5197_p2 }
 0x71f   : > { %p5200_p5 = pnand %p5199_p4, %p5195_p1 }
 0x721   : > { %5203 = shalt.err (!%p5200_p5)  }
 0x722   : > { %s5204_s24 = sshra.s32 %s1884_s20, 4  ;;  %s5205_s24 = int_to_ptr.vmem [resolvable:$true] %s5204_s24 }
 0x723   : > { %s5206_s11 = scalar_lea.vmem %s5205_s24, 1  ;;  %p5209_p7 = scmp.lt.s32.totalorder %s5205_s24, [#allocation2] }
 0x724   : > { %p5207_p6 = scmp.ne.s32.totalorder %s5205_s24, %s5206_s11  ;;  %p5210_p8 = scmp.lt.s32.totalorder %s6117_s10, %s5206_s11 }
 0x726   : > { %p5211_p9 = por %p5210_p8, %p5209_p7 }
 0x728   : > { %p5212_p10 = pnand %p5211_p9, %p5207_p6 }
 0x72a   : > { %5215 = shalt.err (!%p5212_p10)  }
 0x72b   : > { %1886 = dma.hbm_to_vmem [thread:$0]  %s1882_s25, 16, %s1884_s20, %s6105_s9 }
 0x72c   : > { %s5216_s30 = sshra.s32 %s1900_s22, 4  ;;  %s5217_s30 = int_to_ptr.hbm [resolvable:$true] %s5216_s30 }
 0x72d   : > { %s5218_s21 = scalar_lea.hbm %s5217_s30, 1  ;;  %p5221_p12 = scmp.lt.s32.totalorder %s5217_s30, %s7294_s4 }
 0x72e   : > { %p5219_p11 = scmp.ne.s32.totalorder %s5217_s30, %s5218_s21  ;;  %p5222_p13 = scmp.lt.s32.totalorder %s6130_s1, %s5218_s21 }
 0x730   : > { %p5223_p0 = por %p5222_p13, %p5221_p12 }
 0x732   : > { %p5224_p1 = pnand %p5223_p0, %p5219_p11 }
 0x734   : > { %5227 = shalt.err (!%p5224_p1)  }
 0x735   : > { %s5228_s2 = sshra.s32 %s1902_s18, 4  ;;  %s5229_s2 = int_to_ptr.vmem [resolvable:$true] %s5228_s2 }
 0x736   : > { %s5230_s29 = scalar_lea.vmem %s5229_s2, 1  ;;  %p5233_p3 = scmp.lt.s32.totalorder %s5229_s2, [#allocation2] }
 0x737   : > { %p5231_p2 = scmp.ne.s32.totalorder %s5229_s2, %s5230_s29  ;;  %p5234_p4 = scmp.lt.s32.totalorder %s6117_s10, %s5230_s29 }
 0x739   : > { %p5235_p5 = por %p5234_p4, %p5233_p3 }
 0x73b   : > { %p5236_p6 = pnand %p5235_p5, %p5231_p2 }
 0x73d   : > { %5239 = shalt.err (!%p5236_p6)  }
 0x73e   : > { %1904 = dma.hbm_to_vmem [thread:$0]  %s1900_s22, 16, %s1902_s18, %s6105_s9 }
 0x73f   : > { %s1905_s20 = sadd.s32 1, %s7146_s16  ;;  %s2413_s19 = scalar_lea.vmem %s6081_s12, 31 [#allocation2] }
 0x740   : > { %s1906_s26 = sld [smem:[#allocation7 + %s1905_s20]]  ;;  %s7205_s25 = sshll.u32 %s2413_s19, 4  ;;  %s1920_s25 = int_to_ptr.vmem [resolvable:$true] %s7205_s25 }
 0x741   : > { %s1923_s13 = sadd.s32 2, %s7146_s16  ;;  %s2417_s28 = scalar_lea.vmem %s6081_s12, 39 [#allocation2] }
 0x742   : > { %s7209_s23 = sld [smem:[#allocation7 + %s1923_s13]]  ;;  %s7212_s8 = sshll.u32 %s2417_s28, 4  ;;  %s1938_s8 = int_to_ptr.vmem [resolvable:$true] %s7212_s8 }
 0x743   : > { %s1941_s6 = sadd.s32 3, %s7146_s16  ;;  %s2421_s18 = scalar_lea.vmem %s6081_s12, 47 [#allocation2] }
 0x744   : > { %s7216_s14 = sld [smem:[#allocation7 + %s1941_s6]]  ;;  %s1959_s22 = sadd.s32 4, %s7146_s16 }
 0x745   : > { %s7223_s30 = sshll.u32 %s2421_s18, 4  ;;  %s1956_s30 = int_to_ptr.vmem [resolvable:$true] %s7223_s30 }
 0x746   : > { %s1908_s11 = scalar_lea.hbm %s7294_s4, %s1906_s26 }
 0x747   : > { %s1917_s21 = sshll.u32 %s1908_s11, 4  ;;  %s1918_s21 = int_to_ptr.hbm [resolvable:$true] %s1917_s21 }
 0x748   : > { %s1926_s2 = scalar_lea.hbm %s7294_s4, %s7209_s23  ;;  %s5240_s29 = sshra.s32 %s1918_s21, 4  ;;  %s5241_s29 = int_to_ptr.hbm [resolvable:$true] %s5240_s29 }
 0x749   : > { %s5242_s20 = scalar_lea.hbm %s5241_s29, 1  ;;  %p5245_p8 = scmp.lt.s32.totalorder %s5241_s29, %s7294_s4 }
 0x74a   : > { %p5243_p7 = scmp.ne.s32.totalorder %s5241_s29, %s5242_s20  ;;  %p5246_p9 = scmp.lt.s32.totalorder %s6130_s1, %s5242_s20 }
 0x74c   : > { %p5247_p10 = por %p5246_p9, %p5245_p8 }
 0x74e   : > { %p5248_p11 = pnand %p5247_p10, %p5243_p7 }
 0x750   : > { %5251 = shalt.err (!%p5248_p11)  }
 0x751   : > { %s5252_s26 = sshra.s32 %s1920_s25, 4  ;;  %s5253_s26 = int_to_ptr.vmem [resolvable:$true] %s5252_s26 }
 0x752   : > { %s5254_s28 = scalar_lea.vmem %s5253_s26, 1  ;;  %p5257_p13 = scmp.lt.s32.totalorder %s5253_s26, [#allocation2] }
 0x753   : > { %p5255_p12 = scmp.ne.s32.totalorder %s5253_s26, %s5254_s28  ;;  %p5258_p0 = scmp.lt.s32.totalorder %s6117_s10, %s5254_s28 }
 0x755   : > { %p5259_p1 = por %p5258_p0, %p5257_p13 }
 0x757   : > { %p5260_p2 = pnand %p5259_p1, %p5255_p12 }
 0x759   : > { %5263 = shalt.err (!%p5260_p2)  }
 0x75a   : > { %1922 = dma.hbm_to_vmem [thread:$0]  %s1918_s21, 16, %s1920_s25, %s6105_s9 }
 0x75b   : > { %s1935_s23 = sshll.u32 %s1926_s2, 4  ;;  %s1944_s15 = scalar_lea.hbm %s7294_s4, %s7216_s14  ;;  %s1936_s23 = int_to_ptr.hbm [resolvable:$true] %s1935_s23 }
 0x75c   : > { %s7244_s24 = sshll.u32 %s1944_s15, 4  ;;  %s5264_s11 = sshra.s32 %s1936_s23, 4  ;;  %s5265_s11 = int_to_ptr.hbm [resolvable:$true] %s5264_s11  ;;  %s1954_s24 = int_to_ptr.hbm [resolvable:$true] %s7244_s24 }
 0x75d   : > { %s5266_s17 = scalar_lea.hbm %s5265_s11, 1  ;;  %p5269_p4 = scmp.lt.s32.totalorder %s5265_s11, %s7294_s4 }
 0x75e   : > { %p5267_p3 = scmp.ne.s32.totalorder %s5265_s11, %s5266_s17  ;;  %p5270_p5 = scmp.lt.s32.totalorder %s6130_s1, %s5266_s17 }
 0x760   : > { %p5271_p6 = por %p5270_p5, %p5269_p4 }
 0x762   : > { %p5272_p7 = pnand %p5271_p6, %p5267_p3 }
 0x764   : > { %5275 = shalt.err (!%p5272_p7)  }
 0x765   : > { %s5276_s25 = sshra.s32 %s1938_s8, 4  ;;  %s5277_s25 = int_to_ptr.vmem [resolvable:$true] %s5276_s25 }
 0x766   : > { %s5278_s14 = scalar_lea.vmem %s5277_s25, 1  ;;  %p5281_p9 = scmp.lt.s32.totalorder %s5277_s25, [#allocation2] }
 0x767   : > { %p5279_p8 = scmp.ne.s32.totalorder %s5277_s25, %s5278_s14  ;;  %p5282_p10 = scmp.lt.s32.totalorder %s6117_s10, %s5278_s14 }
 0x769   : > { %p5283_p11 = por %p5282_p10, %p5281_p9 }
 0x76b   : > { %p5284_p12 = pnand %p5283_p11, %p5279_p8 }
 0x76d   : > { %5287 = shalt.err (!%p5284_p12)  }
 0x76e   : > { %1940 = dma.hbm_to_vmem [thread:$0]  %s1936_s23, 16, %s1938_s8, %s6105_s9 }
 0x76f   : > { %s1960_s21 = sld [smem:[#allocation7 + %s1959_s22]]  ;;  %s5288_s2 = sshra.s32 %s1954_s24, 4  ;;  %s5289_s2 = int_to_ptr.hbm [resolvable:$true] %s5288_s2 }
 0x770   : > { %s5290_s20 = scalar_lea.hbm %s5289_s2, 1  ;;  %p5293_p0 = scmp.lt.s32.totalorder %s5289_s2, %s7294_s4 }
 0x771   : > { %p5291_p13 = scmp.ne.s32.totalorder %s5289_s2, %s5290_s20  ;;  %p5294_p1 = scmp.lt.s32.totalorder %s6130_s1, %s5290_s20 }
 0x773   : > { %p5295_p2 = por %p5294_p1, %p5293_p0 }
 0x775   : > { %p5296_p3 = pnand %p5295_p2, %p5291_p13 }
 0x777   : > { %5299 = shalt.err (!%p5296_p3)  }
 0x778   : > { %s5300_s26 = sshra.s32 %s1956_s30, 4  ;;  %s5301_s26 = int_to_ptr.vmem [resolvable:$true] %s5300_s26 }
 0x779   : > { %s5302_s8 = scalar_lea.vmem %s5301_s26, 1  ;;  %p5305_p5 = scmp.lt.s32.totalorder %s5301_s26, [#allocation2] }
 0x77a   : > { %p5303_p4 = scmp.ne.s32.totalorder %s5301_s26, %s5302_s8  ;;  %p5306_p6 = scmp.lt.s32.totalorder %s6117_s10, %s5302_s8 }
 0x77c   : > { %p5307_p7 = por %p5306_p6, %p5305_p5 }
 0x77e   : > { %p5308_p8 = pnand %p5307_p7, %p5303_p4 }
 0x780   : > { %5311 = shalt.err (!%p5308_p8)  }
 0x781   : > { %1958 = dma.hbm_to_vmem [thread:$0]  %s1954_s24, 16, %s1956_s30, %s6105_s9 }
 0x782   : > { %s2425_s16 = scalar_lea.vmem %s6081_s12, 55 [#allocation2]  ;;  %s1962_s6 = scalar_lea.hbm %s7294_s4, %s1960_s21 }
 0x783   : > { %s1973_s22 = sshll.u32 %s2425_s16, 4  ;;  %s1971_s18 = sshll.u32 %s1962_s6, 4  ;;  %s1974_s22 = int_to_ptr.vmem [resolvable:$true] %s1973_s22  ;;  %s1972_s18 = int_to_ptr.hbm [resolvable:$true] %s1971_s18 }
 0x784   : > { %s5312_s15 = sshra.s32 %s1972_s18, 4  ;;  %s5313_s15 = int_to_ptr.hbm [resolvable:$true] %s5312_s15 }
 0x785   : > { %s5314_s11 = scalar_lea.hbm %s5313_s15, 1  ;;  %p5317_p10 = scmp.lt.s32.totalorder %s5313_s15, %s7294_s4 }
 0x786   : > { %p5315_p9 = scmp.ne.s32.totalorder %s5313_s15, %s5314_s11  ;;  %p5318_p11 = scmp.lt.s32.totalorder %s6130_s1, %s5314_s11 }
 0x788   : > { %p5319_p12 = por %p5318_p11, %p5317_p10 }
 0x78a   : > { %p5320_p13 = pnand %p5319_p12, %p5315_p9 }
 0x78c   : > { %5323 = shalt.err (!%p5320_p13)  }
 0x78d   : > { %s5324_s12 = sshra.s32 %s1974_s22, 4  ;;  %s5325_s12 = int_to_ptr.vmem [resolvable:$true] %s5324_s12 }
 0x78e   : > { %s5326_s30 = scalar_lea.vmem %s5325_s12, 1  ;;  %p5329_p1 = scmp.lt.s32.totalorder %s5325_s12, [#allocation2] }
 0x78f   : > { %p5327_p0 = scmp.ne.s32.totalorder %s5325_s12, %s5326_s30  ;;  %p5330_p2 = scmp.lt.s32.totalorder %s6117_s10, %s5326_s30 }
 0x791   : > { %p5331_p3 = por %p5330_p2, %p5329_p1 }
 0x793   : > { %p5332_p4 = pnand %p5331_p3, %p5327_p0 }
 0x795   : > { %5335 = shalt.err (!%p5332_p4)  }
 0x796   : > { %1976 = dma.hbm_to_vmem [thread:$0]  %s1972_s18, 16, %s1974_s22, %s6105_s9 }
 0x797 PF: > { %s1977_s24 = smul.u32 56, %s7301_s7  ;;  %s1978_s1 = scalar_lea.sflag [#allocation3], %s7301_s7 }
 0x798   : > { %5370 = dma.done.wait %s1978_s1, 896 }
 0x799   : > { %5371 = vsyncadd %s1978_s1, 4294966400  ;;  %s1982_s29 = scalar_lea.vmem [#allocation2], %s1977_s24  ;;  %v2026_v14 = vlaneseq  ;;  %vm2045_vm1 = vcmask 1040384   ;;  %vm2047_vm2 = vcmask 1041408   ;;  %vm2049_vm3 = vcmask 1042432   ;;  %s2518_s7 = sshll.u32 %s5378_s0, 3 }
 0x79a   : > { %v1983_v1 = vld [vmem:[%s1982_s29] sm:$0xff]  ;;  %v2513_v2 = vld [vmem:[%s1982_s29 + $0x10] sm:$0xff]  ;;  %v2512_v3 = vld [vmem:[%s1982_s29 + $0x8] sm:$0xff]  ;;  %vm2051_vm4 = vcmask 1043456   ;;  %vm2053_vm5 = vcmask 1044480   ;;  %v2071_v44 = vstv %s2518_s7  ;;  %vm2078_vm8 = vcmask 62464  }
 0x79b   : > { %v1993_v4 = vmul.f32 %v2513_v2, %v1983_v1  ;;  %v1987_v5 = vmul.f32 %v2512_v3, %v1983_v1  ;;  %v2516_v6 = vld [vmem:[%s1982_s29 + $0x28] sm:$0xff]  ;;  %v2514_v8 = vld [vmem:[%s1982_s29 + $0x18] sm:$0xff]  ;;  %v2515_v9 = vld [vmem:[%s1982_s29 + $0x20] sm:$0xff]  ;;  %v2027_v18 = vand.u32 127, %v2026_v14  ;;  %vm2091_vm9 = vcmask 0   ;;  %p2519_p5 = scmp.ne.s32.totalorder %s5378_s0, 2 }
 0x79c   : > { %v2014_v7 = vmul.f32 %v2516_v6, %v1983_v1  ;;  %v2517_v10 = vld [vmem:[%s1982_s29 + $0x30] sm:$0xff]  ;;  %v2000_v11 = vmul.f32 %v2514_v8, %v1983_v1  ;;  %v2007_v12 = vmul.f32 %v2515_v9, %v1983_v1 }
 0x79d   : > { %1994 = vadd.xlane.f32.xlu0 %v1993_v4  ;;  %1988 = vadd.xlane.f32.xlu1 %v1987_v5  ;;  %v2021_v13 = vmul.f32 %v2517_v10, %v1983_v1  ;;  %v2072_v47 = vadd.s32 %v2071_v44, %v2027_v18  ;;  %v2077_v63 = vld [vmem:[#allocation8] sm:$0x1] }
 0x79e   : > { %2015 = vadd.xlane.f32.xlu2 %v2014_v7 }
 0x79f   : > { %vm2073_vm7 = vcmp.lt.s32.totalorder %v2072_v47, 20 }
 0x7a5   : > { %2001 = vadd.xlane.f32.xlu0 %v2000_v11  ;;  %2008 = vadd.xlane.f32.xlu1 %v2007_v12 }
 0x7a6   : > { %2022 = vadd.xlane.f32.xlu2 %v2021_v13 }
 0x810   : > { %v1995_v15 = vpop.xlane.xlu0 %1994  ;;  %v1989_v16 = vpop.xlane.xlu1 %1988 }
 0x811   : > { %v2016_v17 = vpop.xlane.xlu2 %2015  ;;  %v1996_v19 = vsub.f32 0.0, %v1995_v15  ;;  %v2028_v21 = vperm.slane %v1989_v16, %v2027_v18 }
 0x812   : > { %v2017_v24 = vsub.f32 0.0, %v2016_v17 }
 0x813   : > { %v2031_v20 = vperm.slane %v1996_v19, %v2027_v18 }
 0x814   : > { %v2040_v33 = vperm.slane %v2017_v24, %v2027_v18 }
 0x815   : > { %v2046_v31 = vsel %vm2045_vm1, %v2028_v21, %v2031_v20 }
 0x818   : > { %v2002_v22 = vpop.xlane.xlu0 %2001  ;;  %v2009_v23 = vpop.xlane.xlu1 %2008 }
 0x819   : > { %v2003_v25 = vsub.f32 0.0, %v2002_v22  ;;  %v2010_v26 = vsub.f32 0.0, %v2009_v23  ;;  %v2023_v27 = vpop.xlane.xlu2 %2022 }
 0x81a   : > { %v2024_v28 = vsub.f32 0.0, %v2023_v27 }
 0x81b   : > { %v2034_v29 = vperm.slane %v2003_v25, %v2027_v18  ;;  %v2037_v30 = vperm.slane %v2010_v26, %v2027_v18 }
 0x81c   : > { %v2043_v32 = vperm.slane %v2024_v28, %v2027_v18 }
 0x81d   : > { %v2048_v34 = vsel %vm2047_vm2, %v2046_v31, %v2034_v29 }
 0x81e   : > { %v2050_v35 = vsel %vm2049_vm3, %v2048_v34, %v2037_v30 }
 0x81f   : > { %v2052_v36 = vsel %vm2051_vm4, %v2050_v35, %v2040_v33 }
 0x820   : > { %v2054_v37 = vsel %vm2053_vm5, %v2052_v36, %v2043_v32 }
 0x821   : > { %v2056_v38 = vand.u32 2147483647, %v2054_v37  ;;  %v2055_v51 = vmin.f32 %v2054_v37, 0.0 }
 0x823   : > { %v2057_v39 = vsub.f32 0.0, %v2056_v38 }
 0x825   : > { %v2058_v40 = vmul.f32 1.442695, %v2057_v39 }
 0x827   : > { %2606 = vpow2.f32 %v2058_v40 }
 0x82d   : > { %v2607_v41 = vpop.eup %2606 }
 0x82e   : > { %v2060_v42 = vadd.f32 1.0, %v2607_v41  ;;  %v2063_v43 = vmul.f32 -0.5, %v2607_v41  ;;  %v2066_v46 = vand.u32 2147483647, %v2607_v41 }
 0x830   : > { %2608 = vlog2.f32 %v2060_v42  ;;  %v2064_v45 = vadd.f32 1.0, %v2063_v43  ;;  %vm2067_vm6 = vcmp.lt.f32.partialorder %v2066_v46, 0.0004427343 }
 0x832   : > { %v2065_v50 = vmul.f32 %v2607_v41, %v2064_v45 }
 0x836   : > { %v2609_v48 = vpop.eup %2608 }
 0x837   : > { %v2062_v49 = vmul.f32 0.6931472, %v2609_v48 }
 0x839   : > { %v2068_v52 = vsel %vm2067_vm6, %v2065_v50, %v2062_v49 }
 0x83a   : > { %v2069_v53 = vsub.f32 %v2055_v51, %v2068_v52 }
 0x83c   : > { %v2076_v54 = vsel %vm2073_vm7, %v2069_v53, 0.0 }
 0x83d   : > { %v2079_v55 = vsel %vm2078_vm8, %v2076_v54, 0.0 }
 0x83e   : > { %2080 = vadd.xlane.f32.xlu0 %v2079_v55 }
 0x8b1   : > { %v2081_v56 = vpop.xlane.xlu0 %2080 }
 0x8b2   : > { %v2082_v57 = vrot.slane %v2081_v56, 4 }
 0x8b4   : > { %v2083_v58 = vadd.f32 %v2082_v57, %v2081_v56 }
 0x8b6   : > { %v2084_v59 = vrot.slane %v2083_v58, 2 }
 0x8b8   : > { %v2085_v60 = vadd.f32 %v2084_v59, %v2083_v58 }
 0x8ba   : > { %v2086_v61 = vrot.slane %v2085_v60, 1 }
 0x8bc   : > { %v2087_v62 = vadd.f32 %v2086_v61, %v2085_v60 }
 0x8be   : > { %2528 = vpush %v2087_v62 }
 0x8ef   : > { %s2529_s9 = spop %2528  ;;  %2096 = sbr.rel (%p2519_p5) target bundleno = 2312 (0x908), region = 472 }
 0x8f0   : > { %v2089_v0 = vstv %s2529_s9 }
 0x8f1   : > { %v2090_v1 = vadd.f32 %v2089_v0, %v2077_v63 }
 0x8f3   : > { %2092 = vst.msk [vmem:[#allocation8] sm:$0x1] %vm2091_vm9, %v2090_v1 }
 0x8f4   : > { %v5441_v2 = vmov 20.0  }
 0x8f5   : > { %2610 = vrcp.f32 %v5441_v2 }
 0x8fa   : > { %v2097_v5 = vld [vmem:[#allocation8] sm:$0x1] }
 0x8fb   : > { %v2611_v3 = vpop.eup %2610  ;;  %v2098_v8 = vsub.f32 0.0, %v2097_v5 }
 0x8fc   : > { %v2100_v4 = vmul.f32 20.0, %v2611_v3  ;;  %vm2104_vm10 = vweird.f32 %v2611_v3 }
 0x8fe   : > { %v2101_v6 = vsub.f32 1.0, %v2100_v4 }
 0x900   : > { %v2102_v7 = vmul.f32 %v2611_v3, %v2101_v6 }
 0x902   : > { %v2103_v9 = vadd.f32 %v2611_v3, %v2102_v7 }
 0x904   : > { %v2105_v10 = vsel %vm2104_vm10, %v2611_v3, %v2103_v9 }
 0x905   : > { %v2106_v11 = vmul.f32 %v2105_v10, %v2098_v8 }
 0x907   : > { %2107 = vst.msk [vmem:[#allocation8] sm:$0x1] %vm2091_vm9, %v2106_v11 }
 0x908 PF: > { %p2534_p6 = scmp.eq.s32.totalorder %s5378_s0, 2  ;;  %s5442_s10 = smov [#allocation8]  }
 0x909   : > { %s2114_s25 = sshll.u32 %s5442_s10, 4  ;;  %s2116_s2 = sshll.u32 %s7295_s5, 4  ;;  %s2115_s25 = int_to_ptr.vmem [resolvable:$true] %s2114_s25  ;;  %s2117_s2 = int_to_ptr.hbm [resolvable:$true] %s2116_s2 }
 0x90a   : > { %2531 = dma.vmem_to_hbm [thread:$0]  (%p2534_p6), %s2115_s25, 16, %s2117_s2, [#allocation9]  }
 0x90b   : > { %5373 = dma.done.wait (%p2534_p6), [#allocation9], 16  }
 0x90c   : > { %5375 = vsyncadd (%p2534_p6), [#allocation9], 4294967280 }
 0x90d PF: > { %s34_s0 = sadd.s32 1, %s5378_s0  }
 0x90e   : > { %p31_p7 = scmp.ge.s32.totalorder %s34_s0, 4  }
 0x910   :  { %33 = sbr.rel (!%p31_p7) target bundleno = 10 (0xa), region = 729 }
 0x915   :  { %2130 = vsyncpa [#allocation9], 1 }
 0x916   :  { %2132 = vsyncpa [#allocation9 + $0x1], 1 }
 0x917   :  { %2133 = vsyncmov [#allocation3] }
 0x91a   :  { %s2134_s20 = vpop.sfrf %2133 }
 0x91b   :  { %p2524_p8 = scmp.ne.s32.totalorder %s2134_s20, 0 }
 0x91d   :  { %2138 = shalt.err (%p2524_p8)  }
 0x91e   :  { %2140 = vsyncmov [#allocation3 + $0x1] }
 0x921   :  { %s2141_s19 = vpop.sfrf %2140 }
 0x922   :  { %p2525_p9 = scmp.ne.s32.totalorder %s2141_s19, 0 }
 0x924   :  { %2145 = shalt.err (%p2525_p9)  }

</bundles_post_ra>
